<compile_context>
chip_gen: v6e
topology: v6e:2x2x1
jax: 0.10.0
libtpu: 0.0.40
codegen_flags: <defaults>
</compile_context>

<pallas_src>
import functools

import jax
import jax.numpy as jnp
from jax.experimental import pallas as pl
from jax.experimental.pallas import tpu as pltpu

# ---- module-level constants the PyTorch source references -------------------
DATA_DIMENSION = 28 * 28          # 784 (flattened input size)
DISCRIMINATOR_ROUND_OUTPUT = False

H1 = 1296
H2 = 324
OUT = 1

# lane-padded feature dims (multiples of 128) -> full-width MXU passes
D_PAD = 896     # 784  -> 7  * 128
H1_PAD = 1408   # 1296 -> 11 * 128
H2_PAD = 384    # 324  -> 3  * 128
OUT_LANES = 128  # lane-dense output slab; sliced to width 1 in the wrapper

_MAX_BATCH_TILE = 256   # rows per grid step (full MXU height on v6e/v7x)


def _round_up(n, m):
    return ((n + m - 1) // m) * m


def _leaky_relu(x, slope=0.2):
    return jnp.where(x >= 0, x, slope * x)


def _discriminator_kernel(x_ref, w1_ref, b1_ref, w2_ref, b2_ref,
                          w3_ref, b3_ref, o_ref, *, round_output):
    # x_ref: (tile_b, D_PAD) bf16; w1/w2: bf16; biases + w3 row: f32.
    x = x_ref[...]

    # Linear(784, 1296) + LeakyReLU(0.2).   (Dropout(0.2): identity, eval mode)
    h1 = jnp.dot(x, w1_ref[...], preferred_element_type=jnp.float32) + b1_ref[...]
    h1 = _leaky_relu(h1)                    # f32 activations (v5e-safe VPU path)

    # Linear(1296, 324) + LeakyReLU(0.2).   (Dropout(0.5): identity, eval mode)
    h2 = jnp.dot(h1.astype(jnp.bfloat16), w2_ref[...],
                 preferred_element_type=jnp.float32) + b2_ref[...]
    h2 = _leaky_relu(h2)

    # Linear(324, 1): N=1 MXU matmul replaced by VPU multiply + lane reduction.
    logit = jnp.sum(h2 * w3_ref[...], axis=-1, keepdims=True) + b3_ref[...]
    out = jax.nn.sigmoid(logit)

    if round_output:  # static Python flag (DISCRIMINATOR_ROUND_OUTPUT)
        out = jnp.round(out)

    # Broadcast across 128 lanes -> unmasked full-vreg store.
    o_ref[...] = jnp.broadcast_to(out, o_ref.shape).astype(o_ref.dtype)


def discriminator_forward(x, params, *, round_output=DISCRIMINATOR_ROUND_OUTPUT):
    """x: any shape with leading batch dim; flattened to (B, DATA_DIMENSION)."""
    w1, b1, w2, b2, w3, b3 = params
    B = x.shape[0]
    x2d = x.reshape(B, DATA_DIMENSION)

    # Batch tile: >= 128 MXU rows per pass; capped at 256 so VMEM stays modest
    # and large batches still produce multiple (parallel) grid steps.
    tile_b = min(_MAX_BATCH_TILE, _round_up(B, 128))
    Bp = _round_up(B, tile_b)

    # Zero-pad batch + feature dims (numerically exact) and cast the big
    # matmul operands to bf16 (f32 accumulation happens in the kernel).
    xp = jnp.pad(x2d, ((0, Bp - B), (0, D_PAD - DATA_DIMENSION))).astype(jnp.bfloat16)
    w1p = jnp.pad(w1, ((0, D_PAD - DATA_DIMENSION), (0, H1_PAD - H1))).astype(jnp.bfloat16)
    b1p = jnp.pad(b1, ((0, 0), (0, H1_PAD - H1)))                       # f32
    w2p = jnp.pad(w2, ((0, H1_PAD - H1), (0, H2_PAD - H2))).astype(jnp.bfloat16)
    b2p = jnp.pad(b2, ((0, 0), (0, H2_PAD - H2)))                       # f32
    w3row = jnp.pad(w3.reshape(1, H2), ((0, 0), (0, H2_PAD - H2)))      # (1, H2_PAD) f32
    b3r = b3.reshape(1, 1)                                              # (1, 1) f32

    grid = (Bp // tile_b,)
    kernel = functools.partial(_discriminator_kernel, round_output=round_output)

    out = pl.pallas_call(
        kernel,
        out_shape=jax.ShapeDtypeStruct((Bp, OUT_LANES), jnp.float32),
        grid=grid,
        in_specs=[
            pl.BlockSpec((tile_b, D_PAD), lambda i: (i, 0)),
            pl.BlockSpec((D_PAD, H1_PAD), lambda i: (0, 0)),
            pl.BlockSpec((1, H1_PAD), lambda i: (0, 0)),
            pl.BlockSpec((H1_PAD, H2_PAD), lambda i: (0, 0)),
            pl.BlockSpec((1, H2_PAD), lambda i: (0, 0)),
            pl.BlockSpec((1, H2_PAD), lambda i: (0, 0)),
            pl.BlockSpec((1, 1), lambda i: (0, 0)),
        ],
        out_specs=pl.BlockSpec((tile_b, OUT_LANES), lambda i: (i, 0)),
        compiler_params=pltpu.CompilerParams(
            dimension_semantics=("parallel",),
            # Actual need ~10 MiB at tile_b=256 (bf16 weights double-buffered
            # + f32 activations); 32 MiB leaves headroom, fits v7x's 64 MiB.
            vmem_limit_bytes=32 << 20,
        ),
    )(xp, w1p, b1p, w2p, b2p, w3row, b3r)

    return out[:B, :OUT]


def init_params(key):
    """Deterministic init matching nn.Linear's U(-1/sqrt(fan_in), 1/sqrt(fan_in))."""
    ks = jax.random.split(key, 6)

    def linear(kw, kb, fan_in, fan_out):
        bound = 1.0 / jnp.sqrt(fan_in)
        # stored as (in, out) == transpose of torch's (out, in)
        w = jax.random.uniform(kw, (fan_in, fan_out), jnp.float32, -bound, bound)
        b = jax.random.uniform(kb, (1, fan_out), jnp.float32, -bound, bound)
        return w, b

    w1, b1 = linear(ks[0], ks[1], DATA_DIMENSION, H1)
    w2, b2 = linear(ks[2], ks[3], H1, H2)
    w3, b3 = linear(ks[4], ks[5], H2, OUT)
    return (w1, b1, w2, b2, w3, b3)


def _reference_forward_f32(x, params, *, round_output=DISCRIMINATOR_ROUND_OUTPUT):
    w1, b1, w2, b2, w3, b3 = params
    h = x.reshape(x.shape[0], -1)
    h = _leaky_relu(h @ w1 + b1)
    h = _leaky_relu(h @ w2 + b2)
    out = jax.nn.sigmoid(h @ w3 + b3)
    if round_output:
        out = jnp.round(out)
    return out


def _reference_forward_mixed(x, params, *, round_output=DISCRIMINATOR_ROUND_OUTPUT):
    # Mirrors the kernel's precision: bf16 matmul inputs, f32 accumulation.
    w1, b1, w2, b2, w3, b3 = params
    h = x.reshape(x.shape[0], -1).astype(jnp.bfloat16)
    h1 = _leaky_relu(jnp.dot(h, w1.astype(jnp.bfloat16),
                             preferred_element_type=jnp.float32) + b1)
    h2 = _leaky_relu(jnp.dot(h1.astype(jnp.bfloat16), w2.astype(jnp.bfloat16),
                             preferred_element_type=jnp.float32) + b2)
    out = jax.nn.sigmoid(h2 @ w3 + b3)
    if round_output:
        out = jnp.round(out)
    return out


if __name__ == "__main__":
    key = jax.random.PRNGKey(0)
    pkey, xkey = jax.random.split(key)

    params = init_params(pkey)
    # small NCHW-style input: batch=2, channels=1, 28x28 -> flattened to 784
    x = jax.random.normal(xkey, (2, 1, 28, 28), jnp.float32)

    out = jax.block_until_ready(discriminator_forward(x, params))
    assert out.shape == (2, 1), out.shape

    # Tight check against a reference using the same bf16/f32 mixed precision.
    ref_mp = _reference_forward_mixed(x, params)
    assert jnp.allclose(out, ref_mp, atol=1e-3, rtol=1e-3), (out, ref_mp)

    # Looser check against the full-f32 reference (bf16 weight drift expected).
    ref_f32 = _reference_forward_f32(x, params)
    assert jnp.allclose(out, ref_f32, atol=2e-2, rtol=2e-2), (out, ref_f32)

    print("KERNEL_OK")
</pallas_src>

<mosaic_0001>
module attributes {stable_mosaic.version = 11 : i64} {
  func.func @_discriminator_kernel(%arg0: i32, %arg1: memref<128x896xbf16, #tpu.memory_space<vmem>>, %arg2: memref<896x1408xbf16, #tpu.memory_space<vmem>>, %arg3: memref<1x1408xf32, #tpu.memory_space<vmem>>, %arg4: memref<1408x384xbf16, #tpu.memory_space<vmem>>, %arg5: memref<1x384xf32, #tpu.memory_space<vmem>>, %arg6: memref<1x384xf32, #tpu.memory_space<vmem>>, %arg7: memref<1x1xf32, #tpu.memory_space<vmem>>, %arg8: memref<128x128xf32, #tpu.memory_space<vmem>>) attributes {dimension_semantics = [#tpu.dimension_semantics<parallel>], iteration_bounds = array<i64: 1>, scalar_prefetch = 0 : i64, scratch_operands = 0 : i64, tpu.core_type = #tpu.core_type<tc>, window_params = [{transform_indices = @transform_0, window_bounds = array<i64: 128, 896>}, {pipeline_mode = #tpu.pipeline_mode<synchronous>, transform_indices = @transform_1, window_bounds = array<i64: 896, 1408>}, {pipeline_mode = #tpu.pipeline_mode<synchronous>, transform_indices = @transform_2, window_bounds = array<i64: 1, 1408>}, {pipeline_mode = #tpu.pipeline_mode<synchronous>, transform_indices = @transform_3, window_bounds = array<i64: 1408, 384>}, {pipeline_mode = #tpu.pipeline_mode<synchronous>, transform_indices = @transform_4, window_bounds = array<i64: 1, 384>}, {pipeline_mode = #tpu.pipeline_mode<synchronous>, transform_indices = @transform_5, window_bounds = array<i64: 1, 384>}, {pipeline_mode = #tpu.pipeline_mode<synchronous>, transform_indices = @transform_6, window_bounds = array<i64: 1, 1>}, {transform_indices = @transform_7, window_bounds = array<i64: 128, 128>}]} {
    %c0 = arith.constant 0 : index
    %c0_0 = arith.constant 0 : index
    %0 = vector.load %arg1[%c0, %c0_0] : memref<128x896xbf16, #tpu.memory_space<vmem>>, vector<128x896xbf16>
    %c0_1 = arith.constant 0 : index
    %c0_2 = arith.constant 0 : index
    %1 = vector.load %arg2[%c0_1, %c0_2] : memref<896x1408xbf16, #tpu.memory_space<vmem>>, vector<896x1408xbf16>
    %cst = arith.constant dense<0.000000e+00> : vector<128x1408xf32>
    %2 = tpu.matmul %0, %1, %cst {dimension_numbers = #tpu.dot_dimension_numbers<[1], [0], [0], [1], [0, 0, 1, 1], [], []>} : vector<128x896xbf16>, vector<896x1408xbf16>, vector<128x1408xf32> -> vector<128x1408xf32>
    %c0_3 = arith.constant 0 : index
    %c0_4 = arith.constant 0 : index
    %3 = vector.load %arg3[%c0_3, %c0_4] : memref<1x1408xf32, #tpu.memory_space<vmem>>, vector<1x1408xf32>
    %4 = vector.broadcast %3 : vector<1x1408xf32> to vector<128x1408xf32>
    %5 = arith.addf %2, %4 : vector<128x1408xf32>
    %cst_5 = arith.constant 0.000000e+00 : f32
    %6 = vector.broadcast %cst_5 : f32 to vector<128x1408xf32>
    %7 = arith.cmpf oge, %5, %6 : vector<128x1408xf32>
    %cst_6 = arith.constant 2.000000e-01 : f32
    %8 = vector.broadcast %cst_6 : f32 to vector<128x1408xf32>
    %9 = arith.mulf %8, %5 : vector<128x1408xf32>
    %10 = arith.select %7, %5, %9 : vector<128x1408xi1>, vector<128x1408xf32>
    %11 = arith.truncf %10 : vector<128x1408xf32> to vector<128x1408xbf16>
    %c0_7 = arith.constant 0 : index
    %c0_8 = arith.constant 0 : index
    %12 = vector.load %arg4[%c0_7, %c0_8] : memref<1408x384xbf16, #tpu.memory_space<vmem>>, vector<1408x384xbf16>
    %cst_9 = arith.constant dense<0.000000e+00> : vector<128x384xf32>
    %13 = tpu.matmul %11, %12, %cst_9 {dimension_numbers = #tpu.dot_dimension_numbers<[1], [0], [0], [1], [0, 0, 1, 1], [], []>} : vector<128x1408xbf16>, vector<1408x384xbf16>, vector<128x384xf32> -> vector<128x384xf32>
    %c0_10 = arith.constant 0 : index
    %c0_11 = arith.constant 0 : index
    %14 = vector.load %arg5[%c0_10, %c0_11] : memref<1x384xf32, #tpu.memory_space<vmem>>, vector<1x384xf32>
    %15 = vector.broadcast %14 : vector<1x384xf32> to vector<128x384xf32>
    %16 = arith.addf %13, %15 : vector<128x384xf32>
    %cst_12 = arith.constant 0.000000e+00 : f32
    %17 = vector.broadcast %cst_12 : f32 to vector<128x384xf32>
    %18 = arith.cmpf oge, %16, %17 : vector<128x384xf32>
    %cst_13 = arith.constant 2.000000e-01 : f32
    %19 = vector.broadcast %cst_13 : f32 to vector<128x384xf32>
    %20 = arith.mulf %19, %16 : vector<128x384xf32>
    %21 = arith.select %18, %16, %20 : vector<128x384xi1>, vector<128x384xf32>
    %c0_14 = arith.constant 0 : index
    %c0_15 = arith.constant 0 : index
    %22 = vector.load %arg6[%c0_14, %c0_15] : memref<1x384xf32, #tpu.memory_space<vmem>>, vector<1x384xf32>
    %23 = vector.broadcast %22 : vector<1x384xf32> to vector<128x384xf32>
    %24 = arith.mulf %21, %23 : vector<128x384xf32>
    %cst_16 = arith.constant dense<0.000000e+00> : vector<128xf32>
    %25 = vector.multi_reduction <add>, %24, %cst_16 [1] : vector<128x384xf32> to vector<128xf32>
    %26 = vector.shape_cast %25 : vector<128xf32> to vector<128x1xf32>
    %c0_17 = arith.constant 0 : index
    %c0_18 = arith.constant 0 : index
    %27 = vector.load %arg7[%c0_17, %c0_18] : memref<1x1xf32, #tpu.memory_space<vmem>>, vector<1x1xf32>
    %28 = vector.broadcast %27 : vector<1x1xf32> to vector<128x1xf32>
    %29 = arith.addf %26, %28 : vector<128x1xf32>
    %30 = arith.negf %29 : vector<128x1xf32>
    %31 = math.exp %30 : vector<128x1xf32>
    %cst_19 = arith.constant 1.000000e+00 : f32
    %32 = vector.broadcast %cst_19 : f32 to vector<128x1xf32>
    %33 = arith.addf %32, %31 : vector<128x1xf32>
    %34 = arith.divf %32, %33 : vector<128x1xf32>
    %35 = vector.shape_cast %34 : vector<128x1xf32> to vector<128x1xf32>
    %36 = vector.broadcast %35 : vector<128x1xf32> to vector<128x128xf32>
    %c0_20 = arith.constant 0 : index
    %c0_21 = arith.constant 0 : index
    %37 = vector.load %arg8[%c0_20, %c0_21] : memref<128x128xf32, #tpu.memory_space<vmem>>, vector<128x128xf32>
    tpu.vector_store %arg8[%c0_20, %c0_21], %36 {strides = array<i32>} : memref<128x128xf32, #tpu.memory_space<vmem>>, vector<128x128xf32>,
    return
  }
  func.func @transform_0(%arg0: i32) -> (i32, i32) {
    %c0_i32 = arith.constant 0 : i32
    %c0_i32_0 = arith.constant 0 : i32
    return %arg0, %c0_i32 : i32, i32
  }
  func.func @transform_1(%arg0: i32) -> (i32, i32) {
    %c0_i32 = arith.constant 0 : i32
    %c0_i32_0 = arith.constant 0 : i32
    %c0_i32_1 = arith.constant 0 : i32
    return %c0_i32, %c0_i32_0 : i32, i32
  }
  func.func @transform_2(%arg0: i32) -> (i32, i32) {
    %c0_i32 = arith.constant 0 : i32
    %c0_i32_0 = arith.constant 0 : i32
    %c0_i32_1 = arith.constant 0 : i32
    return %c0_i32, %c0_i32_0 : i32, i32
  }
  func.func @transform_3(%arg0: i32) -> (i32, i32) {
    %c0_i32 = arith.constant 0 : i32
    %c0_i32_0 = arith.constant 0 : i32
    %c0_i32_1 = arith.constant 0 : i32
    return %c0_i32, %c0_i32_0 : i32, i32
  }
  func.func @transform_4(%arg0: i32) -> (i32, i32) {
    %c0_i32 = arith.constant 0 : i32
    %c0_i32_0 = arith.constant 0 : i32
    %c0_i32_1 = arith.constant 0 : i32
    return %c0_i32, %c0_i32_0 : i32, i32
  }
  func.func @transform_5(%arg0: i32) -> (i32, i32) {
    %c0_i32 = arith.constant 0 : i32
    %c0_i32_0 = arith.constant 0 : i32
    %c0_i32_1 = arith.constant 0 : i32
    return %c0_i32, %c0_i32_0 : i32, i32
  }
  func.func @transform_6(%arg0: i32) -> (i32, i32) {
    %c0_i32 = arith.constant 0 : i32
    %c0_i32_0 = arith.constant 0 : i32
    %c0_i32_1 = arith.constant 0 : i32
    return %c0_i32, %c0_i32_0 : i32, i32
  }
  func.func @transform_7(%arg0: i32) -> (i32, i32) {
    %c0_i32 = arith.constant 0 : i32
    %c0_i32_0 = arith.constant 0 : i32
    return %arg0, %c0_i32 : i32, i32
  }
}

</mosaic_0001>

<bundles_post_ra>
// kernel: tpu_custom_call.1
= control target key start
LH: loop header
LB: loop body
LE: loop exit
PB: predicated region body
PF: predicated region fallthrough
CT: control target
= control target key end

     0   :  { %s16659_s0 = inlined_call_operand.hbm [shape: bf16[128,896], index: 0, kind: input, shape index: {}]   ;;  %s16660_s1 = inlined_call_operand.hbm [shape: bf16[896,1408], index: 1, kind: input, shape index: {}]   ;;  %s16661_s2 = inlined_call_operand.hbm [shape: f32[1,1408], index: 2, kind: input, shape index: {}]   ;;  %s16662_s3 = inlined_call_operand.hbm [shape: bf16[1408,384], index: 3, kind: input, shape index: {}]   ;;  %s16663_s4 = inlined_call_operand.hbm [shape: f32[1,384], index: 4, kind: input, shape index: {}]   ;;  %s16664_s5 = inlined_call_operand.hbm [shape: f32[1,384], index: 5, kind: input, shape index: {}]   ;;  %s16665_s6 = inlined_call_operand.<no memory space> [shape: f32[1,1], index: 6, kind: input, shape index: {}]   ;;  %s16666_s7 = inlined_call_operand.hbm [shape: f32[128,128], index: 7, kind: output, shape index: {}]  }
   0x1   :  { %v12_v0 = vstv %s16665_s6 }
   0x2   :  { %13 = vst [vmem:[#allocation2] sm:$0x1] %v12_v0 }
   0x3   :  { %14 = vsyncpa [#allocation4], 0 }
   0x4   :  { %15 = vsyncpa [#allocation7], 0 }
   0x5   :  { %16 = vsyncpa [#allocation10], 0 }
   0x6   :  { %17 = vsyncpa [#allocation13], 0 }
   0x7   :  { %18 = vsyncpa [#allocation5], 0  ;;  %s14533_s26 = smov [#allocation6]  }
   0x8   :  { %s36_s27 = sshll.u32 %s14533_s26, 4  ;;  %s37_s27 = int_to_ptr.vmem [resolvable:$true] %s36_s27 }
   0x9   :  { %s14391_s28 = scalar_lea.vmem %s37_s27, 78848  ;;  %p14396_p1 = scmp.lt.s32.totalorder %s37_s27, %s37_s27 }
   0xa   :  { %p14392_p0 = scmp.ne.s32.totalorder %s37_s27, %s14391_s28  ;;  %p14397_p2 = scmp.lt.s32.totalorder %s14391_s28, %s14391_s28 }
   0xc   :  { %p14398_p3 = por %p14397_p2, %p14396_p1 }
   0xe   :  { %p14399_p4 = pnand %p14398_p3, %p14392_p0 }
  0x10   :  { %14402 = shalt.err (!%p14399_p4)
}
  0x11   :  { %s14534_s29 = smov 704   ;;  %s14535_s30 = smov 44  }
  0x12   :  { %42 = dma.hbm_to_vmem [thread:$0]  %s16660_s1, 78848, %s37_s27, [#allocation7], %s14534_s29, %s14534_s29, %s14535_s30  }
  0x13   :  { %s14536_s9 = smov [#allocation9]  }
  0x14   :  { %s58_s10 = sshll.u32 %s14536_s9, 4  ;;  %s59_s10 = int_to_ptr.vmem [resolvable:$true] %s58_s10 }
  0x15   :  { %s14411_s11 = scalar_lea.vmem %s59_s10, 33792  ;;  %p14416_p6 = scmp.lt.s32.totalorder %s59_s10, %s59_s10 }
  0x16   :  { %p14412_p5 = scmp.ne.s32.totalorder %s59_s10, %s14411_s11  ;;  %p14417_p7 = scmp.lt.s32.totalorder %s14411_s11, %s14411_s11 }
  0x18   :  { %p14418_p8 = por %p14417_p7, %p14416_p6 }
  0x1a   :  { %p14419_p9 = pnand %p14418_p8, %p14412_p5 }
  0x1c   :  { %14422 = shalt.err (!%p14419_p9)
}
  0x1d   :  { %s14537_s12 = smov 192   ;;  %s14538_s13 = smov 12  }
  0x1e   :  { %64 = dma.hbm_to_vmem [thread:$0]  %s16662_s3, 33792, %s59_s10, [#allocation10], %s14537_s12, %s14537_s12, %s14538_s13  }
  0x1f   :  { %s14539_s16 = smov [#allocation3]  }
  0x20   :  { %s24_s17 = sshll.u32 %s14539_s16, 4  ;;  %s25_s17 = int_to_ptr.vmem [resolvable:$true] %s24_s17 }
  0x21   :  { %s14431_s1 = scalar_lea.vmem %s25_s17, 7168  ;;  %p14436_p11 = scmp.lt.s32.totalorder %s25_s17, %s25_s17 }
  0x22   :  { %p14432_p10 = scmp.ne.s32.totalorder %s25_s17, %s14431_s1  ;;  %p14437_p12 = scmp.lt.s32.totalorder %s14431_s1, %s14431_s1 }
  0x24   :  { %p14438_p13 = por %p14437_p12, %p14436_p11 }
  0x26   :  { %p14439_p0 = pnand %p14438_p13, %p14432_p10 }
  0x28   :  { %14442 = shalt.err (!%p14439_p0)
}
  0x29   :  { %s14540_s18 = smov 448   ;;  %s14541_s19 = smov 28  }
  0x2a   :  { %30 = dma.hbm_to_vmem [thread:$0]  %s16659_s0, 7168, %s25_s17, [#allocation4], %s14540_s18, %s14540_s18, %s14541_s19  }
  0x2b   :  { %s14542_s22 = smov [#allocation8]   ;;  %s14543_s3 = smov [#allocation11]  }
  0x2c   :  { %s49_s23 = sshll.u32 %s14542_s22, 4  ;;  %s71_s24 = sshll.u32 %s14543_s3, 4  ;;  %s50_s23 = int_to_ptr.vmem [resolvable:$true] %s49_s23  ;;  %s72_s24 = int_to_ptr.vmem [resolvable:$true] %s71_s24 }
  0x2d   :  { %s14451_s25 = scalar_lea.vmem %s50_s23, 176  ;;  %s14455_s26 = scalar_lea.vmem %s50_s23, 192 }
  0x2e   :  { %p14452_p1 = scmp.ne.s32.totalorder %s50_s23, %s14451_s25  ;;  %p14456_p2 = scmp.lt.s32.totalorder %s50_s23, %s50_s23 }
  0x2f   :  { %p14457_p3 = scmp.lt.s32.totalorder %s14455_s26, %s14451_s25 }
  0x31   :  { %p14458_p4 = por %p14457_p3, %p14456_p2 }
  0x33   :  { %p14459_p5 = pnand %p14458_p4, %p14452_p1 }
  0x35   :  { %14462 = shalt.err (!%p14459_p5)
}
  0x36   :  { %52 = dma.hbm_to_vmem [thread:$0]  %s16661_s2, 176, %s50_s23, [#allocation7]  }
  0x37   :  { %s14471_s29 = scalar_lea.vmem %s72_s24, 48  ;;  %s14475_s0 = scalar_lea.vmem %s72_s24, 64 }
  0x38   :  { %p14472_p6 = scmp.ne.s32.totalorder %s72_s24, %s14471_s29  ;;  %p14476_p7 = scmp.lt.s32.totalorder %s72_s24, %s72_s24 }
  0x39   :  { %p14477_p8 = scmp.lt.s32.totalorder %s14475_s0, %s14471_s29 }
  0x3b   :  { %p14478_p9 = por %p14477_p8, %p14476_p7 }
  0x3d   :  { %p14479_p10 = pnand %p14478_p9, %p14472_p6 }
  0x3f   :  { %14482 = shalt.err (!%p14479_p10)
}
  0x40   :  { %74 = dma.hbm_to_vmem [thread:$0]  %s16663_s4, 48, %s72_s24, [#allocation10]  }
  0x41   :  { %s14544_s6 = smov [#allocation12]  }
  0x42   :  { %s81_s9 = sshll.u32 %s14544_s6, 4  ;;  %s82_s9 = int_to_ptr.vmem [resolvable:$true] %s81_s9 }
  0x43   :  { %s14491_s10 = scalar_lea.vmem %s82_s9, 48  ;;  %s14495_s11 = scalar_lea.vmem %s82_s9, 64 }
  0x44   :  { %p14492_p11 = scmp.ne.s32.totalorder %s82_s9, %s14491_s10  ;;  %p14496_p12 = scmp.lt.s32.totalorder %s82_s9, %s82_s9 }
  0x45   :  { %p14497_p13 = scmp.lt.s32.totalorder %s14495_s11, %s14491_s10 }
  0x47   :  { %p14498_p0 = por %p14497_p13, %p14496_p12 }
  0x49   :  { %p14499_p1 = pnand %p14498_p0, %p14492_p11 }
  0x4b   :  { %14502 = shalt.err (!%p14499_p1)
}
  0x4c   :  { %84 = dma.hbm_to_vmem [thread:$0]  %s16664_s5, 48, %s82_s9, [#allocation13]  }
  0x4d   :  { %14523 = dma.done.wait [#allocation4], 7168  }
  0x4e   :  { %14524 = vsyncadd [#allocation4], 4294960128 }
  0x4f   :  { %14525 = dma.done.wait [#allocation7], 79024  }
  0x50   :  { %14526 = vsyncadd [#allocation7], 4294888272 }
  0x51   :  { %14527 = dma.done.wait [#allocation10], 33840  }
  0x52   :  { %14528 = vsyncadd [#allocation10], 4294933456 }
  0x53   :  { %14529 = dma.done.wait [#allocation13], 48  }
  0x54   :  { %14530 = vsyncadd [#allocation13], 4294967248  ;;  %v12713_v1 = vld [vmem:[#allocation6 + $0x26c] ss:$44 sps:$4 sm:$0xff]   ;;  %v16667_v3 = vmov 0   ;;  %s14546_s4 = smov [#allocation14]  }
  0x55   :  { %v12715_v2 = vld [vmem:[#allocation6 + $0x7ec] ss:$44 sps:$4 sm:$0xff]   ;;  %12711 = vset.pattern.permute.xlu1 %v16667_v3  ;;  %12712 = vset.pattern.permute.xlu0 %v16667_v3  ;;  %v12717_v4 = vld [vmem:[#allocation6 + $0x268] ss:$44 sps:$4 sm:$0xff]   ;;  %v12723_v8 = vld [vmem:[#allocation6 + $0x210] ss:$44 sps:$4 sm:$0xff]  }
  0x56   :  { %4325 = vmatprep.subr.bf16.mxu0 %v12713_v1  ;;  %v12718_v5 = vld [vmem:[#allocation6 + $0x7e8] ss:$44 sps:$4 sm:$0xff]   ;;  %4438 = vmatprep.subr.bf16.mxu1 %v12715_v2  ;;  %v12724_v9 = vld [vmem:[#allocation6 + $0x790] ss:$44 sps:$4 sm:$0xff]   ;;  %v12729_v12 = vld [vmem:[#allocation6 + $0x1b8] ss:$44 sps:$4 sm:$0xff]  }
  0x57   :  { %v12719_v6 = vld [vmem:[#allocation6 + $0x214] ss:$44 sps:$4 sm:$0xff]   ;;  %4326 = vmatpush1.bf16.msra.mxu0 %v12717_v4  ;;  %4439 = vmatpush1.bf16.msra.mxu1 %v12718_v5  ;;  %v12725_v10 = vld [vmem:[#allocation6 + $0x1bc] ss:$44 sps:$4 sm:$0xff]   ;;  %v12730_v13 = vld [vmem:[#allocation6 + $0x738] ss:$44 sps:$4 sm:$0xff]  }
  0x58   :  { %v12721_v7 = vld [vmem:[#allocation6 + $0x794] ss:$44 sps:$4 sm:$0xff]   ;;  %4327 = vmatprep.subr.bf16.mxu0 %v12719_v6  ;;  %v12727_v11 = vld [vmem:[#allocation6 + $0x73c] ss:$44 sps:$4 sm:$0xff]   ;;  %v12731_v14 = vld [vmem:[#allocation6 + $0x164] ss:$44 sps:$4 sm:$0xff]  }
  0x59   :  { %4440 = vmatprep.subr.bf16.mxu1 %v12721_v7  ;;  %v12733_v15 = vld [vmem:[#allocation6 + $0x6e4] ss:$44 sps:$4 sm:$0xff]   ;;  %v12735_v16 = vld [vmem:[#allocation6 + $0x160] ss:$44 sps:$4 sm:$0xff]   ;;  %v12741_v20 = vld [vmem:[#allocation6 + $0x108] ss:$44 sps:$4 sm:$0xff]  }
  0x5a   :  { %v12736_v17 = vld [vmem:[#allocation6 + $0x6e0] ss:$44 sps:$4 sm:$0xff]   ;;  %v12742_v21 = vld [vmem:[#allocation6 + $0x688] ss:$44 sps:$4 sm:$0xff]   ;;  %v12747_v24 = vld [vmem:[#allocation6 + $0xb0] ss:$44 sps:$4 sm:$0xff]  }
  0x5b   :  { %4328 = vmatpush1.bf16.msra.mxu0 %v12723_v8  ;;  %4441 = vmatpush1.bf16.msra.mxu1 %v12724_v9  ;;  %v12737_v18 = vld [vmem:[#allocation6 + $0x10c] ss:$44 sps:$4 sm:$0xff]   ;;  %v12743_v22 = vld [vmem:[#allocation6 + $0xb4] ss:$44 sps:$4 sm:$0xff]   ;;  %v12748_v25 = vld [vmem:[#allocation6 + $0x630] ss:$44 sps:$4 sm:$0xff]  }
  0x5c   :  { %4329 = vmatprep.subr.bf16.mxu0 %v12725_v10  ;;  %4442 = vmatprep.subr.bf16.mxu1 %v12727_v11  ;;  %v12739_v19 = vld [vmem:[#allocation6 + $0x68c] ss:$44 sps:$4 sm:$0xff]   ;;  %v12745_v23 = vld [vmem:[#allocation6 + $0x634] ss:$44 sps:$4 sm:$0xff]   ;;  %v12749_v26 = vld [vmem:[#allocation6 + $0x5c] ss:$44 sps:$4 sm:$0xff]  }
  0x5d   :  { %v12751_v27 = vld [vmem:[#allocation6 + $0x5dc] ss:$44 sps:$4 sm:$0xff]   ;;  %v12753_v28 = vld [vmem:[#allocation6 + $0x58] ss:$44 sps:$4 sm:$0xff]   ;;  %v12759_v32 = vld [vmem:[#allocation6] ss:$44 sps:$4 sm:$0xff]  }
  0x5e   :  { %v12754_v29 = vld [vmem:[#allocation6 + $0x5d8] ss:$44 sps:$4 sm:$0xff]   ;;  %v12760_v33 = vld [vmem:[#allocation6 + $0x580] ss:$44 sps:$4 sm:$0xff]   ;;  %v12765_v36 = vld [vmem:[#allocation6 + $0x528] ss:$44 sps:$4 sm:$0xff]  }
  0x5f   :  { %4330 = vmatpush1.bf16.msra.mxu0 %v12729_v12  ;;  %4443 = vmatpush1.bf16.msra.mxu1 %v12730_v13  ;;  %v12755_v30 = vld [vmem:[#allocation6 + $0x4] ss:$44 sps:$4 sm:$0xff]   ;;  %v12761_v34 = vld [vmem:[#allocation6 + $0x52c] ss:$44 sps:$4 sm:$0xff]   ;;  %v12766_v37 = vld [vmem:[#allocation6 + $0xaa8] ss:$44 sps:$4 sm:$0xff]  }
  0x60   :  { %4331 = vmatprep.subr.bf16.mxu0 %v12731_v14  ;;  %4444 = vmatprep.subr.bf16.mxu1 %v12733_v15  ;;  %v12757_v31 = vld [vmem:[#allocation6 + $0x584] ss:$44 sps:$4 sm:$0xff]   ;;  %v12763_v35 = vld [vmem:[#allocation6 + $0xaac] ss:$44 sps:$4 sm:$0xff]   ;;  %v12767_v38 = vld [vmem:[#allocation6 + $0x4d4] ss:$44 sps:$4 sm:$0xff]  }
  0x61   :  { %v12769_v39 = vld [vmem:[#allocation6 + $0xa54] ss:$44 sps:$4 sm:$0xff]   ;;  %v12771_v40 = vld [vmem:[#allocation6 + $0x4d0] ss:$44 sps:$4 sm:$0xff]   ;;  %v12777_v44 = vld [vmem:[#allocation6 + $0x478] ss:$44 sps:$4 sm:$0xff]  }
  0x62   :  { %v12772_v41 = vld [vmem:[#allocation6 + $0xa50] ss:$44 sps:$4 sm:$0xff]   ;;  %v12778_v45 = vld [vmem:[#allocation6 + $0x9f8] ss:$44 sps:$4 sm:$0xff]   ;;  %v12783_v48 = vld [vmem:[#allocation6 + $0x420] ss:$44 sps:$4 sm:$0xff]  }
  0x63   :  { %4332 = vmatpush1.bf16.msra.mxu0 %v12735_v16  ;;  %4445 = vmatpush1.bf16.msra.mxu1 %v12736_v17  ;;  %v12773_v42 = vld [vmem:[#allocation6 + $0x47c] ss:$44 sps:$4 sm:$0xff]   ;;  %v12779_v46 = vld [vmem:[#allocation6 + $0x424] ss:$44 sps:$4 sm:$0xff]   ;;  %v12784_v49 = vld [vmem:[#allocation6 + $0x9a0] ss:$44 sps:$4 sm:$0xff]  }
  0x64   :  { %4333 = vmatprep.subr.bf16.mxu0 %v12737_v18  ;;  %4446 = vmatprep.subr.bf16.mxu1 %v12739_v19  ;;  %v12775_v43 = vld [vmem:[#allocation6 + $0x9fc] ss:$44 sps:$4 sm:$0xff]   ;;  %v12781_v47 = vld [vmem:[#allocation6 + $0x9a4] ss:$44 sps:$4 sm:$0xff]   ;;  %v12785_v51 = vld [vmem:[#allocation6 + $0x3cc] ss:$44 sps:$4 sm:$0xff]  }
  0x65   :  { %v12809_v50 = vld [vmem:[#allocation3 + $0x4] ss:$28 sps:$4 sm:$0xff]   ;;  %v12811_v52 = vld [vmem:[#allocation3 + $0xc] ss:$28 sps:$4 sm:$0xff]   ;;  %v12795_v58 = vld [vmem:[#allocation6 + $0x370] ss:$44 sps:$4 sm:$0xff]  }
  0x66   :  { %v12787_v53 = vld [vmem:[#allocation6 + $0x94c] ss:$44 sps:$4 sm:$0xff]   ;;  %4357 = vmatprep.mubr.bf16.mxu0 %v12809_v50  ;;  %4470 = vmatprep.mubr.bf16.mxu1 %v12811_v52  ;;  %v12789_v54 = vld [vmem:[#allocation6 + $0x3c8] ss:$44 sps:$4 sm:$0xff]   ;;  %v12796_v59 = vld [vmem:[#allocation6 + $0x8f0] ss:$44 sps:$4 sm:$0xff]  }
  0x67   :  { %4334 = vmatpush1.bf16.msra.mxu0 %v12741_v20  ;;  %4447 = vmatpush1.bf16.msra.mxu1 %v12742_v21  ;;  %v12790_v55 = vld [vmem:[#allocation6 + $0x948] ss:$44 sps:$4 sm:$0xff]   ;;  %v12801_v62 = vld [vmem:[#allocation6 + $0x318] ss:$44 sps:$4 sm:$0xff]   ;;  %v12807_v2 = vld [vmem:[#allocation6 + $0x2c0] ss:$44 sps:$4 sm:$0xff]  }
  0x68   :  { %4335 = vmatprep.subr.bf16.mxu0 %v12743_v22  ;;  %4448 = vmatprep.subr.bf16.mxu1 %v12745_v23  ;;  %v12791_v56 = vld [vmem:[#allocation6 + $0x374] ss:$44 sps:$4 sm:$0xff]   ;;  %v12797_v60 = vld [vmem:[#allocation6 + $0x31c] ss:$44 sps:$4 sm:$0xff]   ;;  %v12802_v63 = vld [vmem:[#allocation6 + $0x898] ss:$44 sps:$4 sm:$0xff]  }
  0x69   :  { %v12793_v57 = vld [vmem:[#allocation6 + $0x8f4] ss:$44 sps:$4 sm:$0xff]   ;;  %v12799_v61 = vld [vmem:[#allocation6 + $0x89c] ss:$44 sps:$4 sm:$0xff]   ;;  %v12803_v0 = vld [vmem:[#allocation6 + $0x2c4] ss:$44 sps:$4 sm:$0xff]  }
  0x6a   :  { %v12805_v1 = vld [vmem:[#allocation6 + $0x844] ss:$44 sps:$4 sm:$0xff]   ;;  %v12808_v4 = vld [vmem:[#allocation6 + $0x840] ss:$44 sps:$4 sm:$0xff]   ;;  %v12815_v9 = vld [vmem:[#allocation6 + $0xd68] ss:$44 sps:$4 sm:$0xff]  }
  0x6b   :  { %4336 = vmatpush1.bf16.msra.mxu0 %v12747_v24  ;;  %4449 = vmatpush1.bf16.msra.mxu1 %v12748_v25  ;;  %v12817_v5 = vld [vmem:[#allocation6 + $0xd6c] ss:$44 sps:$4 sm:$0xff]   ;;  %v12813_v7 = vld [vmem:[#allocation3] ss:$28 sps:$4 sm:$0xff]   ;;  %v12814_v8 = vld [vmem:[#allocation3 + $0x8] ss:$28 sps:$4 sm:$0xff]  }
  0x6c   :  { %4337 = vmatprep.subr.bf16.mxu0 %v12749_v26  ;;  %4450 = vmatprep.subr.bf16.mxu1 %v12751_v27  ;;  %v12835_v6 = vld [vmem:[#allocation6 + $0x12ec] ss:$44 sps:$4 sm:$0xff]   ;;  %v12820_v10 = vld [vmem:[#allocation6 + $0xd14] ss:$44 sps:$4 sm:$0xff]   ;;  %v12818_v15 = vld [vmem:[#allocation6 + $0xd10] ss:$44 sps:$4 sm:$0xff]  }
  0x6d   :  { %v12821_v11 = vld [vmem:[#allocation3 + $0x3c] ss:$28 sps:$4 sm:$0xff]   ;;  %v12823_v12 = vld [vmem:[#allocation3 + $0x44] ss:$28 sps:$4 sm:$0xff]   ;;  %v12833_v13 = vld [vmem:[#allocation6 + $0x12e8] ss:$44 sps:$4 sm:$0xff]  }
  0x6e   :  { %v12850_v14 = vld [vmem:[#allocation6 + $0x1294] ss:$44 sps:$4 sm:$0xff]   ;;  %v12829_v17 = vld [vmem:[#allocation6 + $0xcbc] ss:$44 sps:$4 sm:$0xff]   ;;  %v12827_v20 = vld [vmem:[#allocation6 + $0xcb8] ss:$44 sps:$4 sm:$0xff]  }
  0x6f   :  { %4338 = vmatpush1.bf16.msra.mxu0 %v12753_v28  ;;  %4451 = vmatpush1.bf16.msra.mxu1 %v12754_v29  ;;  %v12825_v16 = vld [vmem:[#allocation3 + $0x38] ss:$28 sps:$4 sm:$0xff]   ;;  %v12826_v18 = vld [vmem:[#allocation3 + $0x40] ss:$28 sps:$4 sm:$0xff]   ;;  %v12832_v21 = vld [vmem:[#allocation6 + $0xc64] ss:$44 sps:$4 sm:$0xff]  }
  0x70   :  { %4339 = vmatprep.subr.bf16.mxu0 %v12755_v30  ;;  %4452 = vmatprep.subr.bf16.mxu1 %v12757_v31  ;;  %v12848_v19 = vld [vmem:[#allocation6 + $0x1290] ss:$44 sps:$4 sm:$0xff]   ;;  %v12863_v25 = vld [vmem:[#allocation6 + $0x1238] ss:$44 sps:$4 sm:$0xff]   ;;  %v12830_v26 = vld [vmem:[#allocation6 + $0xc60] ss:$44 sps:$4 sm:$0xff]  }
  0x71   :  { %v12836_v22 = vld [vmem:[#allocation3 + $0x74] ss:$28 sps:$4 sm:$0xff]   ;;  %v12838_v23 = vld [vmem:[#allocation3 + $0x7c] ss:$28 sps:$4 sm:$0xff]   ;;  %v12871_v52 = vld [vmem:[#allocation3 + $0xe8] ss:$28 sps:$4 sm:$0xff]  }
  0x72   :  { %v12865_v24 = vld [vmem:[#allocation6 + $0x123c] ss:$44 sps:$4 sm:$0xff]   ;;  %v12880_v27 = vld [vmem:[#allocation6 + $0x11e4] ss:$44 sps:$4 sm:$0xff]   ;;  %v12844_v28 = vld [vmem:[#allocation6 + $0xc0c] ss:$44 sps:$4 sm:$0xff]  }
  0x73   :  { %4340 = vmatpush1.bf16.msra.mxu0 %v12759_v32  ;;  %4453 = vmatpush1.bf16.msra.mxu1 %v12760_v33  ;;  %v12840_v29 = vld [vmem:[#allocation3 + $0x70] ss:$28 sps:$4 sm:$0xff]   ;;  %v12841_v30 = vld [vmem:[#allocation3 + $0x78] ss:$28 sps:$4 sm:$0xff]   ;;  %v12922_v50 = vld [vmem:[#allocation6 + $0x10dc] ss:$44 sps:$4 sm:$0xff]  }
  0x74   :  { %4341 = vmatprep.subr.bf16.mxu0 %v12761_v34  ;;  %4454 = vmatprep.subr.bf16.mxu1 %v12763_v35  ;;  %v12842_v31 = vld [vmem:[#allocation6 + $0xc08] ss:$44 sps:$4 sm:$0xff]   ;;  %v12878_v35 = vld [vmem:[#allocation6 + $0x11e0] ss:$44 sps:$4 sm:$0xff]   ;;  %s11119_s5 = sshll.u32 %s14546_s4, 4  ;;  %s11120_s5 = int_to_ptr.vmem [resolvable:$true] %s11119_s5 }
  0x75   :  { %v12847_v32 = vld [vmem:[#allocation6 + $0xbb4] ss:$44 sps:$4 sm:$0xff]   ;;  %v12851_v33 = vld [vmem:[#allocation3 + $0xac] ss:$28 sps:$4 sm:$0xff]   ;;  %s14503_s13 = scalar_lea.vmem %s11120_s5, 2048  ;;  %p14508_p3 = scmp.lt.s32.totalorder %s11120_s5, %s11120_s5 }
  0x76   :  { %v12853_v34 = vld [vmem:[#allocation3 + $0xb4] ss:$28 sps:$4 sm:$0xff]   ;;  %p14504_p2 = scmp.ne.s32.totalorder %s11120_s5, %s14503_s13  ;;  %p14509_p4 = scmp.lt.s32.totalorder %s14503_s13, %s14503_s13 }
  0x77   :  { %4342 = vmatpush2.bf16.msra.mxu0 %v12765_v36  ;;  %4455 = vmatpush2.bf16.msra.mxu1 %v12766_v37  ;;  %v12895_v36 = vld [vmem:[#allocation6 + $0x118c] ss:$44 sps:$4 sm:$0xff]   ;;  %v12845_v37 = vld [vmem:[#allocation6 + $0xbb0] ss:$44 sps:$4 sm:$0xff]  }
  0x78   :  { %4343 = vmatprep.subr.bf16.mxu0 %v12767_v38  ;;  %4456 = vmatprep.subr.bf16.mxu1 %v12769_v39  ;;  %v12855_v38 = vld [vmem:[#allocation3 + $0xa8] ss:$28 sps:$4 sm:$0xff]   ;;  %p14510_p5 = por %p14509_p4, %p14508_p3 }
  0x79   :  { %v12859_v39 = vld [vmem:[#allocation6 + $0xb5c] ss:$44 sps:$4 sm:$0xff]  }
  0x7a   :  { %p14511_p6 = pnand %p14510_p5, %p14504_p2 }
  0x7b   :  { %4344 = vmatpush2.bf16.msra.mxu0 %v12771_v40  ;;  %4457 = vmatpush2.bf16.msra.mxu1 %v12772_v41  ;;  %v12856_v40 = vld [vmem:[#allocation3 + $0xb0] ss:$28 sps:$4 sm:$0xff]   ;;  %v12893_v41 = vld [vmem:[#allocation6 + $0x1188] ss:$44 sps:$4 sm:$0xff]  }
  0x7c   :  { %4345 = vmatprep.subr.bf16.mxu0 %v12773_v42  ;;  %4458 = vmatprep.subr.bf16.mxu1 %v12775_v43  ;;  %v12857_v42 = vld [vmem:[#allocation6 + $0xb58] ss:$44 sps:$4 sm:$0xff]  }
  0x7d   :  { %v12862_v43 = vld [vmem:[#allocation6 + $0xb04] ss:$44 sps:$4 sm:$0xff]  }
  0x7f   :  { %4346 = vmatpush2.bf16.msra.mxu0 %v12777_v44  ;;  %4459 = vmatpush2.bf16.msra.mxu1 %v12778_v45  ;;  %v12866_v44 = vld [vmem:[#allocation3 + $0xe4] ss:$28 sps:$4 sm:$0xff]   ;;  %v12868_v45 = vld [vmem:[#allocation3 + $0xec] ss:$28 sps:$4 sm:$0xff]  }
  0x80   :  { %4347 = vmatprep.subr.bf16.mxu0 %v12779_v46  ;;  %4460 = vmatprep.subr.bf16.mxu1 %v12781_v47  ;;  %v12910_v46 = vld [vmem:[#allocation6 + $0x1134] ss:$44 sps:$4 sm:$0xff]  }
  0x81   :  { %v12860_v47 = vld [vmem:[#allocation6 + $0xb00] ss:$44 sps:$4 sm:$0xff]  }
  0x83   :  { %4348 = vmatpush2.bf16.msra.mxu0 %v12783_v48  ;;  %4461 = vmatpush2.bf16.msra.mxu1 %v12784_v49  ;;  %v12908_v48 = vld [vmem:[#allocation6 + $0x1130] ss:$44 sps:$4 sm:$0xff]   ;;  %v12874_v49 = vld [vmem:[#allocation6 + $0x102c] ss:$44 sps:$4 sm:$0xff]  }
  0x84   :  { %4349 = vmatprep.subr.bf16.mxu0 %v12785_v51  ;;  %4462 = vmatprep.subr.bf16.mxu1 %v12787_v53  ;;  %v12870_v51 = vld [vmem:[#allocation3 + $0xe0] ss:$28 sps:$4 sm:$0xff]   ;;  %v12872_v53 = vld [vmem:[#allocation6 + $0x1028] ss:$44 sps:$4 sm:$0xff]  }
  0x87   :  { %4350 = vmatpush2.bf16.msra.mxu0 %v12789_v54  ;;  %4463 = vmatpush2.bf16.msra.mxu1 %v12790_v55  ;;  %v12877_v54 = vld [vmem:[#allocation6 + $0xfd4] ss:$44 sps:$4 sm:$0xff]   ;;  %v12881_v55 = vld [vmem:[#allocation3 + $0x11c] ss:$28 sps:$4 sm:$0xff]  }
  0x88   :  { %4351 = vmatprep.subr.bf16.mxu0 %v12791_v56  ;;  %4464 = vmatprep.subr.bf16.mxu1 %v12793_v57  ;;  %v12883_v56 = vld [vmem:[#allocation3 + $0x124] ss:$28 sps:$4 sm:$0xff]  }
  0x89   :  { %v12920_v57 = vld [vmem:[#allocation6 + $0x10d8] ss:$44 sps:$4 sm:$0xff]  }
  0x8b   :  { %4352 = vmatpush2.bf16.msra.mxu0 %v12795_v58  ;;  %4465 = vmatpush2.bf16.msra.mxu1 %v12796_v59  ;;  %v12928_v58 = vld [vmem:[#allocation6 + $0x1084] ss:$44 sps:$4 sm:$0xff]  }
  0x8c   :  { %4353 = vmatprep.subr.bf16.mxu0 %v12797_v60  ;;  %4466 = vmatprep.subr.bf16.mxu1 %v12799_v61  ;;  %v12875_v59 = vld [vmem:[#allocation6 + $0xfd0] ss:$44 sps:$4 sm:$0xff]   ;;  %v12885_v60 = vld [vmem:[#allocation3 + $0x118] ss:$28 sps:$4 sm:$0xff]  }
  0x8d   :  { %v12889_v61 = vld [vmem:[#allocation6 + $0xf7c] ss:$44 sps:$4 sm:$0xff]  }
  0x8f   :  { %4354 = vmatpush2.bf16.msra.mxu0 %v12801_v62  ;;  %4467 = vmatpush2.bf16.msra.mxu1 %v12802_v63  ;;  %v12926_v62 = vld [vmem:[#allocation6 + $0x1080] ss:$44 sps:$4 sm:$0xff]  }
  0x90   :  { %4355 = vmatprep.subr.bf16.mxu0 %v12803_v0  ;;  %4468 = vmatprep.subr.bf16.mxu1 %v12805_v1  ;;  %v12886_v63 = vld [vmem:[#allocation3 + $0x120] ss:$28 sps:$4 sm:$0xff]   ;;  %v12887_v0 = vld [vmem:[#allocation6 + $0xf78] ss:$44 sps:$4 sm:$0xff]  }
  0x91   :  { %v12892_v1 = vld [vmem:[#allocation6 + $0xf24] ss:$44 sps:$4 sm:$0xff]  }
  0x93   :  { %4356 = vmatpush2.bf16.msra.mxu0 %v12807_v2  ;;  %4469 = vmatpush2.bf16.msra.mxu1 %v12808_v4  ;;  %v12896_v2 = vld [vmem:[#allocation3 + $0x154] ss:$28 sps:$4 sm:$0xff]   ;;  %v12898_v4 = vld [vmem:[#allocation3 + $0x15c] ss:$28 sps:$4 sm:$0xff]  }
  0x94   :  { %4551 = vmatprep.subr.bf16.mxu0 %v12817_v5  ;;  %4664 = vmatprep.subr.bf16.mxu1 %v12835_v6  ;;  %v12938_v5 = vld [vmem:[#allocation6 + $0x7f4] ss:$44 sps:$4 sm:$0xff]  }
  0x95   :  { %v12890_v6 = vld [vmem:[#allocation6 + $0xf20] ss:$44 sps:$4 sm:$0xff]  }
  0x96   :  { %4358 = vmatmul.mubr.bf16.vlgmr.msra.gmra.mxu0 %v12813_v7  ;;  %4471 = vmatmul.mubr.bf16.vlgmr.msra.gmra.mxu1 %v12814_v8  ;;  %v12900_v7 = vld [vmem:[#allocation3 + $0x150] ss:$28 sps:$4 sm:$0xff]  }
  0x97   :  { %4552 = vmatpush1.bf16.msra.mxu0 %v12815_v9  ;;  %4367 = vmatprep.mubr.bf16.mxu0 %v12821_v11  ;;  %v12904_v8 = vld [vmem:[#allocation6 + $0xecc] ss:$44 sps:$4 sm:$0xff]   ;;  %v12907_v11 = vld [vmem:[#allocation6 + $0xe74] ss:$44 sps:$4 sm:$0xff]  }
  0x98   :  { %4553 = vmatprep.subr.bf16.mxu0 %v12820_v10  ;;  %4480 = vmatprep.mubr.bf16.mxu1 %v12823_v12  ;;  %v12901_v9 = vld [vmem:[#allocation3 + $0x158] ss:$28 sps:$4 sm:$0xff]   ;;  %v12911_v12 = vld [vmem:[#allocation3 + $0x18c] ss:$28 sps:$4 sm:$0xff]  }
  0x99   :  { %4665 = vmatpush1.bf16.msra.mxu1 %v12833_v13  ;;  %v12902_v10 = vld [vmem:[#allocation6 + $0xec8] ss:$44 sps:$4 sm:$0xff]  }
  0x9a   :  { %4666 = vmatprep.subr.bf16.mxu1 %v12850_v14  ;;  %v12913_v13 = vld [vmem:[#allocation3 + $0x194] ss:$28 sps:$4 sm:$0xff]  }
  0x9b   :  { %4554 = vmatpush1.bf16.msra.mxu0 %v12818_v15  ;;  %v12905_v14 = vld [vmem:[#allocation6 + $0xe70] ss:$44 sps:$4 sm:$0xff]  }
  0x9c   :  { %4555 = vmatprep.subr.bf16.mxu0 %v12829_v17  ;;  %v12919_v15 = vld [vmem:[#allocation6 + $0xe1c] ss:$44 sps:$4 sm:$0xff]   ;;  %v12916_v17 = vld [vmem:[#allocation3 + $0x190] ss:$28 sps:$4 sm:$0xff]  }
  0x9d   :  { %4667 = vmatpush1.bf16.msra.mxu1 %v12848_v19  ;;  %v12929_v19 = vld [vmem:[#allocation3 + $0x14] ss:$28 sps:$4 sm:$0xff]  }
  0x9e   :  { %4368 = vmatmul.mubr.bf16.gmra.mxu0 %v12825_v16  ;;  %4481 = vmatmul.mubr.bf16.gmra.mxu1 %v12826_v18  ;;  %v12915_v16 = vld [vmem:[#allocation3 + $0x188] ss:$28 sps:$4 sm:$0xff]  }
  0x9f   :  { %4556 = vmatpush1.bf16.msra.mxu0 %v12827_v20  ;;  %4377 = vmatprep.mubr.bf16.mxu0 %v12836_v22  ;;  %v12917_v18 = vld [vmem:[#allocation6 + $0xe18] ss:$44 sps:$4 sm:$0xff]   ;;  %v12935_v22 = vld [vmem:[#allocation6 + $0x274] ss:$44 sps:$4 sm:$0xff]  }
  0xa0   :  { %4557 = vmatprep.subr.bf16.mxu0 %v12832_v21  ;;  %4490 = vmatprep.mubr.bf16.mxu1 %v12838_v23  ;;  %v12925_v20 = vld [vmem:[#allocation6 + $0xdc4] ss:$44 sps:$4 sm:$0xff]   ;;  %v12923_v21 = vld [vmem:[#allocation6 + $0xdc0] ss:$44 sps:$4 sm:$0xff]  }
  0xa1   :  { %4668 = vmatprep.subr.bf16.mxu1 %v12865_v24  ;;  %v12931_v23 = vld [vmem:[#allocation3 + $0x10] ss:$28 sps:$4 sm:$0xff]   ;;  %v12932_v24 = vld [vmem:[#allocation3 + $0x18] ss:$28 sps:$4 sm:$0xff]  }
  0xa2   :  { %4669 = vmatpush1.bf16.msra.mxu1 %v12863_v25  ;;  %v12933_v25 = vld [vmem:[#allocation6 + $0x270] ss:$44 sps:$4 sm:$0xff]  }
  0xa3   :  { %4558 = vmatpush1.bf16.msra.mxu0 %v12830_v26  ;;  %4670 = vmatprep.subr.bf16.mxu1 %v12880_v27  ;;  %v12936_v26 = vld [vmem:[#allocation6 + $0x7f0] ss:$44 sps:$4 sm:$0xff]  }
  0xa4   :  { %4559 = vmatprep.subr.bf16.mxu0 %v12844_v28  ;;  %v12941_v27 = vld [vmem:[#allocation6 + $0x21c] ss:$44 sps:$4 sm:$0xff]  }
  0xa5   :  { %v12944_v28 = vld [vmem:[#allocation6 + $0x79c] ss:$44 sps:$4 sm:$0xff]  }
  0xa6   :  { %4378 = vmatmul.mubr.bf16.gmra.mxu0 %v12840_v29  ;;  %4491 = vmatmul.mubr.bf16.gmra.mxu1 %v12841_v30  ;;  %v12945_v29 = vld [vmem:[#allocation3 + $0x4c] ss:$28 sps:$4 sm:$0xff]   ;;  %v12939_v30 = vld [vmem:[#allocation6 + $0x218] ss:$44 sps:$4 sm:$0xff]  }
  0xa7   :  { %4560 = vmatpush1.bf16.msra.mxu0 %v12842_v31  ;;  %4387 = vmatprep.mubr.bf16.mxu0 %v12851_v33  ;;  %v12942_v31 = vld [vmem:[#allocation6 + $0x798] ss:$44 sps:$4 sm:$0xff]  }
  0xa8   :  { %4561 = vmatprep.subr.bf16.mxu0 %v12847_v32  ;;  %4500 = vmatprep.mubr.bf16.mxu1 %v12853_v34  ;;  %v12951_v32 = vld [vmem:[#allocation6 + $0x1c4] ss:$44 sps:$4 sm:$0xff]  }
  0xa9   :  { %4671 = vmatpush1.bf16.msra.mxu1 %v12878_v35  ;;  %v12954_v33 = vld [vmem:[#allocation6 + $0x744] ss:$44 sps:$4 sm:$0xff]  }
  0xaa   :  { %4672 = vmatprep.subr.bf16.mxu1 %v12895_v36  ;;  %v12947_v34 = vld [vmem:[#allocation3 + $0x48] ss:$28 sps:$4 sm:$0xff]   ;;  %v12948_v35 = vld [vmem:[#allocation3 + $0x50] ss:$28 sps:$4 sm:$0xff]  }
  0xab   :  { %4562 = vmatpush1.bf16.msra.mxu0 %v12845_v37  ;;  %v12949_v36 = vld [vmem:[#allocation6 + $0x1c0] ss:$44 sps:$4 sm:$0xff]  }
  0xac   :  { %4563 = vmatprep.subr.bf16.mxu0 %v12859_v39  ;;  %v12952_v37 = vld [vmem:[#allocation6 + $0x740] ss:$44 sps:$4 sm:$0xff]  }
  0xad   :  { %4673 = vmatpush1.bf16.msra.mxu1 %v12893_v41  ;;  %v12960_v39 = vld [vmem:[#allocation6 + $0x6ec] ss:$44 sps:$4 sm:$0xff]   ;;  %v12955_v41 = vld [vmem:[#allocation6 + $0x168] ss:$44 sps:$4 sm:$0xff]  }
  0xae   :  { %4388 = vmatmul.mubr.bf16.gmra.mxu0 %v12855_v38  ;;  %4501 = vmatmul.mubr.bf16.gmra.mxu1 %v12856_v40  ;;  %v12957_v38 = vld [vmem:[#allocation6 + $0x16c] ss:$44 sps:$4 sm:$0xff]   ;;  %v12961_v40 = vld [vmem:[#allocation3 + $0x84] ss:$28 sps:$4 sm:$0xff]  }
  0xaf   :  { %4564 = vmatpush1.bf16.msra.mxu0 %v12857_v42  ;;  %4397 = vmatprep.mubr.bf16.mxu0 %v12866_v44  ;;  %v12958_v42 = vld [vmem:[#allocation6 + $0x6e8] ss:$44 sps:$4 sm:$0xff]  }
  0xb0   :  { %4565 = vmatprep.subr.bf16.mxu0 %v12862_v43  ;;  %4510 = vmatprep.mubr.bf16.mxu1 %v12868_v45  ;;  %v12963_v43 = vld [vmem:[#allocation3 + $0x80] ss:$28 sps:$4 sm:$0xff]  }
  0xb1   :  { %4674 = vmatprep.subr.bf16.mxu1 %v12910_v46  ;;  %v12967_v44 = vld [vmem:[#allocation6 + $0x114] ss:$44 sps:$4 sm:$0xff]   ;;  %v12964_v46 = vld [vmem:[#allocation3 + $0x88] ss:$28 sps:$4 sm:$0xff]  }
  0xb2   :  { %4675 = vmatpush1.bf16.msra.mxu1 %v12908_v48  ;;  %v12970_v45 = vld [vmem:[#allocation6 + $0x694] ss:$44 sps:$4 sm:$0xff]   ;;  %v12968_v48 = vld [vmem:[#allocation6 + $0x690] ss:$44 sps:$4 sm:$0xff]  }
  0xb3   :  { %4566 = vmatpush1.bf16.msra.mxu0 %v12860_v47  ;;  %4676 = vmatprep.subr.bf16.mxu1 %v12922_v50  ;;  %v12965_v47 = vld [vmem:[#allocation6 + $0x110] ss:$44 sps:$4 sm:$0xff]  }
  0xb4   :  { %4567 = vmatprep.subr.bf16.mxu0 %v12874_v49  ;;  %v12973_v49 = vld [vmem:[#allocation6 + $0xbc] ss:$44 sps:$4 sm:$0xff]  }
  0xb5   :  { %v12976_v50 = vld [vmem:[#allocation6 + $0x63c] ss:$44 sps:$4 sm:$0xff]  }
  0xb6   :  { %4398 = vmatmul.mubr.bf16.gmra.mxu0 %v12870_v51  ;;  %4511 = vmatmul.mubr.bf16.gmra.mxu1 %v12871_v52  ;;  %v12977_v51 = vld [vmem:[#allocation3 + $0xbc] ss:$28 sps:$4 sm:$0xff]  }
  0xb7   :  { %4568 = vmatpush2.bf16.msra.mxu0 %v12872_v53  ;;  %4407 = vmatprep.mubr.bf16.mxu0 %v12881_v55  ;;  %v12971_v52 = vld [vmem:[#allocation6 + $0xb8] ss:$44 sps:$4 sm:$0xff]  }
  0xb8   :  { %4569 = vmatprep.subr.bf16.mxu0 %v12877_v54  ;;  %4520 = vmatprep.mubr.bf16.mxu1 %v12883_v56  ;;  %v12974_v53 = vld [vmem:[#allocation6 + $0x638] ss:$44 sps:$4 sm:$0xff]  }
  0xb9   :  { %4677 = vmatpush1.bf16.msra.mxu1 %v12920_v57  ;;  %v12979_v54 = vld [vmem:[#allocation3 + $0xb8] ss:$28 sps:$4 sm:$0xff]   ;;  %v12983_v55 = vld [vmem:[#allocation6 + $0x64] ss:$44 sps:$4 sm:$0xff]   ;;  %v12980_v57 = vld [vmem:[#allocation3 + $0xc0] ss:$28 sps:$4 sm:$0xff]  }
  0xba   :  { %4678 = vmatprep.subr.bf16.mxu1 %v12928_v58  ;;  %v12986_v56 = vld [vmem:[#allocation6 + $0x5e4] ss:$44 sps:$4 sm:$0xff]   ;;  %v12981_v58 = vld [vmem:[#allocation6 + $0x60] ss:$44 sps:$4 sm:$0xff]  }
  0xbb   :  { %4570 = vmatpush2.bf16.msra.mxu0 %v12875_v59  ;;  %v12984_v59 = vld [vmem:[#allocation6 + $0x5e0] ss:$44 sps:$4 sm:$0xff]  }
  0xbc   :  { %4571 = vmatprep.subr.bf16.mxu0 %v12889_v61  ;;  %v12992_v61 = vld [vmem:[#allocation6 + $0x58c] ss:$44 sps:$4 sm:$0xff]  }
  0xbd   :  { %4679 = vmatpush1.bf16.msra.mxu1 %v12926_v62  ;;  %v12993_v62 = vld [vmem:[#allocation3 + $0xf4] ss:$28 sps:$4 sm:$0xff]  }
  0xbe   :  { %4408 = vmatmul.mubr.bf16.gmra.mxu0 %v12885_v60  ;;  %4521 = vmatmul.mubr.bf16.gmra.mxu1 %v12886_v63  ;;  %v12989_v60 = vld [vmem:[#allocation6 + $0xc] ss:$44 sps:$4 sm:$0xff]   ;;  %v12987_v63 = vld [vmem:[#allocation6 + $0x8] ss:$44 sps:$4 sm:$0xff]  }
  0xbf   :  { %4572 = vmatpush2.bf16.msra.mxu0 %v12887_v0  ;;  %4417 = vmatprep.mubr.bf16.mxu0 %v12896_v2  ;;  %v12990_v0 = vld [vmem:[#allocation6 + $0x588] ss:$44 sps:$4 sm:$0xff]  }
  0xc0   :  { %4573 = vmatprep.subr.bf16.mxu0 %v12892_v1  ;;  %4530 = vmatprep.mubr.bf16.mxu1 %v12898_v4  ;;  %v12999_v1 = vld [vmem:[#allocation6 + $0x534] ss:$44 sps:$4 sm:$0xff]   ;;  %v12995_v4 = vld [vmem:[#allocation3 + $0xf0] ss:$28 sps:$4 sm:$0xff]  }
  0xc1   :  { %4890 = vmatprep.subr.bf16.mxu1 %v12938_v5  ;;  %v13002_v2 = vld [vmem:[#allocation6 + $0xab4] ss:$44 sps:$4 sm:$0xff]  }
  0xc2   :  { %v12996_v5 = vld [vmem:[#allocation3 + $0xf8] ss:$28 sps:$4 sm:$0xff]  }
  0xc3   :  { %4574 = vmatpush2.bf16.msra.mxu0 %v12890_v6  ;;  %v12997_v6 = vld [vmem:[#allocation6 + $0x530] ss:$44 sps:$4 sm:$0xff]  }
  0xc4   :  { %4575 = vmatprep.subr.bf16.mxu0 %v12904_v8  ;;  %v13005_v8 = vld [vmem:[#allocation6 + $0x4dc] ss:$44 sps:$4 sm:$0xff]  }
  0xc6   :  { %4418 = vmatmul.mubr.bf16.gmra.mxu0 %v12900_v7  ;;  %4531 = vmatmul.mubr.bf16.gmra.mxu1 %v12901_v9  ;;  %v13000_v7 = vld [vmem:[#allocation6 + $0xab0] ss:$44 sps:$4 sm:$0xff]  }
  0xc7   :  { %4576 = vmatpush2.bf16.msra.mxu0 %v12902_v10  ;;  %4427 = vmatprep.mubr.bf16.mxu0 %v12911_v12  ;;  %v13008_v9 = vld [vmem:[#allocation6 + $0xa5c] ss:$44 sps:$4 sm:$0xff]   ;;  %v13006_v12 = vld [vmem:[#allocation6 + $0xa58] ss:$44 sps:$4 sm:$0xff]  }
  0xc8   :  { %4577 = vmatprep.subr.bf16.mxu0 %v12907_v11  ;;  %4540 = vmatprep.mubr.bf16.mxu1 %v12913_v13  ;;  %v13009_v10 = vld [vmem:[#allocation3 + $0x12c] ss:$28 sps:$4 sm:$0xff]   ;;  %v13003_v11 = vld [vmem:[#allocation6 + $0x4d8] ss:$44 sps:$4 sm:$0xff]  }
  0xc9   :  { %v13015_v13 = vld [vmem:[#allocation6 + $0x484] ss:$44 sps:$4 sm:$0xff]  }
  0xcb   :  { %4578 = vmatpush2.bf16.msra.mxu0 %v12905_v14  ;;  %v13018_v14 = vld [vmem:[#allocation6 + $0xa04] ss:$44 sps:$4 sm:$0xff]  }
  0xcc   :  { %4579 = vmatprep.subr.bf16.mxu0 %v12919_v15  ;;  %v13011_v15 = vld [vmem:[#allocation3 + $0x128] ss:$28 sps:$4 sm:$0xff]  }
  0xce   :  { %4428 = vmatmul.mubr.bf16.gmra.mxu0 %v12915_v16  ;;  %4541 = vmatmul.mubr.bf16.gmra.mxu1 %v12916_v17  ;;  %v13012_v16 = vld [vmem:[#allocation3 + $0x130] ss:$28 sps:$4 sm:$0xff]  }
  0xcf   :  { %4580 = vmatpush2.bf16.msra.mxu0 %v12917_v18  ;;  %4583 = vmatprep.mubr.bf16.mxu0 %v12929_v19  ;;  %v13013_v17 = vld [vmem:[#allocation6 + $0x480] ss:$44 sps:$4 sm:$0xff]  }
  0xd0   :  { %4581 = vmatprep.subr.bf16.mxu0 %v12925_v20  ;;  %4696 = vmatprep.mubr.bf16.mxu1 %v16667_v3  ;;  %v13016_v18 = vld [vmem:[#allocation6 + $0xa00] ss:$44 sps:$4 sm:$0xff]  }
  0xd1   :  { %v13021_v19 = vld [vmem:[#allocation6 + $0x42c] ss:$44 sps:$4 sm:$0xff]  }
  0xd2   :  { %v13024_v20 = vld [vmem:[#allocation6 + $0x9ac] ss:$44 sps:$4 sm:$0xff]  }
  0xd3   :  { %4582 = vmatpush2.bf16.msra.mxu0 %v12923_v21  ;;  %v13025_v21 = vld [vmem:[#allocation3 + $0x164] ss:$28 sps:$4 sm:$0xff]  }
  0xd4   :  { %4777 = vmatprep.subr.bf16.mxu0 %v12935_v22  ;;  %v13019_v22 = vld [vmem:[#allocation6 + $0x428] ss:$44 sps:$4 sm:$0xff]  }
  0xd6   :  { %4584 = vmatmul.mubr.bf16.vlgmr.msra.gmra.mxu0 %v12931_v23  ;;  %4697 = vmatmul.mubr.bf16.vlgmr.msra.gmra.mxu1 %v12932_v24  ;;  %v13022_v23 = vld [vmem:[#allocation6 + $0x9a8] ss:$44 sps:$4 sm:$0xff]  }
  0xd7   :  { %4778 = vmatpush1.bf16.msra.mxu0 %v12933_v25  ;;  %4891 = vmatpush1.bf16.msra.mxu1 %v12936_v26  ;;  %v13031_v24 = vld [vmem:[#allocation6 + $0x3d4] ss:$44 sps:$4 sm:$0xff]  }
  0xd8   :  { %4779 = vmatprep.subr.bf16.mxu0 %v12941_v27  ;;  %4892 = vmatprep.subr.bf16.mxu1 %v12944_v28  ;;  %v13034_v25 = vld [vmem:[#allocation6 + $0x954] ss:$44 sps:$4 sm:$0xff]   ;;  %v13028_v27 = vld [vmem:[#allocation3 + $0x168] ss:$28 sps:$4 sm:$0xff]   ;;  %v13029_v28 = vld [vmem:[#allocation6 + $0x3d0] ss:$44 sps:$4 sm:$0xff]  }
  0xd9   :  { %4593 = vmatprep.mubr.bf16.mxu0 %v12945_v29  ;;  %4706 = vmatprep.mubr.bf16.mxu1 %v16667_v3  ;;  %v13027_v26 = vld [vmem:[#allocation3 + $0x160] ss:$28 sps:$4 sm:$0xff]  }
  0xda   :  { %v13032_v29 = vld [vmem:[#allocation6 + $0x950] ss:$44 sps:$4 sm:$0xff]  }
  0xdb   :  { %4780 = vmatpush1.bf16.msra.mxu0 %v12939_v30  ;;  %4893 = vmatpush1.bf16.msra.mxu1 %v12942_v31  ;;  %v13037_v30 = vld [vmem:[#allocation6 + $0x37c] ss:$44 sps:$4 sm:$0xff]  }
  0xdc   :  { %4781 = vmatprep.subr.bf16.mxu0 %v12951_v32  ;;  %4894 = vmatprep.subr.bf16.mxu1 %v12954_v33  ;;  %v13040_v31 = vld [vmem:[#allocation6 + $0x8fc] ss:$44 sps:$4 sm:$0xff]   ;;  %v13035_v33 = vld [vmem:[#allocation6 + $0x378] ss:$44 sps:$4 sm:$0xff]  }
  0xdd   :  { %v13041_v32 = vld [vmem:[#allocation3 + $0x19c] ss:$28 sps:$4 sm:$0xff]  }
  0xde   :  { %4594 = vmatmul.mubr.bf16.gmra.mxu0 %v12947_v34  ;;  %4707 = vmatmul.mubr.bf16.gmra.mxu1 %v12948_v35  ;;  %v13038_v34 = vld [vmem:[#allocation6 + $0x8f8] ss:$44 sps:$4 sm:$0xff]  }
  0xdf   :  { %4782 = vmatpush1.bf16.msra.mxu0 %v12949_v36  ;;  %4895 = vmatpush1.bf16.msra.mxu1 %v12952_v37  ;;  %v13047_v35 = vld [vmem:[#allocation6 + $0x324] ss:$44 sps:$4 sm:$0xff]   ;;  %v13043_v37 = vld [vmem:[#allocation3 + $0x198] ss:$28 sps:$4 sm:$0xff]  }
  0xe0   :  { %4783 = vmatprep.subr.bf16.mxu0 %v12957_v38  ;;  %4896 = vmatprep.subr.bf16.mxu1 %v12960_v39  ;;  %v13050_v36 = vld [vmem:[#allocation6 + $0x8a4] ss:$44 sps:$4 sm:$0xff]   ;;  %v13044_v38 = vld [vmem:[#allocation3 + $0x1a0] ss:$28 sps:$4 sm:$0xff]  }
  0xe1   :  { %4603 = vmatprep.mubr.bf16.mxu0 %v12961_v40  ;;  %4716 = vmatprep.mubr.bf16.mxu1 %v16667_v3  ;;  %v13045_v39 = vld [vmem:[#allocation6 + $0x320] ss:$44 sps:$4 sm:$0xff]  }
  0xe2   :  { %v13048_v40 = vld [vmem:[#allocation6 + $0x8a0] ss:$44 sps:$4 sm:$0xff]  }
  0xe3   :  { %4784 = vmatpush1.bf16.msra.mxu0 %v12955_v41  ;;  %4897 = vmatpush1.bf16.msra.mxu1 %v12958_v42  ;;  %v13053_v41 = vld [vmem:[#allocation6 + $0x2cc] ss:$44 sps:$4 sm:$0xff]  }
  0xe4   :  { %4785 = vmatprep.subr.bf16.mxu0 %v12967_v44  ;;  %4898 = vmatprep.subr.bf16.mxu1 %v12970_v45  ;;  %v13056_v42 = vld [vmem:[#allocation6 + $0x84c] ss:$44 sps:$4 sm:$0xff]   ;;  %v13054_v44 = vld [vmem:[#allocation6 + $0x848] ss:$44 sps:$4 sm:$0xff]  }
  0xe5   :  { %v13059_v45 = vld [vmem:[#allocation6 + $0xd74] ss:$44 sps:$4 sm:$0xff]  }
  0xe6   :  { %4604 = vmatmul.mubr.bf16.gmra.mxu0 %v12963_v43  ;;  %4717 = vmatmul.mubr.bf16.gmra.mxu1 %v12964_v46  ;;  %v13051_v43 = vld [vmem:[#allocation6 + $0x2c8] ss:$44 sps:$4 sm:$0xff]  }
  0xe7   :  { %4786 = vmatpush1.bf16.msra.mxu0 %v12965_v47  ;;  %4899 = vmatpush1.bf16.msra.mxu1 %v12968_v48  ;;  %v13071_v46 = vld [vmem:[#allocation6 + $0x12f4] ss:$44 sps:$4 sm:$0xff]   ;;  %v14106_v48 = vld [vmem:[#allocation3 + $0xc] ss:$28 sps:$4 sm:$0xff]  }
  0xe8   :  { %4787 = vmatprep.subr.bf16.mxu0 %v12973_v49  ;;  %4900 = vmatprep.subr.bf16.mxu1 %v12976_v50  ;;  %v14105_v47 = vld [vmem:[#allocation3 + $0x4] ss:$28 sps:$4 sm:$0xff]   ;;  %v13057_v49 = vld [vmem:[#allocation6 + $0xd70] ss:$44 sps:$4 sm:$0xff]  }
  0xe9   :  { %4613 = vmatprep.mubr.bf16.mxu0 %v12977_v51  ;;  %4726 = vmatprep.mubr.bf16.mxu1 %v16667_v3  ;;  %v13062_v50 = vld [vmem:[#allocation6 + $0xd1c] ss:$44 sps:$4 sm:$0xff]  }
  0xea   :  { %v13069_v51 = vld [vmem:[#allocation6 + $0x12f0] ss:$44 sps:$4 sm:$0xff]  }
  0xeb   :  { %4788 = vmatpush1.bf16.msra.mxu0 %v12971_v52  ;;  %4901 = vmatpush1.bf16.msra.mxu1 %v12974_v53  ;;  %v14107_v52 = vld [vmem:[#allocation3] ss:$28 sps:$4 sm:$0xff]   ;;  %v14108_v53 = vld [vmem:[#allocation3 + $0x8] ss:$28 sps:$4 sm:$0xff]  }
  0xec   :  { %4789 = vmatprep.subr.bf16.mxu0 %v12983_v55  ;;  %4902 = vmatprep.subr.bf16.mxu1 %v12986_v56  ;;  %v13060_v55 = vld [vmem:[#allocation6 + $0xd18] ss:$44 sps:$4 sm:$0xff]  }
  0xed   :  { %v14109_v56 = vld [vmem:[#allocation3 + $0x3c] ss:$28 sps:$4 sm:$0xff]  }
  0xee   :  { %4614 = vmatmul.mubr.bf16.gmra.mxu0 %v12979_v54  ;;  %4727 = vmatmul.mubr.bf16.gmra.mxu1 %v12980_v57  ;;  %v13080_v54 = vld [vmem:[#allocation6 + $0x129c] ss:$44 sps:$4 sm:$0xff]   ;;  %v14110_v57 = vld [vmem:[#allocation3 + $0x44] ss:$28 sps:$4 sm:$0xff]  }
  0xef   :  { %4790 = vmatpush1.bf16.msra.mxu0 %v12981_v58  ;;  %4903 = vmatpush1.bf16.msra.mxu1 %v12984_v59  ;;  %v13065_v58 = vld [vmem:[#allocation6 + $0xcc4] ss:$44 sps:$4 sm:$0xff]  }
  0xf0   :  { %4791 = vmatprep.subr.bf16.mxu0 %v12989_v60  ;;  %4904 = vmatprep.subr.bf16.mxu1 %v12992_v61  ;;  %v13078_v59 = vld [vmem:[#allocation6 + $0x1298] ss:$44 sps:$4 sm:$0xff]   ;;  %v13063_v60 = vld [vmem:[#allocation6 + $0xcc0] ss:$44 sps:$4 sm:$0xff]  }
  0xf1   :  { %4623 = vmatprep.mubr.bf16.mxu0 %v12993_v62  ;;  %4736 = vmatprep.mubr.bf16.mxu1 %v16667_v3  ;;  %v13068_v61 = vld [vmem:[#allocation6 + $0xc6c] ss:$44 sps:$4 sm:$0xff]   ;;  %v13066_v62 = vld [vmem:[#allocation6 + $0xc68] ss:$44 sps:$4 sm:$0xff]  }
  0xf3   :  { %4792 = vmatpush1.bf16.msra.mxu0 %v12987_v63  ;;  %4905 = vmatpush1.bf16.msra.mxu1 %v12990_v0  ;;  %v13089_v63 = vld [vmem:[#allocation6 + $0x1244] ss:$44 sps:$4 sm:$0xff]   ;;  %v14111_v0 = vld [vmem:[#allocation3 + $0x38] ss:$28 sps:$4 sm:$0xff]  }
  0xf4   :  { %4793 = vmatprep.subr.bf16.mxu0 %v12999_v1  ;;  %4906 = vmatprep.subr.bf16.mxu1 %v13002_v2  ;;  %v14112_v1 = vld [vmem:[#allocation3 + $0x40] ss:$28 sps:$4 sm:$0xff]  }
  0xf5   :  { %v13087_v2 = vld [vmem:[#allocation6 + $0x1240] ss:$44 sps:$4 sm:$0xff]  }
  0xf6   :  { %4624 = vmatmul.mubr.bf16.gmra.mxu0 %v12995_v4  ;;  %4737 = vmatmul.mubr.bf16.gmra.mxu1 %v12996_v5  ;;  %v14113_v4 = vld [vmem:[#allocation3 + $0x74] ss:$28 sps:$4 sm:$0xff]   ;;  %v13098_v5 = vld [vmem:[#allocation6 + $0x11ec] ss:$44 sps:$4 sm:$0xff]  }
  0xf7   :  { %4794 = vmatpush2.bf16.msra.mxu0 %v12997_v6  ;;  %4907 = vmatpush2.bf16.msra.mxu1 %v13000_v7  ;;  %v14114_v6 = vld [vmem:[#allocation3 + $0x7c] ss:$28 sps:$4 sm:$0xff]   ;;  %v13074_v7 = vld [vmem:[#allocation6 + $0xc14] ss:$44 sps:$4 sm:$0xff]  }
  0xf8   :  { %4795 = vmatprep.subr.bf16.mxu0 %v13005_v8  ;;  %4908 = vmatprep.subr.bf16.mxu1 %v13008_v9  ;;  %v13072_v8 = vld [vmem:[#allocation6 + $0xc10] ss:$44 sps:$4 sm:$0xff]  }
  0xf9   :  { %4633 = vmatprep.mubr.bf16.mxu0 %v13009_v10  ;;  %4746 = vmatprep.mubr.bf16.mxu1 %v16667_v3  ;;  %v13077_v9 = vld [vmem:[#allocation6 + $0xbbc] ss:$44 sps:$4 sm:$0xff]  }
  0xfa   :  { %v13096_v10 = vld [vmem:[#allocation6 + $0x11e8] ss:$44 sps:$4 sm:$0xff]  }
  0xfb   :  { %4796 = vmatpush2.bf16.msra.mxu0 %v13003_v11  ;;  %4909 = vmatpush2.bf16.msra.mxu1 %v13006_v12  ;;  %v14115_v11 = vld [vmem:[#allocation3 + $0x70] ss:$28 sps:$4 sm:$0xff]   ;;  %v14116_v12 = vld [vmem:[#allocation3 + $0x78] ss:$28 sps:$4 sm:$0xff]  }
  0xfc   :  { %4797 = vmatprep.subr.bf16.mxu0 %v13015_v13  ;;  %4910 = vmatprep.subr.bf16.mxu1 %v13018_v14  ;;  %v13107_v13 = vld [vmem:[#allocation6 + $0x1194] ss:$44 sps:$4 sm:$0xff]   ;;  %v13075_v14 = vld [vmem:[#allocation6 + $0xbb8] ss:$44 sps:$4 sm:$0xff]  }
  0xfe   :  { %4634 = vmatmul.mubr.bf16.gmra.mxu0 %v13011_v15  ;;  %4747 = vmatmul.mubr.bf16.gmra.mxu1 %v13012_v16  ;;  %v14117_v15 = vld [vmem:[#allocation3 + $0xac] ss:$28 sps:$4 sm:$0xff]   ;;  %v14118_v16 = vld [vmem:[#allocation3 + $0xb4] ss:$28 sps:$4 sm:$0xff]  }
  0xff   :  { %4798 = vmatpush2.bf16.msra.mxu0 %v13013_v17  ;;  %4911 = vmatpush2.bf16.msra.mxu1 %v13016_v18  ;;  %v13083_v17 = vld [vmem:[#allocation6 + $0xb64] ss:$44 sps:$4 sm:$0xff]  }
 0x100   :  { %4799 = vmatprep.subr.bf16.mxu0 %v13021_v19  ;;  %4912 = vmatprep.subr.bf16.mxu1 %v13024_v20  ;;  %v13105_v18 = vld [vmem:[#allocation6 + $0x1190] ss:$44 sps:$4 sm:$0xff]   ;;  %v13081_v19 = vld [vmem:[#allocation6 + $0xb60] ss:$44 sps:$4 sm:$0xff]  }
 0x101   :  { %4643 = vmatprep.mubr.bf16.mxu0 %v13025_v21  ;;  %4756 = vmatprep.mubr.bf16.mxu1 %v16667_v3  ;;  %v13086_v20 = vld [vmem:[#allocation6 + $0xb0c] ss:$44 sps:$4 sm:$0xff]   ;;  %v13084_v21 = vld [vmem:[#allocation6 + $0xb08] ss:$44 sps:$4 sm:$0xff]  }
 0x103   :  { %4800 = vmatpush2.bf16.msra.mxu0 %v13019_v22  ;;  %4913 = vmatpush2.bf16.msra.mxu1 %v13022_v23  ;;  %v13116_v22 = vld [vmem:[#allocation6 + $0x113c] ss:$44 sps:$4 sm:$0xff]  }
 0x104   :  { %4801 = vmatprep.subr.bf16.mxu0 %v13031_v24  ;;  %4914 = vmatprep.subr.bf16.mxu1 %v13034_v25  ;;  %v14119_v23 = vld [vmem:[#allocation3 + $0xa8] ss:$28 sps:$4 sm:$0xff]   ;;  %v14120_v24 = vld [vmem:[#allocation3 + $0xb0] ss:$28 sps:$4 sm:$0xff]  }
 0x105   :  { %v13114_v25 = vld [vmem:[#allocation6 + $0x1138] ss:$44 sps:$4 sm:$0xff]  }
 0x106   :  { %4644 = vmatmul.mubr.bf16.gmra.mxu0 %v13027_v26  ;;  %4757 = vmatmul.mubr.bf16.gmra.mxu1 %v13028_v27  ;;  %v14121_v26 = vld [vmem:[#allocation3 + $0xe4] ss:$28 sps:$4 sm:$0xff]  }
 0x107   :  { %4802 = vmatpush2.bf16.msra.mxu0 %v13029_v28  ;;  %4915 = vmatpush2.bf16.msra.mxu1 %v13032_v29  ;;  %v13122_v27 = vld [vmem:[#allocation6 + $0x10e4] ss:$44 sps:$4 sm:$0xff]   ;;  %v14122_v28 = vld [vmem:[#allocation3 + $0xec] ss:$28 sps:$4 sm:$0xff]   ;;  %v13092_v29 = vld [vmem:[#allocation6 + $0x1034] ss:$44 sps:$4 sm:$0xff]  }
 0x108   :  { %4803 = vmatprep.subr.bf16.mxu0 %v13037_v30  ;;  %4916 = vmatprep.subr.bf16.mxu1 %v13040_v31  ;;  %v13090_v30 = vld [vmem:[#allocation6 + $0x1030] ss:$44 sps:$4 sm:$0xff]  }
 0x109   :  { %4653 = vmatprep.mubr.bf16.mxu0 %v13041_v32  ;;  %4766 = vmatprep.mubr.bf16.mxu1 %v16667_v3  ;;  %v13095_v31 = vld [vmem:[#allocation6 + $0xfdc] ss:$44 sps:$4 sm:$0xff]   ;;  %v13120_v32 = vld [vmem:[#allocation6 + $0x10e0] ss:$44 sps:$4 sm:$0xff]  }
 0x10b   :  { %4804 = vmatpush2.bf16.msra.mxu0 %v13035_v33  ;;  %4917 = vmatpush2.bf16.msra.mxu1 %v13038_v34  ;;  %v14123_v33 = vld [vmem:[#allocation3 + $0xe0] ss:$28 sps:$4 sm:$0xff]   ;;  %v14124_v34 = vld [vmem:[#allocation3 + $0xe8] ss:$28 sps:$4 sm:$0xff]  }
 0x10c   :  { %4805 = vmatprep.subr.bf16.mxu0 %v13047_v35  ;;  %4918 = vmatprep.subr.bf16.mxu1 %v13050_v36  ;;  %v13128_v35 = vld [vmem:[#allocation6 + $0x108c] ss:$44 sps:$4 sm:$0xff]  }
 0x10d   :  { %v13093_v36 = vld [vmem:[#allocation6 + $0xfd8] ss:$44 sps:$4 sm:$0xff]  }
 0x10e   :  { %4654 = vmatmul.mubr.bf16.gmra.mxu0 %v13043_v37  ;;  %4767 = vmatmul.mubr.bf16.gmra.mxu1 %v13044_v38  ;;  %v14125_v37 = vld [vmem:[#allocation3 + $0x11c] ss:$28 sps:$4 sm:$0xff]   ;;  %v14126_v38 = vld [vmem:[#allocation3 + $0x124] ss:$28 sps:$4 sm:$0xff]  }
 0x10f   :  { %4806 = vmatpush2.bf16.msra.mxu0 %v13045_v39  ;;  %4919 = vmatpush2.bf16.msra.mxu1 %v13048_v40  ;;  %v13101_v39 = vld [vmem:[#allocation6 + $0xf84] ss:$44 sps:$4 sm:$0xff]   ;;  %v13126_v40 = vld [vmem:[#allocation6 + $0x1088] ss:$44 sps:$4 sm:$0xff]  }
 0x110   :  { %4807 = vmatprep.subr.bf16.mxu0 %v13053_v41  ;;  %4920 = vmatprep.subr.bf16.mxu1 %v13056_v42  ;;  %v13099_v41 = vld [vmem:[#allocation6 + $0xf80] ss:$44 sps:$4 sm:$0xff]  }
 0x111   :  { %4809 = vmatprep.mubr.bf16.mxu0 %v14105_v47  ;;  %4922 = vmatprep.mubr.bf16.mxu1 %v14106_v48  ;;  %v13104_v42 = vld [vmem:[#allocation6 + $0xf2c] ss:$44 sps:$4 sm:$0xff]   ;;  %v14129_v47 = vld [vmem:[#allocation3 + $0x154] ss:$28 sps:$4 sm:$0xff]  }
 0x112   :  { %v14130_v48 = vld [vmem:[#allocation3 + $0x15c] ss:$28 sps:$4 sm:$0xff]  }
 0x113   :  { %4808 = vmatpush2.bf16.msra.mxu0 %v13051_v43  ;;  %4921 = vmatpush2.bf16.msra.mxu1 %v13054_v44  ;;  %v13134_v43 = vld [vmem:[#allocation6 + $0x7fc] ss:$44 sps:$4 sm:$0xff]   ;;  %v14127_v44 = vld [vmem:[#allocation3 + $0x118] ss:$28 sps:$4 sm:$0xff]  }
 0x114   :  { %5003 = vmatprep.subr.bf16.mxu0 %v13059_v45  ;;  %5116 = vmatprep.subr.bf16.mxu1 %v13071_v46  ;;  %v14128_v45 = vld [vmem:[#allocation3 + $0x120] ss:$28 sps:$4 sm:$0xff]   ;;  %v13102_v46 = vld [vmem:[#allocation6 + $0xf28] ss:$44 sps:$4 sm:$0xff]  }
 0x116   :  { %4810 = vmatmul.mubr.bf16.vlgmr.msra.gmra.mxu0 %v14107_v52  ;;  %4923 = vmatmul.mubr.bf16.vlgmr.msra.gmra.mxu1 %v14108_v53  ;;  %v14131_v52 = vld [vmem:[#allocation3 + $0x150] ss:$28 sps:$4 sm:$0xff]   ;;  %v14132_v53 = vld [vmem:[#allocation3 + $0x158] ss:$28 sps:$4 sm:$0xff]  }
 0x117   :  { %5004 = vmatpush1.bf16.msra.mxu0 %v13057_v49  ;;  %4819 = vmatprep.mubr.bf16.mxu0 %v14109_v56  ;;  %v13110_v49 = vld [vmem:[#allocation6 + $0xed4] ss:$44 sps:$4 sm:$0xff]   ;;  %v846_v56 = vlaneseq }
 0x118   :  { %5005 = vmatprep.subr.bf16.mxu0 %v13062_v50  ;;  %4932 = vmatprep.mubr.bf16.mxu1 %v14110_v57  ;;  %v13108_v50 = vld [vmem:[#allocation6 + $0xed0] ss:$44 sps:$4 sm:$0xff]  }
 0x119   :  { %5117 = vmatpush1.bf16.msra.mxu1 %v13069_v51  ;;  %v13113_v51 = vld [vmem:[#allocation6 + $0xe7c] ss:$44 sps:$4 sm:$0xff]   ;;  %v14134_v57 = vld [vmem:[#allocation3 + $0x194] ss:$28 sps:$4 sm:$0xff]  }
 0x11a   :  { %5118 = vmatprep.subr.bf16.mxu1 %v13080_v54  ;;  %v13111_v54 = vld [vmem:[#allocation6 + $0xe78] ss:$44 sps:$4 sm:$0xff]  }
 0x11b   :  { %5006 = vmatpush1.bf16.msra.mxu0 %v13060_v55  ;;  %v14133_v55 = vld [vmem:[#allocation3 + $0x18c] ss:$28 sps:$4 sm:$0xff]  }
 0x11c   :  { %5007 = vmatprep.subr.bf16.mxu0 %v13065_v58  ;;  %v13119_v58 = vld [vmem:[#allocation6 + $0xe24] ss:$44 sps:$4 sm:$0xff]  }
 0x11d   :  { %5119 = vmatpush1.bf16.msra.mxu1 %v13078_v59  ;;  %v13117_v59 = vld [vmem:[#allocation6 + $0xe20] ss:$44 sps:$4 sm:$0xff]  }
 0x11e   :  { %4820 = vmatmul.mubr.bf16.gmra.mxu0 %v14111_v0  ;;  %4933 = vmatmul.mubr.bf16.gmra.mxu1 %v14112_v1  ;;  %v13123_v0 = vld [vmem:[#allocation6 + $0xdc8] ss:$44 sps:$4 sm:$0xff]  }
 0x11f   :  { %5008 = vmatpush1.bf16.msra.mxu0 %v13063_v60  ;;  %4829 = vmatprep.mubr.bf16.mxu0 %v14113_v4  ;;  %v14620_v60 = vshrl.u32 %v846_v56, 7  ;;  %v14137_v1 = vld [vmem:[#allocation3 + $0x14] ss:$28 sps:$4 sm:$0xff]   ;;  %v842_v4 = vld [vmem:[#allocation8] sm:$0xff] }
 0x120   :  { %5009 = vmatprep.subr.bf16.mxu0 %v13068_v61  ;;  %4942 = vmatprep.mubr.bf16.mxu1 %v14114_v6  ;;  %v13125_v61 = vld [vmem:[#allocation6 + $0xdcc] ss:$44 sps:$4 sm:$0xff]  }
 0x121   :  { %5120 = vmatprep.subr.bf16.mxu1 %v13089_v63  ;;  %v14136_v63 = vld [vmem:[#allocation3 + $0x190] ss:$28 sps:$4 sm:$0xff]   ;;  %v14627_v6 = vsub.s32 1, %v14620_v60  ;;  %v13153_v56 = vld [vmem:[#allocation6 + $0x118] ss:$44 sps:$4 sm:$0xff]  }
 0x122   :  { %5121 = vmatpush1.bf16.msra.mxu1 %v13087_v2  ;;  %v14623_v2 = vsub.s32 0, %v14620_v60 }
 0x123   :  { %5010 = vmatpush1.bf16.msra.mxu0 %v13066_v62  ;;  %5122 = vmatprep.subr.bf16.mxu1 %v13098_v5  ;;  %v14135_v62 = vld [vmem:[#allocation3 + $0x188] ss:$28 sps:$4 sm:$0xff]   ;;  %16754 = vst [vmem:[#allocation21_spill] sm:$0xff] %v14627_v6 }
 0x124   :  { %5011 = vmatprep.subr.bf16.mxu0 %v13074_v7  ;;  %16753 = vst [vmem:[#allocation20_spill] sm:$0xff] %v14623_v2  ;;  %v13131_v5 = vld [vmem:[#allocation6 + $0x27c] ss:$44 sps:$4 sm:$0xff]   ;;  %v13129_v7 = vld [vmem:[#allocation6 + $0x278] ss:$44 sps:$4 sm:$0xff]  }
 0x126   :  { %4830 = vmatmul.mubr.bf16.gmra.mxu0 %v14115_v11  ;;  %4943 = vmatmul.mubr.bf16.gmra.mxu1 %v14116_v12  ;;  %v13140_v11 = vld [vmem:[#allocation6 + $0x7a4] ss:$44 sps:$4 sm:$0xff]   ;;  %v14633_v12 = vrot.slane %v842_v4, %v14627_v6 }
 0x127   :  { %5012 = vmatpush1.bf16.msra.mxu0 %v13072_v8  ;;  %4839 = vmatprep.mubr.bf16.mxu0 %v14117_v15  ;;  %v14630_v8 = vrot.slane %v842_v4, %v14623_v2  ;;  %v14139_v15 = vld [vmem:[#allocation3 + $0x18] ss:$28 sps:$4 sm:$0xff]  }
 0x128   :  { %5013 = vmatprep.subr.bf16.mxu0 %v13077_v9  ;;  %4952 = vmatprep.mubr.bf16.mxu1 %v14118_v16  ;;  %v13132_v9 = vld [vmem:[#allocation6 + $0x7f8] ss:$44 sps:$4 sm:$0xff]  }
 0x129   :  { %5123 = vmatpush1.bf16.msra.mxu1 %v13096_v10  ;;  %v13137_v10 = vld [vmem:[#allocation6 + $0x224] ss:$44 sps:$4 sm:$0xff]  }
 0x12a   :  { %5124 = vmatprep.subr.bf16.mxu1 %v13107_v13 }
 0x12b   :  { %5014 = vmatpush1.bf16.msra.mxu0 %v13075_v14  ;;  %v14138_v14 = vld [vmem:[#allocation3 + $0x10] ss:$28 sps:$4 sm:$0xff]  }
 0x12c   :  { %5015 = vmatprep.subr.bf16.mxu0 %v13083_v17  ;;  %v13135_v17 = vld [vmem:[#allocation6 + $0x220] ss:$44 sps:$4 sm:$0xff]  }
 0x12d   :  { %5125 = vmatpush1.bf16.msra.mxu1 %v13105_v18 }
 0x12e   :  { %4840 = vmatmul.mubr.bf16.gmra.mxu0 %v14119_v23  ;;  %4953 = vmatmul.mubr.bf16.gmra.mxu1 %v14120_v24  ;;  %v13146_v23 = vld [vmem:[#allocation6 + $0x74c] ss:$44 sps:$4 sm:$0xff]  }
 0x12f   :  { %5016 = vmatpush1.bf16.msra.mxu0 %v13081_v19  ;;  %4849 = vmatprep.mubr.bf16.mxu0 %v14121_v26  ;;  %v13138_v19 = vld [vmem:[#allocation6 + $0x7a0] ss:$44 sps:$4 sm:$0xff]  }
 0x130   :  { %5017 = vmatprep.subr.bf16.mxu0 %v13086_v20  ;;  %4962 = vmatprep.mubr.bf16.mxu1 %v14122_v28  ;;  %v14140_v26 = vld [vmem:[#allocation3 + $0x4c] ss:$28 sps:$4 sm:$0xff]  }
 0x131   :  { %5126 = vmatprep.subr.bf16.mxu1 %v13116_v22  ;;  %v13143_v22 = vld [vmem:[#allocation6 + $0x1cc] ss:$44 sps:$4 sm:$0xff]  }
 0x132   :  { %5127 = vmatpush1.bf16.msra.mxu1 %v13114_v25 }
 0x133   :  { %5018 = vmatpush1.bf16.msra.mxu0 %v13084_v21  ;;  %5128 = vmatprep.subr.bf16.mxu1 %v13122_v27 }
 0x134   :  { %5019 = vmatprep.subr.bf16.mxu0 %v13092_v29  ;;  %v13141_v29 = vld [vmem:[#allocation6 + $0x1c8] ss:$44 sps:$4 sm:$0xff]  }
 0x136   :  { %4850 = vmatmul.mubr.bf16.gmra.mxu0 %v14123_v33  ;;  %4963 = vmatmul.mubr.bf16.gmra.mxu1 %v14124_v34 }
 0x137   :  { %5020 = vmatpush2.bf16.msra.mxu0 %v13090_v30  ;;  %4859 = vmatprep.mubr.bf16.mxu0 %v14125_v37 }
 0x138   :  { %5021 = vmatprep.subr.bf16.mxu0 %v13095_v31  ;;  %4972 = vmatprep.mubr.bf16.mxu1 %v14126_v38 }
 0x139   :  { %5129 = vmatpush1.bf16.msra.mxu1 %v13120_v32  ;;  %v13144_v32 = vld [vmem:[#allocation6 + $0x748] ss:$44 sps:$4 sm:$0xff]  }
 0x13a   :  { %5130 = vmatprep.subr.bf16.mxu1 %v13128_v35  ;;  %v13149_v35 = vld [vmem:[#allocation6 + $0x174] ss:$44 sps:$4 sm:$0xff]  }
 0x13b   :  { %5022 = vmatpush2.bf16.msra.mxu0 %v13093_v36  ;;  %v13152_v36 = vld [vmem:[#allocation6 + $0x6f4] ss:$44 sps:$4 sm:$0xff]  }
 0x13c   :  { %5023 = vmatprep.subr.bf16.mxu0 %v13101_v39 }
 0x13d   :  { %5131 = vmatpush1.bf16.msra.mxu1 %v13126_v40  ;;  %v14141_v40 = vld [vmem:[#allocation3 + $0x48] ss:$28 sps:$4 sm:$0xff]  }
 0x13e   :  { %4860 = vmatmul.mubr.bf16.gmra.mxu0 %v14127_v44  ;;  %4973 = vmatmul.mubr.bf16.gmra.mxu1 %v14128_v45 }
 0x13f   :  { %5024 = vmatpush2.bf16.msra.mxu0 %v13099_v41  ;;  %4869 = vmatprep.mubr.bf16.mxu0 %v14129_v47  ;;  %v14142_v41 = vld [vmem:[#allocation3 + $0x50] ss:$28 sps:$4 sm:$0xff]  }
 0x140   :  { %5025 = vmatprep.subr.bf16.mxu0 %v13104_v42  ;;  %4982 = vmatprep.mubr.bf16.mxu1 %v14130_v48 }
 0x141   :  { %5342 = vmatprep.subr.bf16.mxu1 %v13134_v43  ;;  %v13147_v43 = vld [vmem:[#allocation6 + $0x170] ss:$44 sps:$4 sm:$0xff]  }
 0x143   :  { %5026 = vmatpush2.bf16.msra.mxu0 %v13102_v46  ;;  %v13150_v46 = vld [vmem:[#allocation6 + $0x6f0] ss:$44 sps:$4 sm:$0xff]  }
 0x144   :  { %5027 = vmatprep.subr.bf16.mxu0 %v13110_v49  ;;  %v13155_v49 = vld [vmem:[#allocation6 + $0x11c] ss:$44 sps:$4 sm:$0xff]  }
 0x146   :  { %4870 = vmatmul.mubr.bf16.gmra.mxu0 %v14131_v52  ;;  %4983 = vmatmul.mubr.bf16.gmra.mxu1 %v14132_v53  ;;  %v14143_v53 = vld [vmem:[#allocation3 + $0x84] ss:$28 sps:$4 sm:$0xff]  }
 0x147   :  { %5028 = vmatpush2.bf16.msra.mxu0 %v13108_v50  ;;  %4879 = vmatprep.mubr.bf16.mxu0 %v14133_v55  ;;  %v13158_v50 = vld [vmem:[#allocation6 + $0x69c] ss:$44 sps:$4 sm:$0xff]  }
 0x148   :  { %5029 = vmatprep.subr.bf16.mxu0 %v13113_v51  ;;  %4992 = vmatprep.mubr.bf16.mxu1 %v14134_v57 }
 0x14b   :  { %5030 = vmatpush2.bf16.msra.mxu0 %v13111_v54 }
 0x14c   :  { %5031 = vmatprep.subr.bf16.mxu0 %v13119_v58 }
 0x14e   :  { %4880 = vmatmul.mubr.bf16.gmra.mxu0 %v14135_v62  ;;  %4993 = vmatmul.mubr.bf16.gmra.mxu1 %v14136_v63  ;;  %v13161_v63 = vld [vmem:[#allocation6 + $0xc4] ss:$44 sps:$4 sm:$0xff]  }
 0x14f   :  { %5032 = vmatpush2.bf16.msra.mxu0 %v13117_v59  ;;  %5035 = vmatprep.mubr.bf16.mxu0 %v14137_v1  ;;  %v13156_v59 = vld [vmem:[#allocation6 + $0x698] ss:$44 sps:$4 sm:$0xff]  }
 0x150   :  { %5033 = vmatprep.subr.bf16.mxu0 %v13125_v61  ;;  %5148 = vmatprep.mubr.bf16.mxu1 %v16667_v3 }
 0x153   :  { %5034 = vmatpush2.bf16.msra.mxu0 %v13123_v0  ;;  %v13164_v0 = vld [vmem:[#allocation6 + $0x644] ss:$44 sps:$4 sm:$0xff]  }
 0x154   :  { %5229 = vmatprep.subr.bf16.mxu0 %v13131_v5 }
 0x156   :  { %v4359_v13 = vpop.f32.mrf.mxu0  ;;  %5036 = vmatmul.mubr.bf16.vlgmr.msra.gmra.mxu0 %v14138_v14  ;;  %5149 = vmatmul.mubr.bf16.vlgmr.msra.gmra.mxu1 %v14139_v15  ;;  %v4472_v16 = vpop.f32.mrf.mxu1  ;;  %v13162_v15 = vld [vmem:[#allocation6 + $0x640] ss:$44 sps:$4 sm:$0xff]  }
 0x157   :  { %v4360_v18 = vadd.f32 %v4359_v13, %v14630_v8  ;;  %5230 = vmatpush1.bf16.msra.mxu0 %v13129_v7  ;;  %5343 = vmatpush1.bf16.msra.mxu1 %v13132_v9  ;;  %v14144_v7 = vld [vmem:[#allocation3 + $0x80] ss:$28 sps:$4 sm:$0xff]   ;;  %v14145_v9 = vld [vmem:[#allocation3 + $0x88] ss:$28 sps:$4 sm:$0xff]  }
 0x158   :  { %v4361_v20 = vpop.f32.mrf.mxu0  ;;  %v4474_v21 = vpop.f32.mrf.mxu1  ;;  %5231 = vmatprep.subr.bf16.mxu0 %v13137_v10  ;;  %5344 = vmatprep.subr.bf16.mxu1 %v13140_v11  ;;  %v13159_v11 = vld [vmem:[#allocation6 + $0xc0] ss:$44 sps:$4 sm:$0xff]  }
 0x159   :  { %v4362_v24 = vadd.f32 %v4361_v20, %v14633_v12  ;;  %v14637_v25 = vadd.f32 %v4472_v16, %v4360_v18  ;;  %5045 = vmatprep.mubr.bf16.mxu0 %v14140_v26  ;;  %5158 = vmatprep.mubr.bf16.mxu1 %v16667_v3  ;;  %v13167_v18 = vld [vmem:[#allocation6 + $0x6c] ss:$44 sps:$4 sm:$0xff]  }
 0x15a   :  { %v4363_v27 = vpop.f32.mrf.mxu0  ;;  %v4476_v28 = vpop.f32.mrf.mxu1 }
 0x15b   :  { %v4364_v30 = vadd.f32 %v4363_v27, %v14630_v8  ;;  %v14641_v31 = vadd.f32 %v4474_v21, %v4362_v24  ;;  %5232 = vmatpush1.bf16.msra.mxu0 %v13135_v17  ;;  %5345 = vmatpush1.bf16.msra.mxu1 %v13138_v19  ;;  %v13170_v19 = vld [vmem:[#allocation6 + $0x5ec] ss:$44 sps:$4 sm:$0xff]   ;;  %v13168_v27 = vld [vmem:[#allocation6 + $0x5e8] ss:$44 sps:$4 sm:$0xff]  }
 0x15c   :  { %v4365_v33 = vpop.f32.mrf.mxu0  ;;  %v4478_v34 = vpop.f32.mrf.mxu1  ;;  %5233 = vmatprep.subr.bf16.mxu0 %v13143_v22  ;;  %5346 = vmatprep.subr.bf16.mxu1 %v13146_v23  ;;  %v14146_v22 = vld [vmem:[#allocation3 + $0xbc] ss:$28 sps:$4 sm:$0xff]   ;;  %v13165_v23 = vld [vmem:[#allocation6 + $0x68] ss:$44 sps:$4 sm:$0xff]  }
 0x15d   :  { %v4366_v37 = vadd.f32 %v4365_v33, %v14633_v12  ;;  %v14644_v38 = vadd.f32 %v4476_v28, %v4364_v30  ;;  %v13173_v28 = vld [vmem:[#allocation6 + $0x14] ss:$44 sps:$4 sm:$0xff]  }
 0x15e   :  { %v4369_v39 = vpop.f32.mrf.mxu0  ;;  %5046 = vmatmul.mubr.bf16.gmra.mxu0 %v14141_v40  ;;  %5159 = vmatmul.mubr.bf16.gmra.mxu1 %v14142_v41  ;;  %v4482_v42 = vpop.f32.mrf.mxu1  ;;  %v14147_v41 = vld [vmem:[#allocation3 + $0xb8] ss:$28 sps:$4 sm:$0xff]  }
 0x15f   :  { %v4370_v44 = vadd.f32 %v4369_v39, %v14630_v8  ;;  %v14647_v45 = vadd.f32 %v4478_v34, %v4366_v37  ;;  %5234 = vmatpush1.bf16.msra.mxu0 %v13141_v29  ;;  %5347 = vmatpush1.bf16.msra.mxu1 %v13144_v32  ;;  %v13176_v32 = vld [vmem:[#allocation6 + $0x594] ss:$44 sps:$4 sm:$0xff]   ;;  %v13171_v37 = vld [vmem:[#allocation6 + $0x10] ss:$44 sps:$4 sm:$0xff]  }
 0x160   :  { %v4371_v47 = vpop.f32.mrf.mxu0  ;;  %v4484_v48 = vpop.f32.mrf.mxu1  ;;  %5235 = vmatprep.subr.bf16.mxu0 %v13149_v35  ;;  %5348 = vmatprep.subr.bf16.mxu1 %v13152_v36  ;;  %v13174_v39 = vld [vmem:[#allocation6 + $0x590] ss:$44 sps:$4 sm:$0xff]  }
 0x161   :  { %v4372_v51 = vadd.f32 %v4371_v47, %v14633_v12  ;;  %v14650_v52 = vadd.f32 %v4482_v42, %v4370_v44  ;;  %5055 = vmatprep.mubr.bf16.mxu0 %v14143_v53  ;;  %5168 = vmatprep.mubr.bf16.mxu1 %v16667_v3  ;;  %v14148_v42 = vld [vmem:[#allocation3 + $0xc0] ss:$28 sps:$4 sm:$0xff]  }
 0x162   :  { %v4373_v54 = vpop.f32.mrf.mxu0  ;;  %v4486_v55 = vpop.f32.mrf.mxu1  ;;  %v13179_v44 = vld [vmem:[#allocation6 + $0x53c] ss:$44 sps:$4 sm:$0xff]  }
 0x163   :  { %v4374_v57 = vadd.f32 %v4373_v54, %v14630_v8  ;;  %v14654_v58 = vadd.f32 %v4484_v48, %v4372_v51  ;;  %5236 = vmatpush1.bf16.msra.mxu0 %v13147_v43  ;;  %5349 = vmatpush1.bf16.msra.mxu1 %v13150_v46  ;;  %v13182_v46 = vld [vmem:[#allocation6 + $0xabc] ss:$44 sps:$4 sm:$0xff]   ;;  %v14149_v54 = vld [vmem:[#allocation3 + $0xf4] ss:$28 sps:$4 sm:$0xff]  }
 0x164   :  { %v4375_v61 = vpop.f32.mrf.mxu0  ;;  %v4488_v62 = vpop.f32.mrf.mxu1  ;;  %5237 = vmatprep.subr.bf16.mxu0 %v13155_v49  ;;  %5350 = vmatprep.subr.bf16.mxu1 %v13158_v50 }
 0x165   :  { %v4376_v1 = vadd.f32 %v4375_v61, %v14633_v12  ;;  %v14657_v4 = vadd.f32 %v4486_v55, %v4374_v57  ;;  %v13177_v55 = vld [vmem:[#allocation6 + $0x538] ss:$44 sps:$4 sm:$0xff]  }
 0x166   :  { %v4379_v5 = vpop.f32.mrf.mxu0  ;;  %5056 = vmatmul.mubr.bf16.gmra.mxu0 %v14144_v7  ;;  %5169 = vmatmul.mubr.bf16.gmra.mxu1 %v14145_v9  ;;  %v4492_v10 = vpop.f32.mrf.mxu1  ;;  %v13185_v61 = vld [vmem:[#allocation6 + $0x4e4] ss:$44 sps:$4 sm:$0xff]  }
 0x167   :  { %v4380_v13 = vadd.f32 %v4379_v5, %v14630_v8  ;;  %v14660_v14 = vadd.f32 %v4488_v62, %v4376_v1  ;;  %5238 = vmatpush1.bf16.msra.mxu0 %v13153_v56  ;;  %5351 = vmatpush1.bf16.msra.mxu1 %v13156_v59  ;;  %v13180_v56 = vld [vmem:[#allocation6 + $0xab8] ss:$44 sps:$4 sm:$0xff]  }
 0x168   :  { %v4381_v16 = vpop.f32.mrf.mxu0  ;;  %v4494_v17 = vpop.f32.mrf.mxu1  ;;  %5239 = vmatprep.subr.bf16.mxu0 %v13161_v63  ;;  %5352 = vmatprep.subr.bf16.mxu1 %v13164_v0  ;;  %v13188_v62 = vld [vmem:[#allocation6 + $0xa64] ss:$44 sps:$4 sm:$0xff]  }
 0x169   :  { %v4382_v20 = vadd.f32 %v4381_v16, %v14633_v12  ;;  %v14663_v21 = vadd.f32 %v4492_v10, %v4380_v13  ;;  %5065 = vmatprep.mubr.bf16.mxu0 %v14146_v22  ;;  %5178 = vmatprep.mubr.bf16.mxu1 %v16667_v3  ;;  %v13183_v10 = vld [vmem:[#allocation6 + $0x4e0] ss:$44 sps:$4 sm:$0xff]   ;;  %v14151_v16 = vld [vmem:[#allocation3 + $0xf8] ss:$28 sps:$4 sm:$0xff]  }
 0x16a   :  { %v4383_v24 = vpop.f32.mrf.mxu0  ;;  %v4496_v26 = vpop.f32.mrf.mxu1 }
 0x16b   :  { %v4384_v29 = vadd.f32 %v4383_v24, %v14630_v8  ;;  %v14667_v30 = vadd.f32 %v4494_v17, %v4382_v20  ;;  %5240 = vmatpush1.bf16.msra.mxu0 %v13159_v11  ;;  %5353 = vmatpush1.bf16.msra.mxu1 %v13162_v15  ;;  %v13186_v11 = vld [vmem:[#allocation6 + $0xa60] ss:$44 sps:$4 sm:$0xff]  }
 0x16c   :  { %v4385_v33 = vpop.f32.mrf.mxu0  ;;  %v4498_v34 = vpop.f32.mrf.mxu1  ;;  %5241 = vmatprep.subr.bf16.mxu0 %v13167_v18  ;;  %5354 = vmatprep.subr.bf16.mxu1 %v13170_v19  ;;  %v14150_v15 = vld [vmem:[#allocation3 + $0xf0] ss:$28 sps:$4 sm:$0xff]  }
 0x16d   :  { %v4386_v35 = vadd.f32 %v4385_v33, %v14633_v12  ;;  %v14670_v36 = vadd.f32 %v4496_v26, %v4384_v29  ;;  %v13191_v18 = vld [vmem:[#allocation6 + $0x48c] ss:$44 sps:$4 sm:$0xff]   ;;  %v13189_v29 = vld [vmem:[#allocation6 + $0x488] ss:$44 sps:$4 sm:$0xff]  }
 0x16e   :  { %v4389_v40 = vpop.f32.mrf.mxu0  ;;  %5066 = vmatmul.mubr.bf16.gmra.mxu0 %v14147_v41  ;;  %5179 = vmatmul.mubr.bf16.gmra.mxu1 %v14148_v42  ;;  %v4502_v43 = vpop.f32.mrf.mxu1  ;;  %v13194_v19 = vld [vmem:[#allocation6 + $0xa0c] ss:$44 sps:$4 sm:$0xff]  }
 0x16f   :  { %v4390_v47 = vadd.f32 %v4389_v40, %v14630_v8  ;;  %v14673_v48 = vadd.f32 %v4498_v34, %v4386_v35  ;;  %5242 = vmatpush1.bf16.msra.mxu0 %v13165_v23  ;;  %5355 = vmatpush1.bf16.msra.mxu1 %v13168_v27  ;;  %v13197_v35 = vld [vmem:[#allocation6 + $0x434] ss:$44 sps:$4 sm:$0xff]  }
 0x170   :  { %v4391_v49 = vpop.f32.mrf.mxu0  ;;  %v4504_v50 = vpop.f32.mrf.mxu1  ;;  %5243 = vmatprep.subr.bf16.mxu0 %v13173_v28  ;;  %5356 = vmatprep.subr.bf16.mxu1 %v13176_v32  ;;  %v14152_v28 = vld [vmem:[#allocation3 + $0x12c] ss:$28 sps:$4 sm:$0xff]  }
 0x171   :  { %v4392_v51 = vadd.f32 %v4391_v49, %v14633_v12  ;;  %v14676_v53 = vadd.f32 %v4502_v43, %v4390_v47  ;;  %5075 = vmatprep.mubr.bf16.mxu0 %v14149_v54  ;;  %5188 = vmatprep.mubr.bf16.mxu1 %v16667_v3  ;;  %v13192_v32 = vld [vmem:[#allocation6 + $0xa08] ss:$44 sps:$4 sm:$0xff]   ;;  %v13198_v47 = vld [vmem:[#allocation6 + $0x9b0] ss:$44 sps:$4 sm:$0xff]  }
 0x172   :  { %v4393_v57 = vpop.f32.mrf.mxu0  ;;  %v4506_v59 = vpop.f32.mrf.mxu1 }
 0x173   :  { %v4394_v63 = vadd.f32 %v4393_v57, %v14630_v8  ;;  %v14680_v0 = vadd.f32 %v4504_v50, %v4392_v51  ;;  %5244 = vmatpush1.bf16.msra.mxu0 %v13171_v37  ;;  %5357 = vmatpush1.bf16.msra.mxu1 %v13174_v39  ;;  %v13200_v37 = vld [vmem:[#allocation6 + $0x9b4] ss:$44 sps:$4 sm:$0xff]   ;;  %v14153_v50 = vld [vmem:[#allocation3 + $0x128] ss:$28 sps:$4 sm:$0xff]   ;;  %v14154_v51 = vld [vmem:[#allocation3 + $0x130] ss:$28 sps:$4 sm:$0xff]  }
 0x174   :  { %v4395_v1 = vpop.f32.mrf.mxu0  ;;  %v4508_v5 = vpop.f32.mrf.mxu1  ;;  %5245 = vmatprep.subr.bf16.mxu0 %v13179_v44  ;;  %5358 = vmatprep.subr.bf16.mxu1 %v13182_v46  ;;  %v13195_v46 = vld [vmem:[#allocation6 + $0x430] ss:$44 sps:$4 sm:$0xff]  }
 0x175   :  { %v4396_v7 = vadd.f32 %v4395_v1, %v14633_v12  ;;  %v14683_v9 = vadd.f32 %v4506_v59, %v4394_v63 }
 0x176   :  { %v4399_v13 = vpop.f32.mrf.mxu0  ;;  %5076 = vmatmul.mubr.bf16.gmra.mxu0 %v14150_v15  ;;  %5189 = vmatmul.mubr.bf16.gmra.mxu1 %v14151_v16  ;;  %v4512_v17 = vpop.f32.mrf.mxu1  ;;  %v13209_v15 = vld [vmem:[#allocation6 + $0x384] ss:$44 sps:$4 sm:$0xff]  }
 0x177   :  { %v4400_v20 = vadd.f32 %v4399_v13, %v14630_v8  ;;  %v14686_v22 = vadd.f32 %v4508_v5, %v4396_v7  ;;  %5246 = vmatpush2.bf16.msra.mxu0 %v13177_v55  ;;  %5359 = vmatpush2.bf16.msra.mxu1 %v13180_v56  ;;  %v13203_v55 = vld [vmem:[#allocation6 + $0x3dc] ss:$44 sps:$4 sm:$0xff]   ;;  %v14155_v5 = vld [vmem:[#allocation3 + $0x164] ss:$28 sps:$4 sm:$0xff]  }
 0x178   :  { %v4401_v23 = vpop.f32.mrf.mxu0  ;;  %v4514_v24 = vpop.f32.mrf.mxu1  ;;  %5247 = vmatprep.subr.bf16.mxu0 %v13185_v61  ;;  %5360 = vmatprep.subr.bf16.mxu1 %v13188_v62  ;;  %v13206_v56 = vld [vmem:[#allocation6 + $0x95c] ss:$44 sps:$4 sm:$0xff]   ;;  %v13201_v7 = vld [vmem:[#allocation6 + $0x3d8] ss:$44 sps:$4 sm:$0xff]  }
 0x179   :  { %v4402_v26 = vadd.f32 %v4401_v23, %v14633_v12  ;;  %v14689_v27 = vadd.f32 %v4512_v17, %v4400_v20  ;;  %5085 = vmatprep.mubr.bf16.mxu0 %v14152_v28  ;;  %5198 = vmatprep.mubr.bf16.mxu1 %v16667_v3  ;;  %v13212_v16 = vld [vmem:[#allocation6 + $0x904] ss:$44 sps:$4 sm:$0xff]   ;;  %v13210_v28 = vld [vmem:[#allocation6 + $0x900] ss:$44 sps:$4 sm:$0xff]  }
 0x17a   :  { %v4403_v33 = vpop.f32.mrf.mxu0  ;;  %v4516_v34 = vpop.f32.mrf.mxu1 }
 0x17b   :  { %v4404_v39 = vadd.f32 %v4403_v33, %v14630_v8  ;;  %v14693_v40 = vadd.f32 %v4514_v24, %v4402_v26  ;;  %5248 = vmatpush2.bf16.msra.mxu0 %v13183_v10  ;;  %5361 = vmatpush2.bf16.msra.mxu1 %v13186_v11  ;;  %v13204_v10 = vld [vmem:[#allocation6 + $0x958] ss:$44 sps:$4 sm:$0xff]   ;;  %v13207_v26 = vld [vmem:[#allocation6 + $0x380] ss:$44 sps:$4 sm:$0xff]  }
 0x17c   :  { %v4405_v41 = vpop.f32.mrf.mxu0  ;;  %v4518_v42 = vpop.f32.mrf.mxu1  ;;  %5249 = vmatprep.subr.bf16.mxu0 %v13191_v18  ;;  %5362 = vmatprep.subr.bf16.mxu1 %v13194_v19  ;;  %v14157_v33 = vld [vmem:[#allocation3 + $0x168] ss:$28 sps:$4 sm:$0xff]  }
 0x17d   :  { %v4406_v43 = vadd.f32 %v4405_v41, %v14633_v12  ;;  %v14696_v44 = vadd.f32 %v4516_v34, %v4404_v39 }
 0x17e   :  { %v4409_v49 = vpop.f32.mrf.mxu0  ;;  %5086 = vmatmul.mubr.bf16.gmra.mxu0 %v14153_v50  ;;  %5199 = vmatmul.mubr.bf16.gmra.mxu1 %v14154_v51  ;;  %v4522_v54 = vpop.f32.mrf.mxu1  ;;  %v13213_v50 = vld [vmem:[#allocation6 + $0x328] ss:$44 sps:$4 sm:$0xff]  }
 0x17f   :  { %v4410_v57 = vadd.f32 %v4409_v49, %v14630_v8  ;;  %v14699_v59 = vadd.f32 %v4518_v42, %v4406_v43  ;;  %5250 = vmatpush2.bf16.msra.mxu0 %v13189_v29  ;;  %5363 = vmatpush2.bf16.msra.mxu1 %v13192_v32  ;;  %v14156_v32 = vld [vmem:[#allocation3 + $0x160] ss:$28 sps:$4 sm:$0xff]   ;;  %v13216_v51 = vld [vmem:[#allocation6 + $0x8a8] ss:$44 sps:$4 sm:$0xff]  }
 0x180   :  { %v4411_v61 = vpop.f32.mrf.mxu0  ;;  %v4524_v62 = vpop.f32.mrf.mxu1  ;;  %5251 = vmatprep.subr.bf16.mxu0 %v13197_v35  ;;  %5364 = vmatprep.subr.bf16.mxu1 %v13200_v37  ;;  %v13215_v35 = vld [vmem:[#allocation6 + $0x32c] ss:$44 sps:$4 sm:$0xff]  }
 0x181   :  { %v4412_v63 = vadd.f32 %v4411_v61, %v14633_v12  ;;  %v14702_v1 = vadd.f32 %v4522_v54, %v4410_v57  ;;  %5095 = vmatprep.mubr.bf16.mxu0 %v14155_v5  ;;  %5208 = vmatprep.mubr.bf16.mxu1 %v16667_v3  ;;  %v13218_v37 = vld [vmem:[#allocation6 + $0x8ac] ss:$44 sps:$4 sm:$0xff]   ;;  %v13224_v57 = vld [vmem:[#allocation6 + $0x854] ss:$44 sps:$4 sm:$0xff]  }
 0x182   :  { %v4413_v11 = vpop.f32.mrf.mxu0  ;;  %v4526_v13 = vpop.f32.mrf.mxu1  ;;  %v14158_v49 = vld [vmem:[#allocation3 + $0x19c] ss:$28 sps:$4 sm:$0xff]  }
 0x183   :  { %v4414_v17 = vadd.f32 %v4413_v11, %v14630_v8  ;;  %v14706_v18 = vadd.f32 %v4524_v62, %v4412_v63  ;;  %5252 = vmatpush2.bf16.msra.mxu0 %v13195_v46  ;;  %5365 = vmatpush2.bf16.msra.mxu1 %v13198_v47  ;;  %v13219_v11 = vld [vmem:[#allocation6 + $0x2d0] ss:$44 sps:$4 sm:$0xff]  }
 0x184   :  { %v4415_v19 = vpop.f32.mrf.mxu0  ;;  %v4528_v20 = vpop.f32.mrf.mxu1  ;;  %5253 = vmatprep.subr.bf16.mxu0 %v13203_v55  ;;  %5366 = vmatprep.subr.bf16.mxu1 %v13206_v56  ;;  %v13221_v56 = vld [vmem:[#allocation6 + $0x2d4] ss:$44 sps:$4 sm:$0xff]  }
 0x185   :  { %v4416_v23 = vadd.f32 %v4415_v19, %v14633_v12  ;;  %v14709_v24 = vadd.f32 %v4526_v13, %v4414_v17  ;;  %v13222_v13 = vld [vmem:[#allocation6 + $0x850] ss:$44 sps:$4 sm:$0xff]  }
 0x186   :  { %v4419_v29 = vpop.f32.mrf.mxu0  ;;  %5096 = vmatmul.mubr.bf16.gmra.mxu0 %v14156_v32  ;;  %5209 = vmatmul.mubr.bf16.gmra.mxu1 %v14157_v33  ;;  %v4532_v34 = vpop.f32.mrf.mxu1  ;;  %v14160_v17 = vld [vmem:[#allocation3 + $0x1a0] ss:$28 sps:$4 sm:$0xff]  }
 0x187   :  { %v4420_v39 = vadd.f32 %v4419_v29, %v14630_v8  ;;  %v14712_v41 = vadd.f32 %v4528_v20, %v4416_v23  ;;  %5254 = vmatpush2.bf16.msra.mxu0 %v13201_v7  ;;  %5367 = vmatpush2.bf16.msra.mxu1 %v13204_v10  ;;  %v13227_v20 = vld [vmem:[#allocation6 + $0xd7c] ss:$44 sps:$4 sm:$0xff]  }
 0x188   :  { %v4421_v42 = vpop.f32.mrf.mxu0  ;;  %v4534_v43 = vpop.f32.mrf.mxu1  ;;  %5255 = vmatprep.subr.bf16.mxu0 %v13209_v15  ;;  %5368 = vmatprep.subr.bf16.mxu1 %v13212_v16  ;;  %v14159_v16 = vld [vmem:[#allocation3 + $0x198] ss:$28 sps:$4 sm:$0xff]   ;;  %v13239_v23 = vld [vmem:[#allocation6 + $0x12fc] ss:$44 sps:$4 sm:$0xff]  }
 0x189   :  { %v4422_v46 = vadd.f32 %v4421_v42, %v14633_v12  ;;  %v14715_v47 = vadd.f32 %v4532_v34, %v4420_v39  ;;  %5105 = vmatprep.mubr.bf16.mxu0 %v14158_v49  ;;  %5218 = vmatprep.mubr.bf16.mxu1 %v16667_v3 }
 0x18a   :  { %v4423_v54 = vpop.f32.mrf.mxu0  ;;  %v4536_v55 = vpop.f32.mrf.mxu1 }
 0x18b   :  { %v4424_v61 = vadd.f32 %v4423_v54, %v14630_v8  ;;  %v14719_v62 = vadd.f32 %v4534_v43, %v4422_v46  ;;  %5256 = vmatpush2.bf16.msra.mxu0 %v13207_v26  ;;  %5369 = vmatpush2.bf16.msra.mxu1 %v13210_v28  ;;  %v13225_v43 = vld [vmem:[#allocation6 + $0xd78] ss:$44 sps:$4 sm:$0xff]  }
 0x18c   :  { %v4425_v63 = vpop.f32.mrf.mxu0  ;;  %v4538_v5 = vpop.f32.mrf.mxu1  ;;  %5257 = vmatprep.subr.bf16.mxu0 %v13215_v35  ;;  %5370 = vmatprep.subr.bf16.mxu1 %v13218_v37  ;;  %v14161_v35 = vld [vmem:[#allocation3 + $0x4] ss:$28 sps:$4 sm:$0xff]   ;;  %v14162_v37 = vld [vmem:[#allocation3 + $0xc] ss:$28 sps:$4 sm:$0xff]  }
 0x18d   :  { %v4426_v7 = vadd.f32 %v4425_v63, %v14633_v12  ;;  %v14722_v10 = vadd.f32 %v4536_v55, %v4424_v61  ;;  %v13230_v46 = vld [vmem:[#allocation6 + $0xd24] ss:$44 sps:$4 sm:$0xff]  }
 0x18e   :  { %v4429_v15 = vpop.f32.mrf.mxu0  ;;  %5106 = vmatmul.mubr.bf16.gmra.mxu0 %v14159_v16  ;;  %5219 = vmatmul.mubr.bf16.gmra.mxu1 %v14160_v17  ;;  %v4542_v19 = vpop.f32.mrf.mxu1  ;;  %v13237_v61 = vld [vmem:[#allocation6 + $0x12f8] ss:$44 sps:$4 sm:$0xff]  }
 0x18f   :  { %v4430_v26 = vadd.f32 %v4429_v15, %v14630_v8  ;;  %v14725_v28 = vadd.f32 %v4538_v5, %v4426_v7  ;;  %5258 = vmatpush2.bf16.msra.mxu0 %v13213_v50  ;;  %5371 = vmatpush2.bf16.msra.mxu1 %v13216_v51  ;;  %v14163_v5 = vld [vmem:[#allocation3] ss:$28 sps:$4 sm:$0xff]   ;;  %v14164_v7 = vld [vmem:[#allocation3 + $0x8] ss:$28 sps:$4 sm:$0xff]   ;;  %v13233_v15 = vld [vmem:[#allocation6 + $0xccc] ss:$44 sps:$4 sm:$0xff]  }
 0x190   :  { %v4431_v29 = vpop.f32.mrf.mxu0  ;;  %v4544_v32 = vpop.f32.mrf.mxu1  ;;  %5259 = vmatprep.subr.bf16.mxu0 %v13221_v56  ;;  %5372 = vmatprep.subr.bf16.mxu1 %v13224_v57  ;;  %v13228_v57 = vld [vmem:[#allocation6 + $0xd20] ss:$44 sps:$4 sm:$0xff]   ;;  %v13248_v16 = vld [vmem:[#allocation6 + $0x12a4] ss:$44 sps:$4 sm:$0xff]   ;;  %v14165_v17 = vld [vmem:[#allocation3 + $0x3c] ss:$28 sps:$4 sm:$0xff]  }
 0x191   :  { %v4432_v33 = vadd.f32 %v4431_v29, %v14633_v12  ;;  %v14728_v34 = vadd.f32 %v4542_v19, %v4430_v26  ;;  %5261 = vmatprep.mubr.bf16.mxu0 %v14161_v35  ;;  %5374 = vmatprep.mubr.bf16.mxu1 %v14162_v37  ;;  %v13231_v29 = vld [vmem:[#allocation6 + $0xcc8] ss:$44 sps:$4 sm:$0xff]  }
 0x192   :  { %v4433_v39 = vpop.f32.mrf.mxu0  ;;  %v4546_v42 = vpop.f32.mrf.mxu1  ;;  %v13236_v37 = vld [vmem:[#allocation6 + $0xc74] ss:$44 sps:$4 sm:$0xff]  }
 0x193   :  { %v4434_v49 = vadd.f32 %v4433_v39, %v14630_v8  ;;  %v14731_v50 = vadd.f32 %v4544_v32, %v4432_v33  ;;  %5260 = vmatpush2.bf16.msra.mxu0 %v13219_v11  ;;  %5373 = vmatpush2.bf16.msra.mxu1 %v13222_v13  ;;  %v13246_v32 = vld [vmem:[#allocation6 + $0x12a0] ss:$44 sps:$4 sm:$0xff]  }
 0x194   :  { %v4435_v51 = vpop.f32.mrf.mxu0  ;;  %v4548_v54 = vpop.f32.mrf.mxu1  ;;  %5455 = vmatprep.subr.bf16.mxu0 %v13227_v20  ;;  %5568 = vmatprep.subr.bf16.mxu1 %v13239_v23  ;;  %v14166_v20 = vld [vmem:[#allocation3 + $0x44] ss:$28 sps:$4 sm:$0xff]  }
 0x195   :  { %v4436_v55 = vadd.f32 %v4435_v51, %v14633_v12  ;;  %v14734_v56 = vadd.f32 %v4546_v42, %v4434_v49  ;;  %v13234_v51 = vld [vmem:[#allocation6 + $0xc70] ss:$44 sps:$4 sm:$0xff]  }
 0x196   :  { %v4585_v63 = vpop.f32.mrf.mxu0  ;;  %5262 = vmatmul.mubr.bf16.vlgmr.msra.gmra.mxu0 %v14163_v5  ;;  %5375 = vmatmul.mubr.bf16.vlgmr.msra.gmra.mxu1 %v14164_v7  ;;  %v4698_v8 = vpop.f32.mrf.mxu1  ;;  %v14167_v5 = vld [vmem:[#allocation3 + $0x38] ss:$28 sps:$4 sm:$0xff]   ;;  %v14168_v7 = vld [vmem:[#allocation3 + $0x40] ss:$28 sps:$4 sm:$0xff]  }
 0x197   :  { %v14736_v11 = vadd.f32 %v4548_v54, %v4436_v55  ;;  %v4586_v13 = vadd.f32 %v4585_v63, %v14637_v25  ;;  %5456 = vmatpush1.bf16.msra.mxu0 %v13225_v43  ;;  %5271 = vmatprep.mubr.bf16.mxu0 %v14165_v17  ;;  %v13266_v54 = vld [vmem:[#allocation6 + $0x11f4] ss:$44 sps:$4 sm:$0xff]  }
 0x198   :  { %v4587_v12 = vpop.f32.mrf.mxu0  ;;  %v4700_v19 = vpop.f32.mrf.mxu1  ;;  %5457 = vmatprep.subr.bf16.mxu0 %v13230_v46  ;;  %5384 = vmatprep.mubr.bf16.mxu1 %v14166_v20  ;;  %v13255_v46 = vld [vmem:[#allocation6 + $0x1248] ss:$44 sps:$4 sm:$0xff]  }
 0x199   :  { %v4588_v23 = vadd.f32 %v4587_v12, %v14641_v31  ;;  %v4699_v26 = vadd.f32 %v4698_v8, %v4586_v13  ;;  %5569 = vmatpush1.bf16.msra.mxu1 %v13237_v61  ;;  %v13257_v31 = vld [vmem:[#allocation6 + $0x124c] ss:$44 sps:$4 sm:$0xff]  }
 0x19a   :  { %v4589_v33 = vpop.f32.mrf.mxu0  ;;  %v4702_v35 = vpop.f32.mrf.mxu1  ;;  %5570 = vmatprep.subr.bf16.mxu1 %v13248_v16 }
 0x19b   :  { %v4590_v25 = vadd.f32 %v4589_v33, %v14644_v38  ;;  %v4701_v39 = vadd.f32 %v4700_v19, %v4588_v23  ;;  %5458 = vmatpush1.bf16.msra.mxu0 %v13228_v57  ;;  %vm6973_vm0 = vcmp.ge.f32.partialorder %v4699_v26, 0.0  ;;  %v7149_v55 = vmul.f32 0.2, %v4699_v26  ;;  %v13242_v57 = vld [vmem:[#allocation6 + $0xc1c] ss:$44 sps:$4 sm:$0xff]  }
 0x19c   :  { %v4591_v42 = vpop.f32.mrf.mxu0  ;;  %v4704_v43 = vpop.f32.mrf.mxu1  ;;  %5459 = vmatprep.subr.bf16.mxu0 %v13233_v15  ;;  %v14170_v19 = vld [vmem:[#allocation3 + $0x7c] ss:$28 sps:$4 sm:$0xff]  }
 0x19d   :  { %v4592_v49 = vadd.f32 %v4591_v42, %v14647_v45  ;;  %5571 = vmatpush1.bf16.msra.mxu1 %v13246_v32  ;;  %v4703_v61 = vadd.f32 %v4702_v35, %v4590_v25  ;;  %vm6974_vm1 = vcmp.ge.f32.partialorder %v4701_v39, 0.0  ;;  %v7150_v8 = vmul.f32 0.2, %v4701_v39  ;;  %v14169_v45 = vld [vmem:[#allocation3 + $0x74] ss:$28 sps:$4 sm:$0xff]  }
 0x19e   :  { %v4595_v63 = vpop.f32.mrf.mxu0  ;;  %5272 = vmatmul.mubr.bf16.gmra.mxu0 %v14167_v5  ;;  %5385 = vmatmul.mubr.bf16.gmra.mxu1 %v14168_v7  ;;  %v4708_v38 = vpop.f32.mrf.mxu1  ;;  %v13240_v33 = vld [vmem:[#allocation6 + $0xc18] ss:$44 sps:$4 sm:$0xff]  }
 0x19f   :  { %v4596_v15 = vadd.f32 %v4595_v63, %v14650_v52  ;;  %v4705_v16 = vadd.f32 %v4704_v43, %v4592_v49  ;;  %5460 = vmatpush1.bf16.msra.mxu0 %v13231_v29  ;;  %5281 = vmatprep.mubr.bf16.mxu0 %v14169_v45  ;;  %vm6984_vm2 = vcmp.ge.f32.partialorder %v4703_v61, 0.0  ;;  %v7160_v13 = vmul.f32 0.2, %v4703_v61  ;;  %v13245_v42 = vld [vmem:[#allocation6 + $0xbc4] ss:$44 sps:$4 sm:$0xff]  }
 0x1a0   :  { %v4597_v17 = vpop.f32.mrf.mxu0  ;;  %v4710_v12 = vpop.f32.mrf.mxu1  ;;  %5461 = vmatprep.subr.bf16.mxu0 %v13236_v37  ;;  %5394 = vmatprep.mubr.bf16.mxu1 %v14170_v19  ;;  %v7325_v52 = vsel %vm6973_vm0, %v4699_v26, %v7149_v55  ;;  %v13275_v45 = vld [vmem:[#allocation6 + $0x119c] ss:$44 sps:$4 sm:$0xff]   ;;  %v14174_v19 = vld [vmem:[#allocation3 + $0xb4] ss:$28 sps:$4 sm:$0xff]  }
 0x1a1   :  { %vm6985_vm3 = vcmp.ge.f32.partialorder %v4705_v16, 0.0  ;;  %v7161_v20 = vmul.f32 0.2, %v4705_v16  ;;  %v4598_v23 = vadd.f32 %v4597_v17, %v14654_v58  ;;  %v4709_v32 = vadd.f32 %v4708_v38, %v4596_v15  ;;  %5572 = vmatprep.subr.bf16.mxu1 %v13257_v31 }
 0x1a2   :  { %v7336_v35 = vsel %vm6984_vm2, %v4703_v61, %v7160_v13  ;;  %v4599_v29 = vpop.f32.mrf.mxu0  ;;  %v4712_v25 = vpop.f32.mrf.mxu1  ;;  %5573 = vmatpush1.bf16.msra.mxu1 %v13255_v46  ;;  %v7326_v31 = vsel %vm6974_vm1, %v4701_v39, %v7150_v8  ;;  %v13264_v46 = vld [vmem:[#allocation6 + $0x11f0] ss:$44 sps:$4 sm:$0xff]  }
 0x1a3   :  { %v14745_v43 = vpack.c.bf16 %v7336_v35, %v7325_v52  ;;  %v4600_v37 = vadd.f32 %v4599_v29, %v14657_v4  ;;  %5462 = vmatpush1.bf16.msra.mxu0 %v13234_v51  ;;  %5574 = vmatprep.subr.bf16.mxu1 %v13266_v54  ;;  %v7171_v49 = vmul.f32 0.2, %v4709_v32  ;;  %v4711_v63 = vadd.f32 %v4710_v12, %v4598_v23  ;;  %v14171_v51 = vld [vmem:[#allocation3 + $0x70] ss:$28 sps:$4 sm:$0xff]   ;;  %v14172_v54 = vld [vmem:[#allocation3 + $0x78] ss:$28 sps:$4 sm:$0xff]  }
 0x1a4   :  { %v4601_v5 = vpop.f32.mrf.mxu0  ;;  %v4714_v58 = vpop.f32.mrf.mxu1  ;;  %5463 = vmatprep.subr.bf16.mxu0 %v13242_v57  ;;  %v7337_v26 = vsel %vm6985_vm3, %v4705_v16, %v7161_v20  ;;  %vm6995_vm4 = vcmp.ge.f32.partialorder %v4709_v32, 0.0  ;;  %v13243_v16 = vld [vmem:[#allocation6 + $0xbc0] ss:$44 sps:$4 sm:$0xff]   ;;  %v13249_v35 = vld [vmem:[#allocation6 + $0xb68] ss:$44 sps:$4 sm:$0xff]  }
 0x1a5   :  { %16755 = vst [vmem:[#allocation22_spill] sm:$0xff] %v14745_v43  ;;  %v4602_v55 = vadd.f32 %v4601_v5, %v14660_v14  ;;  %v4713_v61 = vadd.f32 %v4712_v25, %v4600_v37  ;;  %v14751_v7 = vpack.c.bf16 %v7337_v26, %v7326_v31  ;;  %v7172_v38 = vmul.f32 0.2, %v4711_v63  ;;  %v14173_v14 = vld [vmem:[#allocation3 + $0xac] ss:$28 sps:$4 sm:$0xff]  }
 0x1a6   :  { %v4605_v4 = vpop.f32.mrf.mxu0  ;;  %5282 = vmatmul.mubr.bf16.gmra.mxu0 %v14171_v51  ;;  %5395 = vmatmul.mubr.bf16.gmra.mxu1 %v14172_v54  ;;  %v4718_v15 = vpop.f32.mrf.mxu1  ;;  %v7347_v13 = vsel %vm6995_vm4, %v4709_v32, %v7171_v49  ;;  %vm6996_vm6 = vcmp.ge.f32.partialorder %v4711_v63, 0.0  ;;  %v13251_v20 = vld [vmem:[#allocation6 + $0xb6c] ss:$44 sps:$4 sm:$0xff]   ;;  %v13254_v49 = vld [vmem:[#allocation6 + $0xb14] ss:$44 sps:$4 sm:$0xff]  }
 0x1a7   :  { %16756 = vst [vmem:[#allocation23_spill] sm:$0xff] %v14751_v7  ;;  %vm7006_vm5 = vcmp.ge.f32.partialorder %v4713_v61, 0.0  ;;  %v7182_v57 = vmul.f32 0.2, %v4713_v61  ;;  %v4606_v39 = vadd.f32 %v4605_v4, %v14663_v21  ;;  %v4715_v8 = vadd.f32 %v4714_v58, %v4602_v55  ;;  %5464 = vmatpush1.bf16.msra.mxu0 %v13240_v33  ;;  %5291 = vmatprep.mubr.bf16.mxu0 %v14173_v14  ;;  %v13273_v33 = vld [vmem:[#allocation6 + $0x1198] ss:$44 sps:$4 sm:$0xff]  }
 0x1a8   :  { %v4607_v17 = vpop.f32.mrf.mxu0  ;;  %v4720_v12 = vpop.f32.mrf.mxu1  ;;  %5465 = vmatprep.subr.bf16.mxu0 %v13245_v42  ;;  %5404 = vmatprep.mubr.bf16.mxu1 %v14174_v19  ;;  %v7348_v58 = vsel %vm6996_vm6, %v4711_v63, %v7172_v38  ;;  %v13252_v51 = vld [vmem:[#allocation6 + $0xb10] ss:$44 sps:$4 sm:$0xff]   ;;  %v13282_v54 = vld [vmem:[#allocation6 + $0x1140] ss:$44 sps:$4 sm:$0xff]   ;;  %v14175_v63 = vld [vmem:[#allocation3 + $0xa8] ss:$28 sps:$4 sm:$0xff]  }
 0x1a9   :  { %v7358_v23 = vsel %vm7006_vm5, %v4713_v61, %v7182_v57  ;;  %vm7007_vm7 = vcmp.ge.f32.partialorder %v4715_v8, 0.0  ;;  %v7183_v52 = vmul.f32 0.2, %v4715_v8  ;;  %v4608_v21 = vadd.f32 %v4607_v17, %v14667_v30  ;;  %5575 = vmatpush1.bf16.msra.mxu1 %v13264_v46  ;;  %v14176_v38 = vld [vmem:[#allocation3 + $0xb0] ss:$28 sps:$4 sm:$0xff]  }
 0x1aa   :  { %v14757_v29 = vpack.c.bf16 %v7358_v23, %v7347_v13  ;;  %v4719_v25 = vadd.f32 %v4718_v15, %v4606_v39  ;;  %v4609_v32 = vpop.f32.mrf.mxu0  ;;  %v4722_v37 = vpop.f32.mrf.mxu1  ;;  %5576 = vmatprep.subr.bf16.mxu1 %v13275_v45  ;;  %v13260_v39 = vld [vmem:[#allocation6 + $0x103c] ss:$44 sps:$4 sm:$0xff]   ;;  %v14177_v13 = vld [vmem:[#allocation3 + $0xe4] ss:$28 sps:$4 sm:$0xff]  }
 0x1ab   :  { %v4610_v42 = vadd.f32 %v4609_v32, %v14670_v36  ;;  %v4721_v5 = vadd.f32 %v4720_v12, %v4608_v21  ;;  %5466 = vmatpush1.bf16.msra.mxu0 %v13243_v16  ;;  %v7359_v31 = vsel %vm7007_vm7, %v4715_v8, %v7183_v52  ;;  %v13284_v36 = vld [vmem:[#allocation6 + $0x1144] ss:$44 sps:$4 sm:$0xff]   ;;  %v13290_v8 = vld [vmem:[#allocation6 + $0x10ec] ss:$44 sps:$4 sm:$0xff]  }
 0x1ac   :  { %16757 = vst [vmem:[#allocation24_spill] sm:$0xff] %v14757_v29  ;;  %v7193_v26 = vmul.f32 0.2, %v4719_v25  ;;  %v4611_v30 = vpop.f32.mrf.mxu0  ;;  %v4724_v55 = vpop.f32.mrf.mxu1  ;;  %5467 = vmatprep.subr.bf16.mxu0 %v13251_v20  ;;  %v14762_v61 = vpack.c.bf16 %v7359_v31, %v7348_v58  ;;  %vm7017_vm8 = vcmp.ge.f32.partialorder %v4719_v25, 0.0  ;;  %v14178_v20 = vld [vmem:[#allocation3 + $0xec] ss:$28 sps:$4 sm:$0xff]  }
 0x1ad   :  { %v4612_v46 = vadd.f32 %v4611_v30, %v14673_v48  ;;  %v4723_v4 = vadd.f32 %v4722_v37, %v4610_v42  ;;  %5577 = vmatpush1.bf16.msra.mxu1 %v13273_v33  ;;  %vm7018_vm9 = vcmp.ge.f32.partialorder %v4721_v5, 0.0  ;;  %v7194_v15 = vmul.f32 0.2, %v4721_v5  ;;  %v13258_v33 = vld [vmem:[#allocation6 + $0x1038] ss:$44 sps:$4 sm:$0xff]  }
 0x1ae   :  { %16758 = vst [vmem:[#allocation25_spill] sm:$0xff] %v14762_v61  ;;  %v4615_v45 = vpop.f32.mrf.mxu0  ;;  %5292 = vmatmul.mubr.bf16.gmra.mxu0 %v14175_v63  ;;  %5405 = vmatmul.mubr.bf16.gmra.mxu1 %v14176_v38  ;;  %v4728_v57 = vpop.f32.mrf.mxu1  ;;  %v7369_v17 = vsel %vm7017_vm8, %v4719_v25, %v7193_v26  ;;  %v13263_v42 = vld [vmem:[#allocation6 + $0xfe4] ss:$44 sps:$4 sm:$0xff]   ;;  %v13269_v63 = vld [vmem:[#allocation6 + $0xf8c] ss:$44 sps:$4 sm:$0xff]  }
 0x1af   :  { %vm7028_vm10 = vcmp.ge.f32.partialorder %v4723_v4, 0.0  ;;  %v7204_v16 = vmul.f32 0.2, %v4723_v4  ;;  %v4616_v14 = vadd.f32 %v4615_v45, %v14676_v53  ;;  %v4725_v48 = vadd.f32 %v4724_v55, %v4612_v46  ;;  %5468 = vmatpush1.bf16.msra.mxu0 %v13249_v35  ;;  %5301 = vmatprep.mubr.bf16.mxu0 %v14177_v13  ;;  %v13296_v38 = vld [vmem:[#allocation6 + $0x1094] ss:$44 sps:$4 sm:$0xff]  }
 0x1b0   :  { %v4617_v12 = vpop.f32.mrf.mxu0  ;;  %v4730_v19 = vpop.f32.mrf.mxu1  ;;  %5469 = vmatprep.subr.bf16.mxu0 %v13254_v49  ;;  %5414 = vmatprep.mubr.bf16.mxu1 %v14178_v20  ;;  %v7370_v25 = vsel %vm7018_vm9, %v4721_v5, %v7194_v15  ;;  %v14182_v13 = vld [vmem:[#allocation3 + $0x124] ss:$28 sps:$4 sm:$0xff]   ;;  %v13267_v20 = vld [vmem:[#allocation6 + $0xf88] ss:$44 sps:$4 sm:$0xff]  }
 0x1b1   :  { %v7380_v23 = vsel %vm7028_vm10, %v4723_v4, %v7204_v16  ;;  %vm7029_vm11 = vcmp.ge.f32.partialorder %v4725_v48, 0.0  ;;  %v7205_v52 = vmul.f32 0.2, %v4725_v48  ;;  %v4618_v21 = vadd.f32 %v4617_v12, %v14680_v0  ;;  %5578 = vmatprep.subr.bf16.mxu1 %v13284_v36  ;;  %v13288_v36 = vld [vmem:[#allocation6 + $0x10e8] ss:$44 sps:$4 sm:$0xff]  }
 0x1b2   :  { %v14768_v32 = vpack.c.bf16 %v7380_v23, %v7369_v17  ;;  %v4729_v53 = vadd.f32 %v4728_v57, %v4616_v14  ;;  %v4619_v35 = vpop.f32.mrf.mxu0  ;;  %v4732_v37 = vpop.f32.mrf.mxu1  ;;  %5579 = vmatpush1.bf16.msra.mxu1 %v13282_v54  ;;  %v13261_v54 = vld [vmem:[#allocation6 + $0xfe0] ss:$44 sps:$4 sm:$0xff]   ;;  %v14181_v16 = vld [vmem:[#allocation3 + $0x11c] ss:$28 sps:$4 sm:$0xff]  }
 0x1b3   :  { %v4620_v49 = vadd.f32 %v4619_v35, %v14683_v9  ;;  %v4731_v58 = vadd.f32 %v4730_v19, %v4618_v21  ;;  %5470 = vmatpush1.bf16.msra.mxu0 %v13252_v51  ;;  %5580 = vmatprep.subr.bf16.mxu1 %v13290_v8  ;;  %v7381_v31 = vsel %vm7029_vm11, %v4725_v48, %v7205_v52  ;;  %v14179_v9 = vld [vmem:[#allocation3 + $0xe0] ss:$28 sps:$4 sm:$0xff]   ;;  %v14180_v51 = vld [vmem:[#allocation3 + $0xe8] ss:$28 sps:$4 sm:$0xff]  }
 0x1b4   :  { %16759 = vst [vmem:[#allocation26_spill] sm:$0xff] %v14768_v32  ;;  %v7215_v26 = vmul.f32 0.2, %v4729_v53  ;;  %v4621_v0 = vpop.f32.mrf.mxu0  ;;  %v4734_v30 = vpop.f32.mrf.mxu1  ;;  %5471 = vmatprep.subr.bf16.mxu0 %v13260_v39  ;;  %v14773_v55 = vpack.c.bf16 %v7381_v31, %v7370_v25  ;;  %vm7039_vm12 = vcmp.ge.f32.partialorder %v4729_v53, 0.0  ;;  %v13408_v32 = vld [vmem:[#allocation6 + $0xc20] ss:$44 sps:$4 sm:$0xff]  }
 0x1b5   :  { %v4622_v46 = vadd.f32 %v4621_v0, %v14686_v22  ;;  %v4733_v4 = vadd.f32 %v4732_v37, %v4620_v49  ;;  %v7216_v5 = vmul.f32 0.2, %v4731_v58  ;;  %vm7040_vm14 = vcmp.ge.f32.partialorder %v4731_v58, 0.0  ;;  %v14282_v61 = vld [vmem:[#allocation3 + $0x40] ss:$28 sps:$4 sm:$0xff]  }
 0x1b6   :  { %16760 = vst [vmem:[#allocation27_spill] sm:$0xff] %v14773_v55  ;;  %v4625_v15 = vpop.f32.mrf.mxu0  ;;  %5302 = vmatmul.mubr.bf16.gmra.mxu0 %v14179_v9  ;;  %5415 = vmatmul.mubr.bf16.gmra.mxu1 %v14180_v51  ;;  %v4738_v45 = vpop.f32.mrf.mxu1  ;;  %v7391_v22 = vsel %vm7039_vm12, %v4729_v53, %v7215_v26  ;;  %v13272_v53 = vld [vmem:[#allocation6 + $0xf34] ss:$44 sps:$4 sm:$0xff]  }
 0x1b7   :  { %vm7050_vm13 = vcmp.ge.f32.partialorder %v4733_v4, 0.0  ;;  %v7226_v57 = vmul.f32 0.2, %v4733_v4  ;;  %v4626_v39 = vadd.f32 %v4625_v15, %v14689_v27  ;;  %v4735_v8 = vadd.f32 %v4734_v30, %v4622_v46  ;;  %5472 = vmatpush2.bf16.msra.mxu0 %v13258_v33  ;;  %5311 = vmatprep.mubr.bf16.mxu0 %v14181_v16  ;;  %v13294_v27 = vld [vmem:[#allocation6 + $0x1090] ss:$44 sps:$4 sm:$0xff]  }
 0x1b8   :  { %v4627_v14 = vpop.f32.mrf.mxu0  ;;  %v4740_v48 = vpop.f32.mrf.mxu1  ;;  %5473 = vmatprep.subr.bf16.mxu0 %v13263_v42  ;;  %5424 = vmatprep.mubr.bf16.mxu1 %v14182_v13  ;;  %v7392_v42 = vsel %vm7040_vm14, %v4731_v58, %v7216_v5  ;;  %v13302_v46 = vld [vmem:[#allocation6 + $0x804] ss:$44 sps:$4 sm:$0xff]   ;;  %v13278_v15 = vld [vmem:[#allocation6 + $0xedc] ss:$44 sps:$4 sm:$0xff]  }
 0x1b9   :  { %v7402_v17 = vsel %vm7050_vm13, %v4733_v4, %v7226_v57  ;;  %vm7051_vm15 = vcmp.ge.f32.partialorder %v4735_v8, 0.0  ;;  %v7227_v12 = vmul.f32 0.2, %v4735_v8  ;;  %v4628_v19 = vadd.f32 %v4627_v14, %v14693_v40  ;;  %5581 = vmatpush1.bf16.msra.mxu1 %v13288_v36  ;;  %v14183_v36 = vld [vmem:[#allocation3 + $0x118] ss:$28 sps:$4 sm:$0xff]  }
 0x1ba   :  { %v14779_v23 = vpack.c.bf16 %v7402_v17, %v7391_v22  ;;  %v4739_v52 = vadd.f32 %v4738_v45, %v4626_v39  ;;  %v4629_v21 = vpop.f32.mrf.mxu0  ;;  %v4742_v33 = vpop.f32.mrf.mxu1  ;;  %5582 = vmatprep.subr.bf16.mxu1 %v13296_v38  ;;  %v13270_v5 = vld [vmem:[#allocation6 + $0xf30] ss:$44 sps:$4 sm:$0xff]   ;;  %v13276_v14 = vld [vmem:[#allocation6 + $0xed8] ss:$44 sps:$4 sm:$0xff]  }
 0x1bb   :  { %v4630_v35 = vadd.f32 %v4629_v21, %v14696_v44  ;;  %v4741_v37 = vadd.f32 %v4740_v48, %v4628_v19  ;;  %5474 = vmatpush2.bf16.msra.mxu0 %v13261_v54  ;;  %v7403_v25 = vsel %vm7051_vm15, %v4735_v8, %v7227_v12  ;;  %v14184_v54 = vld [vmem:[#allocation3 + $0x120] ss:$28 sps:$4 sm:$0xff]   ;;  %v13281_v12 = vld [vmem:[#allocation6 + $0xe84] ss:$44 sps:$4 sm:$0xff]  }
 0x1bc   :  { %16761 = vst [vmem:[#allocation28_spill] sm:$0xff] %v14779_v23  ;;  %v7237_v49 = vmul.f32 0.2, %v4739_v52  ;;  %v4631_v40 = vpop.f32.mrf.mxu0  ;;  %v4744_v31 = vpop.f32.mrf.mxu1  ;;  %5475 = vmatprep.subr.bf16.mxu0 %v13269_v63  ;;  %v14784_v26 = vpack.c.bf16 %v7403_v25, %v7392_v42  ;;  %vm7061_vm0 = vcmp.ge.f32.partialorder %v4739_v52, 0.0  ;;  %v14185_v63 = vld [vmem:[#allocation3 + $0x154] ss:$28 sps:$4 sm:$0xff]  }
 0x1bd   :  { %v4632_v0 = vadd.f32 %v4631_v40, %v14699_v59  ;;  %v4743_v30 = vadd.f32 %v4742_v33, %v4630_v35  ;;  %5583 = vmatpush1.bf16.msra.mxu1 %v13294_v27  ;;  %v7238_v4 = vmul.f32 0.2, %v4741_v37  ;;  %vm7062_vm2 = vcmp.ge.f32.partialorder %v4741_v37, 0.0  ;;  %v14186_v39 = vld [vmem:[#allocation3 + $0x15c] ss:$28 sps:$4 sm:$0xff]  }
 0x1be   :  { %16762 = vst [vmem:[#allocation29_spill] sm:$0xff] %v14784_v26  ;;  %v4635_v44 = vpop.f32.mrf.mxu0  ;;  %5312 = vmatmul.mubr.bf16.gmra.mxu0 %v14183_v36  ;;  %5425 = vmatmul.mubr.bf16.gmra.mxu1 %v14184_v54  ;;  %v4748_v58 = vpop.f32.mrf.mxu1  ;;  %v7413_v59 = vsel %vm7061_vm0, %v4739_v52, %v7237_v49  ;;  %v14187_v40 = vld [vmem:[#allocation3 + $0x150] ss:$28 sps:$4 sm:$0xff]   ;;  %v14224_v26 = vld [vmem:[#allocation3 + $0x38] ss:$28 sps:$4 sm:$0xff]  }
 0x1bf   :  { %vm7072_vm1 = vcmp.ge.f32.partialorder %v4743_v30, 0.0  ;;  %v7248_v9 = vmul.f32 0.2, %v4743_v30  ;;  %v4636_v51 = vadd.f32 %v4635_v44, %v14702_v1  ;;  %v4745_v45 = vadd.f32 %v4744_v31, %v4632_v0  ;;  %5476 = vmatpush2.bf16.msra.mxu0 %v13267_v20  ;;  %5321 = vmatprep.mubr.bf16.mxu0 %v14185_v63  ;;  %v13279_v0 = vld [vmem:[#allocation6 + $0xe80] ss:$44 sps:$4 sm:$0xff]  }
 0x1c0   :  { %v4637_v38 = vpop.f32.mrf.mxu0  ;;  %v4750_v57 = vpop.f32.mrf.mxu1  ;;  %5477 = vmatprep.subr.bf16.mxu0 %v13272_v53  ;;  %5434 = vmatprep.mubr.bf16.mxu1 %v14186_v39  ;;  %v7414_v27 = vsel %vm7062_vm2, %v4741_v37, %v7238_v4  ;;  %v13287_v37 = vld [vmem:[#allocation6 + $0xe2c] ss:$44 sps:$4 sm:$0xff]  }
 0x1c1   :  { %v7424_v8 = vsel %vm7072_vm1, %v4743_v30, %v7248_v9  ;;  %vm7073_vm3 = vcmp.ge.f32.partialorder %v4745_v45, 0.0  ;;  %v7249_v16 = vmul.f32 0.2, %v4745_v45  ;;  %v4638_v22 = vadd.f32 %v4637_v38, %v14706_v18  ;;  %5794 = vmatprep.subr.bf16.mxu1 %v13302_v46  ;;  %v14189_v44 = vld [vmem:[#allocation3 + $0x18c] ss:$28 sps:$4 sm:$0xff]  }
 0x1c2   :  { %v14790_v1 = vpack.c.bf16 %v7424_v8, %v7413_v59  ;;  %v4749_v48 = vadd.f32 %v4748_v58, %v4636_v51  ;;  %v4639_v13 = vpop.f32.mrf.mxu0  ;;  %v4752_v17 = vpop.f32.mrf.mxu1  ;;  %v14190_v58 = vld [vmem:[#allocation3 + $0x194] ss:$28 sps:$4 sm:$0xff]  }
 0x1c3   :  { %v4640_v19 = vadd.f32 %v4639_v13, %v14709_v24  ;;  %v4751_v20 = vadd.f32 %v4750_v57, %v4638_v22  ;;  %5478 = vmatpush2.bf16.msra.mxu0 %v13270_v5  ;;  %v7425_v52 = vsel %vm7073_vm3, %v4745_v45, %v7249_v16  ;;  %v14188_v24 = vld [vmem:[#allocation3 + $0x158] ss:$28 sps:$4 sm:$0xff]  }
 0x1c4   :  { %16763 = vst [vmem:[#allocation30_spill] sm:$0xff] %v14790_v1  ;;  %v7259_v21 = vmul.f32 0.2, %v4749_v48  ;;  %v4641_v33 = vpop.f32.mrf.mxu0  ;;  %v4754_v53 = vpop.f32.mrf.mxu1  ;;  %5479 = vmatprep.subr.bf16.mxu0 %v13278_v15  ;;  %v14794_v18 = vpack.c.bf16 %v7425_v52, %v7414_v27  ;;  %vm7083_vm4 = vcmp.ge.f32.partialorder %v4749_v48, 0.0  ;;  %v13285_v59 = vld [vmem:[#allocation6 + $0xe28] ss:$44 sps:$4 sm:$0xff]  }
 0x1c5   :  { %v4642_v35 = vadd.f32 %v4641_v33, %v14712_v41  ;;  %v4753_v42 = vadd.f32 %v4752_v17, %v4640_v19  ;;  %v7260_v25 = vmul.f32 0.2, %v4751_v20  ;;  %vm7084_vm6 = vcmp.ge.f32.partialorder %v4751_v20, 0.0  ;;  %v13293_v38 = vld [vmem:[#allocation6 + $0xdd4] ss:$44 sps:$4 sm:$0xff]  }
 0x1c6   :  { %16764 = vst [vmem:[#allocation31_spill] sm:$0xff] %v14794_v18  ;;  %v4645_v49 = vpop.f32.mrf.mxu0  ;;  %5322 = vmatmul.mubr.bf16.gmra.mxu0 %v14187_v40  ;;  %5435 = vmatmul.mubr.bf16.gmra.mxu1 %v14188_v24  ;;  %v4758_v31 = vpop.f32.mrf.mxu1  ;;  %v7435_v41 = vsel %vm7083_vm4, %v4749_v48, %v7259_v21  ;;  %v14808_v19 = vsub.s32 2, %v14620_v60  ;;  %v14191_v52 = vld [vmem:[#allocation3 + $0x188] ss:$28 sps:$4 sm:$0xff]   ;;  %v13393_v18 = vld [vmem:[#allocation6 + $0xd80] ss:$44 sps:$4 sm:$0xff]  }
 0x1c7   :  { %vm7094_vm5 = vcmp.ge.f32.partialorder %v4753_v42, 0.0  ;;  %v7270_v30 = vmul.f32 0.2, %v4753_v42  ;;  %v4646_v46 = vadd.f32 %v4645_v49, %v14715_v47  ;;  %v4755_v4 = vadd.f32 %v4754_v53, %v4642_v35  ;;  %5480 = vmatpush2.bf16.msra.mxu0 %v13276_v14  ;;  %5331 = vmatprep.mubr.bf16.mxu0 %v14189_v44  ;;  %v13299_v33 = vld [vmem:[#allocation6 + $0x284] ss:$44 sps:$4 sm:$0xff]  }
 0x1c8   :  { %v4647_v36 = vpop.f32.mrf.mxu0  ;;  %v4760_v54 = vpop.f32.mrf.mxu1  ;;  %5481 = vmatprep.subr.bf16.mxu0 %v13281_v12  ;;  %5444 = vmatprep.mubr.bf16.mxu1 %v14190_v58  ;;  %v7436_v8 = vsel %vm7084_vm6, %v4751_v20, %v7260_v25  ;;  %v13291_v12 = vld [vmem:[#allocation6 + $0xdd0] ss:$44 sps:$4 sm:$0xff]   ;;  %16767 = vst [vmem:[#allocation34_spill] sm:$0xff] %v14808_v19  ;;  %v860_v53 = vsub.s32 3, %v14620_v60  ;;  %v14194_v44 = vld [vmem:[#allocation8] sm:$0xff] }
 0x1c9   :  { %v7446_v5 = vsel %vm7094_vm5, %v4753_v42, %v7270_v30  ;;  %vm7095_vm7 = vcmp.ge.f32.partialorder %v4755_v4, 0.0  ;;  %v7271_v15 = vmul.f32 0.2, %v4755_v4  ;;  %v4648_v9 = vadd.f32 %v4647_v36, %v14719_v62  ;;  %v14192_v20 = vld [vmem:[#allocation3 + $0x190] ss:$28 sps:$4 sm:$0xff]  }
 0x1ca   :  { %v14800_v51 = vpack.c.bf16 %v7446_v5, %v7435_v41  ;;  %v4759_v47 = vadd.f32 %v4758_v31, %v4646_v46  ;;  %v4649_v45 = vpop.f32.mrf.mxu0  ;;  %v4762_v63 = vpop.f32.mrf.mxu1  ;;  %v14193_v25 = vld [vmem:[#allocation3 + $0x14] ss:$28 sps:$4 sm:$0xff]   ;;  %v14818_v41 = vrot.slane %v14194_v44, %v14808_v19  ;;  %v13297_v36 = vld [vmem:[#allocation6 + $0x280] ss:$44 sps:$4 sm:$0xff]  }
 0x1cb   :  { %v4650_v57 = vadd.f32 %v4649_v45, %v14722_v10  ;;  %v4761_v39 = vadd.f32 %v4760_v54, %v4648_v9  ;;  %5482 = vmatpush2.bf16.msra.mxu0 %v13279_v0  ;;  %v7447_v16 = vsel %vm7095_vm7, %v4755_v4, %v7271_v15  ;;  %v13300_v54 = vld [vmem:[#allocation6 + $0x800] ss:$44 sps:$4 sm:$0xff]  }
 0x1cc   :  { %16765 = vst [vmem:[#allocation32_spill] sm:$0xff] %v14800_v51  ;;  %v7281_v22 = vmul.f32 0.2, %v4759_v47  ;;  %v4651_v14 = vpop.f32.mrf.mxu0  ;;  %v4764_v48 = vpop.f32.mrf.mxu1  ;;  %5483 = vmatprep.subr.bf16.mxu0 %v13287_v37  ;;  %v14804_v13 = vpack.c.bf16 %v7447_v16, %v7436_v8  ;;  %vm7105_vm8 = vcmp.ge.f32.partialorder %v4759_v47, 0.0  ;;  %v13305_v58 = vld [vmem:[#allocation6 + $0x22c] ss:$44 sps:$4 sm:$0xff]   ;;  %v14826_v16 = vrot.slane %v14194_v44, %v860_v53 }
 0x1cd   :  { %v4652_v62 = vadd.f32 %v4651_v14, %v14725_v28  ;;  %v4763_v17 = vadd.f32 %v4762_v63, %v4650_v57  ;;  %vm7106_vm9 = vcmp.ge.f32.partialorder %v4761_v39, 0.0  ;;  %v7282_v10 = vmul.f32 0.2, %v4761_v39  ;;  %v14213_v19 = vld [vmem:[#allocation3 + $0x160] ss:$28 sps:$4 sm:$0xff]  }
 0x1ce   :  { %16766 = vst [vmem:[#allocation33_spill] sm:$0xff] %v14804_v13  ;;  %v4655_v27 = vpop.f32.mrf.mxu0  ;;  %5332 = vmatmul.mubr.bf16.gmra.mxu0 %v14191_v52  ;;  %5445 = vmatmul.mubr.bf16.gmra.mxu1 %v14192_v20  ;;  %v4768_v21 = vpop.f32.mrf.mxu1  ;;  %v7457_v49 = vsel %vm7105_vm8, %v4759_v47, %v7281_v22  ;;  %v13306_v22 = vld [vmem:[#allocation6 + $0x7a8] ss:$44 sps:$4 sm:$0xff]   ;;  %v14217_v13 = vld [vmem:[#allocation3 + $0x1a0] ss:$28 sps:$4 sm:$0xff]  }
 0x1cf   :  { %vm7116_vm10 = vcmp.ge.f32.partialorder %v4763_v17, 0.0  ;;  %v7292_v35 = vmul.f32 0.2, %v4763_v17  ;;  %v4656_v28 = vadd.f32 %v4655_v27, %v14728_v34  ;;  %v4765_v42 = vadd.f32 %v4764_v48, %v4652_v62  ;;  %5484 = vmatpush2.bf16.msra.mxu0 %v13285_v59  ;;  %5487 = vmatprep.mubr.bf16.mxu0 %v14193_v25  ;;  %v13308_v59 = vld [vmem:[#allocation6 + $0x7ac] ss:$44 sps:$4 sm:$0xff]  }
 0x1d0   :  { %v4657_v40 = vpop.f32.mrf.mxu0  ;;  %v4770_v24 = vpop.f32.mrf.mxu1  ;;  %5485 = vmatprep.subr.bf16.mxu0 %v13293_v38  ;;  %5600 = vmatprep.mubr.bf16.mxu1 %v16667_v3  ;;  %v7458_v9 = vsel %vm7106_vm9, %v4761_v39, %v7282_v10  ;;  %v14195_v48 = vld [vmem:[#allocation3 + $0x10] ss:$28 sps:$4 sm:$0xff]   ;;  %v14196_v62 = vld [vmem:[#allocation3 + $0x18] ss:$28 sps:$4 sm:$0xff]  }
 0x1d1   :  { %v7468_v31 = vsel %vm7116_vm10, %v4763_v17, %v7292_v35  ;;  %vm7117_vm11 = vcmp.ge.f32.partialorder %v4765_v42, 0.0  ;;  %v7293_v0 = vmul.f32 0.2, %v4765_v42  ;;  %v4658_v37 = vadd.f32 %v4657_v40, %v14731_v50  ;;  %v13314_v10 = vld [vmem:[#allocation6 + $0x754] ss:$44 sps:$4 sm:$0xff]  }
 0x1d2   :  { %v14815_v30 = vpack.c.bf16 %v7468_v31, %v7457_v49  ;;  %v4769_v46 = vadd.f32 %v4768_v21, %v4656_v28  ;;  %v4659_v34 = vpop.f32.mrf.mxu0  ;;  %v4772_v4 = vpop.f32.mrf.mxu1  ;;  %v13309_v25 = vld [vmem:[#allocation6 + $0x1d0] ss:$44 sps:$4 sm:$0xff]   ;;  %v14216_v51 = vld [vmem:[#allocation3 + $0x198] ss:$28 sps:$4 sm:$0xff]  }
 0x1d3   :  { %v4660_v5 = vadd.f32 %v4659_v34, %v14734_v56  ;;  %v4771_v15 = vadd.f32 %v4770_v24, %v4658_v37  ;;  %5486 = vmatpush2.bf16.msra.mxu0 %v13291_v12  ;;  %v7469_v50 = vsel %vm7117_vm11, %v4765_v42, %v7293_v0  ;;  %v13303_v56 = vld [vmem:[#allocation6 + $0x228] ss:$44 sps:$4 sm:$0xff]   ;;  %v13312_v0 = vld [vmem:[#allocation6 + $0x750] ss:$44 sps:$4 sm:$0xff]  }
 0x1d4   :  { %16768 = vst [vmem:[#allocation35_spill] sm:$0xff] %v14815_v30  ;;  %v7303_v47 = vmul.f32 0.2, %v4769_v46  ;;  %v4661_v45 = vpop.f32.mrf.mxu0  ;;  %v4774_v63 = vpop.f32.mrf.mxu1  ;;  %5681 = vmatprep.subr.bf16.mxu0 %v13299_v33  ;;  %v14823_v38 = vpack.c.bf16 %v7469_v50, %v7458_v9  ;;  %vm7127_vm12 = vcmp.ge.f32.partialorder %v4769_v46, 0.0  ;;  %v13311_v12 = vld [vmem:[#allocation6 + $0x1d4] ss:$44 sps:$4 sm:$0xff]  }
 0x1d5   :  { %v4662_v57 = vadd.f32 %v4661_v45, %v14736_v11  ;;  %v4773_v8 = vadd.f32 %v4772_v4, %v4660_v5  ;;  %vm7128_vm13 = vcmp.ge.f32.partialorder %v4771_v15, 0.0  ;;  %v7304_v14 = vmul.f32 0.2, %v4771_v15  ;;  %v14197_v42 = vld [vmem:[#allocation3 + $0x4c] ss:$28 sps:$4 sm:$0xff]  }
 0x1d6   :  { %16769 = vst [vmem:[#allocation36_spill] sm:$0xff] %v14823_v38  ;;  %v4811_v39 = vpop.f32.mrf.mxu0  ;;  %5488 = vmatmul.mubr.bf16.vlgmr.msra.gmra.mxu0 %v14195_v48  ;;  %5601 = vmatmul.mubr.bf16.vlgmr.msra.gmra.mxu1 %v14196_v62  ;;  %v4924_v17 = vpop.f32.mrf.mxu1  ;;  %v7479_v20 = vsel %vm7127_vm12, %v4769_v46, %v7303_v47  ;;  %v13317_v37 = vld [vmem:[#allocation6 + $0x17c] ss:$44 sps:$4 sm:$0xff]   ;;  %v13315_v47 = vld [vmem:[#allocation6 + $0x178] ss:$44 sps:$4 sm:$0xff]  }
 0x1d7   :  { %vm7138_vm14 = vcmp.ge.f32.partialorder %v4773_v8, 0.0  ;;  %v7314_v27 = vmul.f32 0.2, %v4773_v8  ;;  %v4775_v52 = vadd.f32 %v4774_v63, %v4662_v57  ;;  %v4812_v11 = vadd.f32 %v4811_v39, %v14818_v41  ;;  %5682 = vmatpush1.bf16.msra.mxu0 %v13297_v36  ;;  %5795 = vmatpush1.bf16.msra.mxu1 %v13300_v54  ;;  %v13320_v46 = vld [vmem:[#allocation6 + $0x6fc] ss:$44 sps:$4 sm:$0xff]  }
 0x1d8   :  { %v4813_v21 = vpop.f32.mrf.mxu0  ;;  %v4926_v33 = vpop.f32.mrf.mxu1  ;;  %5683 = vmatprep.subr.bf16.mxu0 %v13305_v58  ;;  %5796 = vmatprep.subr.bf16.mxu1 %v13308_v59  ;;  %v7480_v34 = vsel %vm7128_vm13, %v4771_v15, %v7304_v14  ;;  %v13318_v15 = vld [vmem:[#allocation6 + $0x6f8] ss:$44 sps:$4 sm:$0xff]   ;;  %v14199_v59 = vld [vmem:[#allocation3 + $0x50] ss:$28 sps:$4 sm:$0xff]  }
 0x1d9   :  { %v7490_v53 = vsel %vm7138_vm14, %v4773_v8, %v7314_v27  ;;  %vm7139_vm15 = vcmp.ge.f32.partialorder %v4775_v52, 0.0  ;;  %v7315_v35 = vmul.f32 0.2, %v4775_v52  ;;  %v4814_v28 = vadd.f32 %v4813_v21, %v14826_v16  ;;  %5497 = vmatprep.mubr.bf16.mxu0 %v14197_v42  ;;  %5610 = vmatprep.mubr.bf16.mxu1 %v16667_v3  ;;  %v14198_v63 = vld [vmem:[#allocation3 + $0x48] ss:$28 sps:$4 sm:$0xff]  }
 0x1da   :  { %v14832_v49 = vpack.c.bf16 %v7490_v53, %v7479_v20  ;;  %v14834_v40 = vadd.f32 %v4924_v17, %v4812_v11  ;;  %v4815_v24 = vpop.f32.mrf.mxu0  ;;  %v4928_v31 = vpop.f32.mrf.mxu1  ;;  %v13323_v8 = vld [vmem:[#allocation6 + $0x124] ss:$44 sps:$4 sm:$0xff]   ;;  %v13324_v27 = vld [vmem:[#allocation6 + $0x6a0] ss:$44 sps:$4 sm:$0xff]  }
 0x1db   :  { %v4816_v4 = vadd.f32 %v4815_v24, %v14818_v41  ;;  %v14838_v44 = vadd.f32 %v4926_v33, %v4814_v28  ;;  %5684 = vmatpush1.bf16.msra.mxu0 %v13303_v56  ;;  %5797 = vmatpush1.bf16.msra.mxu1 %v13306_v22  ;;  %v7491_v36 = vsel %vm7139_vm15, %v4775_v52, %v7315_v35  ;;  %v13326_v56 = vld [vmem:[#allocation6 + $0x6a4] ss:$44 sps:$4 sm:$0xff]   ;;  %v13329_v20 = vld [vmem:[#allocation6 + $0xcc] ss:$44 sps:$4 sm:$0xff]   ;;  %v13327_v24 = vld [vmem:[#allocation6 + $0xc8] ss:$44 sps:$4 sm:$0xff]  }
 0x1dc   :  { %16770 = vst [vmem:[#allocation37_spill] sm:$0xff] %v14832_v49  ;;  %v4817_v54 = vpop.f32.mrf.mxu0  ;;  %v4930_v58 = vpop.f32.mrf.mxu1  ;;  %5685 = vmatprep.subr.bf16.mxu0 %v13311_v12  ;;  %5798 = vmatprep.subr.bf16.mxu1 %v13314_v10  ;;  %v14841_v5 = vpack.c.bf16 %v7491_v36, %v7480_v34  ;;  %v14200_v12 = vld [vmem:[#allocation3 + $0x84] ss:$28 sps:$4 sm:$0xff]   ;;  %v13332_v21 = vld [vmem:[#allocation6 + $0x64c] ss:$44 sps:$4 sm:$0xff]  }
 0x1dd   :  { %v4818_v9 = vadd.f32 %v4817_v54, %v14826_v16  ;;  %v14844_v50 = vadd.f32 %v4928_v31, %v4816_v4  ;;  %v13321_v10 = vld [vmem:[#allocation6 + $0x120] ss:$44 sps:$4 sm:$0xff]   ;;  %v13330_v31 = vld [vmem:[#allocation6 + $0x648] ss:$44 sps:$4 sm:$0xff]  }
 0x1de   :  { %16771 = vst [vmem:[#allocation38_spill] sm:$0xff] %v14841_v5  ;;  %v4821_v45 = vpop.f32.mrf.mxu0  ;;  %5498 = vmatmul.mubr.bf16.gmra.mxu0 %v14198_v63  ;;  %5611 = vmatmul.mubr.bf16.gmra.mxu1 %v14199_v59  ;;  %v4934_v57 = vpop.f32.mrf.mxu1  ;;  %v13335_v4 = vld [vmem:[#allocation6 + $0x74] ss:$44 sps:$4 sm:$0xff]   ;;  %v14203_v63 = vld [vmem:[#allocation3 + $0xbc] ss:$28 sps:$4 sm:$0xff]  }
 0x1df   :  { %v4822_v22 = vadd.f32 %v4821_v45, %v14818_v41  ;;  %v14847_v14 = vadd.f32 %v4930_v58, %v4818_v9  ;;  %5686 = vmatpush1.bf16.msra.mxu0 %v13309_v25  ;;  %5799 = vmatpush1.bf16.msra.mxu1 %v13312_v0  ;;  %v13338_v36 = vld [vmem:[#allocation6 + $0x5f4] ss:$44 sps:$4 sm:$0xff]   ;;  %v13333_v59 = vld [vmem:[#allocation6 + $0x70] ss:$44 sps:$4 sm:$0xff]   ;;  %v14214_v49 = vld [vmem:[#allocation3 + $0x168] ss:$28 sps:$4 sm:$0xff]  }
 0x1e0   :  { %v4823_v39 = vpop.f32.mrf.mxu0  ;;  %v4936_v48 = vpop.f32.mrf.mxu1  ;;  %5687 = vmatprep.subr.bf16.mxu0 %v13317_v37  ;;  %5800 = vmatprep.subr.bf16.mxu1 %v13320_v46  ;;  %v14201_v37 = vld [vmem:[#allocation3 + $0x80] ss:$28 sps:$4 sm:$0xff]   ;;  %v14202_v46 = vld [vmem:[#allocation3 + $0x88] ss:$28 sps:$4 sm:$0xff]  }
 0x1e1   :  { %v4824_v62 = vadd.f32 %v4823_v39, %v14826_v16  ;;  %v14850_v17 = vadd.f32 %v4934_v57, %v4822_v22  ;;  %5507 = vmatprep.mubr.bf16.mxu0 %v14200_v12  ;;  %5620 = vmatprep.mubr.bf16.mxu1 %v16667_v3  ;;  %v13336_v57 = vld [vmem:[#allocation6 + $0x5f0] ss:$44 sps:$4 sm:$0xff]  }
 0x1e2   :  { %v4825_v52 = vpop.f32.mrf.mxu0  ;;  %v4938_v11 = vpop.f32.mrf.mxu1  ;;  %v13341_v22 = vld [vmem:[#allocation6 + $0x1c] ss:$44 sps:$4 sm:$0xff]  }
 0x1e3   :  { %v4826_v33 = vadd.f32 %v4825_v52, %v14818_v41  ;;  %v14854_v53 = vadd.f32 %v4936_v48, %v4824_v62  ;;  %5688 = vmatpush1.bf16.msra.mxu0 %v13315_v47  ;;  %5801 = vmatpush1.bf16.msra.mxu1 %v13318_v15  ;;  %v13344_v39 = vld [vmem:[#allocation6 + $0x59c] ss:$44 sps:$4 sm:$0xff]  }
 0x1e4   :  { %v4827_v35 = vpop.f32.mrf.mxu0  ;;  %v4940_v28 = vpop.f32.mrf.mxu1  ;;  %5689 = vmatprep.subr.bf16.mxu0 %v13323_v8  ;;  %5802 = vmatprep.subr.bf16.mxu1 %v13326_v56  ;;  %v13384_v5 = vld [vmem:[#allocation6 + $0x8b0] ss:$44 sps:$4 sm:$0xff]  }
 0x1e5   :  { %v4828_v42 = vadd.f32 %v4827_v35, %v14826_v16  ;;  %v14857_v25 = vadd.f32 %v4938_v11, %v4826_v33  ;;  %v13339_v11 = vld [vmem:[#allocation6 + $0x18] ss:$44 sps:$4 sm:$0xff]   ;;  %v14205_v35 = vld [vmem:[#allocation3 + $0xc0] ss:$28 sps:$4 sm:$0xff]  }
 0x1e6   :  { %v4831_v0 = vpop.f32.mrf.mxu0  ;;  %5508 = vmatmul.mubr.bf16.gmra.mxu0 %v14201_v37  ;;  %5621 = vmatmul.mubr.bf16.gmra.mxu1 %v14202_v46  ;;  %v4944_v34 = vpop.f32.mrf.mxu1  ;;  %v14204_v33 = vld [vmem:[#allocation3 + $0xb8] ss:$28 sps:$4 sm:$0xff]  }
 0x1e7   :  { %v4832_v54 = vadd.f32 %v4831_v0, %v14818_v41  ;;  %v14860_v58 = vadd.f32 %v4940_v28, %v4828_v42  ;;  %5690 = vmatpush1.bf16.msra.mxu0 %v13321_v10  ;;  %5803 = vmatpush1.bf16.msra.mxu1 %v13324_v27  ;;  %v13347_v42 = vld [vmem:[#allocation6 + $0x544] ss:$44 sps:$4 sm:$0xff]  }
 0x1e8   :  { %v4833_v9 = vpop.f32.mrf.mxu0  ;;  %v4946_v47 = vpop.f32.mrf.mxu1  ;;  %5691 = vmatprep.subr.bf16.mxu0 %v13329_v20  ;;  %5804 = vmatprep.subr.bf16.mxu1 %v13332_v21  ;;  %v13342_v20 = vld [vmem:[#allocation6 + $0x598] ss:$44 sps:$4 sm:$0xff]  }
 0x1e9   :  { %v4834_v15 = vadd.f32 %v4833_v9, %v14826_v16  ;;  %v14863_v45 = vadd.f32 %v4944_v34, %v4832_v54  ;;  %5517 = vmatprep.mubr.bf16.mxu0 %v14203_v63  ;;  %5630 = vmatprep.mubr.bf16.mxu1 %v16667_v3  ;;  %v13350_v0 = vld [vmem:[#allocation6 + $0xac4] ss:$44 sps:$4 sm:$0xff]   ;;  %v13345_v54 = vld [vmem:[#allocation6 + $0x540] ss:$44 sps:$4 sm:$0xff]  }
 0x1ea   :  { %v4835_v8 = vpop.f32.mrf.mxu0  ;;  %v4948_v56 = vpop.f32.mrf.mxu1  ;;  %v13348_v9 = vld [vmem:[#allocation6 + $0xac0] ss:$44 sps:$4 sm:$0xff]  }
 0x1eb   :  { %v4836_v48 = vadd.f32 %v4835_v8, %v14818_v41  ;;  %v14867_v62 = vadd.f32 %v4946_v47, %v4834_v15  ;;  %5692 = vmatpush1.bf16.msra.mxu0 %v13327_v24  ;;  %5805 = vmatpush1.bf16.msra.mxu1 %v13330_v31  ;;  %v13353_v63 = vld [vmem:[#allocation6 + $0x4ec] ss:$44 sps:$4 sm:$0xff]  }
 0x1ec   :  { %v4837_v12 = vpop.f32.mrf.mxu0  ;;  %v4950_v10 = vpop.f32.mrf.mxu1  ;;  %5693 = vmatprep.subr.bf16.mxu0 %v13335_v4  ;;  %5806 = vmatprep.subr.bf16.mxu1 %v13338_v36  ;;  %v14206_v36 = vld [vmem:[#allocation3 + $0xf4] ss:$28 sps:$4 sm:$0xff]   ;;  %v13356_v8 = vld [vmem:[#allocation6 + $0xa6c] ss:$44 sps:$4 sm:$0xff]  }
 0x1ed   :  { %v4838_v27 = vadd.f32 %v4837_v12, %v14826_v16  ;;  %v14870_v52 = vadd.f32 %v4948_v56, %v4836_v48  ;;  %v13351_v12 = vld [vmem:[#allocation6 + $0x4e8] ss:$44 sps:$4 sm:$0xff]  }
 0x1ee   :  { %v4841_v21 = vpop.f32.mrf.mxu0  ;;  %5518 = vmatmul.mubr.bf16.gmra.mxu0 %v14204_v33  ;;  %5631 = vmatmul.mubr.bf16.gmra.mxu1 %v14205_v35  ;;  %v4954_v28 = vpop.f32.mrf.mxu1  ;;  %v14208_v33 = vld [vmem:[#allocation3 + $0xf8] ss:$28 sps:$4 sm:$0xff]  }
 0x1ef   :  { %v4842_v24 = vadd.f32 %v4841_v21, %v14818_v41  ;;  %v14873_v31 = vadd.f32 %v4950_v10, %v4838_v27  ;;  %5694 = vmatpush1.bf16.msra.mxu0 %v13333_v59  ;;  %5807 = vmatpush1.bf16.msra.mxu1 %v13336_v57  ;;  %v13354_v10 = vld [vmem:[#allocation6 + $0xa68] ss:$44 sps:$4 sm:$0xff]   ;;  %v14207_v21 = vld [vmem:[#allocation3 + $0xf0] ss:$28 sps:$4 sm:$0xff]  }
 0x1f0   :  { %v4843_v37 = vpop.f32.mrf.mxu0  ;;  %v4956_v46 = vpop.f32.mrf.mxu1  ;;  %5695 = vmatprep.subr.bf16.mxu0 %v13341_v22  ;;  %5808 = vmatprep.subr.bf16.mxu1 %v13344_v39 }
 0x1f1   :  { %v4844_v34 = vadd.f32 %v4843_v37, %v14826_v16  ;;  %v14876_v4 = vadd.f32 %v4954_v28, %v4842_v24  ;;  %5527 = vmatprep.mubr.bf16.mxu0 %v14206_v36  ;;  %5640 = vmatprep.mubr.bf16.mxu1 %v16667_v3  ;;  %v13359_v28 = vld [vmem:[#allocation6 + $0x494] ss:$44 sps:$4 sm:$0xff]   ;;  %v13357_v36 = vld [vmem:[#allocation6 + $0x490] ss:$44 sps:$4 sm:$0xff]  }
 0x1f2   :  { %v4845_v47 = vpop.f32.mrf.mxu0  ;;  %v4958_v15 = vpop.f32.mrf.mxu1  ;;  %v13362_v24 = vld [vmem:[#allocation6 + $0xa14] ss:$44 sps:$4 sm:$0xff]  }
 0x1f3   :  { %v4846_v59 = vadd.f32 %v4845_v47, %v14818_v41  ;;  %v14880_v57 = vadd.f32 %v4956_v46, %v4844_v34  ;;  %5696 = vmatpush1.bf16.msra.mxu0 %v13339_v11  ;;  %5809 = vmatpush1.bf16.msra.mxu1 %v13342_v20  ;;  %v14209_v34 = vld [vmem:[#allocation3 + $0x12c] ss:$28 sps:$4 sm:$0xff]   ;;  %v13360_v47 = vld [vmem:[#allocation6 + $0xa10] ss:$44 sps:$4 sm:$0xff]  }
 0x1f4   :  { %v4847_v56 = vpop.f32.mrf.mxu0  ;;  %v4960_v22 = vpop.f32.mrf.mxu1  ;;  %5697 = vmatprep.subr.bf16.mxu0 %v13347_v42  ;;  %5810 = vmatprep.subr.bf16.mxu1 %v13350_v0 }
 0x1f5   :  { %v4848_v39 = vadd.f32 %v4847_v56, %v14826_v16  ;;  %v14883_v48 = vadd.f32 %v4958_v15, %v4846_v59  ;;  %v13365_v56 = vld [vmem:[#allocation6 + $0x43c] ss:$44 sps:$4 sm:$0xff]  }
 0x1f6   :  { %v4851_v27 = vpop.f32.mrf.mxu0  ;;  %5528 = vmatmul.mubr.bf16.gmra.mxu0 %v14207_v21  ;;  %5641 = vmatmul.mubr.bf16.gmra.mxu1 %v14208_v33  ;;  %v4964_v35 = vpop.f32.mrf.mxu1  ;;  %v13363_v21 = vld [vmem:[#allocation6 + $0x438] ss:$44 sps:$4 sm:$0xff]  }
 0x1f7   :  { %v4852_v11 = vadd.f32 %v4851_v27, %v14818_v41  ;;  %v14886_v20 = vadd.f32 %v4960_v22, %v4848_v39  ;;  %5698 = vmatpush2.bf16.msra.mxu0 %v13345_v54  ;;  %5811 = vmatpush2.bf16.msra.mxu1 %v13348_v9  ;;  %v13368_v22 = vld [vmem:[#allocation6 + $0x9bc] ss:$44 sps:$4 sm:$0xff]   ;;  %v13366_v33 = vld [vmem:[#allocation6 + $0x9b8] ss:$44 sps:$4 sm:$0xff]  }
 0x1f8   :  { %v4853_v42 = vpop.f32.mrf.mxu0  ;;  %v4966_v0 = vpop.f32.mrf.mxu1  ;;  %5699 = vmatprep.subr.bf16.mxu0 %v13353_v63  ;;  %5812 = vmatprep.subr.bf16.mxu1 %v13356_v8 }
 0x1f9   :  { %v4854_v37 = vadd.f32 %v4853_v42, %v14826_v16  ;;  %v14889_v46 = vadd.f32 %v4964_v35, %v4852_v11  ;;  %5537 = vmatprep.mubr.bf16.mxu0 %v14209_v34  ;;  %5650 = vmatprep.mubr.bf16.mxu1 %v16667_v3  ;;  %v14210_v11 = vld [vmem:[#allocation3 + $0x128] ss:$28 sps:$4 sm:$0xff]   ;;  %v14211_v42 = vld [vmem:[#allocation3 + $0x130] ss:$28 sps:$4 sm:$0xff]  }
 0x1fa   :  { %v4855_v15 = vpop.f32.mrf.mxu0  ;;  %v4968_v59 = vpop.f32.mrf.mxu1 }
 0x1fb   :  { %v4856_v54 = vadd.f32 %v4855_v15, %v14818_v41  ;;  %v14893_v9 = vadd.f32 %v4966_v0, %v4854_v37  ;;  %5700 = vmatpush2.bf16.msra.mxu0 %v13351_v12  ;;  %5813 = vmatpush2.bf16.msra.mxu1 %v13354_v10  ;;  %v13371_v0 = vld [vmem:[#allocation6 + $0x3e4] ss:$44 sps:$4 sm:$0xff]  }
 0x1fc   :  { %v4857_v63 = vpop.f32.mrf.mxu0  ;;  %v4970_v8 = vpop.f32.mrf.mxu1  ;;  %5701 = vmatprep.subr.bf16.mxu0 %v13359_v28  ;;  %5814 = vmatprep.subr.bf16.mxu1 %v13362_v24  ;;  %v13374_v37 = vld [vmem:[#allocation6 + $0x964] ss:$44 sps:$4 sm:$0xff]  }
 0x1fd   :  { %v4858_v39 = vadd.f32 %v4857_v63, %v14826_v16  ;;  %v14896_v27 = vadd.f32 %v4968_v59, %v4856_v54  ;;  %v14212_v54 = vld [vmem:[#allocation3 + $0x164] ss:$28 sps:$4 sm:$0xff]  }
 0x1fe   :  { %v4861_v35 = vpop.f32.mrf.mxu0  ;;  %5538 = vmatmul.mubr.bf16.gmra.mxu0 %v14210_v11  ;;  %5651 = vmatmul.mubr.bf16.gmra.mxu1 %v14211_v42  ;;  %v4974_v34 = vpop.f32.mrf.mxu1  ;;  %v13369_v63 = vld [vmem:[#allocation6 + $0x3e0] ss:$44 sps:$4 sm:$0xff]  }
 0x1ff   :  { %v4862_v12 = vadd.f32 %v4861_v35, %v14818_v41  ;;  %v14899_v10 = vadd.f32 %v4970_v8, %v4858_v39  ;;  %5702 = vmatpush2.bf16.msra.mxu0 %v13357_v36  ;;  %5815 = vmatpush2.bf16.msra.mxu1 %v13360_v47  ;;  %v13372_v11 = vld [vmem:[#allocation6 + $0x960] ss:$44 sps:$4 sm:$0xff]  }
 0x200   :  { %v4863_v28 = vpop.f32.mrf.mxu0  ;;  %v4976_v24 = vpop.f32.mrf.mxu1  ;;  %5703 = vmatprep.subr.bf16.mxu0 %v13365_v56  ;;  %5816 = vmatprep.subr.bf16.mxu1 %v13368_v22  ;;  %v13377_v8 = vld [vmem:[#allocation6 + $0x38c] ss:$44 sps:$4 sm:$0xff]  }
 0x201   :  { %v4864_v15 = vadd.f32 %v4863_v28, %v14826_v16  ;;  %v14902_v59 = vadd.f32 %v4974_v34, %v4862_v12  ;;  %5547 = vmatprep.mubr.bf16.mxu0 %v14212_v54  ;;  %5660 = vmatprep.mubr.bf16.mxu1 %v16667_v3  ;;  %v13380_v39 = vld [vmem:[#allocation6 + $0x90c] ss:$44 sps:$4 sm:$0xff]   ;;  %v13375_v28 = vld [vmem:[#allocation6 + $0x388] ss:$44 sps:$4 sm:$0xff]  }
 0x202   :  { %v4865_v42 = vpop.f32.mrf.mxu0  ;;  %v4978_v35 = vpop.f32.mrf.mxu1  ;;  %v13378_v54 = vld [vmem:[#allocation6 + $0x908] ss:$44 sps:$4 sm:$0xff]  }
 0x203   :  { %v4866_v36 = vadd.f32 %v4865_v42, %v14818_v41  ;;  %v14906_v47 = vadd.f32 %v4976_v24, %v4864_v15  ;;  %5704 = vmatpush2.bf16.msra.mxu0 %v13363_v21  ;;  %5817 = vmatpush2.bf16.msra.mxu1 %v13366_v33  ;;  %v13383_v24 = vld [vmem:[#allocation6 + $0x334] ss:$44 sps:$4 sm:$0xff]  }
 0x204   :  { %v4867_v56 = vpop.f32.mrf.mxu0  ;;  %v4980_v22 = vpop.f32.mrf.mxu1  ;;  %5705 = vmatprep.subr.bf16.mxu0 %v13371_v0  ;;  %5818 = vmatprep.subr.bf16.mxu1 %v13374_v37  ;;  %v13386_v15 = vld [vmem:[#allocation6 + $0x8b4] ss:$44 sps:$4 sm:$0xff]  }
 0x205   :  { %v4868_v34 = vadd.f32 %v4867_v56, %v14826_v16  ;;  %v14909_v12 = vadd.f32 %v4978_v35, %v4866_v36  ;;  %v13381_v56 = vld [vmem:[#allocation6 + $0x330] ss:$44 sps:$4 sm:$0xff]  }
 0x206   :  { %v4871_v3 = vpop.f32.mrf.mxu0  ;;  %5548 = vmatmul.mubr.bf16.gmra.mxu0 %v14213_v19  ;;  %5661 = vmatmul.mubr.bf16.gmra.mxu1 %v14214_v49  ;;  %v4984_v42 = vpop.f32.mrf.mxu1  ;;  %v14215_v19 = vld [vmem:[#allocation3 + $0x19c] ss:$28 sps:$4 sm:$0xff]   ;;  %v16772_v49 = vmov 0  }
 0x207   :  { %v4872_v21 = vadd.f32 %v4871_v3, %v14818_v41  ;;  %v14912_v33 = vadd.f32 %v4980_v22, %v4868_v34  ;;  %5706 = vmatpush2.bf16.msra.mxu0 %v13369_v63  ;;  %5819 = vmatpush2.bf16.msra.mxu1 %v13372_v11  ;;  %v13389_v22 = vld [vmem:[#allocation6 + $0x2dc] ss:$44 sps:$4 sm:$0xff]  }
 0x208   :  { %v4873_v0 = vpop.f32.mrf.mxu0  ;;  %v4986_v37 = vpop.f32.mrf.mxu1  ;;  %5707 = vmatprep.subr.bf16.mxu0 %v13377_v8  ;;  %5820 = vmatprep.subr.bf16.mxu1 %v13380_v39  ;;  %v13392_v34 = vld [vmem:[#allocation6 + $0x85c] ss:$44 sps:$4 sm:$0xff]  }
 0x209   :  { %v4874_v35 = vadd.f32 %v4873_v0, %v14826_v16  ;;  %v14915_v36 = vadd.f32 %v4984_v42, %v4872_v21  ;;  %5557 = vmatprep.mubr.bf16.mxu0 %v14215_v19  ;;  %5670 = vmatprep.mubr.bf16.mxu1 %v16772_v49  ;;  %v13387_v0 = vld [vmem:[#allocation6 + $0x2d8] ss:$44 sps:$4 sm:$0xff]  }
 0x20a   :  { %v4875_v30 = vpop.f32.mrf.mxu0  ;;  %v4988_v3 = vpop.f32.mrf.mxu1  ;;  %v13390_v19 = vld [vmem:[#allocation6 + $0x858] ss:$44 sps:$4 sm:$0xff]  }
 0x20b   :  { %v4876_v63 = vadd.f32 %v4875_v30, %v14818_v41  ;;  %v14919_v11 = vadd.f32 %v4986_v37, %v4874_v35  ;;  %5708 = vmatpush2.bf16.msra.mxu0 %v13375_v28  ;;  %5821 = vmatpush2.bf16.msra.mxu1 %v13378_v54  ;;  %v13395_v37 = vld [vmem:[#allocation6 + $0xd84] ss:$44 sps:$4 sm:$0xff]  }
 0x20c   :  { %v4877_v8 = vpop.f32.mrf.mxu0  ;;  %v4990_v39 = vpop.f32.mrf.mxu1  ;;  %5709 = vmatprep.subr.bf16.mxu0 %v13383_v24  ;;  %5822 = vmatprep.subr.bf16.mxu1 %v13386_v15  ;;  %v13407_v35 = vld [vmem:[#allocation6 + $0x1304] ss:$44 sps:$4 sm:$0xff]  }
 0x20d   :  { %v4878_v42 = vadd.f32 %v4877_v8, %v14826_v16  ;;  %v14922_v21 = vadd.f32 %v4988_v3, %v4876_v63 }
 0x20e   :  { %v4881_v38 = vpop.f32.mrf.mxu0  ;;  %5558 = vmatmul.mubr.bf16.gmra.mxu0 %v14216_v51  ;;  %5671 = vmatmul.mubr.bf16.gmra.mxu1 %v14217_v13  ;;  %v4994_v30 = vpop.f32.mrf.mxu1  ;;  %v14218_v51 = vld [vmem:[#allocation3 + $0x4] ss:$28 sps:$4 sm:$0xff]   ;;  %v14219_v13 = vld [vmem:[#allocation3 + $0xc] ss:$28 sps:$4 sm:$0xff]  }
 0x20f   :  { %v4882_v28 = vadd.f32 %v4881_v38, %v14818_v41  ;;  %v14925_v54 = vadd.f32 %v4990_v39, %v4878_v42  ;;  %5710 = vmatpush2.bf16.msra.mxu0 %v13381_v56  ;;  %5823 = vmatpush2.bf16.msra.mxu1 %v13384_v5  ;;  %v13398_v38 = vld [vmem:[#allocation6 + $0xd2c] ss:$44 sps:$4 sm:$0xff]  }
 0x210   :  { %v4883_v24 = vpop.f32.mrf.mxu0  ;;  %v4996_v15 = vpop.f32.mrf.mxu1  ;;  %5711 = vmatprep.subr.bf16.mxu0 %v13389_v22  ;;  %5824 = vmatprep.subr.bf16.mxu1 %v13392_v34 }
 0x211   :  { %v4884_v3 = vadd.f32 %v4883_v24, %v14826_v16  ;;  %v14928_v63 = vadd.f32 %v4994_v30, %v4882_v28  ;;  %5713 = vmatprep.mubr.bf16.mxu0 %v14218_v51  ;;  %5826 = vmatprep.mubr.bf16.mxu1 %v14219_v13  ;;  %v13396_v30 = vld [vmem:[#allocation6 + $0xd28] ss:$44 sps:$4 sm:$0xff]   ;;  %v13405_v28 = vld [vmem:[#allocation6 + $0x1300] ss:$44 sps:$4 sm:$0xff]  }
 0x212   :  { %v4885_v8 = vpop.f32.mrf.mxu0  ;;  %v4998_v1 = vpop.f32.mrf.mxu1  ;;  %v14220_v51 = vld [vmem:[#allocation3] ss:$28 sps:$4 sm:$0xff]   ;;  %v14221_v13 = vld [vmem:[#allocation3 + $0x8] ss:$28 sps:$4 sm:$0xff]  }
 0x213   :  { %v4886_v39 = vadd.f32 %v4885_v8, %v14818_v41  ;;  %v14931_v56 = vadd.f32 %v4996_v15, %v4884_v3  ;;  %5712 = vmatpush2.bf16.msra.mxu0 %v13387_v0  ;;  %5825 = vmatpush2.bf16.msra.mxu1 %v13390_v19  ;;  %v13401_v15 = vld [vmem:[#allocation6 + $0xcd4] ss:$44 sps:$4 sm:$0xff]   ;;  %v13416_v3 = vld [vmem:[#allocation6 + $0x12ac] ss:$44 sps:$4 sm:$0xff]  }
 0x214   :  { %v4887_v5 = vpop.f32.mrf.mxu0  ;;  %v5000_v22 = vpop.f32.mrf.mxu1  ;;  %5907 = vmatprep.subr.bf16.mxu0 %v13395_v37  ;;  %6020 = vmatprep.subr.bf16.mxu1 %v13407_v35  ;;  %v14222_v37 = vld [vmem:[#allocation3 + $0x3c] ss:$28 sps:$4 sm:$0xff]   ;;  %v14223_v35 = vld [vmem:[#allocation3 + $0x44] ss:$28 sps:$4 sm:$0xff]  }
 0x215   :  { %v4888_v34 = vadd.f32 %v4887_v5, %v14826_v16  ;;  %v14934_v42 = vadd.f32 %v4998_v1, %v4886_v39  ;;  %v13399_v5 = vld [vmem:[#allocation6 + $0xcd0] ss:$44 sps:$4 sm:$0xff]  }
 0x216   :  { %v5037_v24 = vpop.f32.mrf.mxu0  ;;  %5714 = vmatmul.mubr.bf16.vlgmr.msra.gmra.mxu0 %v14220_v51  ;;  %5827 = vmatmul.mubr.bf16.vlgmr.msra.gmra.mxu1 %v14221_v13  ;;  %v5150_v41 = vpop.f32.mrf.mxu1  ;;  %v13414_v51 = vld [vmem:[#allocation6 + $0x12a8] ss:$44 sps:$4 sm:$0xff]  }
 0x217   :  { %v14936_v0 = vadd.f32 %v5000_v22, %v4888_v34  ;;  %v5038_v19 = vadd.f32 %v5037_v24, %v14834_v40  ;;  %5908 = vmatpush1.bf16.msra.mxu0 %v13393_v18  ;;  %5723 = vmatprep.mubr.bf16.mxu0 %v14222_v37  ;;  %v13404_v22 = vld [vmem:[#allocation6 + $0xc7c] ss:$44 sps:$4 sm:$0xff]  }
 0x218   :  { %v5039_v16 = vpop.f32.mrf.mxu0  ;;  %v5152_v1 = vpop.f32.mrf.mxu1  ;;  %5909 = vmatprep.subr.bf16.mxu0 %v13398_v38  ;;  %5836 = vmatprep.mubr.bf16.mxu1 %v14223_v35  ;;  %v13423_v38 = vld [vmem:[#allocation6 + $0x1250] ss:$44 sps:$4 sm:$0xff]   ;;  %v13402_v35 = vld [vmem:[#allocation6 + $0xc78] ss:$44 sps:$4 sm:$0xff]  }
 0x219   :  { %v5040_v8 = vadd.f32 %v5039_v16, %v14838_v44  ;;  %v5151_v39 = vadd.f32 %v5150_v41, %v5038_v19  ;;  %6021 = vmatpush1.bf16.msra.mxu1 %v13405_v28  ;;  %v13425_v44 = vld [vmem:[#allocation6 + $0x1254] ss:$44 sps:$4 sm:$0xff]   ;;  %v13434_v41 = vld [vmem:[#allocation6 + $0x11fc] ss:$44 sps:$4 sm:$0xff]  }
 0x21a   :  { %v5041_v13 = vpop.f32.mrf.mxu0  ;;  %v5154_v23 = vpop.f32.mrf.mxu1  ;;  %6022 = vmatprep.subr.bf16.mxu1 %v13416_v3  ;;  %v14225_v3 = vld [vmem:[#allocation3 + $0x40] ss:$28 sps:$4 sm:$0xff]  }
 0x21b   :  { %v5042_v40 = vadd.f32 %v5041_v13, %v14844_v50  ;;  %v5153_v18 = vadd.f32 %v5152_v1, %v5040_v8  ;;  %5910 = vmatpush1.bf16.msra.mxu0 %v13396_v30  ;;  %vm6975_vm0 = vcmp.ge.f32.partialorder %v5151_v39, 0.0  ;;  %v7151_v28 = vmul.f32 0.2, %v5151_v39  ;;  %v13410_v30 = vld [vmem:[#allocation6 + $0xc24] ss:$44 sps:$4 sm:$0xff]  }
 0x21c   :  { %v5043_v34 = vpop.f32.mrf.mxu0  ;;  %v5156_v24 = vpop.f32.mrf.mxu1  ;;  %5911 = vmatprep.subr.bf16.mxu0 %v13401_v15 }
 0x21d   :  { %v5044_v37 = vadd.f32 %v5043_v34, %v14847_v14  ;;  %6023 = vmatpush1.bf16.msra.mxu1 %v13414_v51  ;;  %v5155_v19 = vadd.f32 %v5154_v23, %v5042_v40  ;;  %vm6976_vm1 = vcmp.ge.f32.partialorder %v5153_v18, 0.0  ;;  %v7152_v1 = vmul.f32 0.2, %v5153_v18  ;;  %v14226_v14 = vld [vmem:[#allocation3 + $0x74] ss:$28 sps:$4 sm:$0xff]  }
 0x21e   :  { %v5047_v16 = vpop.f32.mrf.mxu0  ;;  %5724 = vmatmul.mubr.bf16.gmra.mxu0 %v14224_v26  ;;  %5837 = vmatmul.mubr.bf16.gmra.mxu1 %v14225_v3  ;;  %v5160_v50 = vpop.f32.mrf.mxu1  ;;  %v14227_v23 = vld [vmem:[#allocation3 + $0x7c] ss:$28 sps:$4 sm:$0xff]  }
 0x21f   :  { %v5048_v15 = vadd.f32 %v5047_v16, %v14850_v17  ;;  %v5157_v8 = vadd.f32 %v5156_v24, %v5044_v37  ;;  %5912 = vmatpush1.bf16.msra.mxu0 %v13399_v5  ;;  %5733 = vmatprep.mubr.bf16.mxu0 %v14226_v14  ;;  %vm6986_vm2 = vcmp.ge.f32.partialorder %v5155_v19, 0.0  ;;  %v7162_v51 = vmul.f32 0.2, %v5155_v19  ;;  %v13413_v16 = vld [vmem:[#allocation6 + $0xbcc] ss:$44 sps:$4 sm:$0xff]  }
 0x220   :  { %v5049_v13 = vpop.f32.mrf.mxu0  ;;  %v5162_v34 = vpop.f32.mrf.mxu1  ;;  %5913 = vmatprep.subr.bf16.mxu0 %v13404_v22  ;;  %5846 = vmatprep.mubr.bf16.mxu1 %v14227_v23  ;;  %v7327_v17 = vsel %vm6975_vm0, %v5151_v39, %v7151_v28 }
 0x221   :  { %vm6987_vm3 = vcmp.ge.f32.partialorder %v5157_v8, 0.0  ;;  %v7163_v26 = vmul.f32 0.2, %v5157_v8  ;;  %v5050_v40 = vadd.f32 %v5049_v13, %v14854_v53  ;;  %v5161_v3 = vadd.f32 %v5160_v50, %v5048_v15  ;;  %6024 = vmatprep.subr.bf16.mxu1 %v13425_v44  ;;  %v13443_v13 = vld [vmem:[#allocation6 + $0x11a4] ss:$44 sps:$4 sm:$0xff]  }
 0x222   :  { %v7338_v24 = vsel %vm6986_vm2, %v5155_v19, %v7162_v51  ;;  %v5051_v5 = vpop.f32.mrf.mxu0  ;;  %v5164_v37 = vpop.f32.mrf.mxu1  ;;  %6025 = vmatpush1.bf16.msra.mxu1 %v13423_v38  ;;  %v7328_v44 = vsel %vm6976_vm1, %v5153_v18, %v7152_v1  ;;  %v13432_v38 = vld [vmem:[#allocation6 + $0x11f8] ss:$44 sps:$4 sm:$0xff]  }
 0x223   :  { %v14945_v14 = vpack.c.bf16 %v7338_v24, %v7327_v17  ;;  %v5052_v22 = vadd.f32 %v5051_v5, %v14857_v25  ;;  %5914 = vmatpush1.bf16.msra.mxu0 %v13402_v35  ;;  %6026 = vmatprep.subr.bf16.mxu1 %v13434_v41  ;;  %v7173_v23 = vmul.f32 0.2, %v5161_v3  ;;  %v5163_v55 = vadd.f32 %v5162_v34, %v5050_v40  ;;  %v14228_v35 = vld [vmem:[#allocation3 + $0x70] ss:$28 sps:$4 sm:$0xff]   ;;  %v14229_v41 = vld [vmem:[#allocation3 + $0x78] ss:$28 sps:$4 sm:$0xff]  }
 0x224   :  { %v5053_v29 = vpop.f32.mrf.mxu0  ;;  %v5166_v53 = vpop.f32.mrf.mxu1  ;;  %5915 = vmatprep.subr.bf16.mxu0 %v13410_v30  ;;  %v7339_v39 = vsel %vm6987_vm3, %v5157_v8, %v7163_v26  ;;  %vm6997_vm4 = vcmp.ge.f32.partialorder %v5161_v3, 0.0  ;;  %v13411_v8 = vld [vmem:[#allocation6 + $0xbc8] ss:$44 sps:$4 sm:$0xff]  }
 0x225   :  { %16773 = vst [vmem:[#allocation39_spill] sm:$0xff] %v14945_v14  ;;  %v5054_v28 = vadd.f32 %v5053_v29, %v14860_v58  ;;  %v5165_v19 = vadd.f32 %v5164_v37, %v5052_v22  ;;  %v14951_v50 = vpack.c.bf16 %v7339_v39, %v7328_v44  ;;  %v7174_v15 = vmul.f32 0.2, %v5163_v55  ;;  %v14230_v29 = vld [vmem:[#allocation3 + $0xac] ss:$28 sps:$4 sm:$0xff]  }
 0x226   :  { %v5057_v25 = vpop.f32.mrf.mxu0  ;;  %5734 = vmatmul.mubr.bf16.gmra.mxu0 %v14228_v35  ;;  %5847 = vmatmul.mubr.bf16.gmra.mxu1 %v14229_v41  ;;  %v5170_v51 = vpop.f32.mrf.mxu1  ;;  %v7349_v58 = vsel %vm6997_vm4, %v5161_v3, %v7173_v23  ;;  %vm6998_vm6 = vcmp.ge.f32.partialorder %v5163_v55, 0.0  ;;  %v14231_v40 = vld [vmem:[#allocation3 + $0xb4] ss:$28 sps:$4 sm:$0xff]   ;;  %v13422_v44 = vld [vmem:[#allocation6 + $0xb1c] ss:$44 sps:$4 sm:$0xff]  }
 0x227   :  { %16774 = vst [vmem:[#allocation40_spill] sm:$0xff] %v14951_v50  ;;  %vm7008_vm5 = vcmp.ge.f32.partialorder %v5165_v19, 0.0  ;;  %v7184_v30 = vmul.f32 0.2, %v5165_v19  ;;  %v5058_v18 = vadd.f32 %v5057_v25, %v14863_v45  ;;  %v5167_v1 = vadd.f32 %v5166_v53, %v5054_v28  ;;  %5916 = vmatpush1.bf16.msra.mxu0 %v13408_v32  ;;  %5743 = vmatprep.mubr.bf16.mxu0 %v14230_v29  ;;  %v13419_v17 = vld [vmem:[#allocation6 + $0xb74] ss:$44 sps:$4 sm:$0xff]  }
 0x228   :  { %v5059_v34 = vpop.f32.mrf.mxu0  ;;  %v5172_v26 = vpop.f32.mrf.mxu1  ;;  %5917 = vmatprep.subr.bf16.mxu0 %v13413_v16  ;;  %5856 = vmatprep.mubr.bf16.mxu1 %v14231_v40  ;;  %v13417_v37 = vld [vmem:[#allocation6 + $0xb70] ss:$44 sps:$4 sm:$0xff]   ;;  %v13441_v32 = vld [vmem:[#allocation6 + $0x11a0] ss:$44 sps:$4 sm:$0xff]   ;;  %v7350_v28 = vsel %vm6998_vm6, %v5163_v55, %v7174_v15  ;;  %v14232_v55 = vld [vmem:[#allocation3 + $0xa8] ss:$28 sps:$4 sm:$0xff]  }
 0x229   :  { %v7360_v24 = vsel %vm7008_vm5, %v5165_v19, %v7184_v30  ;;  %vm7009_vm7 = vcmp.ge.f32.partialorder %v5167_v1, 0.0  ;;  %v7185_v5 = vmul.f32 0.2, %v5167_v1  ;;  %v5060_v45 = vadd.f32 %v5059_v34, %v14867_v62  ;;  %6027 = vmatpush1.bf16.msra.mxu1 %v13432_v38  ;;  %v13420_v30 = vld [vmem:[#allocation6 + $0xb18] ss:$44 sps:$4 sm:$0xff]  }
 0x22a   :  { %v14957_v22 = vpack.c.bf16 %v7360_v24, %v7349_v58  ;;  %v5171_v53 = vadd.f32 %v5170_v51, %v5058_v18  ;;  %v5061_v3 = vpop.f32.mrf.mxu0  ;;  %v5174_v23 = vpop.f32.mrf.mxu1  ;;  %6028 = vmatprep.subr.bf16.mxu1 %v13443_v13  ;;  %v13450_v13 = vld [vmem:[#allocation6 + $0x1148] ss:$44 sps:$4 sm:$0xff]   ;;  %v14233_v15 = vld [vmem:[#allocation3 + $0xb0] ss:$28 sps:$4 sm:$0xff]   ;;  %v14234_v40 = vld [vmem:[#allocation3 + $0xe4] ss:$28 sps:$4 sm:$0xff]  }
 0x22b   :  { %v5062_v16 = vadd.f32 %v5061_v3, %v14870_v52  ;;  %v5173_v39 = vadd.f32 %v5172_v26, %v5060_v45  ;;  %5918 = vmatpush1.bf16.msra.mxu0 %v13411_v8  ;;  %v7361_v19 = vsel %vm7009_vm7, %v5167_v1, %v7185_v5  ;;  %v13452_v52 = vld [vmem:[#allocation6 + $0x114c] ss:$44 sps:$4 sm:$0xff]   ;;  %v13428_v29 = vld [vmem:[#allocation6 + $0x1044] ss:$44 sps:$4 sm:$0xff]   ;;  %v13458_v58 = vld [vmem:[#allocation6 + $0x10f4] ss:$44 sps:$4 sm:$0xff]  }
 0x22c   :  { %16775 = vst [vmem:[#allocation41_spill] sm:$0xff] %v14957_v22  ;;  %v7195_v25 = vmul.f32 0.2, %v5171_v53  ;;  %v5063_v62 = vpop.f32.mrf.mxu0  ;;  %v5176_v35 = vpop.f32.mrf.mxu1  ;;  %5919 = vmatprep.subr.bf16.mxu0 %v13419_v17  ;;  %v14962_v38 = vpack.c.bf16 %v7361_v19, %v7350_v28  ;;  %vm7019_vm8 = vcmp.ge.f32.partialorder %v5171_v53, 0.0  ;;  %v14235_v45 = vld [vmem:[#allocation3 + $0xec] ss:$28 sps:$4 sm:$0xff]  }
 0x22d   :  { %v5064_v41 = vadd.f32 %v5063_v62, %v14873_v31  ;;  %v5175_v51 = vadd.f32 %v5174_v23, %v5062_v16  ;;  %6029 = vmatpush1.bf16.msra.mxu1 %v13441_v32  ;;  %vm7020_vm9 = vcmp.ge.f32.partialorder %v5173_v39, 0.0  ;;  %v7196_v18 = vmul.f32 0.2, %v5173_v39  ;;  %v13426_v16 = vld [vmem:[#allocation6 + $0x1040] ss:$44 sps:$4 sm:$0xff]  }
 0x22e   :  { %16776 = vst [vmem:[#allocation42_spill] sm:$0xff] %v14962_v38  ;;  %v5067_v8 = vpop.f32.mrf.mxu0  ;;  %5744 = vmatmul.mubr.bf16.gmra.mxu0 %v14232_v55  ;;  %5857 = vmatmul.mubr.bf16.gmra.mxu1 %v14233_v15  ;;  %v5180_v1 = vpop.f32.mrf.mxu1  ;;  %v7371_v17 = vsel %vm7019_vm8, %v5171_v53, %v7195_v25  ;;  %v13431_v62 = vld [vmem:[#allocation6 + $0xfec] ss:$44 sps:$4 sm:$0xff]   ;;  %v13456_v15 = vld [vmem:[#allocation6 + $0x10f0] ss:$44 sps:$4 sm:$0xff]  }
 0x22f   :  { %vm7030_vm10 = vcmp.ge.f32.partialorder %v5175_v51, 0.0  ;;  %v7206_v34 = vmul.f32 0.2, %v5175_v51  ;;  %v5068_v26 = vadd.f32 %v5067_v8, %v14876_v4  ;;  %v5177_v31 = vadd.f32 %v5176_v35, %v5064_v41  ;;  %5920 = vmatpush1.bf16.msra.mxu0 %v13417_v37  ;;  %5753 = vmatprep.mubr.bf16.mxu0 %v14234_v40  ;;  %v14238_v40 = vld [vmem:[#allocation3 + $0x11c] ss:$28 sps:$4 sm:$0xff]  }
 0x230   :  { %v5069_v24 = vpop.f32.mrf.mxu0  ;;  %v5182_v5 = vpop.f32.mrf.mxu1  ;;  %5921 = vmatprep.subr.bf16.mxu0 %v13422_v44  ;;  %5866 = vmatprep.mubr.bf16.mxu1 %v14235_v45  ;;  %v7372_v53 = vsel %vm7020_vm9, %v5173_v39, %v7196_v18 }
 0x231   :  { %v7382_v32 = vsel %vm7030_vm10, %v5175_v51, %v7206_v34  ;;  %vm7031_vm11 = vcmp.ge.f32.partialorder %v5177_v31, 0.0  ;;  %v7207_v3 = vmul.f32 0.2, %v5177_v31  ;;  %v5070_v23 = vadd.f32 %v5069_v24, %v14880_v57  ;;  %6030 = vmatprep.subr.bf16.mxu1 %v13452_v52  ;;  %v13464_v34 = vld [vmem:[#allocation6 + $0x109c] ss:$44 sps:$4 sm:$0xff]  }
 0x232   :  { %v14968_v28 = vpack.c.bf16 %v7382_v32, %v7371_v17  ;;  %v5181_v4 = vadd.f32 %v5180_v1, %v5068_v26  ;;  %v5071_v37 = vpop.f32.mrf.mxu0  ;;  %v5184_v19 = vpop.f32.mrf.mxu1  ;;  %6031 = vmatpush1.bf16.msra.mxu1 %v13450_v13  ;;  %v13429_v13 = vld [vmem:[#allocation6 + $0xfe8] ss:$44 sps:$4 sm:$0xff]  }
 0x233   :  { %v5072_v44 = vadd.f32 %v5071_v37, %v14883_v48  ;;  %v5183_v25 = vadd.f32 %v5182_v5, %v5070_v23  ;;  %5922 = vmatpush1.bf16.msra.mxu0 %v13420_v30  ;;  %6032 = vmatprep.subr.bf16.mxu1 %v13458_v58  ;;  %v7383_v35 = vsel %vm7031_vm11, %v5177_v31, %v7207_v3  ;;  %v14236_v48 = vld [vmem:[#allocation3 + $0xe0] ss:$28 sps:$4 sm:$0xff]   ;;  %v14237_v30 = vld [vmem:[#allocation3 + $0xe8] ss:$28 sps:$4 sm:$0xff]  }
 0x234   :  { %16777 = vst [vmem:[#allocation43_spill] sm:$0xff] %v14968_v28  ;;  %v7217_v41 = vmul.f32 0.2, %v5181_v4  ;;  %v5073_v57 = vpop.f32.mrf.mxu0  ;;  %v5186_v51 = vpop.f32.mrf.mxu1  ;;  %5923 = vmatprep.subr.bf16.mxu0 %v13428_v29  ;;  %v14973_v52 = vpack.c.bf16 %v7383_v35, %v7372_v53  ;;  %vm7041_vm12 = vcmp.ge.f32.partialorder %v5181_v4, 0.0  ;;  %v13437_v58 = vld [vmem:[#allocation6 + $0xf94] ss:$44 sps:$4 sm:$0xff]  }
 0x235   :  { %v5074_v8 = vadd.f32 %v5073_v57, %v14886_v20  ;;  %v5185_v55 = vadd.f32 %v5184_v19, %v5072_v44  ;;  %v7218_v39 = vmul.f32 0.2, %v5183_v25  ;;  %vm7042_vm14 = vcmp.ge.f32.partialorder %v5183_v25, 0.0  ;;  %v14239_v5 = vld [vmem:[#allocation3 + $0x124] ss:$28 sps:$4 sm:$0xff]  }
 0x236   :  { %16778 = vst [vmem:[#allocation44_spill] sm:$0xff] %v14973_v52  ;;  %v5077_v18 = vpop.f32.mrf.mxu0  ;;  %5754 = vmatmul.mubr.bf16.gmra.mxu0 %v14236_v48  ;;  %5867 = vmatmul.mubr.bf16.gmra.mxu1 %v14237_v30  ;;  %v5190_v1 = vpop.f32.mrf.mxu1  ;;  %v7393_v20 = vsel %vm7041_vm12, %v5181_v4, %v7217_v41  ;;  %v13435_v23 = vld [vmem:[#allocation6 + $0xf90] ss:$44 sps:$4 sm:$0xff]   ;;  %v14240_v30 = vld [vmem:[#allocation3 + $0x118] ss:$28 sps:$4 sm:$0xff]  }
 0x237   :  { %vm7052_vm13 = vcmp.ge.f32.partialorder %v5185_v55, 0.0  ;;  %v7228_v26 = vmul.f32 0.2, %v5185_v55  ;;  %v5078_v29 = vadd.f32 %v5077_v18, %v14889_v46  ;;  %v5187_v31 = vadd.f32 %v5186_v51, %v5074_v8  ;;  %5924 = vmatpush2.bf16.msra.mxu0 %v13426_v16  ;;  %5763 = vmatprep.mubr.bf16.mxu0 %v14238_v40  ;;  %v13462_v46 = vld [vmem:[#allocation6 + $0x1098] ss:$44 sps:$4 sm:$0xff]  }
 0x238   :  { %v5079_v17 = vpop.f32.mrf.mxu0  ;;  %v5192_v24 = vpop.f32.mrf.mxu1  ;;  %5925 = vmatprep.subr.bf16.mxu0 %v13431_v62  ;;  %5876 = vmatprep.mubr.bf16.mxu1 %v14239_v5  ;;  %v13440_v4 = vld [vmem:[#allocation6 + $0xf3c] ss:$44 sps:$4 sm:$0xff]   ;;  %v7394_v35 = vsel %vm7042_vm14, %v5183_v25, %v7218_v39  ;;  %v13470_v18 = vld [vmem:[#allocation6 + $0x80c] ss:$44 sps:$4 sm:$0xff]  }
 0x239   :  { %v7404_v45 = vsel %vm7052_vm13, %v5185_v55, %v7228_v26  ;;  %vm7053_vm15 = vcmp.ge.f32.partialorder %v5187_v31, 0.0  ;;  %v7229_v32 = vmul.f32 0.2, %v5187_v31  ;;  %v5080_v3 = vadd.f32 %v5079_v17, %v14893_v9  ;;  %6033 = vmatpush1.bf16.msra.mxu1 %v13456_v15  ;;  %v13438_v39 = vld [vmem:[#allocation6 + $0xf38] ss:$44 sps:$4 sm:$0xff]  }
 0x23a   :  { %v14979_v37 = vpack.c.bf16 %v7404_v45, %v7393_v20  ;;  %v5191_v16 = vadd.f32 %v5190_v1, %v5078_v29  ;;  %v5081_v19 = vpop.f32.mrf.mxu0  ;;  %v5194_v53 = vpop.f32.mrf.mxu1  ;;  %6034 = vmatprep.subr.bf16.mxu1 %v13464_v34  ;;  %v13446_v1 = vld [vmem:[#allocation6 + $0xee4] ss:$44 sps:$4 sm:$0xff]   ;;  %v14243_v20 = vld [vmem:[#allocation3 + $0x15c] ss:$28 sps:$4 sm:$0xff]   ;;  %v13444_v45 = vld [vmem:[#allocation6 + $0xee0] ss:$44 sps:$4 sm:$0xff]  }
 0x23b   :  { %v5082_v44 = vadd.f32 %v5081_v19, %v14896_v27  ;;  %v5193_v62 = vadd.f32 %v5192_v24, %v5080_v3  ;;  %5926 = vmatpush2.bf16.msra.mxu0 %v13429_v13  ;;  %v7405_v41 = vsel %vm7053_vm15, %v5187_v31, %v7229_v32  ;;  %v14241_v13 = vld [vmem:[#allocation3 + $0x120] ss:$28 sps:$4 sm:$0xff]   ;;  %v14242_v29 = vld [vmem:[#allocation3 + $0x154] ss:$28 sps:$4 sm:$0xff]   ;;  %v14278_v52 = vld [vmem:[#allocation3 + $0x8] ss:$28 sps:$4 sm:$0xff]  }
 0x23c   :  { %16779 = vst [vmem:[#allocation45_spill] sm:$0xff] %v14979_v37  ;;  %v7239_v57 = vmul.f32 0.2, %v5191_v16  ;;  %v5083_v9 = vpop.f32.mrf.mxu0  ;;  %v5196_v51 = vpop.f32.mrf.mxu1  ;;  %5927 = vmatprep.subr.bf16.mxu0 %v13437_v58  ;;  %v14984_v8 = vpack.c.bf16 %v7405_v41, %v7394_v35  ;;  %vm7063_vm0 = vcmp.ge.f32.partialorder %v5191_v16, 0.0  ;;  %v14277_v28 = vld [vmem:[#allocation3] ss:$28 sps:$4 sm:$0xff]  }
 0x23d   :  { %v5084_v55 = vadd.f32 %v5083_v9, %v14899_v10  ;;  %v5195_v15 = vadd.f32 %v5194_v53, %v5082_v44  ;;  %6035 = vmatpush1.bf16.msra.mxu1 %v13462_v46  ;;  %v7240_v48 = vmul.f32 0.2, %v5193_v62  ;;  %vm7064_vm2 = vcmp.ge.f32.partialorder %v5193_v62, 0.0  ;;  %v13449_v46 = vld [vmem:[#allocation6 + $0xe8c] ss:$44 sps:$4 sm:$0xff]  }
 0x23e   :  { %16780 = vst [vmem:[#allocation46_spill] sm:$0xff] %v14984_v8  ;;  %v5087_v27 = vpop.f32.mrf.mxu0  ;;  %5764 = vmatmul.mubr.bf16.gmra.mxu0 %v14240_v30  ;;  %5877 = vmatmul.mubr.bf16.gmra.mxu1 %v14241_v13  ;;  %v5200_v25 = vpop.f32.mrf.mxu1  ;;  %v7415_v10 = vsel %vm7063_vm0, %v5191_v16, %v7239_v57 }
 0x23f   :  { %vm7074_vm1 = vcmp.ge.f32.partialorder %v5195_v15, 0.0  ;;  %v7250_v34 = vmul.f32 0.2, %v5195_v15  ;;  %v5088_v58 = vadd.f32 %v5087_v27, %v14902_v59  ;;  %v5197_v26 = vadd.f32 %v5196_v51, %v5084_v55  ;;  %5928 = vmatpush2.bf16.msra.mxu0 %v13435_v23  ;;  %5773 = vmatprep.mubr.bf16.mxu0 %v14242_v29  ;;  %v13447_v27 = vld [vmem:[#allocation6 + $0xe88] ss:$44 sps:$4 sm:$0xff]  }
 0x240   :  { %v5089_v31 = vpop.f32.mrf.mxu0  ;;  %v5202_v40 = vpop.f32.mrf.mxu1  ;;  %5929 = vmatprep.subr.bf16.mxu0 %v13440_v4  ;;  %5886 = vmatprep.mubr.bf16.mxu1 %v14243_v20  ;;  %v7416_v53 = vsel %vm7064_vm2, %v5193_v62, %v7240_v48  ;;  %v13455_v62 = vld [vmem:[#allocation6 + $0xe34] ss:$44 sps:$4 sm:$0xff]   ;;  %v13453_v20 = vld [vmem:[#allocation6 + $0xe30] ss:$44 sps:$4 sm:$0xff]  }
 0x241   :  { %v7426_v17 = vsel %vm7074_vm1, %v5195_v15, %v7250_v34  ;;  %vm7075_vm3 = vcmp.ge.f32.partialorder %v5197_v26, 0.0  ;;  %v7251_v24 = vmul.f32 0.2, %v5197_v26  ;;  %v5090_v5 = vadd.f32 %v5089_v31, %v14906_v47  ;;  %6246 = vmatprep.subr.bf16.mxu1 %v13470_v18  ;;  %v14244_v15 = vld [vmem:[#allocation3 + $0x150] ss:$28 sps:$4 sm:$0xff]  }
 0x242   :  { %v14990_v59 = vpack.c.bf16 %v7426_v17, %v7415_v10  ;;  %v5201_v32 = vadd.f32 %v5200_v25, %v5088_v58  ;;  %v5091_v3 = vpop.f32.mrf.mxu0  ;;  %v5204_v23 = vpop.f32.mrf.mxu1  ;;  %v14246_v25 = vld [vmem:[#allocation3 + $0x18c] ss:$28 sps:$4 sm:$0xff]   ;;  %v14247_v34 = vld [vmem:[#allocation3 + $0x194] ss:$28 sps:$4 sm:$0xff]  }
 0x243   :  { %v5092_v16 = vadd.f32 %v5091_v3, %v14909_v12  ;;  %v5203_v19 = vadd.f32 %v5202_v40, %v5090_v5  ;;  %5930 = vmatpush2.bf16.msra.mxu0 %v13438_v39  ;;  %v7427_v4 = vsel %vm7075_vm3, %v5197_v26, %v7251_v24  ;;  %v14245_v12 = vld [vmem:[#allocation3 + $0x158] ss:$28 sps:$4 sm:$0xff]   ;;  %v13461_v17 = vld [vmem:[#allocation6 + $0xddc] ss:$44 sps:$4 sm:$0xff]  }
 0x244   :  { %16781 = vst [vmem:[#allocation47_spill] sm:$0xff] %v14990_v59  ;;  %v7261_v44 = vmul.f32 0.2, %v5201_v32  ;;  %v5093_v35 = vpop.f32.mrf.mxu0  ;;  %v5206_v41 = vpop.f32.mrf.mxu1  ;;  %5931 = vmatprep.subr.bf16.mxu0 %v13446_v1  ;;  %v14994_v47 = vpack.c.bf16 %v7427_v4, %v7416_v53  ;;  %vm7085_vm4 = vcmp.ge.f32.partialorder %v5201_v32, 0.0  ;;  %v13459_v4 = vld [vmem:[#allocation6 + $0xdd8] ss:$44 sps:$4 sm:$0xff]  }
 0x245   :  { %v5094_v57 = vadd.f32 %v5093_v35, %v14912_v33  ;;  %v5205_v9 = vadd.f32 %v5204_v23, %v5092_v16  ;;  %v7262_v51 = vmul.f32 0.2, %v5203_v19  ;;  %vm7086_vm6 = vcmp.ge.f32.partialorder %v5203_v19, 0.0  ;;  %v14273_v59 = vld [vmem:[#allocation3 + $0x198] ss:$28 sps:$4 sm:$0xff]  }
 0x246   :  { %16782 = vst [vmem:[#allocation48_spill] sm:$0xff] %v14994_v47  ;;  %v5097_v55 = vpop.f32.mrf.mxu0  ;;  %5774 = vmatmul.mubr.bf16.gmra.mxu0 %v14244_v15  ;;  %5887 = vmatmul.mubr.bf16.gmra.mxu1 %v14245_v12  ;;  %v5210_v18 = vpop.f32.mrf.mxu1  ;;  %v7437_v33 = vsel %vm7085_vm4, %v5201_v32, %v7261_v44  ;;  %v14250_v12 = vld [vmem:[#allocation3 + $0x14] ss:$28 sps:$4 sm:$0xff]   ;;  %v14274_v47 = vld [vmem:[#allocation3 + $0x1a0] ss:$28 sps:$4 sm:$0xff]  }
 0x247   :  { %vm7096_vm5 = vcmp.ge.f32.partialorder %v5205_v9, 0.0  ;;  %v7272_v48 = vmul.f32 0.2, %v5205_v9  ;;  %v5098_v30 = vadd.f32 %v5097_v55, %v14915_v36  ;;  %v5207_v13 = vadd.f32 %v5206_v41, %v5094_v57  ;;  %5932 = vmatpush2.bf16.msra.mxu0 %v13444_v45  ;;  %5783 = vmatprep.mubr.bf16.mxu0 %v14246_v25  ;;  %v14248_v41 = vld [vmem:[#allocation3 + $0x188] ss:$28 sps:$4 sm:$0xff]  }
 0x248   :  { %v5099_v39 = vpop.f32.mrf.mxu0  ;;  %v5212_v1 = vpop.f32.mrf.mxu1  ;;  %5933 = vmatprep.subr.bf16.mxu0 %v13449_v46  ;;  %5896 = vmatprep.mubr.bf16.mxu1 %v14247_v34  ;;  %v7438_v45 = vsel %vm7086_vm6, %v5203_v19, %v7262_v51  ;;  %v864_v19 = vsub.s32 4, %v14620_v60 }
 0x249   :  { %v7448_v58 = vsel %vm7096_vm5, %v5205_v9, %v7272_v48  ;;  %vm7097_vm7 = vcmp.ge.f32.partialorder %v5207_v13, 0.0  ;;  %v7273_v26 = vmul.f32 0.2, %v5207_v13  ;;  %v5100_v29 = vadd.f32 %v5099_v39, %v14919_v11  ;;  %v13467_v9 = vld [vmem:[#allocation6 + $0x28c] ss:$44 sps:$4 sm:$0xff]  }
 0x24a   :  { %v15000_v10 = vpack.c.bf16 %v7448_v58, %v7437_v33  ;;  %v5211_v36 = vadd.f32 %v5210_v18, %v5098_v30  ;;  %v5101_v31 = vpop.f32.mrf.mxu0  ;;  %v5214_v40 = vpop.f32.mrf.mxu1  ;;  %v13465_v58 = vld [vmem:[#allocation6 + $0x288] ss:$44 sps:$4 sm:$0xff]  }
 0x24b   :  { %v5102_v24 = vadd.f32 %v5101_v31, %v14922_v21  ;;  %v5213_v5 = vadd.f32 %v5212_v1, %v5100_v29  ;;  %5934 = vmatpush2.bf16.msra.mxu0 %v13447_v27  ;;  %v7449_v32 = vsel %vm7097_vm7, %v5207_v13, %v7273_v26  ;;  %v14249_v21 = vld [vmem:[#allocation3 + $0x190] ss:$28 sps:$4 sm:$0xff]   ;;  %v14251_v1 = vld [vmem:[#allocation8] sm:$0xff]  ;;  %v13468_v26 = vld [vmem:[#allocation6 + $0x808] ss:$44 sps:$4 sm:$0xff]  }
 0x24c   :  { %16783 = vst [vmem:[#allocation49_spill] sm:$0xff] %v15000_v10  ;;  %v7283_v3 = vmul.f32 0.2, %v5211_v36  ;;  %v5103_v23 = vpop.f32.mrf.mxu0  ;;  %v5216_v46 = vpop.f32.mrf.mxu1  ;;  %5935 = vmatprep.subr.bf16.mxu0 %v13455_v62  ;;  %v15004_v16 = vpack.c.bf16 %v7449_v32, %v7438_v45  ;;  %vm7107_vm8 = vcmp.ge.f32.partialorder %v5211_v36, 0.0  ;;  %v868_v62 = vsub.s32 5, %v14620_v60 }
 0x24d   :  { %v5104_v11 = vadd.f32 %v5103_v23, %v14925_v54  ;;  %v5215_v53 = vadd.f32 %v5214_v40, %v5102_v24  ;;  %v7284_v44 = vmul.f32 0.2, %v5213_v5  ;;  %vm7108_vm10 = vcmp.ge.f32.partialorder %v5213_v5, 0.0  ;;  %v13473_v29 = vld [vmem:[#allocation6 + $0x234] ss:$44 sps:$4 sm:$0xff]  }
 0x24e   :  { %16784 = vst [vmem:[#allocation50_spill] sm:$0xff] %v15004_v16  ;;  %v5107_v35 = vpop.f32.mrf.mxu0  ;;  %5784 = vmatmul.mubr.bf16.gmra.mxu0 %v14248_v41  ;;  %5897 = vmatmul.mubr.bf16.gmra.mxu1 %v14249_v21  ;;  %v5220_v57 = vpop.f32.mrf.mxu1  ;;  %v7459_v54 = vsel %vm7107_vm8, %v5211_v36, %v7283_v3  ;;  %v15015_v34 = vrot.slane %v14251_v1, %v864_v19  ;;  %v13476_v45 = vld [vmem:[#allocation6 + $0x7b4] ss:$44 sps:$4 sm:$0xff]   ;;  %v13479_v41 = vld [vmem:[#allocation6 + $0x1dc] ss:$44 sps:$4 sm:$0xff]  }
 0x24f   :  { %vm7118_vm9 = vcmp.ge.f32.partialorder %v5215_v53, 0.0  ;;  %v7294_v51 = vmul.f32 0.2, %v5215_v53  ;;  %v5108_v55 = vadd.f32 %v5107_v35, %v14928_v63  ;;  %v5217_v15 = vadd.f32 %v5216_v46, %v5104_v11  ;;  %5936 = vmatpush2.bf16.msra.mxu0 %v13453_v20  ;;  %5939 = vmatprep.mubr.bf16.mxu0 %v14250_v12  ;;  %v13474_v11 = vld [vmem:[#allocation6 + $0x7b0] ss:$44 sps:$4 sm:$0xff]  }
 0x250   :  { %v5109_v18 = vpop.f32.mrf.mxu0  ;;  %v5222_v27 = vpop.f32.mrf.mxu1  ;;  %5937 = vmatprep.subr.bf16.mxu0 %v13461_v17  ;;  %6052 = vmatprep.mubr.bf16.mxu1 %v16772_v49  ;;  %v7460_v40 = vsel %vm7108_vm10, %v5213_v5, %v7284_v44  ;;  %v15023_v46 = vrot.slane %v14251_v1, %v868_v62  ;;  %v14253_v44 = vld [vmem:[#allocation3 + $0x18] ss:$28 sps:$4 sm:$0xff]   ;;  %v13482_v21 = vld [vmem:[#allocation6 + $0x75c] ss:$44 sps:$4 sm:$0xff]  }
 0x251   :  { %v7470_v48 = vsel %vm7118_vm9, %v5215_v53, %v7294_v51  ;;  %vm7119_vm11 = vcmp.ge.f32.partialorder %v5217_v15, 0.0  ;;  %v7295_v30 = vmul.f32 0.2, %v5217_v15  ;;  %v5110_v13 = vadd.f32 %v5109_v18, %v14931_v56  ;;  %v14254_v18 = vld [vmem:[#allocation3 + $0x4c] ss:$28 sps:$4 sm:$0xff]  }
 0x252   :  { %v15013_v63 = vpack.c.bf16 %v7470_v48, %v7459_v54  ;;  %v5221_v25 = vadd.f32 %v5220_v57, %v5108_v55  ;;  %v5111_v33 = vpop.f32.mrf.mxu0  ;;  %v5224_v39 = vpop.f32.mrf.mxu1  ;;  %v13480_v62 = vld [vmem:[#allocation6 + $0x758] ss:$44 sps:$4 sm:$0xff]  }
 0x253   :  { %v5112_v36 = vadd.f32 %v5111_v33, %v14934_v42  ;;  %v5223_v31 = vadd.f32 %v5222_v27, %v5110_v13  ;;  %5938 = vmatpush2.bf16.msra.mxu0 %v13459_v4  ;;  %v7471_v20 = vsel %vm7119_vm11, %v5217_v15, %v7295_v30  ;;  %v13471_v42 = vld [vmem:[#allocation6 + $0x230] ss:$44 sps:$4 sm:$0xff]   ;;  %v13477_v27 = vld [vmem:[#allocation6 + $0x1d8] ss:$44 sps:$4 sm:$0xff]  }
 0x254   :  { %16785 = vst [vmem:[#allocation51_spill] sm:$0xff] %v15013_v63  ;;  %v7305_v56 = vmul.f32 0.2, %v5221_v25  ;;  %v5113_v17 = vpop.f32.mrf.mxu0  ;;  %v5226_v24 = vpop.f32.mrf.mxu1  ;;  %6133 = vmatprep.subr.bf16.mxu0 %v13467_v9  ;;  %v15020_v32 = vpack.c.bf16 %v7471_v20, %v7460_v40  ;;  %vm7129_vm12 = vcmp.ge.f32.partialorder %v5221_v25, 0.0  ;;  %v14252_v4 = vld [vmem:[#allocation3 + $0x10] ss:$28 sps:$4 sm:$0xff]  }
 0x255   :  { %v5114_v3 = vadd.f32 %v5113_v17, %v14936_v0  ;;  %v5225_v23 = vadd.f32 %v5224_v39, %v5112_v36  ;;  %vm7130_vm13 = vcmp.ge.f32.partialorder %v5223_v31, 0.0  ;;  %v7306_v53 = vmul.f32 0.2, %v5223_v31  ;;  %v13485_v33 = vld [vmem:[#allocation6 + $0x184] ss:$44 sps:$4 sm:$0xff]  }
 0x256   :  { %16786 = vst [vmem:[#allocation52_spill] sm:$0xff] %v15020_v32  ;;  %v5263_v5 = vpop.f32.mrf.mxu0  ;;  %5940 = vmatmul.mubr.bf16.vlgmr.msra.gmra.mxu0 %v14252_v4  ;;  %6053 = vmatmul.mubr.bf16.vlgmr.msra.gmra.mxu1 %v14253_v44  ;;  %v5376_v35 = vpop.f32.mrf.mxu1  ;;  %v7481_v9 = vsel %vm7129_vm12, %v5221_v25, %v7305_v56  ;;  %v13488_v39 = vld [vmem:[#allocation6 + $0x704] ss:$44 sps:$4 sm:$0xff]   ;;  %v13494_v4 = vld [vmem:[#allocation6 + $0x6ac] ss:$44 sps:$4 sm:$0xff]  }
 0x257   :  { %vm7140_vm14 = vcmp.ge.f32.partialorder %v5225_v23, 0.0  ;;  %v7316_v57 = vmul.f32 0.2, %v5225_v23  ;;  %v5227_v19 = vadd.f32 %v5226_v24, %v5114_v3  ;;  %v5264_v0 = vadd.f32 %v5263_v5, %v15015_v34  ;;  %6134 = vmatpush1.bf16.msra.mxu0 %v13465_v58  ;;  %6247 = vmatpush1.bf16.msra.mxu1 %v13468_v26  ;;  %v13483_v24 = vld [vmem:[#allocation6 + $0x180] ss:$44 sps:$4 sm:$0xff]  }
 0x258   :  { %v5265_v51 = vpop.f32.mrf.mxu0  ;;  %v5378_v55 = vpop.f32.mrf.mxu1  ;;  %6135 = vmatprep.subr.bf16.mxu0 %v13473_v29  ;;  %6248 = vmatprep.subr.bf16.mxu1 %v13476_v45  ;;  %v7482_v1 = vsel %vm7130_vm13, %v5223_v31, %v7306_v53  ;;  %v13486_v31 = vld [vmem:[#allocation6 + $0x700] ss:$44 sps:$4 sm:$0xff]   ;;  %v14255_v3 = vld [vmem:[#allocation3 + $0x48] ss:$28 sps:$4 sm:$0xff]  }
 0x259   :  { %v7492_v15 = vsel %vm7140_vm14, %v5225_v23, %v7316_v57  ;;  %vm7141_vm15 = vcmp.ge.f32.partialorder %v5227_v19, 0.0  ;;  %v7317_v12 = vmul.f32 0.2, %v5227_v19  ;;  %v5266_v54 = vadd.f32 %v5265_v51, %v15023_v46  ;;  %5949 = vmatprep.mubr.bf16.mxu0 %v14254_v18  ;;  %6062 = vmatprep.mubr.bf16.mxu1 %v16772_v49  ;;  %v14256_v23 = vld [vmem:[#allocation3 + $0x50] ss:$28 sps:$4 sm:$0xff]  }
 0x25a   :  { %v15029_v48 = vpack.c.bf16 %v7492_v15, %v7481_v9  ;;  %v15031_v30 = vadd.f32 %v5376_v35, %v5264_v0  ;;  %v5267_v13 = vpop.f32.mrf.mxu0  ;;  %v5380_v25 = vpop.f32.mrf.mxu1  ;;  %v13491_v5 = vld [vmem:[#allocation6 + $0x12c] ss:$44 sps:$4 sm:$0xff]   ;;  %v14257_v57 = vld [vmem:[#allocation3 + $0x84] ss:$28 sps:$4 sm:$0xff]   ;;  %v13492_v0 = vld [vmem:[#allocation6 + $0x6a8] ss:$44 sps:$4 sm:$0xff]  }
 0x25b   :  { %v5268_v58 = vadd.f32 %v5267_v13, %v15015_v34  ;;  %v15035_v26 = vadd.f32 %v5378_v55, %v5266_v54  ;;  %6136 = vmatpush1.bf16.msra.mxu0 %v13471_v42  ;;  %6249 = vmatpush1.bf16.msra.mxu1 %v13474_v11  ;;  %v7493_v29 = vsel %vm7141_vm15, %v5227_v19, %v7317_v12  ;;  %v13489_v19 = vld [vmem:[#allocation6 + $0x128] ss:$44 sps:$4 sm:$0xff]   ;;  %v14270_v32 = vld [vmem:[#allocation3 + $0x160] ss:$28 sps:$4 sm:$0xff]  }
 0x25c   :  { %16787 = vst [vmem:[#allocation53_spill] sm:$0xff] %v15029_v48  ;;  %v5269_v36 = vpop.f32.mrf.mxu0  ;;  %v5382_v40 = vpop.f32.mrf.mxu1  ;;  %6137 = vmatprep.subr.bf16.mxu0 %v13479_v41  ;;  %6250 = vmatprep.subr.bf16.mxu1 %v13482_v21  ;;  %v15038_v20 = vpack.c.bf16 %v7493_v29, %v7482_v1  ;;  %v13497_v12 = vld [vmem:[#allocation6 + $0xd4] ss:$44 sps:$4 sm:$0xff]  }
 0x25d   :  { %v5270_v56 = vadd.f32 %v5269_v36, %v15023_v46  ;;  %v15041_v17 = vadd.f32 %v5380_v25, %v5268_v58  ;;  %v13500_v54 = vld [vmem:[#allocation6 + $0x654] ss:$44 sps:$4 sm:$0xff]   ;;  %v13495_v25 = vld [vmem:[#allocation6 + $0xd0] ss:$44 sps:$4 sm:$0xff]   ;;  %v14259_v58 = vld [vmem:[#allocation3 + $0x88] ss:$28 sps:$4 sm:$0xff]  }
 0x25e   :  { %16788 = vst [vmem:[#allocation54_spill] sm:$0xff] %v15038_v20  ;;  %v5273_v45 = vpop.f32.mrf.mxu0  ;;  %5950 = vmatmul.mubr.bf16.gmra.mxu0 %v14255_v3  ;;  %6063 = vmatmul.mubr.bf16.gmra.mxu1 %v14256_v23  ;;  %v5386_v42 = vpop.f32.mrf.mxu1  ;;  %v14258_v1 = vld [vmem:[#allocation3 + $0x80] ss:$28 sps:$4 sm:$0xff]  }
 0x25f   :  { %v5274_v11 = vadd.f32 %v5273_v45, %v15015_v34  ;;  %v15044_v53 = vadd.f32 %v5382_v40, %v5270_v56  ;;  %6138 = vmatpush1.bf16.msra.mxu0 %v13477_v27  ;;  %6251 = vmatpush1.bf16.msra.mxu1 %v13480_v62  ;;  %v13503_v56 = vld [vmem:[#allocation6 + $0x7c] ss:$44 sps:$4 sm:$0xff]  }
 0x260   :  { %v5275_v44 = vpop.f32.mrf.mxu0  ;;  %v5388_v35 = vpop.f32.mrf.mxu1  ;;  %6139 = vmatprep.subr.bf16.mxu0 %v13485_v33  ;;  %6252 = vmatprep.subr.bf16.mxu1 %v13488_v39  ;;  %v13498_v33 = vld [vmem:[#allocation6 + $0x650] ss:$44 sps:$4 sm:$0xff]  }
 0x261   :  { %v5276_v41 = vadd.f32 %v5275_v44, %v15023_v46  ;;  %v15047_v21 = vadd.f32 %v5386_v42, %v5274_v11  ;;  %5959 = vmatprep.mubr.bf16.mxu0 %v14257_v57  ;;  %6072 = vmatprep.mubr.bf16.mxu1 %v16772_v49  ;;  %v14260_v42 = vld [vmem:[#allocation3 + $0xbc] ss:$28 sps:$4 sm:$0xff]   ;;  %v13509_v57 = vld [vmem:[#allocation6 + $0x24] ss:$44 sps:$4 sm:$0xff]  }
 0x262   :  { %v5277_v9 = vpop.f32.mrf.mxu0  ;;  %v5390_v51 = vpop.f32.mrf.mxu1  ;;  %v13501_v11 = vld [vmem:[#allocation6 + $0x78] ss:$44 sps:$4 sm:$0xff]   ;;  %v13546_v20 = vld [vmem:[#allocation6 + $0x910] ss:$44 sps:$4 sm:$0xff]  }
 0x263   :  { %v5278_v55 = vadd.f32 %v5277_v9, %v15015_v34  ;;  %v15051_v15 = vadd.f32 %v5388_v35, %v5276_v41  ;;  %6140 = vmatpush1.bf16.msra.mxu0 %v13483_v24  ;;  %6253 = vmatpush1.bf16.msra.mxu1 %v13486_v31  ;;  %v13506_v24 = vld [vmem:[#allocation6 + $0x5fc] ss:$44 sps:$4 sm:$0xff]  }
 0x264   :  { %v5279_v18 = vpop.f32.mrf.mxu0  ;;  %v5392_v27 = vpop.f32.mrf.mxu1  ;;  %6141 = vmatprep.subr.bf16.mxu0 %v13491_v5  ;;  %6254 = vmatprep.subr.bf16.mxu1 %v13494_v4  ;;  %v13504_v5 = vld [vmem:[#allocation6 + $0x5f8] ss:$44 sps:$4 sm:$0xff]  }
 0x265   :  { %v5280_v62 = vadd.f32 %v5279_v18, %v15023_v46  ;;  %v15054_v13 = vadd.f32 %v5390_v51, %v5278_v55 }
 0x266   :  { %v5283_v39 = vpop.f32.mrf.mxu0  ;;  %5960 = vmatmul.mubr.bf16.gmra.mxu0 %v14258_v1  ;;  %6073 = vmatmul.mubr.bf16.gmra.mxu1 %v14259_v58  ;;  %v5396_v29 = vpop.f32.mrf.mxu1  ;;  %v13515_v1 = vld [vmem:[#allocation6 + $0x54c] ss:$44 sps:$4 sm:$0xff]  }
 0x267   :  { %v5284_v36 = vadd.f32 %v5283_v39, %v15015_v34  ;;  %v15057_v40 = vadd.f32 %v5392_v27, %v5280_v62  ;;  %6142 = vmatpush1.bf16.msra.mxu0 %v13489_v19  ;;  %6255 = vmatpush1.bf16.msra.mxu1 %v13492_v0  ;;  %v13512_v19 = vld [vmem:[#allocation6 + $0x5a4] ss:$44 sps:$4 sm:$0xff]   ;;  %v14261_v27 = vld [vmem:[#allocation3 + $0xb8] ss:$28 sps:$4 sm:$0xff]   ;;  %v14262_v62 = vld [vmem:[#allocation3 + $0xc0] ss:$28 sps:$4 sm:$0xff]  }
 0x268   :  { %v5285_v31 = vpop.f32.mrf.mxu0  ;;  %v5398_v45 = vpop.f32.mrf.mxu1  ;;  %6143 = vmatprep.subr.bf16.mxu0 %v13497_v12  ;;  %6256 = vmatprep.subr.bf16.mxu1 %v13500_v54  ;;  %v13507_v12 = vld [vmem:[#allocation6 + $0x20] ss:$44 sps:$4 sm:$0xff]  }
 0x269   :  { %v5286_v3 = vadd.f32 %v5285_v31, %v15023_v46  ;;  %v15060_v23 = vadd.f32 %v5396_v29, %v5284_v36  ;;  %5969 = vmatprep.mubr.bf16.mxu0 %v14260_v42  ;;  %6082 = vmatprep.mubr.bf16.mxu1 %v16772_v49  ;;  %v13510_v54 = vld [vmem:[#allocation6 + $0x5a0] ss:$44 sps:$4 sm:$0xff]   ;;  %v14263_v31 = vld [vmem:[#allocation3 + $0xf4] ss:$28 sps:$4 sm:$0xff]  }
 0x26a   :  { %v5287_v4 = vpop.f32.mrf.mxu0  ;;  %v5400_v44 = vpop.f32.mrf.mxu1  ;;  %v13518_v58 = vld [vmem:[#allocation6 + $0xacc] ss:$44 sps:$4 sm:$0xff]  }
 0x26b   :  { %v5288_v35 = vadd.f32 %v5287_v4, %v15015_v34  ;;  %v15064_v41 = vadd.f32 %v5398_v45, %v5286_v3  ;;  %6144 = vmatpush1.bf16.msra.mxu0 %v13495_v25  ;;  %6257 = vmatpush1.bf16.msra.mxu1 %v13498_v33  ;;  %v13513_v45 = vld [vmem:[#allocation6 + $0x548] ss:$44 sps:$4 sm:$0xff]  }
 0x26c   :  { %v5289_v0 = vpop.f32.mrf.mxu0  ;;  %v5402_v9 = vpop.f32.mrf.mxu1  ;;  %6145 = vmatprep.subr.bf16.mxu0 %v13503_v56  ;;  %6258 = vmatprep.subr.bf16.mxu1 %v13506_v24  ;;  %v13516_v3 = vld [vmem:[#allocation6 + $0xac8] ss:$44 sps:$4 sm:$0xff]  }
 0x26d   :  { %v5290_v51 = vadd.f32 %v5289_v0, %v15023_v46  ;;  %v15067_v55 = vadd.f32 %v5400_v44, %v5288_v35  ;;  %v13521_v44 = vld [vmem:[#allocation6 + $0x4f4] ss:$44 sps:$4 sm:$0xff]  }
 0x26e   :  { %v5293_v18 = vpop.f32.mrf.mxu0  ;;  %5970 = vmatmul.mubr.bf16.gmra.mxu0 %v14261_v27  ;;  %6083 = vmatmul.mubr.bf16.gmra.mxu1 %v14262_v62  ;;  %v5406_v39 = vpop.f32.mrf.mxu1  ;;  %v13524_v35 = vld [vmem:[#allocation6 + $0xa74] ss:$44 sps:$4 sm:$0xff]   ;;  %v14264_v62 = vld [vmem:[#allocation3 + $0xf0] ss:$28 sps:$4 sm:$0xff]  }
 0x26f   :  { %v5294_v25 = vadd.f32 %v5293_v18, %v15015_v34  ;;  %v15070_v33 = vadd.f32 %v5402_v9, %v5290_v51  ;;  %6146 = vmatpush1.bf16.msra.mxu0 %v13501_v11  ;;  %6259 = vmatpush1.bf16.msra.mxu1 %v13504_v5  ;;  %v13519_v51 = vld [vmem:[#allocation6 + $0x4f0] ss:$44 sps:$4 sm:$0xff]  }
 0x270   :  { %v5295_v29 = vpop.f32.mrf.mxu0  ;;  %v5408_v36 = vpop.f32.mrf.mxu1  ;;  %6147 = vmatprep.subr.bf16.mxu0 %v13509_v57  ;;  %6260 = vmatprep.subr.bf16.mxu1 %v13512_v19  ;;  %v13522_v18 = vld [vmem:[#allocation6 + $0xa70] ss:$44 sps:$4 sm:$0xff]  }
 0x271   :  { %v5296_v56 = vadd.f32 %v5295_v29, %v15023_v46  ;;  %v15073_v24 = vadd.f32 %v5406_v39, %v5294_v25  ;;  %5979 = vmatprep.mubr.bf16.mxu0 %v14263_v31  ;;  %6092 = vmatprep.mubr.bf16.mxu1 %v16772_v49  ;;  %v14265_v39 = vld [vmem:[#allocation3 + $0xf8] ss:$28 sps:$4 sm:$0xff]  }
 0x272   :  { %v5297_v42 = vpop.f32.mrf.mxu0  ;;  %v5410_v4 = vpop.f32.mrf.mxu1 }
 0x273   :  { %v5298_v11 = vadd.f32 %v5297_v42, %v15015_v34  ;;  %v15077_v5 = vadd.f32 %v5408_v36, %v5296_v56  ;;  %6148 = vmatpush1.bf16.msra.mxu0 %v13507_v12  ;;  %6261 = vmatpush1.bf16.msra.mxu1 %v13510_v54  ;;  %v14266_v42 = vld [vmem:[#allocation3 + $0x12c] ss:$28 sps:$4 sm:$0xff]  }
 0x274   :  { %v5299_v57 = vpop.f32.mrf.mxu0  ;;  %v5412_v19 = vpop.f32.mrf.mxu1  ;;  %6149 = vmatprep.subr.bf16.mxu0 %v13515_v1  ;;  %6262 = vmatprep.subr.bf16.mxu1 %v13518_v58  ;;  %v13527_v1 = vld [vmem:[#allocation6 + $0x49c] ss:$44 sps:$4 sm:$0xff]  }
 0x275   :  { %v5300_v0 = vadd.f32 %v5299_v57, %v15023_v46  ;;  %v15080_v9 = vadd.f32 %v5410_v4, %v5298_v11  ;;  %v13530_v58 = vld [vmem:[#allocation6 + $0xa1c] ss:$44 sps:$4 sm:$0xff]   ;;  %v13525_v4 = vld [vmem:[#allocation6 + $0x498] ss:$44 sps:$4 sm:$0xff]  }
 0x276   :  { %v5303_v27 = vpop.f32.mrf.mxu0  ;;  %5980 = vmatmul.mubr.bf16.gmra.mxu0 %v14264_v62  ;;  %6093 = vmatmul.mubr.bf16.gmra.mxu1 %v14265_v39  ;;  %v5416_v25 = vpop.f32.mrf.mxu1  ;;  %v13528_v11 = vld [vmem:[#allocation6 + $0xa18] ss:$44 sps:$4 sm:$0xff]  }
 0x277   :  { %v5304_v12 = vadd.f32 %v5303_v27, %v15015_v34  ;;  %v15083_v54 = vadd.f32 %v5412_v19, %v5300_v0  ;;  %6150 = vmatpush2.bf16.msra.mxu0 %v13513_v45  ;;  %6263 = vmatpush2.bf16.msra.mxu1 %v13516_v3 }
 0x278   :  { %v5305_v29 = vpop.f32.mrf.mxu0  ;;  %v5418_v36 = vpop.f32.mrf.mxu1  ;;  %6151 = vmatprep.subr.bf16.mxu0 %v13521_v44  ;;  %6264 = vmatprep.subr.bf16.mxu1 %v13524_v35  ;;  %v13533_v44 = vld [vmem:[#allocation6 + $0x444] ss:$44 sps:$4 sm:$0xff]  }
 0x279   :  { %v5306_v56 = vadd.f32 %v5305_v29, %v15023_v46  ;;  %v15086_v31 = vadd.f32 %v5416_v25, %v5304_v12  ;;  %5989 = vmatprep.mubr.bf16.mxu0 %v14266_v42  ;;  %6102 = vmatprep.mubr.bf16.mxu1 %v16772_v49  ;;  %v13536_v35 = vld [vmem:[#allocation6 + $0x9c4] ss:$44 sps:$4 sm:$0xff]   ;;  %v13531_v25 = vld [vmem:[#allocation6 + $0x440] ss:$44 sps:$4 sm:$0xff]  }
 0x27a   :  { %v5307_v57 = vpop.f32.mrf.mxu0  ;;  %v5420_v19 = vpop.f32.mrf.mxu1  ;;  %v13534_v12 = vld [vmem:[#allocation6 + $0x9c0] ss:$44 sps:$4 sm:$0xff]   ;;  %v14267_v42 = vld [vmem:[#allocation3 + $0x128] ss:$28 sps:$4 sm:$0xff]  }
 0x27b   :  { %v5308_v45 = vadd.f32 %v5307_v57, %v15015_v34  ;;  %v15090_v3 = vadd.f32 %v5418_v36, %v5306_v56  ;;  %6152 = vmatpush2.bf16.msra.mxu0 %v13519_v51  ;;  %6265 = vmatpush2.bf16.msra.mxu1 %v13522_v18  ;;  %v14268_v57 = vld [vmem:[#allocation3 + $0x130] ss:$28 sps:$4 sm:$0xff]  }
 0x27c   :  { %v5309_v0 = vpop.f32.mrf.mxu0  ;;  %v5422_v27 = vpop.f32.mrf.mxu1  ;;  %6153 = vmatprep.subr.bf16.mxu0 %v13527_v1  ;;  %6266 = vmatprep.subr.bf16.mxu1 %v13530_v58  ;;  %v13539_v1 = vld [vmem:[#allocation6 + $0x3ec] ss:$44 sps:$4 sm:$0xff]  }
 0x27d   :  { %v5310_v62 = vadd.f32 %v5309_v0, %v15023_v46  ;;  %v15093_v39 = vadd.f32 %v5420_v19, %v5308_v45  ;;  %v13542_v58 = vld [vmem:[#allocation6 + $0x96c] ss:$44 sps:$4 sm:$0xff]  }
 0x27e   :  { %v5313_v29 = vpop.f32.mrf.mxu0  ;;  %5990 = vmatmul.mubr.bf16.gmra.mxu0 %v14267_v42  ;;  %6103 = vmatmul.mubr.bf16.gmra.mxu1 %v14268_v57  ;;  %v5426_v36 = vpop.f32.mrf.mxu1  ;;  %v14269_v42 = vld [vmem:[#allocation3 + $0x164] ss:$28 sps:$4 sm:$0xff]   ;;  %v13537_v57 = vld [vmem:[#allocation6 + $0x3e8] ss:$44 sps:$4 sm:$0xff]  }
 0x27f   :  { %v5314_v51 = vadd.f32 %v5313_v29, %v15015_v34  ;;  %v15096_v18 = vadd.f32 %v5422_v27, %v5310_v62  ;;  %6154 = vmatpush2.bf16.msra.mxu0 %v13525_v4  ;;  %6267 = vmatpush2.bf16.msra.mxu1 %v13528_v11  ;;  %v13540_v29 = vld [vmem:[#allocation6 + $0x968] ss:$44 sps:$4 sm:$0xff]  }
 0x280   :  { %v5315_v56 = vpop.f32.mrf.mxu0  ;;  %v5428_v0 = vpop.f32.mrf.mxu1  ;;  %6155 = vmatprep.subr.bf16.mxu0 %v13533_v44  ;;  %6268 = vmatprep.subr.bf16.mxu1 %v13536_v35  ;;  %v13545_v44 = vld [vmem:[#allocation6 + $0x394] ss:$44 sps:$4 sm:$0xff]  }
 0x281   :  { %v5316_v19 = vadd.f32 %v5315_v56, %v15023_v46  ;;  %v15099_v45 = vadd.f32 %v5426_v36, %v5314_v51  ;;  %5999 = vmatprep.mubr.bf16.mxu0 %v14269_v42  ;;  %6112 = vmatprep.mubr.bf16.mxu1 %v16772_v49  ;;  %v13548_v35 = vld [vmem:[#allocation6 + $0x914] ss:$44 sps:$4 sm:$0xff]   ;;  %v13543_v42 = vld [vmem:[#allocation6 + $0x390] ss:$44 sps:$4 sm:$0xff]  }
 0x282   :  { %v5317_v27 = vpop.f32.mrf.mxu0  ;;  %v5430_v62 = vpop.f32.mrf.mxu1 }
 0x283   :  { %v5318_v4 = vadd.f32 %v5317_v27, %v15015_v34  ;;  %v15103_v11 = vadd.f32 %v5428_v0, %v5316_v19  ;;  %6156 = vmatpush2.bf16.msra.mxu0 %v13531_v25  ;;  %6269 = vmatpush2.bf16.msra.mxu1 %v13534_v12  ;;  %v14271_v27 = vld [vmem:[#allocation3 + $0x168] ss:$28 sps:$4 sm:$0xff]  }
 0x284   :  { %v5319_v48 = vpop.f32.mrf.mxu0  ;;  %v5432_v56 = vpop.f32.mrf.mxu1  ;;  %6157 = vmatprep.subr.bf16.mxu0 %v13539_v1  ;;  %6270 = vmatprep.subr.bf16.mxu1 %v13542_v58  ;;  %v13551_v1 = vld [vmem:[#allocation6 + $0x33c] ss:$44 sps:$4 sm:$0xff]  }
 0x285   :  { %v5320_v36 = vadd.f32 %v5319_v48, %v15023_v46  ;;  %v15106_v51 = vadd.f32 %v5430_v62, %v5318_v4  ;;  %v13554_v58 = vld [vmem:[#allocation6 + $0x8bc] ss:$44 sps:$4 sm:$0xff]  }
 0x286   :  { %v5323_v63 = vpop.f32.mrf.mxu0  ;;  %6000 = vmatmul.mubr.bf16.gmra.mxu0 %v14270_v32  ;;  %6113 = vmatmul.mubr.bf16.gmra.mxu1 %v14271_v27  ;;  %v5436_v0 = vpop.f32.mrf.mxu1  ;;  %v14272_v32 = vld [vmem:[#allocation3 + $0x19c] ss:$28 sps:$4 sm:$0xff]  }
 0x287   :  { %v5324_v25 = vadd.f32 %v5323_v63, %v15015_v34  ;;  %v15109_v12 = vadd.f32 %v5432_v56, %v5320_v36  ;;  %6158 = vmatpush2.bf16.msra.mxu0 %v13537_v57  ;;  %6271 = vmatpush2.bf16.msra.mxu1 %v13540_v29  ;;  %v13549_v27 = vld [vmem:[#allocation6 + $0x338] ss:$44 sps:$4 sm:$0xff]  }
 0x288   :  { %v5325_v19 = vpop.f32.mrf.mxu0  ;;  %v5438_v48 = vpop.f32.mrf.mxu1  ;;  %6159 = vmatprep.subr.bf16.mxu0 %v13545_v44  ;;  %6272 = vmatprep.subr.bf16.mxu1 %v13548_v35  ;;  %v13552_v63 = vld [vmem:[#allocation6 + $0x8b8] ss:$44 sps:$4 sm:$0xff]  }
 0x289   :  { %v5326_v62 = vadd.f32 %v5325_v19, %v15023_v46  ;;  %v15112_v4 = vadd.f32 %v5436_v0, %v5324_v25  ;;  %6009 = vmatprep.mubr.bf16.mxu0 %v14272_v32  ;;  %6122 = vmatprep.mubr.bf16.mxu1 %v16772_v49  ;;  %v13557_v57 = vld [vmem:[#allocation6 + $0x2e4] ss:$44 sps:$4 sm:$0xff]   ;;  %v13555_v19 = vld [vmem:[#allocation6 + $0x2e0] ss:$44 sps:$4 sm:$0xff]  }
 0x28a   :  { %v5327_v56 = vpop.f32.mrf.mxu0  ;;  %v5440_v36 = vpop.f32.mrf.mxu1  ;;  %v13560_v29 = vld [vmem:[#allocation6 + $0x864] ss:$44 sps:$4 sm:$0xff]  }
 0x28b   :  { %v5328_v10 = vadd.f32 %v5327_v56, %v15015_v34  ;;  %v15116_v16 = vadd.f32 %v5438_v48, %v5326_v62  ;;  %6160 = vmatpush2.bf16.msra.mxu0 %v13543_v42  ;;  %6273 = vmatpush2.bf16.msra.mxu1 %v13546_v20  ;;  %v13558_v56 = vld [vmem:[#allocation6 + $0x860] ss:$44 sps:$4 sm:$0xff]  }
 0x28c   :  { %v5329_v44 = vpop.f32.mrf.mxu0  ;;  %v5442_v35 = vpop.f32.mrf.mxu1  ;;  %6161 = vmatprep.subr.bf16.mxu0 %v13551_v1  ;;  %6274 = vmatprep.subr.bf16.mxu1 %v13554_v58  ;;  %v13563_v20 = vld [vmem:[#allocation6 + $0xd8c] ss:$44 sps:$4 sm:$0xff]  }
 0x28d   :  { %v5330_v0 = vadd.f32 %v5329_v44, %v15023_v46  ;;  %v15119_v25 = vadd.f32 %v5440_v36, %v5328_v10  ;;  %v13575_v1 = vld [vmem:[#allocation6 + $0x130c] ss:$44 sps:$4 sm:$0xff]   ;;  %v13561_v44 = vld [vmem:[#allocation6 + $0xd88] ss:$44 sps:$4 sm:$0xff]  }
 0x28e   :  { %v5333_v32 = vpop.f32.mrf.mxu0  ;;  %6010 = vmatmul.mubr.bf16.gmra.mxu0 %v14273_v59  ;;  %6123 = vmatmul.mubr.bf16.gmra.mxu1 %v14274_v47  ;;  %v5446_v37 = vpop.f32.mrf.mxu1  ;;  %v14275_v59 = vld [vmem:[#allocation3 + $0x4] ss:$28 sps:$4 sm:$0xff]   ;;  %v14276_v47 = vld [vmem:[#allocation3 + $0xc] ss:$28 sps:$4 sm:$0xff]  }
 0x28f   :  { %v5334_v48 = vadd.f32 %v5333_v32, %v15015_v34  ;;  %v15122_v42 = vadd.f32 %v5442_v35, %v5330_v0  ;;  %6162 = vmatpush2.bf16.msra.mxu0 %v13549_v27  ;;  %6275 = vmatpush2.bf16.msra.mxu1 %v13552_v63  ;;  %v13566_v0 = vld [vmem:[#allocation6 + $0xd34] ss:$44 sps:$4 sm:$0xff]  }
 0x290   :  { %v5335_v58 = vpop.f32.mrf.mxu0  ;;  %v5448_v62 = vpop.f32.mrf.mxu1  ;;  %6163 = vmatprep.subr.bf16.mxu0 %v13557_v57  ;;  %6276 = vmatprep.subr.bf16.mxu1 %v13560_v29  ;;  %v13573_v57 = vld [vmem:[#allocation6 + $0x1308] ss:$44 sps:$4 sm:$0xff]  }
 0x291   :  { %v5336_v10 = vadd.f32 %v5335_v58, %v15023_v46  ;;  %v15125_v36 = vadd.f32 %v5446_v37, %v5334_v48  ;;  %6165 = vmatprep.mubr.bf16.mxu0 %v14275_v59  ;;  %6278 = vmatprep.mubr.bf16.mxu1 %v14276_v47  ;;  %v13584_v37 = vld [vmem:[#allocation6 + $0x12b4] ss:$44 sps:$4 sm:$0xff]   ;;  %v13564_v59 = vld [vmem:[#allocation6 + $0xd30] ss:$44 sps:$4 sm:$0xff]  }
 0x292   :  { %v5337_v32 = vpop.f32.mrf.mxu0  ;;  %v5450_v35 = vpop.f32.mrf.mxu1 }
 0x293   :  { %v5338_v27 = vadd.f32 %v5337_v32, %v15015_v34  ;;  %v15128_v63 = vadd.f32 %v5448_v62, %v5336_v10  ;;  %6164 = vmatpush2.bf16.msra.mxu0 %v13555_v19  ;;  %6277 = vmatpush2.bf16.msra.mxu1 %v13558_v56  ;;  %v14279_v56 = vld [vmem:[#allocation3 + $0x3c] ss:$28 sps:$4 sm:$0xff]   ;;  %v14280_v32 = vld [vmem:[#allocation3 + $0x44] ss:$28 sps:$4 sm:$0xff]  }
 0x294   :  { %v5339_v29 = vpop.f32.mrf.mxu0  ;;  %v5452_v8 = vpop.f32.mrf.mxu1  ;;  %6359 = vmatprep.subr.bf16.mxu0 %v13563_v20  ;;  %6472 = vmatprep.subr.bf16.mxu1 %v13575_v1  ;;  %v13569_v20 = vld [vmem:[#allocation6 + $0xcdc] ss:$44 sps:$4 sm:$0xff]  }
 0x295   :  { %v5340_v48 = vadd.f32 %v5339_v29, %v15023_v46  ;;  %v15131_v58 = vadd.f32 %v5450_v35, %v5338_v27  ;;  %v13582_v1 = vld [vmem:[#allocation6 + $0x12b0] ss:$44 sps:$4 sm:$0xff]   ;;  %v13567_v27 = vld [vmem:[#allocation6 + $0xcd8] ss:$44 sps:$4 sm:$0xff]  }
 0x296   :  { %v5489_v47 = vpop.f32.mrf.mxu0  ;;  %6166 = vmatmul.mubr.bf16.vlgmr.msra.gmra.mxu0 %v14277_v28  ;;  %6279 = vmatmul.mubr.bf16.vlgmr.msra.gmra.mxu1 %v14278_v52  ;;  %v5602_v34 = vpop.f32.mrf.mxu1  ;;  %v13572_v29 = vld [vmem:[#allocation6 + $0xc84] ss:$44 sps:$4 sm:$0xff]  }
 0x297   :  { %v15133_v62 = vadd.f32 %v5452_v8, %v5340_v48  ;;  %v5490_v19 = vadd.f32 %v5489_v47, %v15031_v30  ;;  %6360 = vmatpush1.bf16.msra.mxu0 %v13561_v44  ;;  %6175 = vmatprep.mubr.bf16.mxu0 %v14279_v56  ;;  %v13593_v48 = vld [vmem:[#allocation6 + $0x125c] ss:$44 sps:$4 sm:$0xff]  }
 0x298   :  { %v5491_v10 = vpop.f32.mrf.mxu0  ;;  %v5604_v46 = vpop.f32.mrf.mxu1  ;;  %6361 = vmatprep.subr.bf16.mxu0 %v13566_v0  ;;  %6288 = vmatprep.mubr.bf16.mxu1 %v14280_v32  ;;  %v13591_v0 = vld [vmem:[#allocation6 + $0x1258] ss:$44 sps:$4 sm:$0xff]  }
 0x299   :  { %v5492_v35 = vadd.f32 %v5491_v10, %v15035_v26  ;;  %v5603_v28 = vadd.f32 %v5602_v34, %v5490_v19  ;;  %6473 = vmatpush1.bf16.msra.mxu1 %v13573_v57  ;;  %v13570_v34 = vld [vmem:[#allocation6 + $0xc80] ss:$44 sps:$4 sm:$0xff]   ;;  %v13602_v57 = vld [vmem:[#allocation6 + $0x1204] ss:$44 sps:$4 sm:$0xff]  }
 0x29a   :  { %v5493_v52 = vpop.f32.mrf.mxu0  ;;  %v5606_v8 = vpop.f32.mrf.mxu1  ;;  %6474 = vmatprep.subr.bf16.mxu1 %v13584_v37  ;;  %v14281_v37 = vld [vmem:[#allocation3 + $0x38] ss:$28 sps:$4 sm:$0xff]  }
 0x29b   :  { %vm6977_vm0 = vcmp.ge.f32.partialorder %v5603_v28, 0.0  ;;  %v5494_v30 = vadd.f32 %v5493_v52, %v15041_v17  ;;  %v5605_v44 = vadd.f32 %v5604_v46, %v5492_v35  ;;  %6362 = vmatpush1.bf16.msra.mxu0 %v13564_v59  ;;  %v7153_v32 = vmul.f32 0.2, %v5603_v28  ;;  %v13578_v59 = vld [vmem:[#allocation6 + $0xc2c] ss:$44 sps:$4 sm:$0xff]  }
 0x29c   :  { %v5495_v47 = vpop.f32.mrf.mxu0  ;;  %v5608_v56 = vpop.f32.mrf.mxu1  ;;  %6363 = vmatprep.subr.bf16.mxu0 %v13569_v20  ;;  %v14283_v20 = vld [vmem:[#allocation3 + $0x74] ss:$28 sps:$4 sm:$0xff]  }
 0x29d   :  { %v7154_v22 = vmul.f32 0.2, %v5605_v44  ;;  %v5496_v26 = vadd.f32 %v5495_v47, %v15044_v53  ;;  %6475 = vmatpush1.bf16.msra.mxu1 %v13582_v1  ;;  %v5607_v19 = vadd.f32 %v5606_v8, %v5494_v30  ;;  %vm6978_vm1 = vcmp.ge.f32.partialorder %v5605_v44, 0.0  ;;  %v14284_v8 = vld [vmem:[#allocation3 + $0x7c] ss:$28 sps:$4 sm:$0xff]  }
 0x29e   :  { %v5499_v10 = vpop.f32.mrf.mxu0  ;;  %6176 = vmatmul.mubr.bf16.gmra.mxu0 %v14281_v37  ;;  %6289 = vmatmul.mubr.bf16.gmra.mxu1 %v14282_v61  ;;  %v5612_v17 = vpop.f32.mrf.mxu1  ;;  %v13576_v37 = vld [vmem:[#allocation6 + $0xc28] ss:$44 sps:$4 sm:$0xff]  }
 0x29f   :  { %v5500_v46 = vadd.f32 %v5499_v10, %v15047_v21  ;;  %v5609_v35 = vadd.f32 %v5608_v56, %v5496_v26  ;;  %6364 = vmatpush1.bf16.msra.mxu0 %v13567_v27  ;;  %6185 = vmatprep.mubr.bf16.mxu0 %v14283_v20  ;;  %vm6988_vm2 = vcmp.ge.f32.partialorder %v5607_v19, 0.0  ;;  %v7164_v53 = vmul.f32 0.2, %v5607_v19  ;;  %v13581_v20 = vld [vmem:[#allocation6 + $0xbd4] ss:$44 sps:$4 sm:$0xff]  }
 0x2a0   :  { %v5501_v52 = vpop.f32.mrf.mxu0  ;;  %v5614_v1 = vpop.f32.mrf.mxu1  ;;  %6365 = vmatprep.subr.bf16.mxu0 %v13572_v29  ;;  %6298 = vmatprep.mubr.bf16.mxu1 %v14284_v8  ;;  %v7329_v21 = vsel %vm6977_vm0, %v5603_v28, %v7153_v32  ;;  %v13600_v8 = vld [vmem:[#allocation6 + $0x1200] ss:$44 sps:$4 sm:$0xff]   ;;  %v7330_v28 = vsel %vm6978_vm1, %v5605_v44, %v7154_v22 }
 0x2a1   :  { %vm6989_vm3 = vcmp.ge.f32.partialorder %v5609_v35, 0.0  ;;  %v7165_v30 = vmul.f32 0.2, %v5609_v35  ;;  %v5502_v61 = vadd.f32 %v5501_v52, %v15051_v15  ;;  %v5613_v47 = vadd.f32 %v5612_v17, %v5500_v46  ;;  %6476 = vmatprep.subr.bf16.mxu1 %v13593_v48  ;;  %v14285_v52 = vld [vmem:[#allocation3 + $0x70] ss:$28 sps:$4 sm:$0xff]  }
 0x2a2   :  { %v7340_v27 = vsel %vm6988_vm2, %v5607_v19, %v7164_v53  ;;  %v5503_v56 = vpop.f32.mrf.mxu0  ;;  %v5616_v26 = vpop.f32.mrf.mxu1  ;;  %6477 = vmatpush1.bf16.msra.mxu1 %v13591_v0  ;;  %v13579_v19 = vld [vmem:[#allocation6 + $0xbd0] ss:$44 sps:$4 sm:$0xff]  }
 0x2a3   :  { %v15142_v10 = vpack.c.bf16 %v7340_v27, %v7329_v21  ;;  %vm6999_vm4 = vcmp.ge.f32.partialorder %v5613_v47, 0.0  ;;  %v5504_v29 = vadd.f32 %v5503_v56, %v15054_v13  ;;  %6366 = vmatpush1.bf16.msra.mxu0 %v13570_v34  ;;  %6478 = vmatprep.subr.bf16.mxu1 %v13602_v57  ;;  %v7175_v38 = vmul.f32 0.2, %v5613_v47  ;;  %v14286_v57 = vld [vmem:[#allocation3 + $0x78] ss:$28 sps:$4 sm:$0xff]  }
 0x2a4   :  { %v5615_v15 = vadd.f32 %v5614_v1, %v5502_v61  ;;  %v5505_v17 = vpop.f32.mrf.mxu0  ;;  %v5618_v46 = vpop.f32.mrf.mxu1  ;;  %6367 = vmatprep.subr.bf16.mxu0 %v13578_v59  ;;  %v7341_v48 = vsel %vm6989_vm3, %v5609_v35, %v7165_v30  ;;  %v13587_v61 = vld [vmem:[#allocation6 + $0xb7c] ss:$44 sps:$4 sm:$0xff]   ;;  %v13611_v21 = vld [vmem:[#allocation6 + $0x11ac] ss:$44 sps:$4 sm:$0xff]   ;;  %v14288_v56 = vld [vmem:[#allocation3 + $0xb4] ss:$28 sps:$4 sm:$0xff]  }
 0x2a5   :  { %16789 = vst [vmem:[#allocation55_spill] sm:$0xff] %v15142_v10  ;;  %v5506_v0 = vadd.f32 %v5505_v17, %v15057_v40  ;;  %v5617_v32 = vadd.f32 %v5616_v26, %v5504_v29  ;;  %v15148_v53 = vpack.c.bf16 %v7341_v48, %v7330_v28  ;;  %v14287_v40 = vld [vmem:[#allocation3 + $0xac] ss:$28 sps:$4 sm:$0xff]   ;;  %v7351_v35 = vsel %vm6999_vm4, %v5613_v47, %v7175_v38 }
 0x2a6   :  { %v7176_v13 = vmul.f32 0.2, %v5615_v15  ;;  %v5509_v34 = vpop.f32.mrf.mxu0  ;;  %6186 = vmatmul.mubr.bf16.gmra.mxu0 %v14285_v52  ;;  %6299 = vmatmul.mubr.bf16.gmra.mxu1 %v14286_v57  ;;  %v5622_v1 = vpop.f32.mrf.mxu1  ;;  %vm7000_vm6 = vcmp.ge.f32.partialorder %v5615_v15, 0.0  ;;  %v13609_v28 = vld [vmem:[#allocation6 + $0x11a8] ss:$44 sps:$4 sm:$0xff]  }
 0x2a7   :  { %16790 = vst [vmem:[#allocation56_spill] sm:$0xff] %v15148_v53  ;;  %vm7010_vm5 = vcmp.ge.f32.partialorder %v5617_v32, 0.0  ;;  %v7186_v59 = vmul.f32 0.2, %v5617_v32  ;;  %v5510_v22 = vadd.f32 %v5509_v34, %v15060_v23  ;;  %v5619_v44 = vadd.f32 %v5618_v46, %v5506_v0  ;;  %6368 = vmatpush1.bf16.msra.mxu0 %v13576_v37  ;;  %6195 = vmatprep.mubr.bf16.mxu0 %v14287_v40  ;;  %v14289_v40 = vld [vmem:[#allocation3 + $0xa8] ss:$28 sps:$4 sm:$0xff]  }
 0x2a8   :  { %v5511_v30 = vpop.f32.mrf.mxu0  ;;  %v5624_v27 = vpop.f32.mrf.mxu1  ;;  %6369 = vmatprep.subr.bf16.mxu0 %v13581_v20  ;;  %6308 = vmatprep.mubr.bf16.mxu1 %v14288_v56  ;;  %v13585_v20 = vld [vmem:[#allocation6 + $0xb78] ss:$44 sps:$4 sm:$0xff]   ;;  %v7352_v0 = vsel %vm7000_vm6, %v5615_v15, %v7176_v13  ;;  %v14290_v15 = vld [vmem:[#allocation3 + $0xb0] ss:$28 sps:$4 sm:$0xff]  }
 0x2a9   :  { %v7362_v26 = vsel %vm7010_vm5, %v5617_v32, %v7186_v59  ;;  %vm7011_vm7 = vcmp.ge.f32.partialorder %v5619_v44, 0.0  ;;  %v7187_v29 = vmul.f32 0.2, %v5619_v44  ;;  %v5512_v17 = vadd.f32 %v5511_v30, %v15064_v41  ;;  %6479 = vmatpush1.bf16.msra.mxu1 %v13600_v8  ;;  %v13590_v41 = vld [vmem:[#allocation6 + $0xb24] ss:$44 sps:$4 sm:$0xff]  }
 0x2aa   :  { %v15153_v23 = vpack.c.bf16 %v7362_v26, %v7351_v35  ;;  %v5623_v37 = vadd.f32 %v5622_v1, %v5510_v22  ;;  %v5513_v46 = vpop.f32.mrf.mxu0  ;;  %v5626_v48 = vpop.f32.mrf.mxu1  ;;  %6480 = vmatprep.subr.bf16.mxu1 %v13611_v21  ;;  %v13588_v21 = vld [vmem:[#allocation6 + $0xb20] ss:$44 sps:$4 sm:$0xff]  }
 0x2ab   :  { %v5514_v38 = vadd.f32 %v5513_v46, %v15067_v55  ;;  %v5625_v47 = vadd.f32 %v5624_v27, %v5512_v17  ;;  %6370 = vmatpush1.bf16.msra.mxu0 %v13579_v19  ;;  %v7363_v32 = vsel %vm7011_vm7, %v5619_v44, %v7187_v29  ;;  %v13620_v55 = vld [vmem:[#allocation6 + $0x1154] ss:$44 sps:$4 sm:$0xff]   ;;  %v13618_v44 = vld [vmem:[#allocation6 + $0x1150] ss:$44 sps:$4 sm:$0xff]   ;;  %v14292_v17 = vld [vmem:[#allocation3 + $0xec] ss:$28 sps:$4 sm:$0xff]  }
 0x2ac   :  { %16791 = vst [vmem:[#allocation57_spill] sm:$0xff] %v15153_v23  ;;  %v7197_v34 = vmul.f32 0.2, %v5623_v37  ;;  %v5515_v52 = vpop.f32.mrf.mxu0  ;;  %v5628_v57 = vpop.f32.mrf.mxu1  ;;  %6371 = vmatprep.subr.bf16.mxu0 %v13587_v61  ;;  %v15157_v8 = vpack.c.bf16 %v7363_v32, %v7352_v0  ;;  %vm7021_vm8 = vcmp.ge.f32.partialorder %v5623_v37, 0.0  ;;  %v13626_v27 = vld [vmem:[#allocation6 + $0x10fc] ss:$44 sps:$4 sm:$0xff]  }
 0x2ad   :  { %v5516_v1 = vadd.f32 %v5515_v52, %v15070_v33  ;;  %v5627_v59 = vadd.f32 %v5626_v48, %v5514_v38  ;;  %6481 = vmatpush1.bf16.msra.mxu1 %v13609_v28  ;;  %vm7022_vm9 = vcmp.ge.f32.partialorder %v5625_v47, 0.0  ;;  %v7198_v19 = vmul.f32 0.2, %v5625_v47  ;;  %v14291_v33 = vld [vmem:[#allocation3 + $0xe4] ss:$28 sps:$4 sm:$0xff]  }
 0x2ae   :  { %16792 = vst [vmem:[#allocation58_spill] sm:$0xff] %v15157_v8  ;;  %v5519_v22 = vpop.f32.mrf.mxu0  ;;  %6196 = vmatmul.mubr.bf16.gmra.mxu0 %v14289_v40  ;;  %6309 = vmatmul.mubr.bf16.gmra.mxu1 %v14290_v15  ;;  %v5632_v13 = vpop.f32.mrf.mxu1  ;;  %v7373_v56 = vsel %vm7021_vm8, %v5623_v37, %v7197_v34  ;;  %v13596_v28 = vld [vmem:[#allocation6 + $0x104c] ss:$44 sps:$4 sm:$0xff]   ;;  %v14334_v8 = vld [vmem:[#allocation3] ss:$28 sps:$4 sm:$0xff]  }
 0x2af   :  { %vm7032_vm10 = vcmp.ge.f32.partialorder %v5627_v59, 0.0  ;;  %v7208_v61 = vmul.f32 0.2, %v5627_v59  ;;  %v5520_v35 = vadd.f32 %v5519_v22, %v15073_v24  ;;  %v5629_v30 = vadd.f32 %v5628_v57, %v5516_v1  ;;  %6372 = vmatpush1.bf16.msra.mxu0 %v13585_v20  ;;  %6205 = vmatprep.mubr.bf16.mxu0 %v14291_v33  ;;  %v13594_v57 = vld [vmem:[#allocation6 + $0x1048] ss:$44 sps:$4 sm:$0xff]  }
 0x2b0   :  { %v5521_v26 = vpop.f32.mrf.mxu0  ;;  %v5634_v29 = vpop.f32.mrf.mxu1  ;;  %6373 = vmatprep.subr.bf16.mxu0 %v13590_v41  ;;  %6318 = vmatprep.mubr.bf16.mxu1 %v14292_v17  ;;  %v7374_v37 = vsel %vm7022_vm9, %v5625_v47, %v7198_v19  ;;  %v14296_v17 = vld [vmem:[#allocation3 + $0x124] ss:$28 sps:$4 sm:$0xff]  }
 0x2b1   :  { %v7384_v46 = vsel %vm7032_vm10, %v5627_v59, %v7208_v61  ;;  %vm7033_vm11 = vcmp.ge.f32.partialorder %v5629_v30, 0.0  ;;  %v7209_v48 = vmul.f32 0.2, %v5629_v30  ;;  %v5522_v38 = vadd.f32 %v5521_v26, %v15077_v5  ;;  %6482 = vmatprep.subr.bf16.mxu1 %v13620_v55  ;;  %v13599_v5 = vld [vmem:[#allocation6 + $0xff4] ss:$44 sps:$4 sm:$0xff]  }
 0x2b2   :  { %v15163_v24 = vpack.c.bf16 %v7384_v46, %v7373_v56  ;;  %v5633_v20 = vadd.f32 %v5632_v13, %v5520_v35  ;;  %v5523_v0 = vpop.f32.mrf.mxu0  ;;  %v5636_v32 = vpop.f32.mrf.mxu1  ;;  %6483 = vmatpush1.bf16.msra.mxu1 %v13618_v44  ;;  %v13624_v13 = vld [vmem:[#allocation6 + $0x10f8] ss:$44 sps:$4 sm:$0xff]  }
 0x2b3   :  { %v5524_v34 = vadd.f32 %v5523_v0, %v15080_v9  ;;  %v5635_v52 = vadd.f32 %v5634_v29, %v5522_v38  ;;  %6374 = vmatpush1.bf16.msra.mxu0 %v13588_v21  ;;  %6484 = vmatprep.subr.bf16.mxu1 %v13626_v27  ;;  %v7385_v41 = vsel %vm7033_vm11, %v5629_v30, %v7209_v48  ;;  %v14293_v9 = vld [vmem:[#allocation3 + $0xe0] ss:$28 sps:$4 sm:$0xff]   ;;  %v14294_v21 = vld [vmem:[#allocation3 + $0xe8] ss:$28 sps:$4 sm:$0xff]  }
 0x2b4   :  { %16793 = vst [vmem:[#allocation59_spill] sm:$0xff] %v15163_v24  ;;  %v7219_v1 = vmul.f32 0.2, %v5633_v20  ;;  %v5525_v59 = vpop.f32.mrf.mxu0  ;;  %v5638_v22 = vpop.f32.mrf.mxu1  ;;  %6375 = vmatprep.subr.bf16.mxu0 %v13596_v28  ;;  %v15167_v55 = vpack.c.bf16 %v7385_v41, %v7374_v37  ;;  %vm7043_vm12 = vcmp.ge.f32.partialorder %v5633_v20, 0.0  ;;  %v13632_v61 = vld [vmem:[#allocation6 + $0x10a4] ss:$44 sps:$4 sm:$0xff]  }
 0x2b5   :  { %v5526_v40 = vadd.f32 %v5525_v59, %v15083_v54  ;;  %v5637_v15 = vadd.f32 %v5636_v32, %v5524_v34  ;;  %v7220_v47 = vmul.f32 0.2, %v5635_v52  ;;  %v13597_v27 = vld [vmem:[#allocation6 + $0xff0] ss:$44 sps:$4 sm:$0xff]   ;;  %vm7044_vm14 = vcmp.ge.f32.partialorder %v5635_v52, 0.0 }
 0x2b6   :  { %16794 = vst [vmem:[#allocation60_spill] sm:$0xff] %v15167_v55  ;;  %v5529_v19 = vpop.f32.mrf.mxu0  ;;  %6206 = vmatmul.mubr.bf16.gmra.mxu0 %v14293_v9  ;;  %6319 = vmatmul.mubr.bf16.gmra.mxu1 %v14294_v21  ;;  %v5642_v44 = vpop.f32.mrf.mxu1  ;;  %v14295_v56 = vld [vmem:[#allocation3 + $0x11c] ss:$28 sps:$4 sm:$0xff]   ;;  %v7395_v54 = vsel %vm7043_vm12, %v5633_v20, %v7219_v1  ;;  %v13630_v38 = vld [vmem:[#allocation6 + $0x10a0] ss:$44 sps:$4 sm:$0xff]  }
 0x2b7   :  { %vm7054_vm13 = vcmp.ge.f32.partialorder %v5637_v15, 0.0  ;;  %v7230_v35 = vmul.f32 0.2, %v5637_v15  ;;  %v5530_v30 = vadd.f32 %v5529_v19, %v15086_v31  ;;  %v5639_v33 = vadd.f32 %v5638_v22, %v5526_v40  ;;  %6376 = vmatpush2.bf16.msra.mxu0 %v13594_v57  ;;  %6215 = vmatprep.mubr.bf16.mxu0 %v14295_v56  ;;  %v13605_v28 = vld [vmem:[#allocation6 + $0xf9c] ss:$44 sps:$4 sm:$0xff]  }
 0x2b8   :  { %v5531_v26 = vpop.f32.mrf.mxu0  ;;  %v5644_v29 = vpop.f32.mrf.mxu1  ;;  %6377 = vmatprep.subr.bf16.mxu0 %v13599_v5  ;;  %6328 = vmatprep.mubr.bf16.mxu1 %v14296_v17  ;;  %v13603_v41 = vld [vmem:[#allocation6 + $0xf98] ss:$44 sps:$4 sm:$0xff]   ;;  %v7396_v1 = vsel %vm7044_vm14, %v5635_v52, %v7220_v47  ;;  %v13637_v9 = vld [vmem:[#allocation6 + $0xad0] ss:$44 sps:$4 sm:$0xff]  }
 0x2b9   :  { %v7406_v46 = vsel %vm7054_vm13, %v5637_v15, %v7230_v35  ;;  %vm7055_vm15 = vcmp.ge.f32.partialorder %v5639_v33, 0.0  ;;  %v7231_v48 = vmul.f32 0.2, %v5639_v33  ;;  %v5532_v31 = vadd.f32 %v5531_v26, %v15090_v3  ;;  %6485 = vmatpush1.bf16.msra.mxu1 %v13624_v13  ;;  %v13608_v3 = vld [vmem:[#allocation6 + $0xf44] ss:$44 sps:$4 sm:$0xff]  }
 0x2ba   :  { %v15174_v0 = vpack.c.bf16 %v7406_v46, %v7395_v54  ;;  %v5643_v32 = vadd.f32 %v5642_v44, %v5530_v30  ;;  %v5533_v37 = vpop.f32.mrf.mxu0  ;;  %v5646_v20 = vpop.f32.mrf.mxu1  ;;  %6486 = vmatprep.subr.bf16.mxu1 %v13632_v61  ;;  %v14297_v44 = vld [vmem:[#allocation3 + $0x118] ss:$28 sps:$4 sm:$0xff]   ;;  %v14298_v61 = vld [vmem:[#allocation3 + $0x120] ss:$28 sps:$4 sm:$0xff]  }
 0x2bb   :  { %v5534_v34 = vadd.f32 %v5533_v37, %v15093_v39  ;;  %v5645_v57 = vadd.f32 %v5644_v29, %v5532_v31  ;;  %6378 = vmatpush2.bf16.msra.mxu0 %v13597_v27  ;;  %v7407_v59 = vsel %vm7055_vm15, %v5639_v33, %v7231_v48  ;;  %v13606_v33 = vld [vmem:[#allocation6 + $0xf40] ss:$44 sps:$4 sm:$0xff]   ;;  %v14299_v27 = vld [vmem:[#allocation3 + $0x154] ss:$28 sps:$4 sm:$0xff]   ;;  %v14300_v26 = vld [vmem:[#allocation3 + $0x15c] ss:$28 sps:$4 sm:$0xff]  }
 0x2bc   :  { %16795 = vst [vmem:[#allocation61_spill] sm:$0xff] %v15174_v0  ;;  %v7241_v22 = vmul.f32 0.2, %v5643_v32  ;;  %v5535_v5 = vpop.f32.mrf.mxu0  ;;  %v5648_v40 = vpop.f32.mrf.mxu1  ;;  %6379 = vmatprep.subr.bf16.mxu0 %v13605_v28  ;;  %v15178_v15 = vpack.c.bf16 %v7407_v59, %v7396_v1  ;;  %vm7065_vm0 = vcmp.ge.f32.partialorder %v5643_v32, 0.0  ;;  %v13614_v29 = vld [vmem:[#allocation6 + $0xeec] ss:$44 sps:$4 sm:$0xff]  }
 0x2bd   :  { %v5536_v13 = vadd.f32 %v5535_v5, %v15096_v18  ;;  %v5647_v19 = vadd.f32 %v5646_v20, %v5534_v34  ;;  %6487 = vmatpush1.bf16.msra.mxu1 %v13630_v38  ;;  %v7242_v39 = vmul.f32 0.2, %v5645_v57  ;;  %vm7066_vm2 = vcmp.ge.f32.partialorder %v5645_v57, 0.0  ;;  %v13612_v20 = vld [vmem:[#allocation6 + $0xee8] ss:$44 sps:$4 sm:$0xff]  }
 0x2be   :  { %16796 = vst [vmem:[#allocation62_spill] sm:$0xff] %v15178_v15  ;;  %v5539_v21 = vpop.f32.mrf.mxu0  ;;  %6216 = vmatmul.mubr.bf16.gmra.mxu0 %v14297_v44  ;;  %6329 = vmatmul.mubr.bf16.gmra.mxu1 %v14298_v61  ;;  %v5652_v52 = vpop.f32.mrf.mxu1  ;;  %v7417_v18 = vsel %vm7065_vm0, %v5643_v32, %v7241_v22  ;;  %v13617_v5 = vld [vmem:[#allocation6 + $0xe94] ss:$44 sps:$4 sm:$0xff]   ;;  %v13615_v61 = vld [vmem:[#allocation6 + $0xe90] ss:$44 sps:$4 sm:$0xff]  }
 0x2bf   :  { %vm7076_vm1 = vcmp.ge.f32.partialorder %v5647_v19, 0.0  ;;  %v7252_v47 = vmul.f32 0.2, %v5647_v19  ;;  %v5540_v35 = vadd.f32 %v5539_v21, %v15099_v45  ;;  %v5649_v30 = vadd.f32 %v5648_v40, %v5536_v13  ;;  %6380 = vmatpush2.bf16.msra.mxu0 %v13603_v41  ;;  %6225 = vmatprep.mubr.bf16.mxu0 %v14299_v27  ;;  %v13666_v55 = vld [vmem:[#allocation6 + $0xd90] ss:$44 sps:$4 sm:$0xff]  }
 0x2c0   :  { %v5541_v56 = vpop.f32.mrf.mxu0  ;;  %v5654_v54 = vpop.f32.mrf.mxu1  ;;  %6381 = vmatprep.subr.bf16.mxu0 %v13608_v3  ;;  %6338 = vmatprep.mubr.bf16.mxu1 %v14300_v26  ;;  %v7418_v34 = vsel %vm7066_vm2, %v5645_v57, %v7242_v39 }
 0x2c1   :  { %v7428_v17 = vsel %vm7076_vm1, %v5647_v19, %v7252_v47  ;;  %vm7077_vm3 = vcmp.ge.f32.partialorder %v5649_v30, 0.0  ;;  %v7253_v28 = vmul.f32 0.2, %v5649_v30  ;;  %v5542_v45 = vadd.f32 %v5541_v56, %v15103_v11  ;;  %12151 = vmatprep.subr.bf16.mxu1 %v13637_v9  ;;  %v14302_v9 = vld [vmem:[#allocation3 + $0x158] ss:$28 sps:$4 sm:$0xff]  }
 0x2c2   :  { %v15185_v46 = vpack.c.bf16 %v7428_v17, %v7417_v18  ;;  %v5653_v48 = vadd.f32 %v5652_v52, %v5540_v35  ;;  %v5543_v31 = vpop.f32.mrf.mxu0  ;;  %v5656_v38 = vpop.f32.mrf.mxu1  ;;  %v14303_v52 = vld [vmem:[#allocation3 + $0x18c] ss:$28 sps:$4 sm:$0xff]  }
 0x2c3   :  { %v5544_v32 = vadd.f32 %v5543_v31, %v15106_v51  ;;  %v5655_v37 = vadd.f32 %v5654_v54, %v5542_v45  ;;  %6382 = vmatpush2.bf16.msra.mxu0 %v13606_v33  ;;  %v7429_v41 = vsel %vm7077_vm3, %v5649_v30, %v7253_v28  ;;  %v14301_v51 = vld [vmem:[#allocation3 + $0x150] ss:$28 sps:$4 sm:$0xff]   ;;  %v13623_v33 = vld [vmem:[#allocation6 + $0xe3c] ss:$44 sps:$4 sm:$0xff]   ;;  %v13621_v45 = vld [vmem:[#allocation6 + $0xe38] ss:$44 sps:$4 sm:$0xff]  }
 0x2c4   :  { %16797 = vst [vmem:[#allocation63_spill] sm:$0xff] %v15185_v46  ;;  %v7263_v1 = vmul.f32 0.2, %v5653_v48  ;;  %v5545_v59 = vpop.f32.mrf.mxu0  ;;  %v5658_v22 = vpop.f32.mrf.mxu1  ;;  %6383 = vmatprep.subr.bf16.mxu0 %v13614_v29  ;;  %v15189_v11 = vpack.c.bf16 %v7429_v41, %v7418_v34  ;;  %vm7087_vm4 = vcmp.ge.f32.partialorder %v5653_v48, 0.0  ;;  %v14304_v30 = vld [vmem:[#allocation3 + $0x194] ss:$28 sps:$4 sm:$0xff]  }
 0x2c5   :  { %v5546_v40 = vadd.f32 %v5545_v59, %v15109_v12  ;;  %v5657_v3 = vadd.f32 %v5656_v38, %v5544_v32  ;;  %v7264_v13 = vmul.f32 0.2, %v5655_v37  ;;  %vm7088_vm6 = vcmp.ge.f32.partialorder %v5655_v37, 0.0  ;;  %v13629_v34 = vld [vmem:[#allocation6 + $0xde4] ss:$44 sps:$4 sm:$0xff]  }
 0x2c6   :  { %16798 = vst [vmem:[#allocation64_spill] sm:$0xff] %v15189_v11  ;;  %v5549_v19 = vpop.f32.mrf.mxu0  ;;  %6226 = vmatmul.mubr.bf16.gmra.mxu0 %v14301_v51  ;;  %6339 = vmatmul.mubr.bf16.gmra.mxu1 %v14302_v9  ;;  %v5662_v21 = vpop.f32.mrf.mxu1  ;;  %v7439_v47 = vsel %vm7087_vm4, %v5653_v48, %v7263_v1  ;;  %v13627_v51 = vld [vmem:[#allocation6 + $0xde0] ss:$44 sps:$4 sm:$0xff]   ;;  %v14307_v9 = vld [vmem:[#allocation3 + $0x14] ss:$28 sps:$4 sm:$0xff]  }
 0x2c7   :  { %vm7098_vm5 = vcmp.ge.f32.partialorder %v5657_v3, 0.0  ;;  %v7274_v57 = vmul.f32 0.2, %v5657_v3  ;;  %v5550_v39 = vadd.f32 %v5549_v19, %v15112_v4  ;;  %v5659_v44 = vadd.f32 %v5658_v22, %v5546_v40  ;;  %6384 = vmatpush2.bf16.msra.mxu0 %v13612_v20  ;;  %6235 = vmatprep.mubr.bf16.mxu0 %v14303_v52  ;;  %v15337_v11 = vld [vmem:[#allocation3 + $0x1a0] ss:$28 sps:$4 sm:$0xff]  }
 0x2c8   :  { %v5551_v12 = vpop.f32.mrf.mxu0  ;;  %v5664_v35 = vpop.f32.mrf.mxu1  ;;  %6385 = vmatprep.subr.bf16.mxu0 %v13617_v5  ;;  %6348 = vmatprep.mubr.bf16.mxu1 %v14304_v30  ;;  %v7440_v48 = vsel %vm7088_vm6, %v5655_v37, %v7264_v13  ;;  %v14306_v5 = vld [vmem:[#allocation3 + $0x190] ss:$28 sps:$4 sm:$0xff]   ;;  %v872_v37 = vsub.s32 6, %v14620_v60 }
 0x2c9   :  { %v7450_v27 = vsel %vm7098_vm5, %v5657_v3, %v7274_v57  ;;  %vm7099_vm7 = vcmp.ge.f32.partialorder %v5659_v44, 0.0  ;;  %v7275_v18 = vmul.f32 0.2, %v5659_v44  ;;  %v5552_v4 = vadd.f32 %v5551_v12, %v15116_v16 }
 0x2ca   :  { %v15196_v56 = vpack.c.bf16 %v7450_v27, %v7439_v47  ;;  %v5663_v54 = vadd.f32 %v5662_v21, %v5550_v39  ;;  %v5553_v26 = vpop.f32.mrf.mxu0  ;;  %v5666_v29 = vpop.f32.mrf.mxu1  ;;  %v13633_v39 = vld [vmem:[#allocation6 + $0x550] ss:$44 sps:$4 sm:$0xff]  }
 0x2cb   :  { %v5554_v17 = vadd.f32 %v5553_v26, %v15119_v25  ;;  %v5665_v28 = vadd.f32 %v5664_v35, %v5552_v4  ;;  %6386 = vmatpush2.bf16.msra.mxu0 %v13615_v61  ;;  %v7451_v31 = vsel %vm7099_vm7, %v5659_v44, %v7275_v18  ;;  %v14305_v25 = vld [vmem:[#allocation3 + $0x188] ss:$28 sps:$4 sm:$0xff]   ;;  %v876_v44 = vsub.s32 7, %v14620_v60 }
 0x2cc   :  { %16799 = vst [vmem:[#allocation65_spill] sm:$0xff] %v15196_v56  ;;  %v7285_v38 = vmul.f32 0.2, %v5663_v54  ;;  %v5555_v32 = vpop.f32.mrf.mxu0  ;;  %v5668_v20 = vpop.f32.mrf.mxu1  ;;  %6387 = vmatprep.subr.bf16.mxu0 %v13623_v33  ;;  %v15200_v41 = vpack.c.bf16 %v7451_v31, %v7440_v48  ;;  %vm7109_vm8 = vcmp.ge.f32.partialorder %v5663_v54, 0.0  ;;  %v14308_v33 = vld [vmem:[#allocation8] sm:$0xff] }
 0x2cd   :  { %v5556_v16 = vadd.f32 %v5555_v32, %v15122_v42  ;;  %v5667_v1 = vadd.f32 %v5666_v29, %v5554_v17  ;;  %v7286_v59 = vmul.f32 0.2, %v5665_v28  ;;  %vm7110_vm10 = vcmp.ge.f32.partialorder %v5665_v28, 0.0 }
 0x2ce   :  { %16800 = vst [vmem:[#allocation66_spill] sm:$0xff] %v15200_v41  ;;  %v5559_v22 = vpop.f32.mrf.mxu0  ;;  %6236 = vmatmul.mubr.bf16.gmra.mxu0 %v14305_v25  ;;  %6349 = vmatmul.mubr.bf16.gmra.mxu1 %v14306_v5  ;;  %v5672_v40 = vpop.f32.mrf.mxu1  ;;  %v7461_v42 = vsel %vm7109_vm8, %v5663_v54, %v7285_v38  ;;  %v15212_v27 = vrot.slane %v14308_v33, %v872_v37  ;;  %v13634_v54 = vld [vmem:[#allocation6 + $0x290] ss:$44 sps:$4 sm:$0xff]  }
 0x2cf   :  { %vm7120_vm9 = vcmp.ge.f32.partialorder %v5667_v1, 0.0  ;;  %v7296_v3 = vmul.f32 0.2, %v5667_v1  ;;  %v5560_v13 = vadd.f32 %v5559_v22, %v15125_v36  ;;  %v5669_v19 = vadd.f32 %v5668_v20, %v5556_v16  ;;  %6388 = vmatpush2.bf16.msra.mxu0 %v13621_v45  ;;  %6391 = vmatprep.mubr.bf16.mxu0 %v14307_v9  ;;  %v14309_v16 = vld [vmem:[#allocation3 + $0x10] ss:$28 sps:$4 sm:$0xff]  }
 0x2d0   :  { %v5561_v21 = vpop.f32.mrf.mxu0  ;;  %v5674_v57 = vpop.f32.mrf.mxu1  ;;  %6389 = vmatprep.subr.bf16.mxu0 %v13629_v34  ;;  %6504 = vmatprep.mubr.bf16.mxu1 %v16772_v49  ;;  %v7462_v60 = vsel %vm7110_vm10, %v5665_v28, %v7286_v59  ;;  %v15219_v32 = vrot.slane %v14308_v33, %v876_v44  ;;  %v14310_v28 = vld [vmem:[#allocation3 + $0x18] ss:$28 sps:$4 sm:$0xff]  }
 0x2d1   :  { %v7472_v61 = vsel %vm7120_vm9, %v5667_v1, %v7296_v3  ;;  %vm7121_vm11 = vcmp.ge.f32.partialorder %v5669_v19, 0.0  ;;  %v7297_v36 = vmul.f32 0.2, %v5669_v19  ;;  %v5562_v52 = vadd.f32 %v5561_v21, %v15128_v63  ;;  %v13635_v63 = vld [vmem:[#allocation6 + $0x4f8] ss:$44 sps:$4 sm:$0xff]  }
 0x2d2   :  { %v15210_v47 = vpack.c.bf16 %v7472_v61, %v7461_v42  ;;  %v5673_v12 = vadd.f32 %v5672_v40, %v5560_v13  ;;  %v5563_v35 = vpop.f32.mrf.mxu0  ;;  %v5676_v30 = vpop.f32.mrf.mxu1  ;;  %v13641_v59 = vld [vmem:[#allocation6 + $0xa78] ss:$44 sps:$4 sm:$0xff]   ;;  %v14311_v40 = vld [vmem:[#allocation3 + $0x4c] ss:$28 sps:$4 sm:$0xff]  }
 0x2d3   :  { %v5564_v18 = vadd.f32 %v5563_v35, %v15131_v58  ;;  %v5675_v4 = vadd.f32 %v5674_v57, %v5562_v52  ;;  %6390 = vmatpush2.bf16.msra.mxu0 %v13627_v51  ;;  %v7473_v26 = vsel %vm7121_vm11, %v5669_v19, %v7297_v36  ;;  %v13638_v58 = vld [vmem:[#allocation6 + $0x810] ss:$44 sps:$4 sm:$0xff]   ;;  %v13639_v19 = vld [vmem:[#allocation6 + $0x4a0] ss:$44 sps:$4 sm:$0xff]   ;;  %v13642_v21 = vld [vmem:[#allocation6 + $0x7b8] ss:$44 sps:$4 sm:$0xff]  }
 0x2d4   :  { %16801 = vst [vmem:[#allocation67_spill] sm:$0xff] %v15210_v47  ;;  %v7307_v29 = vmul.f32 0.2, %v5673_v12  ;;  %v5565_v17 = vpop.f32.mrf.mxu0  ;;  %v5678_v45 = vpop.f32.mrf.mxu1  ;;  %12087 = vmatprep.subr.bf16.mxu0 %v13633_v39  ;;  %v15216_v48 = vpack.c.bf16 %v7473_v26, %v7462_v60  ;;  %vm7131_vm12 = vcmp.ge.f32.partialorder %v5673_v12, 0.0  ;;  %v14327_v47 = vld [vmem:[#allocation3 + $0x160] ss:$28 sps:$4 sm:$0xff]  }
 0x2d5   :  { %v5566_v31 = vadd.f32 %v5565_v17, %v15133_v62  ;;  %v5677_v38 = vadd.f32 %v5676_v30, %v5564_v18  ;;  %v7308_v20 = vmul.f32 0.2, %v5675_v4  ;;  %v13636_v62 = vld [vmem:[#allocation6 + $0x238] ss:$44 sps:$4 sm:$0xff]   ;;  %vm7132_vm14 = vcmp.ge.f32.partialorder %v5675_v4, 0.0 }
 0x2d6   :  { %16802 = vst [vmem:[#allocation68_spill] sm:$0xff] %v15216_v48  ;;  %v5715_v34 = vpop.f32.mrf.mxu0  ;;  %6392 = vmatmul.mubr.bf16.vlgmr.msra.gmra.mxu0 %v14309_v16  ;;  %6505 = vmatmul.mubr.bf16.vlgmr.msra.gmra.mxu1 %v14310_v28  ;;  %v5828_v1 = vpop.f32.mrf.mxu1  ;;  %v7483_v37 = vsel %vm7131_vm12, %v5673_v12, %v7307_v29  ;;  %v13640_v18 = vld [vmem:[#allocation6 + $0x1e0] ss:$44 sps:$4 sm:$0xff]   ;;  %v13643_v17 = vld [vmem:[#allocation6 + $0x448] ss:$44 sps:$4 sm:$0xff]  }
 0x2d7   :  { %vm7142_vm13 = vcmp.ge.f32.partialorder %v5677_v38, 0.0  ;;  %v7318_v22 = vmul.f32 0.2, %v5677_v38  ;;  %v5679_v25 = vadd.f32 %v5678_v45, %v5566_v31  ;;  %v5716_v5 = vadd.f32 %v5715_v34, %v15212_v27  ;;  %12088 = vmatpush3.bf16.msra.mxu0 %v13634_v54  ;;  %6401 = vmatprep.mubr.bf16.mxu0 %v14311_v40  ;;  %v13645_v54 = vld [vmem:[#allocation6 + $0xa20] ss:$44 sps:$4 sm:$0xff]  }
 0x2d8   :  { %v5717_v3 = vpop.f32.mrf.mxu0  ;;  %v5830_v13 = vpop.f32.mrf.mxu1  ;;  %6514 = vmatprep.mubr.bf16.mxu1 %v16772_v49  ;;  %12089 = vmatprep.subr.bf16.mxu0 %v13635_v63  ;;  %v7484_v12 = vsel %vm7132_vm14, %v5675_v4, %v7308_v20  ;;  %v13646_v45 = vld [vmem:[#allocation6 + $0x760] ss:$44 sps:$4 sm:$0xff]   ;;  %v14312_v31 = vld [vmem:[#allocation3 + $0x48] ss:$28 sps:$4 sm:$0xff]  }
 0x2d9   :  { %v7494_v51 = vsel %vm7142_vm13, %v5677_v38, %v7318_v22  ;;  %vm7143_vm15 = vcmp.ge.f32.partialorder %v5679_v25, 0.0  ;;  %v7319_v9 = vmul.f32 0.2, %v5679_v25  ;;  %v5718_v42 = vadd.f32 %v5717_v3, %v15219_v32  ;;  %12152 = vmatpush3.bf16.msra.mxu1 %v13638_v58  ;;  %v15238_v38 = vld [vmem:[#allocation3 + $0x50] ss:$28 sps:$4 sm:$0xff]  }
 0x2da   :  { %v15225_v57 = vpack.c.bf16 %v7494_v51, %v7483_v37  ;;  %v15227_v39 = vadd.f32 %v5828_v1, %v5716_v5  ;;  %v5719_v44 = vpop.f32.mrf.mxu0  ;;  %v5832_v61 = vpop.f32.mrf.mxu1  ;;  %12153 = vmatprep.subr.bf16.mxu1 %v13641_v59  ;;  %v13649_v58 = vld [vmem:[#allocation6 + $0x9c8] ss:$44 sps:$4 sm:$0xff]   ;;  %v14314_v16 = vld [vmem:[#allocation3 + $0x84] ss:$28 sps:$4 sm:$0xff]   ;;  %v13647_v5 = vld [vmem:[#allocation6 + $0x3f0] ss:$44 sps:$4 sm:$0xff]  }
 0x2db   :  { %v5720_v36 = vadd.f32 %v5719_v44, %v15212_v27  ;;  %v15230_v52 = vadd.f32 %v5830_v13, %v5718_v42  ;;  %12090 = vmatpush3.bf16.msra.mxu0 %v13636_v62  ;;  %v7495_v35 = vsel %vm7143_vm15, %v5679_v25, %v7319_v9  ;;  %v13644_v59 = vld [vmem:[#allocation6 + $0x188] ss:$44 sps:$4 sm:$0xff]   ;;  %v13648_v9 = vld [vmem:[#allocation6 + $0x130] ss:$44 sps:$4 sm:$0xff]  }
 0x2dc   :  { %16803 = vst [vmem:[#allocation69_spill] sm:$0xff] %v15225_v57  ;;  %v5721_v30 = vpop.f32.mrf.mxu0  ;;  %v5834_v33 = vpop.f32.mrf.mxu1  ;;  %12091 = vmatprep.subr.bf16.mxu0 %v13639_v19  ;;  %v15233_v60 = vpack.c.bf16 %v7495_v35, %v7484_v12  ;;  %v13650_v40 = vld [vmem:[#allocation6 + $0x708] ss:$44 sps:$4 sm:$0xff]   ;;  %v13653_v42 = vld [vmem:[#allocation6 + $0x970] ss:$44 sps:$4 sm:$0xff]  }
 0x2dd   :  { %v5722_v26 = vadd.f32 %v5721_v30, %v15219_v32  ;;  %v15236_v29 = vadd.f32 %v5832_v61, %v5720_v36  ;;  %12154 = vmatpush3.bf16.msra.mxu1 %v13642_v21  ;;  %v13651_v61 = vld [vmem:[#allocation6 + $0x398] ss:$44 sps:$4 sm:$0xff]   ;;  %v13654_v36 = vld [vmem:[#allocation6 + $0x6b0] ss:$44 sps:$4 sm:$0xff]  }
 0x2de   :  { %16804 = vst [vmem:[#allocation70_spill] sm:$0xff] %v15233_v60  ;;  %v5725_v63 = vpop.f32.mrf.mxu0  ;;  %6402 = vmatmul.mubr.bf16.gmra.mxu0 %v14312_v31  ;;  %6515 = vmatmul.mubr.bf16.gmra.mxu1 %v15238_v38  ;;  %v5838_v4 = vpop.f32.mrf.mxu1  ;;  %v14315_v35 = vld [vmem:[#allocation3 + $0x80] ss:$28 sps:$4 sm:$0xff]   ;;  %v15254_v30 = vld [vmem:[#allocation3 + $0x88] ss:$28 sps:$4 sm:$0xff]  }
 0x2df   :  { %v5726_v20 = vadd.f32 %v5725_v63, %v15212_v27  ;;  %v15242_v34 = vadd.f32 %v5834_v33, %v5722_v26  ;;  %6411 = vmatprep.mubr.bf16.mxu0 %v14314_v16  ;;  %6524 = vmatprep.mubr.bf16.mxu1 %v16772_v49  ;;  %v13652_v31 = vld [vmem:[#allocation6 + $0xd8] ss:$44 sps:$4 sm:$0xff]  }
 0x2e0   :  { %v5727_v28 = vpop.f32.mrf.mxu0  ;;  %v5840_v1 = vpop.f32.mrf.mxu1  ;;  %12092 = vmatpush3.bf16.msra.mxu0 %v13640_v18  ;;  %12155 = vmatprep.subr.bf16.mxu1 %v13645_v54  ;;  %v13657_v18 = vld [vmem:[#allocation6 + $0x918] ss:$44 sps:$4 sm:$0xff]  }
 0x2e1   :  { %v5728_v22 = vadd.f32 %v5727_v28, %v15219_v32  ;;  %v15246_v25 = vadd.f32 %v5838_v4, %v5726_v20  ;;  %12093 = vmatprep.subr.bf16.mxu0 %v13643_v17  ;;  %12156 = vmatpush3.bf16.msra.mxu1 %v13646_v45  ;;  %v14317_v17 = vld [vmem:[#allocation3 + $0xbc] ss:$28 sps:$4 sm:$0xff]   ;;  %v13655_v20 = vld [vmem:[#allocation6 + $0x340] ss:$44 sps:$4 sm:$0xff]   ;;  %v15321_v48 = vld [vmem:[#allocation3 + $0x168] ss:$28 sps:$4 sm:$0xff]  }
 0x2e2   :  { %v5729_v62 = vpop.f32.mrf.mxu0  ;;  %v5842_v37 = vpop.f32.mrf.mxu1  ;;  %12157 = vmatprep.subr.bf16.mxu1 %v13649_v58  ;;  %v13658_v16 = vld [vmem:[#allocation6 + $0x658] ss:$44 sps:$4 sm:$0xff]  }
 0x2e3   :  { %v5730_v3 = vadd.f32 %v5729_v62, %v15212_v27  ;;  %v15249_v13 = vadd.f32 %v5840_v1, %v5728_v22  ;;  %v13656_v62 = vld [vmem:[#allocation6 + $0x80] ss:$44 sps:$4 sm:$0xff]  }
 0x2e4   :  { %v5731_v19 = vpop.f32.mrf.mxu0  ;;  %v5844_v51 = vpop.f32.mrf.mxu1  ;;  %12094 = vmatpush3.bf16.msra.mxu0 %v13644_v59 }
 0x2e5   :  { %v5732_v21 = vadd.f32 %v5731_v19, %v15219_v32  ;;  %v15252_v44 = vadd.f32 %v5842_v37, %v5730_v3  ;;  %12095 = vmatprep.subr.bf16.mxu0 %v13647_v5  ;;  %12158 = vmatpush3.bf16.msra.mxu1 %v13650_v40  ;;  %v13660_v37 = vld [vmem:[#allocation6 + $0x8c0] ss:$44 sps:$4 sm:$0xff]  }
 0x2e6   :  { %v5735_v12 = vpop.f32.mrf.mxu0  ;;  %6412 = vmatmul.mubr.bf16.gmra.mxu0 %v14315_v35  ;;  %6525 = vmatmul.mubr.bf16.gmra.mxu1 %v15254_v30  ;;  %v5848_v33 = vpop.f32.mrf.mxu1 }
 0x2e7   :  { %v5736_v54 = vadd.f32 %v5735_v12, %v15212_v27  ;;  %v15258_v26 = vadd.f32 %v5844_v51, %v5732_v21  ;;  %6421 = vmatprep.mubr.bf16.mxu0 %v14317_v17  ;;  %6534 = vmatprep.mubr.bf16.mxu1 %v16772_v49  ;;  %v13659_v51 = vld [vmem:[#allocation6 + $0x2e8] ss:$44 sps:$4 sm:$0xff]  }
 0x2e8   :  { %v5737_v45 = vpop.f32.mrf.mxu0  ;;  %v5850_v63 = vpop.f32.mrf.mxu1  ;;  %12096 = vmatpush3.bf16.msra.mxu0 %v13648_v9  ;;  %12159 = vmatprep.subr.bf16.mxu1 %v13653_v42  ;;  %v13662_v9 = vld [vmem:[#allocation6 + $0x600] ss:$44 sps:$4 sm:$0xff]   ;;  %v14318_v21 = vld [vmem:[#allocation3 + $0xb8] ss:$28 sps:$4 sm:$0xff]  }
 0x2e9   :  { %v5738_v4 = vadd.f32 %v5737_v45, %v15219_v32  ;;  %v15262_v58 = vadd.f32 %v5848_v33, %v5736_v54  ;;  %12097 = vmatprep.subr.bf16.mxu0 %v13651_v61  ;;  %12160 = vmatpush3.bf16.msra.mxu1 %v13654_v36  ;;  %v15270_v61 = vld [vmem:[#allocation3 + $0xc0] ss:$28 sps:$4 sm:$0xff]   ;;  %v13663_v12 = vld [vmem:[#allocation6 + $0x868] ss:$44 sps:$4 sm:$0xff]  }
 0x2ea   :  { %v5739_v28 = vpop.f32.mrf.mxu0  ;;  %v5852_v1 = vpop.f32.mrf.mxu1  ;;  %12161 = vmatprep.subr.bf16.mxu1 %v13657_v18  ;;  %v14320_v18 = vld [vmem:[#allocation3 + $0xf4] ss:$28 sps:$4 sm:$0xff]  }
 0x2eb   :  { %v5740_v59 = vadd.f32 %v5739_v28, %v15212_v27  ;;  %v15265_v22 = vadd.f32 %v5850_v63, %v5738_v4  ;;  %v13661_v45 = vld [vmem:[#allocation6 + $0x28] ss:$44 sps:$4 sm:$0xff]  }
 0x2ec   :  { %v5741_v5 = vpop.f32.mrf.mxu0  ;;  %v5854_v40 = vpop.f32.mrf.mxu1  ;;  %12098 = vmatpush3.bf16.msra.mxu0 %v13652_v31  ;;  %v13664_v4 = vld [vmem:[#allocation6 + $0x5a8] ss:$44 sps:$4 sm:$0xff]  }
 0x2ed   :  { %v5742_v3 = vadd.f32 %v5741_v5, %v15219_v32  ;;  %v15268_v19 = vadd.f32 %v5852_v1, %v5740_v59  ;;  %12099 = vmatprep.subr.bf16.mxu0 %v13655_v20  ;;  %12162 = vmatpush3.bf16.msra.mxu1 %v13658_v16  ;;  %v13665_v20 = vld [vmem:[#allocation6 + $0x1050] ss:$44 sps:$4 sm:$0xff]  }
 0x2ee   :  { %v5745_v42 = vpop.f32.mrf.mxu0  ;;  %6422 = vmatmul.mubr.bf16.gmra.mxu0 %v14318_v21  ;;  %6535 = vmatmul.mubr.bf16.gmra.mxu1 %v15270_v61  ;;  %v5858_v36 = vpop.f32.mrf.mxu1 }
 0x2ef   :  { %v5746_v35 = vadd.f32 %v5745_v42, %v15212_v27  ;;  %v15274_v33 = vadd.f32 %v5854_v40, %v5742_v3  ;;  %6431 = vmatprep.mubr.bf16.mxu0 %v14320_v18  ;;  %6544 = vmatprep.mubr.bf16.mxu1 %v16772_v49  ;;  %v15288_v42 = vld [vmem:[#allocation3 + $0xf8] ss:$28 sps:$4 sm:$0xff]  }
 0x2f0   :  { %v5747_v54 = vpop.f32.mrf.mxu0  ;;  %v5860_v17 = vpop.f32.mrf.mxu1  ;;  %12100 = vmatpush3.bf16.msra.mxu0 %v13656_v62  ;;  %12163 = vmatprep.subr.bf16.mxu1 %v13660_v37  ;;  %v15283_v62 = vld [vmem:[#allocation6 + $0x1310] ss:$44 sps:$4 sm:$0xff]  }
 0x2f1   :  { %v5748_v63 = vadd.f32 %v5747_v54, %v15219_v32  ;;  %v15278_v31 = vadd.f32 %v5858_v36, %v5746_v35  ;;  %12101 = vmatprep.subr.bf16.mxu0 %v13659_v51  ;;  %12164 = vmatpush3.bf16.msra.mxu1 %v13662_v9  ;;  %v14321_v9 = vld [vmem:[#allocation3 + $0xf0] ss:$28 sps:$4 sm:$0xff]  }
 0x2f2   :  { %v5749_v16 = vpop.f32.mrf.mxu0  ;;  %v5862_v28 = vpop.f32.mrf.mxu1  ;;  %12165 = vmatprep.subr.bf16.mxu1 %v13663_v12  ;;  %v14323_v35 = vld [vmem:[#allocation3 + $0x12c] ss:$28 sps:$4 sm:$0xff]  }
 0x2f3   :  { %v5750_v1 = vadd.f32 %v5749_v16, %v15212_v27  ;;  %v15281_v59 = vadd.f32 %v5860_v17, %v5748_v63 }
 0x2f4   :  { %v5751_v5 = vpop.f32.mrf.mxu0  ;;  %v5864_v40 = vpop.f32.mrf.mxu1  ;;  %12102 = vmatpush3.bf16.msra.mxu0 %v13661_v45 }
 0x2f5   :  { %v5752_v37 = vadd.f32 %v5751_v5, %v15219_v32  ;;  %v15286_v3 = vadd.f32 %v5862_v28, %v5750_v1  ;;  %12166 = vmatpush3.bf16.msra.mxu1 %v13664_v4  ;;  %12215 = vmatprep.subr.bf16.mxu0 %v13665_v20 }
 0x2f6   :  { %v5755_v51 = vpop.f32.mrf.mxu0  ;;  %6432 = vmatmul.mubr.bf16.gmra.mxu0 %v14321_v9  ;;  %6545 = vmatmul.mubr.bf16.gmra.mxu1 %v15288_v42  ;;  %v5868_v21 = vpop.f32.mrf.mxu1  ;;  %v15305_v9 = vld [vmem:[#allocation3 + $0x130] ss:$28 sps:$4 sm:$0xff]  }
 0x2f7   :  { %v5756_v36 = vadd.f32 %v5755_v51, %v15212_v27  ;;  %v15292_v12 = vadd.f32 %v5864_v40, %v5752_v37  ;;  %6441 = vmatprep.mubr.bf16.mxu0 %v14323_v35  ;;  %6554 = vmatprep.mubr.bf16.mxu1 %v16772_v49  ;;  %v14324_v51 = vld [vmem:[#allocation3 + $0x128] ss:$28 sps:$4 sm:$0xff]  }
 0x2f8   :  { %v5757_v18 = vpop.f32.mrf.mxu0  ;;  %v5870_v54 = vpop.f32.mrf.mxu1  ;;  %12631 = vmatprep.subr.bf16.mxu1 %v15283_v62 }
 0x2f9   :  { %v5758_v17 = vadd.f32 %v5757_v18, %v15219_v32  ;;  %v15297_v45 = vadd.f32 %v5868_v21, %v5756_v36  ;;  %v14326_v18 = vld [vmem:[#allocation3 + $0x164] ss:$28 sps:$4 sm:$0xff]  }
 0x2fa   :  { %v5759_v63 = vpop.f32.mrf.mxu0  ;;  %v5872_v4 = vpop.f32.mrf.mxu1 }
 0x2fb   :  { %v5760_v20 = vadd.f32 %v5759_v63, %v15212_v27  ;;  %v15300_v16 = vadd.f32 %v5870_v54, %v5758_v17 }
 0x2fc   :  { %v5761_v28 = vpop.f32.mrf.mxu0  ;;  %v5874_v1 = vpop.f32.mrf.mxu1 }
 0x2fd   :  { %v5762_v5 = vadd.f32 %v5761_v28, %v15219_v32  ;;  %v15303_v40 = vadd.f32 %v5872_v4, %v5760_v20 }
 0x2fe   :  { %v5765_v37 = vpop.f32.mrf.mxu0  ;;  %6442 = vmatmul.mubr.bf16.gmra.mxu0 %v14324_v51  ;;  %6555 = vmatmul.mubr.bf16.gmra.mxu1 %v15305_v9  ;;  %v5878_v21 = vpop.f32.mrf.mxu1 }
 0x2ff   :  { %v5766_v36 = vadd.f32 %v5765_v37, %v15212_v27  ;;  %v15309_v35 = vadd.f32 %v5874_v1, %v5762_v5  ;;  %6451 = vmatprep.mubr.bf16.mxu0 %v14326_v18  ;;  %6564 = vmatprep.mubr.bf16.mxu1 %v16772_v49 }
 0x300   :  { %v5767_v54 = vpop.f32.mrf.mxu0  ;;  %v5880_v17 = vpop.f32.mrf.mxu1 }
 0x301   :  { %v5768_v63 = vadd.f32 %v5767_v54, %v15219_v32  ;;  %v15313_v4 = vadd.f32 %v5878_v21, %v5766_v36 }
 0x302   :  { %v5769_v20 = vpop.f32.mrf.mxu0  ;;  %v5882_v28 = vpop.f32.mrf.mxu1 }
 0x303   :  { %v5770_v51 = vadd.f32 %v5769_v20, %v15212_v27  ;;  %v15316_v57 = vadd.f32 %v5880_v17, %v5768_v63  ;;  %v14329_v17 = vld [vmem:[#allocation3 + $0x19c] ss:$28 sps:$4 sm:$0xff]  }
 0x304   :  { %v5771_v60 = vpop.f32.mrf.mxu0  ;;  %v5884_v37 = vpop.f32.mrf.mxu1 }
 0x305   :  { %v5772_v1 = vadd.f32 %v5771_v60, %v15219_v32  ;;  %v15319_v5 = vadd.f32 %v5882_v28, %v5770_v51 }
 0x306   :  { %v5775_v18 = vpop.f32.mrf.mxu0  ;;  %6452 = vmatmul.mubr.bf16.gmra.mxu0 %v14327_v47  ;;  %6565 = vmatmul.mubr.bf16.gmra.mxu1 %v15321_v48  ;;  %v5888_v21 = vpop.f32.mrf.mxu1 }
 0x307   :  { %v5776_v36 = vadd.f32 %v5775_v18, %v15212_v27  ;;  %v15325_v54 = vadd.f32 %v5884_v37, %v5772_v1  ;;  %6461 = vmatprep.mubr.bf16.mxu0 %v14329_v17  ;;  %6574 = vmatprep.mubr.bf16.mxu1 %v16772_v49  ;;  %v14330_v49 = vld [vmem:[#allocation3 + $0x198] ss:$28 sps:$4 sm:$0xff]  }
 0x308   :  { %v5777_v63 = vpop.f32.mrf.mxu0  ;;  %v5890_v60 = vpop.f32.mrf.mxu1 }
 0x309   :  { %v5778_v20 = vadd.f32 %v5777_v63, %v15219_v32  ;;  %v15329_v28 = vadd.f32 %v5888_v21, %v5776_v36 }
 0x30a   :  { %v5779_v47 = vpop.f32.mrf.mxu0  ;;  %v5892_v51 = vpop.f32.mrf.mxu1 }
 0x30b   :  { %v5780_v56 = vadd.f32 %v5779_v47, %v15212_v27  ;;  %v15332_v41 = vadd.f32 %v5890_v60, %v5778_v20  ;;  %v14332_v60 = vld [vmem:[#allocation3 + $0x4] ss:$28 sps:$4 sm:$0xff]   ;;  %v14333_v20 = vld [vmem:[#allocation3 + $0xc] ss:$28 sps:$4 sm:$0xff]  }
 0x30c   :  { %v5781_v46 = vpop.f32.mrf.mxu0  ;;  %v5894_v18 = vpop.f32.mrf.mxu1 }
 0x30d   :  { %v5782_v37 = vadd.f32 %v5781_v46, %v15219_v32  ;;  %v15335_v1 = vadd.f32 %v5892_v51, %v5780_v56 }
 0x30e   :  { %v5785_v17 = vpop.f32.mrf.mxu0  ;;  %6462 = vmatmul.mubr.bf16.gmra.mxu0 %v14330_v49  ;;  %6575 = vmatmul.mubr.bf16.gmra.mxu1 %v15337_v11  ;;  %v5898_v21 = vpop.f32.mrf.mxu1 }
 0x30f   :  { %v5786_v36 = vadd.f32 %v5785_v17, %v15212_v27  ;;  %v15341_v63 = vadd.f32 %v5894_v18, %v5782_v37  ;;  %6617 = vmatprep.mubr.bf16.mxu0 %v14332_v60  ;;  %6714 = vmatprep.mubr.bf16.mxu1 %v14333_v20  ;;  %v13667_v37 = vld [vmem:[#allocation6 + $0xff8] ss:$44 sps:$4 sm:$0xff]  }
 0x310   :  { %v5787_v47 = vpop.f32.mrf.mxu0  ;;  %v5900_v46 = vpop.f32.mrf.mxu1 }
 0x311   :  { %v5788_v56 = vadd.f32 %v5787_v47, %v15219_v32  ;;  %v15344_v51 = vadd.f32 %v5898_v21, %v5786_v36  ;;  %v14335_v47 = vld [vmem:[#allocation3 + $0x8] ss:$28 sps:$4 sm:$0xff]  }
 0x312   :  { %v5789_v49 = vpop.f32.mrf.mxu0  ;;  %v5902_v0 = vpop.f32.mrf.mxu1  ;;  %v13672_v36 = vld [vmem:[#allocation6 + $0x12b8] ss:$44 sps:$4 sm:$0xff]  }
 0x313   :  { %v5790_v15 = vadd.f32 %v5789_v49, %v15212_v27  ;;  %v15347_v24 = vadd.f32 %v5900_v46, %v5788_v56  ;;  %v14336_v46 = vld [vmem:[#allocation3 + $0x3c] ss:$28 sps:$4 sm:$0xff]  }
 0x314   :  { %v5791_v17 = vpop.f32.mrf.mxu0  ;;  %v5904_v18 = vpop.f32.mrf.mxu1  ;;  %v13668_v56 = vld [vmem:[#allocation6 + $0xd38] ss:$44 sps:$4 sm:$0xff]  }
 0x315   :  { %v5792_v60 = vadd.f32 %v5791_v17, %v15219_v32  ;;  %v15350_v23 = vadd.f32 %v5902_v0, %v5790_v15  ;;  %v14337_v32 = vld [vmem:[#allocation3 + $0x44] ss:$28 sps:$4 sm:$0xff]  }
 0x316   :  { %v5941_v20 = vpop.f32.mrf.mxu0  ;;  %6618 = vmatmul.mubr.bf16.vlgmr.msra.gmra.mxu0 %v14334_v8  ;;  %6715 = vmatmul.mubr.bf16.vlgmr.msra.gmra.mxu1 %v14335_v47  ;;  %v6054_v21 = vpop.f32.mrf.mxu1  ;;  %v13670_v0 = vld [vmem:[#allocation6 + $0xfa0] ss:$44 sps:$4 sm:$0xff]  }
 0x317   :  { %v15352_v10 = vadd.f32 %v5904_v18, %v5792_v60  ;;  %v5942_v27 = vadd.f32 %v5941_v20, %v15227_v39  ;;  %12216 = vmatpush3.bf16.msra.mxu0 %v13666_v55  ;;  %6625 = vmatprep.mubr.bf16.mxu0 %v14336_v46  ;;  %v13671_v47 = vld [vmem:[#allocation6 + $0xce0] ss:$44 sps:$4 sm:$0xff]  }
 0x318   :  { %v5943_v49 = vpop.f32.mrf.mxu0  ;;  %v6056_v53 = vpop.f32.mrf.mxu1  ;;  %6722 = vmatprep.mubr.bf16.mxu1 %v14337_v32  ;;  %12217 = vmatprep.subr.bf16.mxu0 %v13667_v37  ;;  %v13675_v46 = vld [vmem:[#allocation6 + $0x1260] ss:$44 sps:$4 sm:$0xff]  }
 0x319   :  { %v5944_v8 = vadd.f32 %v5943_v49, %v15230_v52  ;;  %v6055_v15 = vadd.f32 %v6054_v21, %v5942_v27  ;;  %12632 = vmatpush3.bf16.msra.mxu1 %v15283_v62  ;;  %v13673_v52 = vld [vmem:[#allocation6 + $0xf48] ss:$44 sps:$4 sm:$0xff]   ;;  %v14339_v32 = vld [vmem:[#allocation3 + $0x40] ss:$28 sps:$4 sm:$0xff]  }
 0x31a   :  { %v5945_v17 = vpop.f32.mrf.mxu0  ;;  %v6058_v18 = vpop.f32.mrf.mxu1  ;;  %12633 = vmatprep.subr.bf16.mxu1 %v13672_v36  ;;  %v14338_v49 = vld [vmem:[#allocation3 + $0x38] ss:$28 sps:$4 sm:$0xff]  }
 0x31b   :  { %v5946_v39 = vadd.f32 %v5945_v17, %v15236_v29  ;;  %v15358_v55 = vadd.f32 %v6056_v53, %v5944_v8  ;;  %12218 = vmatpush3.bf16.msra.mxu0 %v13668_v56  ;;  %v7155_v21 = vmul.f32 0.2, %v6055_v15  ;;  %v13678_v53 = vld [vmem:[#allocation6 + $0x1208] ss:$44 sps:$4 sm:$0xff]   ;;  %vm6979_vm0 = vcmp.ge.f32.partialorder %v6055_v15, 0.0 }
 0x31c   :  { %v5947_v60 = vpop.f32.mrf.mxu0  ;;  %v6060_v20 = vpop.f32.mrf.mxu1  ;;  %12219 = vmatprep.subr.bf16.mxu0 %v13670_v0  ;;  %v14340_v0 = vld [vmem:[#allocation3 + $0x74] ss:$28 sps:$4 sm:$0xff]   ;;  %v14341_v17 = vld [vmem:[#allocation3 + $0x7c] ss:$28 sps:$4 sm:$0xff]  }
 0x31d   :  { %v5948_v37 = vadd.f32 %v5947_v60, %v15242_v34  ;;  %12634 = vmatpush3.bf16.msra.mxu1 %v13672_v36  ;;  %v6059_v27 = vadd.f32 %v6058_v18, %v5946_v39  ;;  %v13674_v34 = vld [vmem:[#allocation6 + $0xc88] ss:$44 sps:$4 sm:$0xff]   ;;  %v7156_v36 = vmul.f32 0.2, %v15358_v55  ;;  %vm6980_vm3 = vcmp.ge.f32.partialorder %v15358_v55, 0.0 }
 0x31e   :  { %v5951_v62 = vpop.f32.mrf.mxu0  ;;  %6626 = vmatmul.mubr.bf16.gmra.mxu0 %v14338_v49  ;;  %6723 = vmatmul.mubr.bf16.gmra.mxu1 %v14339_v32  ;;  %v6064_v29 = vpop.f32.mrf.mxu1 }
 0x31f   :  { %v5952_v56 = vadd.f32 %v5951_v62, %v15246_v25  ;;  %v6061_v8 = vadd.f32 %v6060_v20, %v5948_v37  ;;  %6633 = vmatprep.mubr.bf16.mxu0 %v14340_v0  ;;  %6730 = vmatprep.mubr.bf16.mxu1 %v14341_v17  ;;  %vm6990_vm1 = vcmp.ge.f32.partialorder %v6059_v27, 0.0  ;;  %v7166_v18 = vmul.f32 0.2, %v6059_v27  ;;  %v13676_v25 = vld [vmem:[#allocation6 + $0xef0] ss:$44 sps:$4 sm:$0xff]  }
 0x320   :  { %v5953_v39 = vpop.f32.mrf.mxu0  ;;  %v6066_v60 = vpop.f32.mrf.mxu1  ;;  %12220 = vmatpush3.bf16.msra.mxu0 %v13671_v47  ;;  %12635 = vmatprep.subr.bf16.mxu1 %v13675_v46  ;;  %v7331_v20 = vsel %vm6979_vm0, %v6055_v15, %v7155_v21 }
 0x321   :  { %vm6991_vm2 = vcmp.ge.f32.partialorder %v6061_v8, 0.0  ;;  %v7167_v49 = vmul.f32 0.2, %v6061_v8  ;;  %v5954_v32 = vadd.f32 %v5953_v39, %v15249_v13  ;;  %v6065_v43 = vadd.f32 %v6064_v29, %v5952_v56  ;;  %12221 = vmatprep.subr.bf16.mxu0 %v13673_v52  ;;  %12636 = vmatpush3.bf16.msra.mxu1 %v13675_v46  ;;  %v13677_v52 = vld [vmem:[#allocation6 + $0xc30] ss:$44 sps:$4 sm:$0xff]  }
 0x322   :  { %v7342_v37 = vsel %vm6990_vm1, %v6059_v27, %v7166_v18  ;;  %v5955_v62 = vpop.f32.mrf.mxu0  ;;  %v6068_v0 = vpop.f32.mrf.mxu1  ;;  %12637 = vmatprep.subr.bf16.mxu1 %v13678_v53  ;;  %v13681_v46 = vld [vmem:[#allocation6 + $0x11b0] ss:$44 sps:$4 sm:$0xff]   ;;  %v13679_v27 = vld [vmem:[#allocation6 + $0xe98] ss:$44 sps:$4 sm:$0xff]  }
 0x323   :  { %v15366_v17 = vpack.c.bf16 %v7342_v37, %v7331_v20  ;;  %v5956_v47 = vadd.f32 %v5955_v62, %v15252_v44  ;;  %v7177_v14 = vmul.f32 0.2, %v6065_v43  ;;  %v6067_v7 = vadd.f32 %v6066_v60, %v5954_v32  ;;  %v14342_v39 = vld [vmem:[#allocation3 + $0x70] ss:$28 sps:$4 sm:$0xff]   ;;  %v13684_v32 = vld [vmem:[#allocation6 + $0x1158] ss:$44 sps:$4 sm:$0xff]  }
 0x324   :  { %v5957_v50 = vpop.f32.mrf.mxu0  ;;  %v6070_v13 = vpop.f32.mrf.mxu1  ;;  %12222 = vmatpush3.bf16.msra.mxu0 %v13674_v34  ;;  %v7343_v29 = vsel %vm6991_vm2, %v6061_v8, %v7167_v49  ;;  %vm7001_vm4 = vcmp.ge.f32.partialorder %v6065_v43, 0.0  ;;  %v7332_v44 = vsel %vm6980_vm3, %v15358_v55, %v7156_v36  ;;  %v14343_v34 = vld [vmem:[#allocation3 + $0x78] ss:$28 sps:$4 sm:$0xff]   ;;  %v14344_v49 = vld [vmem:[#allocation3 + $0xac] ss:$28 sps:$4 sm:$0xff]  }
 0x325   :  { %16805 = vst [vmem:[#allocation71_spill] sm:$0xff] %v15366_v17  ;;  %v5958_v15 = vadd.f32 %v5957_v50, %v15258_v26  ;;  %v6069_v21 = vadd.f32 %v6068_v0, %v5956_v47  ;;  %12223 = vmatprep.subr.bf16.mxu0 %v13676_v25  ;;  %12638 = vmatpush3.bf16.msra.mxu1 %v13678_v53  ;;  %v7178_v56 = vmul.f32 0.2, %v6067_v7  ;;  %v14345_v25 = vld [vmem:[#allocation3 + $0xb4] ss:$28 sps:$4 sm:$0xff]   ;;  %vm7002_vm6 = vcmp.ge.f32.partialorder %v6067_v7, 0.0 }
 0x326   :  { %v5961_v18 = vpop.f32.mrf.mxu0  ;;  %6634 = vmatmul.mubr.bf16.gmra.mxu0 %v14342_v39  ;;  %6731 = vmatmul.mubr.bf16.gmra.mxu1 %v14343_v34  ;;  %v6074_v60 = vpop.f32.mrf.mxu1  ;;  %v15374_v8 = vpack.c.bf16 %v7343_v29, %v7332_v44  ;;  %v7353_v55 = vsel %vm7001_vm4, %v6065_v43, %v7177_v14  ;;  %v13680_v37 = vld [vmem:[#allocation6 + $0xbd8] ss:$44 sps:$4 sm:$0xff]  }
 0x327   :  { %vm7012_vm5 = vcmp.ge.f32.partialorder %v6069_v21, 0.0  ;;  %v7188_v50 = vmul.f32 0.2, %v6069_v21  ;;  %v5962_v26 = vadd.f32 %v5961_v18, %v15262_v58  ;;  %v6071_v53 = vadd.f32 %v6070_v13, %v5958_v15  ;;  %6641 = vmatprep.mubr.bf16.mxu0 %v14344_v49  ;;  %6738 = vmatprep.mubr.bf16.mxu1 %v14345_v25  ;;  %v13682_v58 = vld [vmem:[#allocation6 + $0xe40] ss:$44 sps:$4 sm:$0xff]  }
 0x328   :  { %16806 = vst [vmem:[#allocation72_spill] sm:$0xff] %v15374_v8  ;;  %v5963_v36 = vpop.f32.mrf.mxu0  ;;  %v6076_v20 = vpop.f32.mrf.mxu1  ;;  %12224 = vmatpush3.bf16.msra.mxu0 %v13677_v52  ;;  %12639 = vmatprep.subr.bf16.mxu1 %v13681_v46  ;;  %v7354_v52 = vsel %vm7002_vm6, %v6067_v7, %v7178_v56  ;;  %v14346_v25 = vld [vmem:[#allocation3 + $0xa8] ss:$28 sps:$4 sm:$0xff]   ;;  %v14347_v7 = vld [vmem:[#allocation3 + $0xb0] ss:$28 sps:$4 sm:$0xff]  }
 0x329   :  { %v7364_v62 = vsel %vm7012_vm5, %v6069_v21, %v7188_v50  ;;  %vm7013_vm7 = vcmp.ge.f32.partialorder %v6071_v53, 0.0  ;;  %v7189_v0 = vmul.f32 0.2, %v6071_v53  ;;  %v5964_v47 = vadd.f32 %v5963_v36, %v15265_v22  ;;  %12225 = vmatprep.subr.bf16.mxu0 %v13679_v27  ;;  %12640 = vmatpush3.bf16.msra.mxu1 %v13681_v46  ;;  %v13683_v22 = vld [vmem:[#allocation6 + $0xb80] ss:$44 sps:$4 sm:$0xff]  }
 0x32a   :  { %v15379_v13 = vpack.c.bf16 %v7364_v62, %v7353_v55  ;;  %v6075_v29 = vadd.f32 %v6074_v60, %v5962_v26  ;;  %v5965_v15 = vpop.f32.mrf.mxu0  ;;  %v6078_v44 = vpop.f32.mrf.mxu1  ;;  %12641 = vmatprep.subr.bf16.mxu1 %v13684_v32  ;;  %v13685_v27 = vld [vmem:[#allocation6 + $0x1100] ss:$44 sps:$4 sm:$0xff]   ;;  %v13686_v26 = vld [vmem:[#allocation6 + $0xde8] ss:$44 sps:$4 sm:$0xff]  }
 0x32b   :  { %v5966_v43 = vadd.f32 %v5965_v15, %v15268_v19  ;;  %v6077_v14 = vadd.f32 %v6076_v20, %v5964_v47  ;;  %v7365_v18 = vsel %vm7013_vm7, %v6071_v53, %v7189_v0  ;;  %v13688_v53 = vld [vmem:[#allocation6 + $0x10a8] ss:$44 sps:$4 sm:$0xff]  }
 0x32c   :  { %16807 = vst [vmem:[#allocation73_spill] sm:$0xff] %v15379_v13  ;;  %v7199_v21 = vmul.f32 0.2, %v6075_v29  ;;  %v5967_v39 = vpop.f32.mrf.mxu0  ;;  %v6080_v34 = vpop.f32.mrf.mxu1  ;;  %12226 = vmatpush3.bf16.msra.mxu0 %v13680_v37  ;;  %v15383_v46 = vpack.c.bf16 %v7365_v18, %v7354_v52  ;;  %vm7023_vm8 = vcmp.ge.f32.partialorder %v6075_v29, 0.0  ;;  %v14348_v37 = vld [vmem:[#allocation3 + $0xe4] ss:$28 sps:$4 sm:$0xff]  }
 0x32d   :  { %v5968_v60 = vadd.f32 %v5967_v39, %v15274_v33  ;;  %v6079_v50 = vadd.f32 %v6078_v44, %v5966_v43  ;;  %12227 = vmatprep.subr.bf16.mxu0 %v13682_v58  ;;  %12642 = vmatpush3.bf16.msra.mxu1 %v13684_v32  ;;  %v7200_v19 = vmul.f32 0.2, %v6077_v14  ;;  %v14349_v33 = vld [vmem:[#allocation3 + $0xec] ss:$28 sps:$4 sm:$0xff]   ;;  %vm7024_vm10 = vcmp.ge.f32.partialorder %v6077_v14, 0.0 }
 0x32e   :  { %16808 = vst [vmem:[#allocation74_spill] sm:$0xff] %v15383_v46  ;;  %v5971_v49 = vpop.f32.mrf.mxu0  ;;  %6642 = vmatmul.mubr.bf16.gmra.mxu0 %v14346_v25  ;;  %6739 = vmatmul.mubr.bf16.gmra.mxu1 %v14347_v7  ;;  %v6084_v56 = vpop.f32.mrf.mxu1  ;;  %v7375_v32 = vsel %vm7023_vm8, %v6075_v29, %v7199_v21  ;;  %v13687_v47 = vld [vmem:[#allocation6 + $0xb28] ss:$44 sps:$4 sm:$0xff]  }
 0x32f   :  { %vm7034_vm9 = vcmp.ge.f32.partialorder %v6079_v50, 0.0  ;;  %v7210_v55 = vmul.f32 0.2, %v6079_v50  ;;  %v5972_v36 = vadd.f32 %v5971_v49, %v15278_v31  ;;  %v6081_v20 = vadd.f32 %v6080_v34, %v5968_v60  ;;  %6649 = vmatprep.mubr.bf16.mxu0 %v14348_v37  ;;  %6746 = vmatprep.mubr.bf16.mxu1 %v14349_v33  ;;  %v13694_v31 = vld [vmem:[#allocation9 + $0xac] ss:$12 sps:$4 sm:$0xff]  }
 0x330   :  { %v5973_v62 = vpop.f32.mrf.mxu0  ;;  %v6086_v0 = vpop.f32.mrf.mxu1  ;;  %12228 = vmatpush3.bf16.msra.mxu0 %v13683_v22  ;;  %12643 = vmatprep.subr.bf16.mxu1 %v13685_v27  ;;  %v7376_v34 = vsel %vm7024_vm10, %v6077_v14, %v7200_v19  ;;  %v14352_v37 = vld [vmem:[#allocation3 + $0x11c] ss:$28 sps:$4 sm:$0xff]   ;;  %v14353_v33 = vld [vmem:[#allocation3 + $0x124] ss:$28 sps:$4 sm:$0xff]  }
 0x331   :  { %v7386_v58 = vsel %vm7034_vm9, %v6079_v50, %v7210_v55  ;;  %vm7035_vm11 = vcmp.ge.f32.partialorder %v6081_v20, 0.0  ;;  %v7211_v15 = vmul.f32 0.2, %v6081_v20  ;;  %v5974_v44 = vadd.f32 %v5973_v62, %v15281_v59  ;;  %12229 = vmatprep.subr.bf16.mxu0 %v13686_v26  ;;  %12644 = vmatpush3.bf16.msra.mxu1 %v13685_v27  ;;  %v13691_v59 = vld [vmem:[#allocation9 + $0x22c] ss:$12 sps:$4 sm:$0xff]  }
 0x332   :  { %v15389_v43 = vpack.c.bf16 %v7386_v58, %v7375_v32  ;;  %v6085_v52 = vadd.f32 %v6084_v56, %v5972_v36  ;;  %v5975_v18 = vpop.f32.mrf.mxu0  ;;  %v6088_v39 = vpop.f32.mrf.mxu1  ;;  %12645 = vmatprep.subr.bf16.mxu1 %v13688_v53  ;;  %v14351_v55 = vld [vmem:[#allocation3 + $0xe8] ss:$28 sps:$4 sm:$0xff]  }
 0x333   :  { %v5976_v29 = vadd.f32 %v5975_v18, %v15286_v3  ;;  %v6087_v21 = vadd.f32 %v6086_v0, %v5974_v44  ;;  %v7387_v22 = vsel %vm7035_vm11, %v6081_v20, %v7211_v15  ;;  %v14350_v3 = vld [vmem:[#allocation3 + $0xe0] ss:$28 sps:$4 sm:$0xff]  }
 0x334   :  { %16809 = vst [vmem:[#allocation75_spill] sm:$0xff] %v15389_v43  ;;  %v7221_v60 = vmul.f32 0.2, %v6085_v52  ;;  %v5977_v50 = vpop.f32.mrf.mxu0  ;;  %v6090_v49 = vpop.f32.mrf.mxu1  ;;  %12230 = vmatpush3.bf16.msra.mxu0 %v13687_v47  ;;  %v15393_v26 = vpack.c.bf16 %v7387_v22, %v7376_v34  ;;  %vm7045_vm12 = vcmp.ge.f32.partialorder %v6085_v52, 0.0 }
 0x335   :  { %v5978_v27 = vadd.f32 %v5977_v50, %v15292_v12  ;;  %v6089_v25 = vadd.f32 %v6088_v39, %v5976_v29  ;;  %12646 = vmatpush3.bf16.msra.mxu1 %v13688_v53  ;;  %9366 = vmatprep.subr.bf16.mxu0 %v13694_v31  ;;  %v7222_v7 = vmul.f32 0.2, %v6087_v21  ;;  %vm7046_vm14 = vcmp.ge.f32.partialorder %v6087_v21, 0.0 }
 0x336   :  { %16810 = vst [vmem:[#allocation76_spill] sm:$0xff] %v15393_v26  ;;  %v5981_v56 = vpop.f32.mrf.mxu0  ;;  %6650 = vmatmul.mubr.bf16.gmra.mxu0 %v14350_v3  ;;  %6747 = vmatmul.mubr.bf16.gmra.mxu1 %v14351_v55  ;;  %v6094_v14 = vpop.f32.mrf.mxu1  ;;  %v7397_v12 = vsel %vm7045_vm12, %v6085_v52, %v7221_v60  ;;  %v14356_v3 = vld [vmem:[#allocation3 + $0x154] ss:$28 sps:$4 sm:$0xff]   ;;  %v14357_v55 = vld [vmem:[#allocation3 + $0x15c] ss:$28 sps:$4 sm:$0xff]  }
 0x337   :  { %vm7056_vm13 = vcmp.ge.f32.partialorder %v6089_v25, 0.0  ;;  %v7232_v19 = vmul.f32 0.2, %v6089_v25  ;;  %v5982_v36 = vadd.f32 %v5981_v56, %v15297_v45  ;;  %v6091_v20 = vadd.f32 %v6090_v49, %v5978_v27  ;;  %6657 = vmatprep.mubr.bf16.mxu0 %v14352_v37  ;;  %6754 = vmatprep.mubr.bf16.mxu1 %v14353_v33  ;;  %v14354_v27 = vld [vmem:[#allocation3 + $0x118] ss:$28 sps:$4 sm:$0xff]  }
 0x338   :  { %v5983_v53 = vpop.f32.mrf.mxu0  ;;  %v6096_v32 = vpop.f32.mrf.mxu1  ;;  %9479 = vmatprep.subr.bf16.mxu1 %v13691_v59  ;;  %v7398_v39 = vsel %vm7046_vm14, %v6087_v21, %v7222_v7 }
 0x339   :  { %v7408_v62 = vsel %vm7056_vm13, %v6089_v25, %v7232_v19  ;;  %vm7057_vm15 = vcmp.ge.f32.partialorder %v6091_v20, 0.0  ;;  %v7233_v0 = vmul.f32 0.2, %v6091_v20  ;;  %v5984_v47 = vadd.f32 %v5983_v53, %v15300_v16  ;;  %v14355_v25 = vld [vmem:[#allocation3 + $0x120] ss:$28 sps:$4 sm:$0xff]  }
 0x33a   :  { %v15399_v58 = vpack.c.bf16 %v7408_v62, %v7397_v12  ;;  %v6095_v15 = vadd.f32 %v6094_v14, %v5982_v36  ;;  %v5985_v45 = vpop.f32.mrf.mxu0  ;;  %v6098_v44 = vpop.f32.mrf.mxu1 }
 0x33b   :  { %v5986_v31 = vadd.f32 %v5985_v45, %v15303_v40  ;;  %v6097_v18 = vadd.f32 %v6096_v32, %v5984_v47  ;;  %v7409_v29 = vsel %vm7057_vm15, %v6091_v20, %v7233_v0 }
 0x33c   :  { %16811 = vst [vmem:[#allocation77_spill] sm:$0xff] %v15399_v58  ;;  %v7243_v52 = vmul.f32 0.2, %v6095_v15  ;;  %v5987_v34 = vpop.f32.mrf.mxu0  ;;  %v6100_v22 = vpop.f32.mrf.mxu1  ;;  %v15402_v60 = vpack.c.bf16 %v7409_v29, %v7398_v39  ;;  %vm7067_vm0 = vcmp.ge.f32.partialorder %v6095_v15, 0.0 }
 0x33d   :  { %v5988_v50 = vadd.f32 %v5987_v34, %v15309_v35  ;;  %v6099_v49 = vadd.f32 %v6098_v44, %v5986_v31  ;;  %v7244_v16 = vmul.f32 0.2, %v6097_v18  ;;  %vm7068_vm2 = vcmp.ge.f32.partialorder %v6097_v18, 0.0  ;;  %v14358_v34 = vld [vmem:[#allocation3 + $0x150] ss:$28 sps:$4 sm:$0xff]  }
 0x33e   :  { %16812 = vst [vmem:[#allocation78_spill] sm:$0xff] %v15402_v60  ;;  %v5991_v59 = vpop.f32.mrf.mxu0  ;;  %6658 = vmatmul.mubr.bf16.gmra.mxu0 %v14354_v27  ;;  %6755 = vmatmul.mubr.bf16.gmra.mxu1 %v14355_v25  ;;  %v6104_v56 = vpop.f32.mrf.mxu1  ;;  %v7419_v14 = vsel %vm7067_vm0, %v6095_v15, %v7243_v52 }
 0x33f   :  { %vm7078_vm1 = vcmp.ge.f32.partialorder %v6099_v49, 0.0  ;;  %v7254_v40 = vmul.f32 0.2, %v6099_v49  ;;  %v5992_v21 = vadd.f32 %v5991_v59, %v15313_v4  ;;  %v6101_v7 = vadd.f32 %v6100_v22, %v5988_v50  ;;  %6665 = vmatprep.mubr.bf16.mxu0 %v14356_v3  ;;  %6762 = vmatprep.mubr.bf16.mxu1 %v14357_v55  ;;  %v14359_v22 = vld [vmem:[#allocation3 + $0x158] ss:$28 sps:$4 sm:$0xff]  }
 0x340   :  { %v5993_v35 = vpop.f32.mrf.mxu0  ;;  %v6106_v19 = vpop.f32.mrf.mxu1  ;;  %v7420_v0 = vsel %vm7068_vm2, %v6097_v18, %v7244_v16  ;;  %v14360_v16 = vld [vmem:[#allocation3 + $0x18c] ss:$28 sps:$4 sm:$0xff]   ;;  %v14361_v59 = vld [vmem:[#allocation3 + $0x194] ss:$28 sps:$4 sm:$0xff]  }
 0x341   :  { %v7430_v36 = vsel %vm7078_vm1, %v6099_v49, %v7254_v40  ;;  %vm7079_vm3 = vcmp.ge.f32.partialorder %v6101_v7, 0.0  ;;  %v7255_v20 = vmul.f32 0.2, %v6101_v7  ;;  %v5994_v37 = vadd.f32 %v5993_v35, %v15316_v57 }
 0x342   :  { %v15408_v33 = vpack.c.bf16 %v7430_v36, %v7419_v14  ;;  %v6105_v12 = vadd.f32 %v6104_v56, %v5992_v21  ;;  %v5995_v53 = vpop.f32.mrf.mxu0  ;;  %v6108_v4 = vpop.f32.mrf.mxu1 }
 0x343   :  { %v5996_v32 = vadd.f32 %v5995_v53, %v15319_v5  ;;  %v6107_v62 = vadd.f32 %v6106_v19, %v5994_v37  ;;  %v7431_v47 = vsel %vm7079_vm3, %v6101_v7, %v7255_v20 }
 0x344   :  { %16813 = vst [vmem:[#allocation79_spill] sm:$0xff] %v15408_v33  ;;  %v7265_v45 = vmul.f32 0.2, %v6105_v12  ;;  %v5997_v15 = vpop.f32.mrf.mxu0  ;;  %v6110_v44 = vpop.f32.mrf.mxu1  ;;  %v15411_v31 = vpack.c.bf16 %v7431_v47, %v7420_v0  ;;  %vm7089_vm4 = vcmp.ge.f32.partialorder %v6105_v12, 0.0  ;;  %v14362_v47 = vld [vmem:[#allocation3 + $0x188] ss:$28 sps:$4 sm:$0xff]  }
 0x345   :  { %v5998_v39 = vadd.f32 %v5997_v15, %v15325_v54  ;;  %v6109_v29 = vadd.f32 %v6108_v4, %v5996_v32  ;;  %v7266_v57 = vmul.f32 0.2, %v6107_v62  ;;  %vm7090_vm6 = vcmp.ge.f32.partialorder %v6107_v62, 0.0 }
 0x346   :  { %16814 = vst [vmem:[#allocation80_spill] sm:$0xff] %v15411_v31  ;;  %v6001_v52 = vpop.f32.mrf.mxu0  ;;  %6666 = vmatmul.mubr.bf16.gmra.mxu0 %v14358_v34  ;;  %6763 = vmatmul.mubr.bf16.gmra.mxu1 %v14359_v22  ;;  %v6114_v50 = vpop.f32.mrf.mxu1  ;;  %v7441_v27 = vsel %vm7089_vm4, %v6105_v12, %v7265_v45  ;;  %v14363_v45 = vld [vmem:[#allocation3 + $0x190] ss:$28 sps:$4 sm:$0xff]  }
 0x347   :  { %vm7100_vm5 = vcmp.ge.f32.partialorder %v6109_v29, 0.0  ;;  %v7276_v5 = vmul.f32 0.2, %v6109_v29  ;;  %v6002_v18 = vadd.f32 %v6001_v52, %v15329_v28  ;;  %v6111_v49 = vadd.f32 %v6110_v44, %v5998_v39  ;;  %6673 = vmatprep.mubr.bf16.mxu0 %v14360_v16  ;;  %6770 = vmatprep.mubr.bf16.mxu1 %v14361_v59  ;;  %v14364_v39 = vld [vmem:[#allocation3 + $0x14] ss:$28 sps:$4 sm:$0xff]  }
 0x348   :  { %v6003_v54 = vpop.f32.mrf.mxu0  ;;  %v6116_v25 = vpop.f32.mrf.mxu1  ;;  %v7442_v19 = vsel %vm7090_vm6, %v6107_v62, %v7266_v57  ;;  %v843_v57 = vld [vmem:[#allocation8 + $0x8] sm:$0x7] }
 0x349   :  { %v7452_v56 = vsel %vm7100_vm5, %v6109_v29, %v7276_v5  ;;  %vm7101_vm7 = vcmp.ge.f32.partialorder %v6111_v49, 0.0  ;;  %v7277_v40 = vmul.f32 0.2, %v6111_v49  ;;  %v6004_v21 = vadd.f32 %v6003_v54, %v15332_v41  ;;  %v14365_v29 = vld [vmem:[#allocation3 + $0x18] ss:$28 sps:$4 sm:$0xff]  }
 0x34a   :  { %v15417_v7 = vpack.c.bf16 %v7452_v56, %v7441_v27  ;;  %v6115_v3 = vadd.f32 %v6114_v50, %v6002_v18  ;;  %v6005_v55 = vpop.f32.mrf.mxu0  ;;  %v6118_v28 = vpop.f32.mrf.mxu1  ;;  %v15429_v59 = vrot.slane %v843_v57, %v14623_v2  ;;  %v13692_v56 = vld [vmem:[#allocation9 + $0xa8] ss:$12 sps:$4 sm:$0xff]  }
 0x34b   :  { %v6006_v14 = vadd.f32 %v6005_v55, %v15335_v1  ;;  %v6117_v35 = vadd.f32 %v6116_v25, %v6004_v21  ;;  %v7453_v36 = vsel %vm7101_vm7, %v6111_v49, %v7277_v40  ;;  %v13689_v25 = vld [vmem:[#allocation9 + $0x228] ss:$12 sps:$4 sm:$0xff]  }
 0x34c   :  { %16815 = vst [vmem:[#allocation81_spill] sm:$0xff] %v15417_v7  ;;  %v7287_v20 = vmul.f32 0.2, %v6115_v3  ;;  %v6007_v37 = vpop.f32.mrf.mxu0  ;;  %v6120_v12 = vpop.f32.mrf.mxu1  ;;  %v15420_v53 = vpack.c.bf16 %v7453_v36, %v7442_v19  ;;  %vm7111_vm8 = vcmp.ge.f32.partialorder %v6115_v3, 0.0  ;;  %v16828_v7 = vld [vmem:[#allocation24_spill] sm:$0xff] }
 0x34d   :  { %v6008_v4 = vadd.f32 %v6007_v37, %v15341_v63  ;;  %v6119_v32 = vadd.f32 %v6118_v28, %v6006_v14  ;;  %v7288_v41 = vmul.f32 0.2, %v6117_v35  ;;  %vm7112_vm10 = vcmp.ge.f32.partialorder %v6117_v35, 0.0  ;;  %v13700_v14 = vld [vmem:[#allocation9 + $0x94] ss:$12 sps:$4 sm:$0xff]  }
 0x34e   :  { %16816 = vst [vmem:[#allocation82_spill] sm:$0xff] %v15420_v53  ;;  %v6011_v0 = vpop.f32.mrf.mxu0  ;;  %6674 = vmatmul.mubr.bf16.gmra.mxu0 %v14362_v47  ;;  %6771 = vmatmul.mubr.bf16.gmra.mxu1 %v14363_v45  ;;  %v6124_v15 = vpop.f32.mrf.mxu1  ;;  %v7463_v63 = vsel %vm7111_vm8, %v6115_v3, %v7287_v20  ;;  %v15437_v37 = vrot.slane %v843_v57, %v14627_v6  ;;  %v14367_v57 = vld [vmem:[#allocation3 + $0x4c] ss:$28 sps:$4 sm:$0xff]   ;;  %v14380_v6 = vld [vmem:[#allocation3 + $0x198] ss:$28 sps:$4 sm:$0xff]  }
 0x34f   :  { %vm7122_vm9 = vcmp.ge.f32.partialorder %v6119_v32, 0.0  ;;  %v7298_v1 = vmul.f32 0.2, %v6119_v32  ;;  %v6012_v62 = vadd.f32 %v6011_v0, %v15344_v51  ;;  %v6121_v44 = vadd.f32 %v6120_v12, %v6008_v4  ;;  %6811 = vmatprep.mubr.bf16.mxu0 %v14364_v39  ;;  %12647 = vmatprep.mubr.bf16.mxu1 %v14365_v29  ;;  %v14366_v4 = vld [vmem:[#allocation3 + $0x10] ss:$28 sps:$4 sm:$0xff]  }
 0x350   :  { %v6013_v52 = vpop.f32.mrf.mxu0  ;;  %v6126_v34 = vpop.f32.mrf.mxu1  ;;  %v7464_v40 = vsel %vm7112_vm10, %v6117_v35, %v7288_v41 }
 0x351   :  { %v7474_v22 = vsel %vm7122_vm9, %v6119_v32, %v7298_v1  ;;  %vm7123_vm11 = vcmp.ge.f32.partialorder %v6121_v44, 0.0  ;;  %v7299_v50 = vmul.f32 0.2, %v6121_v44  ;;  %v6014_v5 = vadd.f32 %v6013_v52, %v15347_v24  ;;  %v13697_v24 = vld [vmem:[#allocation9 + $0x214] ss:$12 sps:$4 sm:$0xff]  }
 0x352   :  { %v15426_v18 = vpack.c.bf16 %v7474_v22, %v7463_v63  ;;  %v6125_v49 = vadd.f32 %v6124_v15, %v6012_v62  ;;  %v6015_v51 = vpop.f32.mrf.mxu0  ;;  %v6128_v16 = vpop.f32.mrf.mxu1  ;;  %v13695_v32 = vld [vmem:[#allocation9 + $0x210] ss:$12 sps:$4 sm:$0xff]  }
 0x353   :  { %v6016_v27 = vadd.f32 %v6015_v51, %v15350_v23  ;;  %v6127_v54 = vadd.f32 %v6126_v34, %v6014_v5  ;;  %v7475_v21 = vsel %vm7123_vm11, %v6121_v44, %v7299_v50  ;;  %v13703_v62 = vld [vmem:[#allocation9 + $0x1fc] ss:$12 sps:$4 sm:$0xff]   ;;  %v13701_v51 = vld [vmem:[#allocation9 + $0x1f8] ss:$12 sps:$4 sm:$0xff]  }
 0x354   :  { %16817 = vst [vmem:[#allocation83_spill] sm:$0xff] %v15426_v18  ;;  %v7309_v3 = vmul.f32 0.2, %v6125_v49  ;;  %v6017_v55 = vpop.f32.mrf.mxu0  ;;  %v6130_v28 = vpop.f32.mrf.mxu1  ;;  %v15433_v19 = vpack.c.bf16 %v7475_v21, %v7464_v40  ;;  %vm7133_vm12 = vcmp.ge.f32.partialorder %v6125_v49, 0.0  ;;  %v13706_v44 = vld [vmem:[#allocation9 + $0x7c] ss:$12 sps:$4 sm:$0xff]  }
 0x355   :  { %v6018_v36 = vadd.f32 %v6017_v55, %v15352_v10  ;;  %v6129_v20 = vadd.f32 %v6128_v16, %v6016_v27  ;;  %vm7134_vm13 = vcmp.ge.f32.partialorder %v6127_v54, 0.0  ;;  %v7310_v23 = vmul.f32 0.2, %v6127_v54  ;;  %v13698_v10 = vld [vmem:[#allocation9 + $0x90] ss:$12 sps:$4 sm:$0xff]  }
 0x356   :  { %16818 = vst [vmem:[#allocation84_spill] sm:$0xff] %v15433_v19  ;;  %v6167_v12 = vpop.f32.mrf.mxu0  ;;  %6812 = vmatmul.mubr.bf16.vlgmr.msra.gmra.mxu0 %v14366_v4  ;;  %12648 = vmatmul.mubr.bf16.vlgmr.msra.gmra.mxu1 %v15238_v38  ;;  %v6280_v35 = vpop.f32.mrf.mxu1  ;;  %v7485_v45 = vsel %vm7133_vm12, %v6125_v49, %v7309_v3  ;;  %v13704_v16 = vld [vmem:[#allocation9 + $0x78] ss:$12 sps:$4 sm:$0xff]  }
 0x357   :  { %vm7144_vm14 = vcmp.ge.f32.partialorder %v6129_v20, 0.0  ;;  %v7320_v41 = vmul.f32 0.2, %v6129_v20  ;;  %v6131_v0 = vadd.f32 %v6130_v28, %v6018_v36  ;;  %v6168_v47 = vadd.f32 %v6167_v12, %v15429_v59  ;;  %9480 = vmatpush1.bf16.msra.mxu1 %v13689_v25  ;;  %9367 = vmatpush1.bf16.msra.mxu0 %v13692_v56  ;;  %v13709_v56 = vld [vmem:[#allocation9 + $0x1e4] ss:$12 sps:$4 sm:$0xff]  }
 0x358   :  { %v6169_v15 = vpop.f32.mrf.mxu0  ;;  %9481 = vmatprep.subr.bf16.mxu1 %v13697_v24  ;;  %v6282_v1 = vpop.f32.mrf.mxu1  ;;  %9368 = vmatprep.subr.bf16.mxu0 %v13700_v14  ;;  %v7486_v50 = vsel %vm7134_vm13, %v6127_v54, %v7310_v23  ;;  %v13712_v40 = vld [vmem:[#allocation9 + $0x64] ss:$12 sps:$4 sm:$0xff]   ;;  %v14368_v28 = vld [vmem:[#allocation3 + $0x48] ss:$28 sps:$4 sm:$0xff]   ;;  %v13710_v23 = vld [vmem:[#allocation9 + $0x60] ss:$12 sps:$4 sm:$0xff]  }
 0x359   :  { %v7496_v39 = vsel %vm7144_vm14, %v6129_v20, %v7320_v41  ;;  %vm7145_vm15 = vcmp.ge.f32.partialorder %v6131_v0, 0.0  ;;  %v7321_v38 = vmul.f32 0.2, %v6131_v0  ;;  %v6170_v29 = vadd.f32 %v6169_v15, %v15437_v37  ;;  %6819 = vmatprep.mubr.bf16.mxu0 %v14367_v57  ;;  %12651 = vmatprep.mubr.bf16.mxu1 %v15254_v30  ;;  %v13707_v20 = vld [vmem:[#allocation9 + $0x1e0] ss:$12 sps:$4 sm:$0xff]  }
 0x35a   :  { %v15444_v63 = vpack.c.bf16 %v7496_v39, %v7485_v45  ;;  %v15446_v52 = vadd.f32 %v6280_v35, %v6168_v47  ;;  %v6171_v34 = vpop.f32.mrf.mxu0  ;;  %v6284_v22 = vpop.f32.mrf.mxu1  ;;  %v13715_v35 = vld [vmem:[#allocation9 + $0x1cc] ss:$12 sps:$4 sm:$0xff]  }
 0x35b   :  { %v6172_v5 = vadd.f32 %v6171_v34, %v15429_v59  ;;  %v15450_v49 = vadd.f32 %v6282_v1, %v6170_v29  ;;  %9482 = vmatpush1.bf16.msra.mxu1 %v13695_v32  ;;  %9369 = vmatpush1.bf16.msra.mxu0 %v13698_v10  ;;  %v7497_v27 = vsel %vm7145_vm15, %v6131_v0, %v7321_v38  ;;  %v13718_v32 = vld [vmem:[#allocation9 + $0x4c] ss:$12 sps:$4 sm:$0xff]   ;;  %v13713_v1 = vld [vmem:[#allocation9 + $0x1c8] ss:$12 sps:$4 sm:$0xff]  }
 0x35c   :  { %16819 = vst [vmem:[#allocation85_spill] sm:$0xff] %v15444_v63  ;;  %v6173_v25 = vpop.f32.mrf.mxu0  ;;  %9483 = vmatprep.subr.bf16.mxu1 %v13703_v62  ;;  %v6286_v30 = vpop.f32.mrf.mxu1  ;;  %9370 = vmatprep.subr.bf16.mxu0 %v13706_v44  ;;  %v15453_v21 = vpack.c.bf16 %v7497_v27, %v7486_v50  ;;  %v13716_v62 = vld [vmem:[#allocation9 + $0x48] ss:$12 sps:$4 sm:$0xff]   ;;  %v13722_v27 = vld [vmem:[#allocation9 + $0x30] ss:$12 sps:$4 sm:$0xff]  }
 0x35d   :  { %v6174_v54 = vadd.f32 %v6173_v25, %v15437_v37  ;;  %v15456_v3 = vadd.f32 %v6284_v22, %v6172_v5  ;;  %v13721_v38 = vld [vmem:[#allocation9 + $0x1b4] ss:$12 sps:$4 sm:$0xff]  }
 0x35e   :  { %16820 = vst [vmem:[#allocation86_spill] sm:$0xff] %v15453_v21  ;;  %v6177_v55 = vpop.f32.mrf.mxu0  ;;  %6820 = vmatmul.mubr.bf16.gmra.mxu0 %v14368_v28  ;;  %12652 = vmatmul.mubr.bf16.gmra.mxu1 %v15270_v61  ;;  %v6290_v24 = vpop.f32.mrf.mxu1  ;;  %v14369_v61 = vld [vmem:[#allocation3 + $0x84] ss:$28 sps:$4 sm:$0xff]  }
 0x35f   :  { %v6178_v14 = vadd.f32 %v6177_v55, %v15429_v59  ;;  %v15460_v36 = vadd.f32 %v6286_v30, %v6174_v54  ;;  %9484 = vmatpush1.bf16.msra.mxu1 %v13701_v51  ;;  %9371 = vmatpush1.bf16.msra.mxu0 %v13704_v16  ;;  %v13724_v29 = vld [vmem:[#allocation9 + $0x34] ss:$12 sps:$4 sm:$0xff]   ;;  %v13719_v16 = vld [vmem:[#allocation9 + $0x1b0] ss:$12 sps:$4 sm:$0xff]  }
 0x360   :  { %v6179_v12 = vpop.f32.mrf.mxu0  ;;  %9485 = vmatprep.subr.bf16.mxu1 %v13709_v56  ;;  %v6292_v4 = vpop.f32.mrf.mxu1  ;;  %9372 = vmatprep.subr.bf16.mxu0 %v13712_v40  ;;  %v14370_v22 = vld [vmem:[#allocation3 + $0x80] ss:$28 sps:$4 sm:$0xff]   ;;  %v13727_v56 = vld [vmem:[#allocation9 + $0x19c] ss:$12 sps:$4 sm:$0xff]  }
 0x361   :  { %v6180_v41 = vadd.f32 %v6179_v12, %v15437_v37  ;;  %v15463_v0 = vadd.f32 %v6290_v24, %v6178_v14  ;;  %6827 = vmatprep.mubr.bf16.mxu0 %v14369_v61  ;;  %12655 = vmatprep.mubr.bf16.mxu1 %v15288_v42  ;;  %v13730_v40 = vld [vmem:[#allocation9 + $0x1c] ss:$12 sps:$4 sm:$0xff]   ;;  %v13728_v12 = vld [vmem:[#allocation9 + $0x18] ss:$12 sps:$4 sm:$0xff]  }
 0x362   :  { %v6181_v47 = vpop.f32.mrf.mxu0  ;;  %v6294_v10 = vpop.f32.mrf.mxu1 }
 0x363   :  { %v6182_v45 = vadd.f32 %v6181_v47, %v15429_v59  ;;  %v15467_v15 = vadd.f32 %v6292_v4, %v6180_v41  ;;  %9486 = vmatpush1.bf16.msra.mxu1 %v13707_v20  ;;  %9373 = vmatpush1.bf16.msra.mxu0 %v13710_v23  ;;  %v13725_v23 = vld [vmem:[#allocation9 + $0x198] ss:$12 sps:$4 sm:$0xff]  }
 0x364   :  { %v6183_v44 = vpop.f32.mrf.mxu0  ;;  %9487 = vmatprep.subr.bf16.mxu1 %v13715_v35  ;;  %v6296_v39 = vpop.f32.mrf.mxu1  ;;  %9374 = vmatprep.subr.bf16.mxu0 %v13718_v32  ;;  %v13733_v32 = vld [vmem:[#allocation9 + $0x184] ss:$12 sps:$4 sm:$0xff]  }
 0x365   :  { %v6184_v57 = vadd.f32 %v6183_v44, %v15437_v37  ;;  %v15470_v34 = vadd.f32 %v6294_v10, %v6182_v45  ;;  %v14372_v10 = vld [vmem:[#allocation3 + $0xb8] ss:$28 sps:$4 sm:$0xff]  }
 0x366   :  { %v6187_v42 = vpop.f32.mrf.mxu0  ;;  %6828 = vmatmul.mubr.bf16.gmra.mxu0 %v14370_v22  ;;  %12656 = vmatmul.mubr.bf16.gmra.mxu1 %v15305_v9  ;;  %v6300_v50 = vpop.f32.mrf.mxu1  ;;  %v14371_v9 = vld [vmem:[#allocation3 + $0xbc] ss:$28 sps:$4 sm:$0xff]  }
 0x367   :  { %v6188_v5 = vadd.f32 %v6187_v42, %v15429_v59  ;;  %v15474_v51 = vadd.f32 %v6296_v39, %v6184_v57  ;;  %9488 = vmatpush1.bf16.msra.mxu1 %v13713_v1  ;;  %9375 = vmatpush1.bf16.msra.mxu0 %v13716_v62  ;;  %v13731_v44 = vld [vmem:[#allocation9 + $0x180] ss:$12 sps:$4 sm:$0xff]  }
 0x368   :  { %v6189_v25 = vpop.f32.mrf.mxu0  ;;  %9489 = vmatprep.subr.bf16.mxu1 %v13721_v38  ;;  %v6302_v30 = vpop.f32.mrf.mxu1  ;;  %9376 = vmatprep.subr.bf16.mxu0 %v13724_v29  ;;  %v13734_v39 = vld [vmem:[#allocation9] ss:$12 sps:$4 sm:$0xff]  }
 0x369   :  { %v6190_v54 = vadd.f32 %v6189_v25, %v15437_v37  ;;  %v15477_v55 = vadd.f32 %v6300_v50, %v6188_v5  ;;  %6835 = vmatprep.mubr.bf16.mxu0 %v14371_v9  ;;  %12659 = vmatprep.mubr.bf16.mxu1 %v15321_v48  ;;  %v13736_v48 = vld [vmem:[#allocation9 + $0x4] ss:$12 sps:$4 sm:$0xff]   ;;  %v16821_v38 = vld [vmem:[#allocation40_spill] sm:$0xff] }
 0x36a   :  { %v6191_v28 = vpop.f32.mrf.mxu0  ;;  %v6304_v24 = vpop.f32.mrf.mxu1  ;;  %v13739_v42 = vld [vmem:[#allocation9 + $0x2ec] ss:$12 sps:$4 sm:$0xff]  }
 0x36b   :  { %v6192_v14 = vadd.f32 %v6191_v28, %v15429_v59  ;;  %v15481_v20 = vadd.f32 %v6302_v30, %v6190_v54  ;;  %9490 = vmatpush1.bf16.msra.mxu1 %v13719_v16  ;;  %9377 = vmatpush1.bf16.msra.mxu0 %v13722_v27  ;;  %v13742_v22 = vld [vmem:[#allocation9 + $0x16c] ss:$12 sps:$4 sm:$0xff]   ;;  %v13745_v28 = vld [vmem:[#allocation9 + $0x2d4] ss:$12 sps:$4 sm:$0xff]  }
 0x36c   :  { %v6193_v4 = vpop.f32.mrf.mxu0  ;;  %9491 = vmatprep.subr.bf16.mxu1 %v13727_v56  ;;  %v6306_v35 = vpop.f32.mrf.mxu1  ;;  %9378 = vmatprep.subr.bf16.mxu0 %v13730_v40  ;;  %v13737_v56 = vld [vmem:[#allocation9 + $0x2e8] ss:$12 sps:$4 sm:$0xff]  }
 0x36d   :  { %v6194_v41 = vadd.f32 %v6193_v4, %v15437_v37  ;;  %v15484_v61 = vadd.f32 %v6304_v24, %v6192_v14  ;;  %v13740_v40 = vld [vmem:[#allocation9 + $0x168] ss:$12 sps:$4 sm:$0xff]   ;;  %v14374_v4 = vld [vmem:[#allocation3 + $0xf0] ss:$28 sps:$4 sm:$0xff]  }
 0x36e   :  { %v6197_v47 = vpop.f32.mrf.mxu0  ;;  %6836 = vmatmul.mubr.bf16.gmra.mxu0 %v14372_v10  ;;  %12660 = vmatmul.mubr.bf16.gmra.mxu1 %v15337_v11  ;;  %v6310_v45 = vpop.f32.mrf.mxu1  ;;  %v14373_v11 = vld [vmem:[#allocation3 + $0xf4] ss:$28 sps:$4 sm:$0xff]   ;;  %v13748_v24 = vld [vmem:[#allocation9 + $0x154] ss:$12 sps:$4 sm:$0xff]  }
 0x36f   :  { %v6198_v1 = vadd.f32 %v6197_v47, %v15429_v59  ;;  %v15488_v62 = vadd.f32 %v6306_v35, %v6194_v41  ;;  %9492 = vmatpush1.bf16.msra.mxu1 %v13725_v23  ;;  %9379 = vmatpush1.bf16.msra.mxu0 %v13728_v12  ;;  %v13746_v47 = vld [vmem:[#allocation9 + $0x150] ss:$12 sps:$4 sm:$0xff]  }
 0x370   :  { %9511 = vmatprep.mubr.bf16.mxu1 %v16821_v38  ;;  %v6199_v29 = vpop.f32.mrf.mxu0  ;;  %9493 = vmatprep.subr.bf16.mxu1 %v13733_v32  ;;  %v6312_v57 = vpop.f32.mrf.mxu1  ;;  %v13781_v38 = vld [vmem:[#allocation9 + $0x244] ss:$12 sps:$4 sm:$0xff]  }
 0x371   :  { %v6200_v50 = vadd.f32 %v6199_v29, %v15437_v37  ;;  %v15492_v5 = vadd.f32 %v6310_v45, %v6198_v1  ;;  %9380 = vmatprep.subr.bf16.mxu0 %v13736_v48  ;;  %6843 = vmatprep.mubr.bf16.mxu0 %v14373_v11  ;;  %v13743_v48 = vld [vmem:[#allocation9 + $0x2d0] ss:$12 sps:$4 sm:$0xff]  }
 0x372   :  { %v6201_v16 = vpop.f32.mrf.mxu0  ;;  %v6314_v27 = vpop.f32.mrf.mxu1  ;;  %v13751_v1 = vld [vmem:[#allocation9 + $0x2bc] ss:$12 sps:$4 sm:$0xff]  }
 0x373   :  { %v6202_v25 = vadd.f32 %v6201_v16, %v15429_v59  ;;  %v15495_v30 = vadd.f32 %v6312_v57, %v6200_v50  ;;  %9494 = vmatpush1.bf16.msra.mxu1 %v13731_v44  ;;  %9381 = vmatpush1.bf16.msra.mxu0 %v13734_v39  ;;  %v13754_v44 = vld [vmem:[#allocation9 + $0x13c] ss:$12 sps:$4 sm:$0xff]   ;;  %v13749_v16 = vld [vmem:[#allocation9 + $0x2b8] ss:$12 sps:$4 sm:$0xff]  }
 0x374   :  { %v6203_v54 = vpop.f32.mrf.mxu0  ;;  %9495 = vmatprep.subr.bf16.mxu1 %v13739_v42  ;;  %v6316_v9 = vpop.f32.mrf.mxu1  ;;  %9382 = vmatprep.subr.bf16.mxu0 %v13742_v22  ;;  %v14375_v57 = vld [vmem:[#allocation3 + $0x12c] ss:$28 sps:$4 sm:$0xff]  }
 0x375   :  { %v6204_v14 = vadd.f32 %v6203_v54, %v15437_v37  ;;  %v15498_v23 = vadd.f32 %v6314_v27, %v6202_v25  ;;  %v13752_v27 = vld [vmem:[#allocation9 + $0x138] ss:$12 sps:$4 sm:$0xff]  }
 0x376   :  { %v6207_v12 = vpop.f32.mrf.mxu0  ;;  %6844 = vmatmul.mubr.bf16.gmra.mxu0 %v14374_v4  ;;  %v6320_v35 = vpop.f32.mrf.mxu1  ;;  %v13760_v54 = vld [vmem:[#allocation9 + $0x124] ss:$12 sps:$4 sm:$0xff]  }
 0x377   :  { %v6208_v32 = vadd.f32 %v6207_v12, %v15429_v59  ;;  %v15501_v41 = vadd.f32 %v6316_v9, %v6204_v14  ;;  %9496 = vmatpush2.bf16.msra.mxu1 %v13737_v56  ;;  %9383 = vmatpush2.bf16.msra.mxu0 %v13740_v40  ;;  %v13757_v40 = vld [vmem:[#allocation9 + $0x2a4] ss:$12 sps:$4 sm:$0xff]   ;;  %v14376_v14 = vld [vmem:[#allocation3 + $0x128] ss:$28 sps:$4 sm:$0xff]  }
 0x378   :  { %v6209_v10 = vpop.f32.mrf.mxu0  ;;  %9497 = vmatprep.subr.bf16.mxu1 %v13745_v28  ;;  %v6322_v45 = vpop.f32.mrf.mxu1  ;;  %9384 = vmatprep.subr.bf16.mxu0 %v13748_v24 }
 0x379   :  { %v6210_v39 = vadd.f32 %v6209_v10, %v15437_v37  ;;  %v15504_v29 = vadd.f32 %v6320_v35, %v6208_v32  ;;  %6851 = vmatprep.mubr.bf16.mxu0 %v14375_v57  ;;  %v13755_v32 = vld [vmem:[#allocation9 + $0x2a0] ss:$12 sps:$4 sm:$0xff]   ;;  %v14377_v57 = vld [vmem:[#allocation3 + $0x164] ss:$28 sps:$4 sm:$0xff]  }
 0x37a   :  { %v6211_v42 = vpop.f32.mrf.mxu0  ;;  %v6324_v22 = vpop.f32.mrf.mxu1 }
 0x37b   :  { %v6212_v50 = vadd.f32 %v6211_v42, %v15429_v59  ;;  %v15507_v11 = vadd.f32 %v6322_v45, %v6210_v39  ;;  %9498 = vmatpush2.bf16.msra.mxu1 %v13743_v48  ;;  %9385 = vmatpush2.bf16.msra.mxu0 %v13746_v47  ;;  %v13758_v48 = vld [vmem:[#allocation9 + $0x120] ss:$12 sps:$4 sm:$0xff]  }
 0x37c   :  { %v6213_v25 = vpop.f32.mrf.mxu0  ;;  %9499 = vmatprep.subr.bf16.mxu1 %v13751_v1  ;;  %v6326_v56 = vpop.f32.mrf.mxu1  ;;  %9386 = vmatprep.subr.bf16.mxu0 %v13754_v44  ;;  %v13763_v45 = vld [vmem:[#allocation9 + $0x28c] ss:$12 sps:$4 sm:$0xff]  }
 0x37d   :  { %v6214_v9 = vadd.f32 %v6213_v25, %v15437_v37  ;;  %v15510_v28 = vadd.f32 %v6324_v22, %v6212_v50  ;;  %v13766_v1 = vld [vmem:[#allocation9 + $0x10c] ss:$12 sps:$4 sm:$0xff]   ;;  %v13764_v25 = vld [vmem:[#allocation9 + $0x108] ss:$12 sps:$4 sm:$0xff]  }
 0x37e   :  { %v6217_v24 = vpop.f32.mrf.mxu0  ;;  %6852 = vmatmul.mubr.bf16.gmra.mxu0 %v14376_v14  ;;  %v6330_v12 = vpop.f32.mrf.mxu1 }
 0x37f   :  { %v6218_v4 = vadd.f32 %v6217_v24, %v15429_v59  ;;  %v15513_v35 = vadd.f32 %v6326_v56, %v6214_v9  ;;  %9500 = vmatpush2.bf16.msra.mxu1 %v13749_v16  ;;  %9387 = vmatpush2.bf16.msra.mxu0 %v13752_v27  ;;  %v13761_v27 = vld [vmem:[#allocation9 + $0x288] ss:$12 sps:$4 sm:$0xff]  }
 0x380   :  { %v6219_v47 = vpop.f32.mrf.mxu0  ;;  %9501 = vmatprep.subr.bf16.mxu1 %v13757_v40  ;;  %v6332_v10 = vpop.f32.mrf.mxu1  ;;  %9388 = vmatprep.subr.bf16.mxu0 %v13760_v54  ;;  %v13769_v54 = vld [vmem:[#allocation9 + $0x274] ss:$12 sps:$4 sm:$0xff]  }
 0x381   :  { %v6220_v44 = vadd.f32 %v6219_v47, %v15437_v37  ;;  %v15516_v39 = vadd.f32 %v6330_v12, %v6218_v4  ;;  %6859 = vmatprep.mubr.bf16.mxu0 %v14377_v57  ;;  %v13772_v9 = vld [vmem:[#allocation9 + $0xf4] ss:$12 sps:$4 sm:$0xff]   ;;  %v13775_v57 = vld [vmem:[#allocation9 + $0x25c] ss:$12 sps:$4 sm:$0xff]  }
 0x382   :  { %v6221_v42 = vpop.f32.mrf.mxu0  ;;  %v6334_v22 = vpop.f32.mrf.mxu1  ;;  %v14378_v4 = vld [vmem:[#allocation3 + $0x160] ss:$28 sps:$4 sm:$0xff]  }
 0x383   :  { %v6222_v50 = vadd.f32 %v6221_v42, %v15429_v59  ;;  %v15519_v16 = vadd.f32 %v6332_v10, %v6220_v44  ;;  %9502 = vmatpush2.bf16.msra.mxu1 %v13755_v32  ;;  %9389 = vmatpush2.bf16.msra.mxu0 %v13758_v48  ;;  %v13767_v48 = vld [vmem:[#allocation9 + $0x270] ss:$12 sps:$4 sm:$0xff]  }
 0x384   :  { %v6223_v56 = vpop.f32.mrf.mxu0  ;;  %9503 = vmatprep.subr.bf16.mxu1 %v13763_v45  ;;  %v6336_v40 = vpop.f32.mrf.mxu1  ;;  %9390 = vmatprep.subr.bf16.mxu0 %v13766_v1  ;;  %v13770_v45 = vld [vmem:[#allocation9 + $0xf0] ss:$12 sps:$4 sm:$0xff]  }
 0x385   :  { %v6224_v24 = vadd.f32 %v6223_v56, %v15437_v37  ;;  %v15522_v14 = vadd.f32 %v6334_v22, %v6222_v50  ;;  %v13778_v42 = vld [vmem:[#allocation9 + $0xdc] ss:$12 sps:$4 sm:$0xff]   ;;  %v14379_v56 = vld [vmem:[#allocation3 + $0x19c] ss:$28 sps:$4 sm:$0xff]  }
 0x386   :  { %v6227_v12 = vpop.f32.mrf.mxu0  ;;  %6860 = vmatmul.mubr.bf16.gmra.mxu0 %v14378_v4  ;;  %v6340_v47 = vpop.f32.mrf.mxu1 }
 0x387   :  { %v6228_v10 = vadd.f32 %v6227_v12, %v15429_v59  ;;  %v15525_v32 = vadd.f32 %v6336_v40, %v6224_v24  ;;  %9504 = vmatpush2.bf16.msra.mxu1 %v13761_v27  ;;  %9391 = vmatpush2.bf16.msra.mxu0 %v13764_v25  ;;  %v13773_v25 = vld [vmem:[#allocation9 + $0x258] ss:$12 sps:$4 sm:$0xff]  }
 0x388   :  { %v6229_v44 = vpop.f32.mrf.mxu0  ;;  %9505 = vmatprep.subr.bf16.mxu1 %v13769_v54  ;;  %v6342_v1 = vpop.f32.mrf.mxu1  ;;  %9392 = vmatprep.subr.bf16.mxu0 %v13772_v9  ;;  %v13776_v54 = vld [vmem:[#allocation9 + $0xd8] ss:$12 sps:$4 sm:$0xff]  }
 0x389   :  { %v6230_v22 = vadd.f32 %v6229_v44, %v15437_v37  ;;  %v15528_v50 = vadd.f32 %v6340_v47, %v6228_v10  ;;  %6867 = vmatprep.mubr.bf16.mxu0 %v14379_v56  ;;  %v13784_v44 = vld [vmem:[#allocation9 + $0xc4] ss:$12 sps:$4 sm:$0xff]  }
 0x38a   :  { %v6231_v4 = vpop.f32.mrf.mxu0  ;;  %v6344_v12 = vpop.f32.mrf.mxu1 }
 0x38b   :  { %v6232_v40 = vadd.f32 %v6231_v4, %v15429_v59  ;;  %v15531_v27 = vadd.f32 %v6342_v1, %v6230_v22  ;;  %9506 = vmatpush2.bf16.msra.mxu1 %v13767_v48  ;;  %9393 = vmatpush2.bf16.msra.mxu0 %v13770_v45  ;;  %v13779_v45 = vld [vmem:[#allocation9 + $0x240] ss:$12 sps:$4 sm:$0xff]  }
 0x38c   :  { %v6233_v24 = vpop.f32.mrf.mxu0  ;;  %9507 = vmatprep.subr.bf16.mxu1 %v13775_v57  ;;  %v6346_v9 = vpop.f32.mrf.mxu1  ;;  %9394 = vmatprep.subr.bf16.mxu0 %v13778_v42  ;;  %v13782_v57 = vld [vmem:[#allocation9 + $0xc0] ss:$12 sps:$4 sm:$0xff]  }
 0x38d   :  { %v6234_v47 = vadd.f32 %v6233_v24, %v15437_v37  ;;  %v15534_v10 = vadd.f32 %v6344_v12, %v6232_v40  ;;  %v16822_v22 = vld [vmem:[#allocation23_spill] sm:$0xff]  ;;  %v13787_v12 = vld [vmem:[#allocation9 + $0x52c] ss:$12 sps:$4 sm:$0xff]  }
 0x38e   :  { %v6237_v56 = vpop.f32.mrf.mxu0  ;;  %6868 = vmatmul.mubr.bf16.gmra.mxu0 %v14380_v6  ;;  %v6350_v4 = vpop.f32.mrf.mxu1  ;;  %v13790_v40 = vld [vmem:[#allocation9 + $0x3ac] ss:$12 sps:$4 sm:$0xff]  }
 0x38f   :  { %v6238_v1 = vadd.f32 %v6237_v56, %v15429_v59  ;;  %v15537_v48 = vadd.f32 %v6346_v9, %v6234_v47  ;;  %9508 = vmatpush2.bf16.msra.mxu1 %v13773_v25  ;;  %9395 = vmatpush2.bf16.msra.mxu0 %v13776_v54  ;;  %v13785_v54 = vld [vmem:[#allocation9 + $0x528] ss:$12 sps:$4 sm:$0xff]  }
 0x390   :  { %9398 = vmatprep.mubr.bf16.mxu0 %v16822_v22  ;;  %v6239_v42 = vpop.f32.mrf.mxu0  ;;  %9509 = vmatprep.subr.bf16.mxu1 %v13781_v38  ;;  %v6352_v24 = vpop.f32.mrf.mxu1  ;;  %v13788_v22 = vld [vmem:[#allocation9 + $0x3a8] ss:$12 sps:$4 sm:$0xff]  }
 0x391   :  { %v6240_v2 = vadd.f32 %v6239_v42, %v15437_v37  ;;  %v15541_v63 = vadd.f32 %v6350_v4, %v6238_v1  ;;  %9396 = vmatprep.subr.bf16.mxu0 %v13784_v44  ;;  %v13793_v4 = vld [vmem:[#allocation9 + $0x514] ss:$12 sps:$4 sm:$0xff]  }
 0x392   :  { %v6241_v6 = vpop.f32.mrf.mxu0  ;;  %v6354_v56 = vpop.f32.mrf.mxu1  ;;  %v13796_v44 = vld [vmem:[#allocation9 + $0x394] ss:$12 sps:$4 sm:$0xff]  }
 0x393   :  { %v6242_v9 = vadd.f32 %v6241_v6, %v15429_v59  ;;  %v15544_v25 = vadd.f32 %v6352_v24, %v6240_v2  ;;  %9510 = vmatpush2.bf16.msra.mxu1 %v13779_v45  ;;  %9397 = vmatpush2.bf16.msra.mxu0 %v13782_v57  ;;  %v16823_v1 = vld [vmem:[#allocation39_spill] sm:$0xff]  ;;  %v16824_v59 = vld [vmem:[#allocation22_spill] sm:$0xff] }
 0x394   :  { %v6243_v47 = vpop.f32.mrf.mxu0  ;;  %9705 = vmatprep.subr.bf16.mxu1 %v13787_v12  ;;  %v6356_v38 = vpop.f32.mrf.mxu1  ;;  %9592 = vmatprep.subr.bf16.mxu0 %v13790_v40  ;;  %v16825_v24 = vld [vmem:[#allocation42_spill] sm:$0xff]  ;;  %v16826_v40 = vld [vmem:[#allocation25_spill] sm:$0xff] }
 0x395   :  { %v6244_v21 = vadd.f32 %v6243_v47, %v15437_v37  ;;  %v15547_v42 = vadd.f32 %v6354_v56, %v6242_v9  ;;  %v13791_v12 = vld [vmem:[#allocation9 + $0x510] ss:$12 sps:$4 sm:$0xff]  }
 0x396   :  { %9512 = vmatmul.mubr.bf16.vlgmr.msra.gmra.mxu1 %v16823_v1  ;;  %v6393_v18 = vpop.f32.mrf.mxu0  ;;  %9399 = vmatmul.mubr.bf16.vlgmr.msra.gmra.mxu0 %v16824_v59  ;;  %v6506_v2 = vpop.f32.mrf.mxu1  ;;  %v13794_v56 = vld [vmem:[#allocation9 + $0x390] ss:$12 sps:$4 sm:$0xff]  }
 0x397   :  { %v15551_v45 = vadd.f32 %v6356_v38, %v6244_v21  ;;  %v6394_v57 = vadd.f32 %v6393_v18, %v15446_v52  ;;  %9521 = vmatprep.mubr.bf16.mxu1 %v16825_v24  ;;  %9706 = vmatpush1.bf16.msra.mxu1 %v13785_v54  ;;  %v13799_v9 = vld [vmem:[#allocation9 + $0x4fc] ss:$12 sps:$4 sm:$0xff]   ;;  %v13797_v54 = vld [vmem:[#allocation9 + $0x4f8] ss:$12 sps:$4 sm:$0xff]  }
 0x398   :  { %9408 = vmatprep.mubr.bf16.mxu0 %v16826_v40  ;;  %9593 = vmatpush1.bf16.msra.mxu0 %v13788_v22  ;;  %v6395_v37 = vpop.f32.mrf.mxu0  ;;  %v6508_v6 = vpop.f32.mrf.mxu1  ;;  %v13802_v21 = vld [vmem:[#allocation9 + $0x37c] ss:$12 sps:$4 sm:$0xff]   ;;  %v13800_v40 = vld [vmem:[#allocation9 + $0x378] ss:$12 sps:$4 sm:$0xff]  }
 0x399   :  { %v6396_v47 = vadd.f32 %v6395_v37, %v15450_v49  ;;  %v6507_v1 = vadd.f32 %v6506_v2, %v6394_v57  ;;  %9707 = vmatprep.subr.bf16.mxu1 %v13793_v4  ;;  %9594 = vmatprep.subr.bf16.mxu0 %v13796_v44  ;;  %v13805_v49 = vld [vmem:[#allocation9 + $0x4e4] ss:$12 sps:$4 sm:$0xff]  }
 0x39a   :  { %v6397_v38 = vpop.f32.mrf.mxu0  ;;  %v6510_v59 = vpop.f32.mrf.mxu1  ;;  %v13808_v2 = vld [vmem:[#allocation9 + $0x364] ss:$12 sps:$4 sm:$0xff]  }
 0x39b   :  { %v6398_v18 = vadd.f32 %v6397_v38, %v15456_v3  ;;  %v6509_v52 = vadd.f32 %v6508_v6, %v6396_v47  ;;  %9708 = vmatpush1.bf16.msra.mxu1 %v13791_v12  ;;  %v7157_v4 = vmul.f32 0.2, %v6507_v1  ;;  %v16827_v57 = vld [vmem:[#allocation41_spill] sm:$0xff]  ;;  %v13803_v12 = vld [vmem:[#allocation9 + $0x4e0] ss:$12 sps:$4 sm:$0xff]   ;;  %vm6981_vm0 = vcmp.ge.f32.partialorder %v6507_v1, 0.0 }
 0x39c   :  { %9595 = vmatpush1.bf16.msra.mxu0 %v13794_v56  ;;  %v6399_v24 = vpop.f32.mrf.mxu0  ;;  %9709 = vmatprep.subr.bf16.mxu1 %v13799_v9  ;;  %v6512_v22 = vpop.f32.mrf.mxu1  ;;  %v16829_v9 = vld [vmem:[#allocation44_spill] sm:$0xff] }
 0x39d   :  { %v6400_v19 = vadd.f32 %v6399_v24, %v15460_v36  ;;  %9596 = vmatprep.subr.bf16.mxu0 %v13802_v21  ;;  %v6511_v44 = vadd.f32 %v6510_v59, %v6398_v18  ;;  %v13806_v36 = vld [vmem:[#allocation9 + $0x360] ss:$12 sps:$4 sm:$0xff]   ;;  %vm6982_vm1 = vcmp.ge.f32.partialorder %v6509_v52, 0.0  ;;  %v7158_v47 = vmul.f32 0.2, %v6509_v52 }
 0x39e   :  { %9522 = vmatmul.mubr.bf16.gmra.mxu1 %v16827_v57  ;;  %v6403_v37 = vpop.f32.mrf.mxu0  ;;  %9409 = vmatmul.mubr.bf16.gmra.mxu0 %v16828_v7  ;;  %v6516_v3 = vpop.f32.mrf.mxu1  ;;  %v13811_v24 = vld [vmem:[#allocation9 + $0x4cc] ss:$12 sps:$4 sm:$0xff]   ;;  %v16830_v21 = vld [vmem:[#allocation27_spill] sm:$0xff] }
 0x39f   :  { %v6404_v6 = vadd.f32 %v6403_v37, %v15463_v0  ;;  %v6513_v56 = vadd.f32 %v6512_v22, %v6400_v19  ;;  %9531 = vmatprep.mubr.bf16.mxu1 %v16829_v9  ;;  %9710 = vmatpush1.bf16.msra.mxu1 %v13797_v54  ;;  %vm6992_vm2 = vcmp.ge.f32.partialorder %v6511_v44, 0.0  ;;  %v7168_v59 = vmul.f32 0.2, %v6511_v44  ;;  %v13814_v19 = vld [vmem:[#allocation9 + $0x34c] ss:$12 sps:$4 sm:$0xff]  }
 0x3a0   :  { %9418 = vmatprep.mubr.bf16.mxu0 %v16830_v21  ;;  %9597 = vmatpush1.bf16.msra.mxu0 %v13800_v40  ;;  %v6405_v38 = vpop.f32.mrf.mxu0  ;;  %v6518_v18 = vpop.f32.mrf.mxu1  ;;  %v7333_v54 = vsel %vm6981_vm0, %v6507_v1, %v7157_v4  ;;  %v13809_v40 = vld [vmem:[#allocation9 + $0x4c8] ss:$12 sps:$4 sm:$0xff]  }
 0x3a1   :  { %vm6993_vm3 = vcmp.ge.f32.partialorder %v6513_v56, 0.0  ;;  %v7169_v57 = vmul.f32 0.2, %v6513_v56  ;;  %v6406_v7 = vadd.f32 %v6405_v38, %v15467_v15  ;;  %v6517_v0 = vadd.f32 %v6516_v3, %v6404_v6  ;;  %9711 = vmatprep.subr.bf16.mxu1 %v13805_v49  ;;  %9598 = vmatprep.subr.bf16.mxu0 %v13808_v2  ;;  %v13812_v49 = vld [vmem:[#allocation9 + $0x348] ss:$12 sps:$4 sm:$0xff]  }
 0x3a2   :  { %v7344_v22 = vsel %vm6992_vm2, %v6511_v44, %v7168_v59  ;;  %v6407_v37 = vpop.f32.mrf.mxu0  ;;  %v6520_v9 = vpop.f32.mrf.mxu1  ;;  %v7334_v2 = vsel %vm6982_vm1, %v6509_v52, %v7158_v47  ;;  %v13817_v3 = vld [vmem:[#allocation9 + $0x4b4] ss:$12 sps:$4 sm:$0xff]   ;;  %v16835_v47 = vld [vmem:[#allocation46_spill] sm:$0xff] }
 0x3a3   :  { %v15566_v53 = vpack.c.bf16 %v7344_v22, %v7333_v54  ;;  %v6408_v21 = vadd.f32 %v6407_v37, %v15470_v34  ;;  %9712 = vmatpush1.bf16.msra.mxu1 %v13803_v12  ;;  %v7179_v33 = vmul.f32 0.2, %v6517_v0  ;;  %v6519_v31 = vadd.f32 %v6518_v18, %v6406_v7  ;;  %v13820_v34 = vld [vmem:[#allocation9 + $0x334] ss:$12 sps:$4 sm:$0xff]   ;;  %v13818_v18 = vld [vmem:[#allocation9 + $0x330] ss:$12 sps:$4 sm:$0xff]  }
 0x3a4   :  { %9599 = vmatpush1.bf16.msra.mxu0 %v13806_v36  ;;  %v6409_v58 = vpop.f32.mrf.mxu0  ;;  %9713 = vmatprep.subr.bf16.mxu1 %v13811_v24  ;;  %v6522_v15 = vpop.f32.mrf.mxu1  ;;  %v7345_v1 = vsel %vm6993_vm3, %v6513_v56, %v7169_v57  ;;  %vm7003_vm4 = vcmp.ge.f32.partialorder %v6517_v0, 0.0  ;;  %v16833_v7 = vld [vmem:[#allocation43_spill] sm:$0xff]  ;;  %v16834_v24 = vld [vmem:[#allocation26_spill] sm:$0xff] }
 0x3a5   :  { %16831 = vst [vmem:[#allocation87_spill] sm:$0xff] %v15566_v53  ;;  %v6410_v4 = vadd.f32 %v6409_v58, %v15474_v51  ;;  %v6521_v44 = vadd.f32 %v6520_v9, %v6408_v21  ;;  %9600 = vmatprep.subr.bf16.mxu0 %v13814_v19  ;;  %v15572_v12 = vpack.c.bf16 %v7345_v1, %v7334_v2  ;;  %v7180_v6 = vmul.f32 0.2, %v6519_v31  ;;  %v13815_v58 = vld [vmem:[#allocation9 + $0x4b0] ss:$12 sps:$4 sm:$0xff]  }
 0x3a6   :  { %9532 = vmatmul.mubr.bf16.gmra.mxu1 %v16833_v7  ;;  %v6413_v36 = vpop.f32.mrf.mxu0  ;;  %9419 = vmatmul.mubr.bf16.gmra.mxu0 %v16834_v24  ;;  %v6526_v59 = vpop.f32.mrf.mxu1  ;;  %v7355_v51 = vsel %vm7003_vm4, %v6517_v0, %v7179_v33  ;;  %vm7004_vm6 = vcmp.ge.f32.partialorder %v6519_v31, 0.0  ;;  %v16836_v9 = vld [vmem:[#allocation29_spill] sm:$0xff]  ;;  %v13823_v19 = vld [vmem:[#allocation9 + $0x49c] ss:$12 sps:$4 sm:$0xff]   ;;  %v13821_v1 = vld [vmem:[#allocation9 + $0x498] ss:$12 sps:$4 sm:$0xff]  }
 0x3a7   :  { %16832 = vst [vmem:[#allocation88_spill] sm:$0xff] %v15572_v12  ;;  %vm7014_vm5 = vcmp.ge.f32.partialorder %v6521_v44, 0.0  ;;  %v7190_v52 = vmul.f32 0.2, %v6521_v44  ;;  %v6414_v57 = vadd.f32 %v6413_v36, %v15477_v55  ;;  %v6523_v56 = vadd.f32 %v6522_v15, %v6410_v4  ;;  %9541 = vmatprep.mubr.bf16.mxu1 %v16835_v47  ;;  %9714 = vmatpush1.bf16.msra.mxu1 %v13809_v40  ;;  %v13826_v37 = vld [vmem:[#allocation9 + $0x31c] ss:$12 sps:$4 sm:$0xff]  }
 0x3a8   :  { %9428 = vmatprep.mubr.bf16.mxu0 %v16836_v9  ;;  %9601 = vmatpush1.bf16.msra.mxu0 %v13812_v49  ;;  %v6415_v21 = vpop.f32.mrf.mxu0  ;;  %v6528_v38 = vpop.f32.mrf.mxu1  ;;  %v7356_v4 = vsel %vm7004_vm6, %v6519_v31, %v7180_v6  ;;  %v16839_v6 = vld [vmem:[#allocation28_spill] sm:$0xff]  ;;  %v13943_v24 = vld [vmem:[#allocation9 + $0x6c4] ss:$12 sps:$4 sm:$0xff]  }
 0x3a9   :  { %v7366_v54 = vsel %vm7014_vm5, %v6521_v44, %v7190_v52  ;;  %vm7015_vm7 = vcmp.ge.f32.partialorder %v6523_v56, 0.0  ;;  %v7191_v22 = vmul.f32 0.2, %v6523_v56  ;;  %v6416_v55 = vadd.f32 %v6415_v21, %v15481_v20  ;;  %9715 = vmatprep.subr.bf16.mxu1 %v13817_v3  ;;  %9602 = vmatprep.subr.bf16.mxu0 %v13820_v34  ;;  %v13824_v3 = vld [vmem:[#allocation9 + $0x318] ss:$12 sps:$4 sm:$0xff]   ;;  %v16838_v21 = vld [vmem:[#allocation45_spill] sm:$0xff] }
 0x3aa   :  { %v15581_v40 = vpack.c.bf16 %v7366_v54, %v7355_v51  ;;  %v6527_v15 = vadd.f32 %v6526_v59, %v6414_v57  ;;  %v6417_v33 = vpop.f32.mrf.mxu0  ;;  %v6530_v0 = vpop.f32.mrf.mxu1  ;;  %v13832_v51 = vld [vmem:[#allocation9 + $0x304] ss:$12 sps:$4 sm:$0xff]   ;;  %v16840_v54 = vld [vmem:[#allocation48_spill] sm:$0xff] }
 0x3ab   :  { %v6418_v2 = vadd.f32 %v6417_v33, %v15484_v61  ;;  %v6529_v49 = vadd.f32 %v6528_v38, %v6416_v55  ;;  %9716 = vmatpush1.bf16.msra.mxu1 %v13815_v58  ;;  %v7367_v44 = vsel %vm7015_vm7, %v6523_v56, %v7191_v22  ;;  %v13829_v61 = vld [vmem:[#allocation9 + $0x484] ss:$12 sps:$4 sm:$0xff]  }
 0x3ac   :  { %v7201_v36 = vmul.f32 0.2, %v6527_v15  ;;  %9603 = vmatpush1.bf16.msra.mxu0 %v13818_v18  ;;  %v6419_v52 = vpop.f32.mrf.mxu0  ;;  %9717 = vmatprep.subr.bf16.mxu1 %v13823_v19  ;;  %v6532_v20 = vpop.f32.mrf.mxu1  ;;  %v15585_v34 = vpack.c.bf16 %v7367_v44, %v7356_v4  ;;  %vm7025_vm8 = vcmp.ge.f32.partialorder %v6527_v15, 0.0  ;;  %v16841_v55 = vld [vmem:[#allocation31_spill] sm:$0xff] }
 0x3ad   :  { %v6420_v59 = vadd.f32 %v6419_v52, %v15488_v62  ;;  %v6531_v57 = vadd.f32 %v6530_v0, %v6418_v2  ;;  %9604 = vmatprep.subr.bf16.mxu0 %v13826_v37  ;;  %v7202_v58 = vmul.f32 0.2, %v6529_v49  ;;  %v13827_v62 = vld [vmem:[#allocation9 + $0x480] ss:$12 sps:$4 sm:$0xff]   ;;  %vm7026_vm10 = vcmp.ge.f32.partialorder %v6529_v49, 0.0 }
 0x3ae   :  { %16837 = vst [vmem:[#allocation89_spill] sm:$0xff] %v15585_v34  ;;  %9542 = vmatmul.mubr.bf16.gmra.mxu1 %v16838_v21  ;;  %v6423_v31 = vpop.f32.mrf.mxu0  ;;  %9429 = vmatmul.mubr.bf16.gmra.mxu0 %v16839_v6  ;;  %v6536_v56 = vpop.f32.mrf.mxu1  ;;  %v7377_v22 = vsel %vm7025_vm8, %v6527_v15, %v7201_v36  ;;  %v13830_v0 = vld [vmem:[#allocation9 + $0x300] ss:$12 sps:$4 sm:$0xff]  }
 0x3af   :  { %vm7036_vm9 = vcmp.ge.f32.partialorder %v6531_v57, 0.0  ;;  %v7212_v38 = vmul.f32 0.2, %v6531_v57  ;;  %v6424_v18 = vadd.f32 %v6423_v31, %v15492_v5  ;;  %v6533_v19 = vadd.f32 %v6532_v20, %v6420_v59  ;;  %9551 = vmatprep.mubr.bf16.mxu1 %v16840_v54  ;;  %9718 = vmatpush1.bf16.msra.mxu1 %v13821_v1  ;;  %v13835_v2 = vld [vmem:[#allocation9 + $0x5ec] ss:$12 sps:$4 sm:$0xff]  }
 0x3b0   :  { %9438 = vmatprep.mubr.bf16.mxu0 %v16841_v55  ;;  %9605 = vmatpush1.bf16.msra.mxu0 %v13824_v3  ;;  %v6425_v37 = vpop.f32.mrf.mxu0  ;;  %v6538_v33 = vpop.f32.mrf.mxu1  ;;  %v13838_v52 = vld [vmem:[#allocation9 + $0x46c] ss:$12 sps:$4 sm:$0xff]   ;;  %v13833_v31 = vld [vmem:[#allocation9 + $0x5e8] ss:$12 sps:$4 sm:$0xff]   ;;  %v7378_v54 = vsel %vm7026_vm10, %v6529_v49, %v7202_v58  ;;  %v13932_v55 = vld [vmem:[#allocation9 + $0x6f0] ss:$12 sps:$4 sm:$0xff]  }
 0x3b1   :  { %v7388_v4 = vsel %vm7036_vm9, %v6531_v57, %v7212_v38  ;;  %vm7037_vm11 = vcmp.ge.f32.partialorder %v6533_v19, 0.0  ;;  %v7213_v44 = vmul.f32 0.2, %v6533_v19  ;;  %v6426_v5 = vadd.f32 %v6425_v37, %v15495_v30  ;;  %9719 = vmatprep.subr.bf16.mxu1 %v13829_v61  ;;  %9606 = vmatprep.subr.bf16.mxu0 %v13832_v51  ;;  %v13836_v61 = vld [vmem:[#allocation9 + $0x468] ss:$12 sps:$4 sm:$0xff]   ;;  %v16842_v37 = vld [vmem:[#allocation47_spill] sm:$0xff] }
 0x3b2   :  { %v15595_v1 = vpack.c.bf16 %v7388_v4, %v7377_v22  ;;  %v6537_v20 = vadd.f32 %v6536_v56, %v6424_v18  ;;  %v6427_v15 = vpop.f32.mrf.mxu0  ;;  %v6540_v36 = vpop.f32.mrf.mxu1  ;;  %v13844_v22 = vld [vmem:[#allocation9 + $0x454] ss:$12 sps:$4 sm:$0xff]   ;;  %v16843_v58 = vld [vmem:[#allocation30_spill] sm:$0xff] }
 0x3b3   :  { %v6428_v59 = vadd.f32 %v6427_v15, %v15498_v23  ;;  %v6539_v3 = vadd.f32 %v6538_v33, %v6426_v5  ;;  %9720 = vmatpush1.bf16.msra.mxu1 %v13827_v62  ;;  %v7389_v57 = vsel %vm7037_vm11, %v6533_v19, %v7213_v44  ;;  %v13841_v23 = vld [vmem:[#allocation9 + $0x5d4] ss:$12 sps:$4 sm:$0xff]   ;;  %v13847_v15 = vld [vmem:[#allocation9 + $0x5bc] ss:$12 sps:$4 sm:$0xff]  }
 0x3b4   :  { %v7223_v38 = vmul.f32 0.2, %v6537_v20  ;;  %9607 = vmatpush1.bf16.msra.mxu0 %v13830_v0  ;;  %v6429_v21 = vpop.f32.mrf.mxu0  ;;  %9721 = vmatprep.subr.bf16.mxu1 %v13835_v2  ;;  %v6542_v30 = vpop.f32.mrf.mxu1  ;;  %v15599_v51 = vpack.c.bf16 %v7389_v57, %v7378_v54  ;;  %vm7047_vm12 = vcmp.ge.f32.partialorder %v6537_v20, 0.0  ;;  %v16844_v2 = vld [vmem:[#allocation50_spill] sm:$0xff]  ;;  %v16845_v4 = vld [vmem:[#allocation33_spill] sm:$0xff] }
 0x3b5   :  { %v6430_v56 = vadd.f32 %v6429_v21, %v15501_v41  ;;  %v6541_v18 = vadd.f32 %v6540_v36, %v6428_v59  ;;  %9608 = vmatprep.subr.bf16.mxu0 %v13838_v52  ;;  %v7224_v62 = vmul.f32 0.2, %v6539_v3  ;;  %v13839_v41 = vld [vmem:[#allocation9 + $0x5d0] ss:$12 sps:$4 sm:$0xff]   ;;  %vm7048_vm14 = vcmp.ge.f32.partialorder %v6539_v3, 0.0 }
 0x3b6   :  { %9552 = vmatmul.mubr.bf16.gmra.mxu1 %v16842_v37  ;;  %v6433_v49 = vpop.f32.mrf.mxu0  ;;  %9439 = vmatmul.mubr.bf16.gmra.mxu0 %v16843_v58  ;;  %v6546_v19 = vpop.f32.mrf.mxu1  ;;  %v7399_v21 = vsel %vm7047_vm12, %v6537_v20, %v7223_v38  ;;  %v13842_v52 = vld [vmem:[#allocation9 + $0x450] ss:$12 sps:$4 sm:$0xff]  }
 0x3b7   :  { %vm7058_vm13 = vcmp.ge.f32.partialorder %v6541_v18, 0.0  ;;  %v7234_v33 = vmul.f32 0.2, %v6541_v18  ;;  %v6434_v0 = vadd.f32 %v6433_v49, %v15504_v29  ;;  %v6543_v54 = vadd.f32 %v6542_v30, %v6430_v56  ;;  %9561 = vmatprep.mubr.bf16.mxu1 %v16844_v2  ;;  %9722 = vmatpush2.bf16.msra.mxu1 %v13833_v31  ;;  %v13850_v57 = vld [vmem:[#allocation9 + $0x43c] ss:$12 sps:$4 sm:$0xff]  }
 0x3b8   :  { %9448 = vmatprep.mubr.bf16.mxu0 %v16845_v4  ;;  %9609 = vmatpush2.bf16.msra.mxu0 %v13836_v61  ;;  %v6435_v44 = vpop.f32.mrf.mxu0  ;;  %v6548_v5 = vpop.f32.mrf.mxu1  ;;  %v13845_v49 = vld [vmem:[#allocation9 + $0x5b8] ss:$12 sps:$4 sm:$0xff]   ;;  %v7400_v2 = vsel %vm7048_vm14, %v6539_v3, %v7224_v62  ;;  %v16847_v62 = vld [vmem:[#allocation32_spill] sm:$0xff]  ;;  %v13934_v4 = vld [vmem:[#allocation9 + $0x6f4] ss:$12 sps:$4 sm:$0xff]  }
 0x3b9   :  { %v7410_v36 = vsel %vm7058_vm13, %v6541_v18, %v7234_v33  ;;  %vm7059_vm15 = vcmp.ge.f32.partialorder %v6543_v54, 0.0  ;;  %v7235_v59 = vmul.f32 0.2, %v6543_v54  ;;  %v6436_v29 = vadd.f32 %v6435_v44, %v15507_v11  ;;  %9723 = vmatprep.subr.bf16.mxu1 %v13841_v23  ;;  %9610 = vmatprep.subr.bf16.mxu0 %v13844_v22  ;;  %v13848_v23 = vld [vmem:[#allocation9 + $0x438] ss:$12 sps:$4 sm:$0xff]   ;;  %v16846_v44 = vld [vmem:[#allocation49_spill] sm:$0xff] }
 0x3ba   :  { %v15609_v31 = vpack.c.bf16 %v7410_v36, %v7399_v21  ;;  %v6547_v30 = vadd.f32 %v6546_v19, %v6434_v0  ;;  %v6437_v20 = vpop.f32.mrf.mxu0  ;;  %v6550_v38 = vpop.f32.mrf.mxu1  ;;  %v13856_v21 = vld [vmem:[#allocation9 + $0x424] ss:$12 sps:$4 sm:$0xff]   ;;  %v16849_v36 = vld [vmem:[#allocation36_spill] sm:$0xff]  ;;  %v16886_v58 = vld [vmem:[#allocation70_spill] sm:$0xff] }
 0x3bb   :  { %v6438_v56 = vadd.f32 %v6437_v20, %v15510_v28  ;;  %v6549_v61 = vadd.f32 %v6548_v5, %v6436_v29  ;;  %9724 = vmatpush2.bf16.msra.mxu1 %v13839_v41  ;;  %v7411_v18 = vsel %vm7059_vm15, %v6543_v54, %v7235_v59  ;;  %v13853_v28 = vld [vmem:[#allocation9 + $0x5a4] ss:$12 sps:$4 sm:$0xff]   ;;  %v13859_v20 = vld [vmem:[#allocation9 + $0x58c] ss:$12 sps:$4 sm:$0xff]  }
 0x3bc   :  { %v7245_v33 = vmul.f32 0.2, %v6547_v30  ;;  %9611 = vmatpush2.bf16.msra.mxu0 %v13842_v52  ;;  %v6439_v37 = vpop.f32.mrf.mxu0  ;;  %9725 = vmatprep.subr.bf16.mxu1 %v13847_v15  ;;  %v6552_v11 = vpop.f32.mrf.mxu1  ;;  %v15613_v22 = vpack.c.bf16 %v7411_v18, %v7400_v2  ;;  %vm7069_vm0 = vcmp.ge.f32.partialorder %v6547_v30, 0.0  ;;  %v16848_v15 = vld [vmem:[#allocation52_spill] sm:$0xff] }
 0x3bd   :  { %v6440_v19 = vadd.f32 %v6439_v37, %v15513_v35  ;;  %v6551_v0 = vadd.f32 %v6550_v38, %v6438_v56  ;;  %9612 = vmatprep.subr.bf16.mxu0 %v13850_v57  ;;  %v7246_v41 = vmul.f32 0.2, %v6549_v61  ;;  %v13851_v35 = vld [vmem:[#allocation9 + $0x5a0] ss:$12 sps:$4 sm:$0xff]   ;;  %vm7070_vm2 = vcmp.ge.f32.partialorder %v6549_v61, 0.0 }
 0x3be   :  { %9562 = vmatmul.mubr.bf16.gmra.mxu1 %v16846_v44  ;;  %v6443_v3 = vpop.f32.mrf.mxu0  ;;  %9449 = vmatmul.mubr.bf16.gmra.mxu0 %v16847_v62  ;;  %v6556_v54 = vpop.f32.mrf.mxu1  ;;  %v7421_v37 = vsel %vm7069_vm0, %v6547_v30, %v7245_v33  ;;  %v13854_v57 = vld [vmem:[#allocation9 + $0x420] ss:$12 sps:$4 sm:$0xff]  }
 0x3bf   :  { %vm7080_vm1 = vcmp.ge.f32.partialorder %v6551_v0, 0.0  ;;  %v7256_v5 = vmul.f32 0.2, %v6551_v0  ;;  %v6444_v52 = vadd.f32 %v6443_v3, %v15516_v39  ;;  %v6553_v2 = vadd.f32 %v6552_v11, %v6440_v19  ;;  %9571 = vmatprep.mubr.bf16.mxu1 %v16848_v15  ;;  %9726 = vmatpush2.bf16.msra.mxu1 %v13845_v49  ;;  %v13862_v18 = vld [vmem:[#allocation9 + $0x40c] ss:$12 sps:$4 sm:$0xff]  }
 0x3c0   :  { %9458 = vmatprep.mubr.bf16.mxu0 %v16849_v36  ;;  %9613 = vmatpush2.bf16.msra.mxu0 %v13848_v23  ;;  %v6445_v59 = vpop.f32.mrf.mxu0  ;;  %v6558_v29 = vpop.f32.mrf.mxu1  ;;  %v13857_v3 = vld [vmem:[#allocation9 + $0x588] ss:$12 sps:$4 sm:$0xff]   ;;  %v7422_v15 = vsel %vm7070_vm2, %v6549_v61, %v7246_v41  ;;  %v16852_v41 = vld [vmem:[#allocation35_spill] sm:$0xff] }
 0x3c1   :  { %v7432_v38 = vsel %vm7080_vm1, %v6551_v0, %v7256_v5  ;;  %vm7081_vm3 = vcmp.ge.f32.partialorder %v6553_v2, 0.0  ;;  %v7257_v56 = vmul.f32 0.2, %v6553_v2  ;;  %v6446_v39 = vadd.f32 %v6445_v59, %v15519_v16  ;;  %9727 = vmatprep.subr.bf16.mxu1 %v13853_v28  ;;  %9614 = vmatprep.subr.bf16.mxu0 %v13856_v21  ;;  %v13860_v28 = vld [vmem:[#allocation9 + $0x408] ss:$12 sps:$4 sm:$0xff]   ;;  %v16851_v59 = vld [vmem:[#allocation51_spill] sm:$0xff] }
 0x3c2   :  { %v15623_v49 = vpack.c.bf16 %v7432_v38, %v7421_v37  ;;  %v6557_v11 = vadd.f32 %v6556_v54, %v6444_v52  ;;  %v6447_v30 = vpop.f32.mrf.mxu0  ;;  %v6560_v33 = vpop.f32.mrf.mxu1  ;;  %v13868_v37 = vld [vmem:[#allocation9 + $0x3f4] ss:$12 sps:$4 sm:$0xff]   ;;  %v16854_v38 = vld [vmem:[#allocation38_spill] sm:$0xff]  ;;  %v16882_v36 = vld [vmem:[#allocation68_spill] sm:$0xff] }
 0x3c3   :  { %v6448_v19 = vadd.f32 %v6447_v30, %v15522_v14  ;;  %v6559_v23 = vadd.f32 %v6558_v29, %v6446_v39  ;;  %9728 = vmatpush2.bf16.msra.mxu1 %v13851_v35  ;;  %v7433_v0 = vsel %vm7081_vm3, %v6553_v2, %v7257_v56  ;;  %v13865_v14 = vld [vmem:[#allocation9 + $0x574] ss:$12 sps:$4 sm:$0xff]   ;;  %v13871_v30 = vld [vmem:[#allocation9 + $0x55c] ss:$12 sps:$4 sm:$0xff]  }
 0x3c4   :  { %16850 = vst [vmem:[#allocation90_spill] sm:$0xff] %v15623_v49  ;;  %v7267_v5 = vmul.f32 0.2, %v6557_v11  ;;  %9615 = vmatpush2.bf16.msra.mxu0 %v13854_v57  ;;  %v6449_v44 = vpop.f32.mrf.mxu0  ;;  %9729 = vmatprep.subr.bf16.mxu1 %v13859_v20  ;;  %v6562_v16 = vpop.f32.mrf.mxu1  ;;  %v15627_v21 = vpack.c.bf16 %v7433_v0, %v7422_v15  ;;  %vm7091_vm4 = vcmp.ge.f32.partialorder %v6557_v11, 0.0  ;;  %v16853_v20 = vld [vmem:[#allocation54_spill] sm:$0xff] }
 0x3c5   :  { %v6450_v54 = vadd.f32 %v6449_v44, %v15525_v32  ;;  %v6561_v52 = vadd.f32 %v6560_v33, %v6448_v19  ;;  %9616 = vmatprep.subr.bf16.mxu0 %v13862_v18  ;;  %v7268_v35 = vmul.f32 0.2, %v6559_v23  ;;  %v13863_v32 = vld [vmem:[#allocation9 + $0x570] ss:$12 sps:$4 sm:$0xff]   ;;  %vm7092_vm6 = vcmp.ge.f32.partialorder %v6559_v23, 0.0 }
 0x3c6   :  { %9572 = vmatmul.mubr.bf16.gmra.mxu1 %v16851_v59  ;;  %v6453_v61 = vpop.f32.mrf.mxu0  ;;  %9459 = vmatmul.mubr.bf16.gmra.mxu0 %v16852_v41  ;;  %v6566_v2 = vpop.f32.mrf.mxu1  ;;  %v7443_v44 = vsel %vm7091_vm4, %v6557_v11, %v7267_v5  ;;  %v13866_v18 = vld [vmem:[#allocation9 + $0x3f0] ss:$12 sps:$4 sm:$0xff]   ;;  %v13923_v62 = vld [vmem:[#allocation9 + $0x720] ss:$12 sps:$4 sm:$0xff]  }
 0x3c7   :  { %vm7102_vm5 = vcmp.ge.f32.partialorder %v6561_v52, 0.0  ;;  %v7278_v29 = vmul.f32 0.2, %v6561_v52  ;;  %v6454_v57 = vadd.f32 %v6453_v61, %v15528_v50  ;;  %v6563_v15 = vadd.f32 %v6562_v16, %v6450_v54  ;;  %9581 = vmatprep.mubr.bf16.mxu1 %v16853_v20  ;;  %9730 = vmatpush2.bf16.msra.mxu1 %v13857_v3  ;;  %v13874_v0 = vld [vmem:[#allocation9 + $0x3dc] ss:$12 sps:$4 sm:$0xff]  }
 0x3c8   :  { %9468 = vmatprep.mubr.bf16.mxu0 %v16854_v38  ;;  %9617 = vmatpush2.bf16.msra.mxu0 %v13860_v28  ;;  %v6455_v56 = vpop.f32.mrf.mxu0  ;;  %v6568_v39 = vpop.f32.mrf.mxu1  ;;  %v13869_v61 = vld [vmem:[#allocation9 + $0x558] ss:$12 sps:$4 sm:$0xff]   ;;  %v7444_v20 = vsel %vm7092_vm6, %v6559_v23, %v7268_v35  ;;  %v16858_v35 = vld [vmem:[#allocation37_spill] sm:$0xff] }
 0x3c9   :  { %v7454_v33 = vsel %vm7102_vm5, %v6561_v52, %v7278_v29  ;;  %vm7103_vm7 = vcmp.ge.f32.partialorder %v6563_v15, 0.0  ;;  %v7279_v19 = vmul.f32 0.2, %v6563_v15  ;;  %v6456_v50 = vadd.f32 %v6455_v56, %v15531_v27  ;;  %9731 = vmatprep.subr.bf16.mxu1 %v13865_v14  ;;  %9618 = vmatprep.subr.bf16.mxu0 %v13868_v37  ;;  %v13872_v14 = vld [vmem:[#allocation9 + $0x3d8] ss:$12 sps:$4 sm:$0xff]   ;;  %v16857_v56 = vld [vmem:[#allocation53_spill] sm:$0xff] }
 0x3ca   :  { %v15637_v3 = vpack.c.bf16 %v7454_v33, %v7443_v44  ;;  %v6567_v16 = vadd.f32 %v6566_v2, %v6454_v57  ;;  %v6457_v11 = vpop.f32.mrf.mxu0  ;;  %v6570_v5 = vpop.f32.mrf.mxu1  ;;  %v13880_v44 = vld [vmem:[#allocation9 + $0x3c4] ss:$12 sps:$4 sm:$0xff]  }
 0x3cb   :  { %v6458_v54 = vadd.f32 %v6457_v11, %v15534_v10  ;;  %v6569_v28 = vadd.f32 %v6568_v39, %v6456_v50  ;;  %9732 = vmatpush2.bf16.msra.mxu1 %v13863_v32  ;;  %v7455_v52 = vsel %vm7103_vm7, %v6563_v15, %v7279_v19  ;;  %v13877_v10 = vld [vmem:[#allocation9 + $0x544] ss:$12 sps:$4 sm:$0xff]   ;;  %v13878_v50 = vld [vmem:[#allocation9 + $0x3c0] ss:$12 sps:$4 sm:$0xff]  }
 0x3cc   :  { %16855 = vst [vmem:[#allocation91_spill] sm:$0xff] %v15637_v3  ;;  %v7289_v29 = vmul.f32 0.2, %v6567_v16  ;;  %9619 = vmatpush2.bf16.msra.mxu0 %v13866_v18  ;;  %v6459_v59 = vpop.f32.mrf.mxu0  ;;  %9733 = vmatprep.subr.bf16.mxu1 %v13871_v30  ;;  %v6572_v27 = vpop.f32.mrf.mxu1  ;;  %v15641_v37 = vpack.c.bf16 %v7455_v52, %v7444_v20  ;;  %vm7113_vm8 = vcmp.ge.f32.partialorder %v6567_v16, 0.0  ;;  %v16859_v30 = vld [vmem:[#allocation56_spill] sm:$0xff] }
 0x3cd   :  { %v6460_v2 = vadd.f32 %v6459_v59, %v15537_v48  ;;  %v6571_v57 = vadd.f32 %v6570_v5, %v6458_v54  ;;  %9620 = vmatprep.subr.bf16.mxu0 %v13874_v0  ;;  %v7290_v32 = vmul.f32 0.2, %v6569_v28  ;;  %v13875_v48 = vld [vmem:[#allocation9 + $0x540] ss:$12 sps:$4 sm:$0xff]   ;;  %vm7114_vm10 = vcmp.ge.f32.partialorder %v6569_v28, 0.0 }
 0x3ce   :  { %16856 = vst [vmem:[#allocation92_spill] sm:$0xff] %v15641_v37  ;;  %9582 = vmatmul.mubr.bf16.gmra.mxu1 %v16857_v56  ;;  %v6463_v23 = vpop.f32.mrf.mxu0  ;;  %9469 = vmatmul.mubr.bf16.gmra.mxu0 %v16858_v35  ;;  %v6576_v15 = vpop.f32.mrf.mxu1  ;;  %v7465_v59 = vsel %vm7113_vm8, %v6567_v16, %v7289_v29  ;;  %v13904_v0 = vld [vmem:[#allocation9 + $0x82c] ss:$12 sps:$4 sm:$0xff]   ;;  %v13914_v38 = vld [vmem:[#allocation9 + $0x750] ss:$12 sps:$4 sm:$0xff]  }
 0x3cf   :  { %vm7124_vm9 = vcmp.ge.f32.partialorder %v6571_v57, 0.0  ;;  %v7300_v39 = vmul.f32 0.2, %v6571_v57  ;;  %v6464_v18 = vadd.f32 %v6463_v23, %v15541_v63  ;;  %v6573_v20 = vadd.f32 %v6572_v27, %v6460_v2  ;;  %9734 = vmatpush2.bf16.msra.mxu1 %v13869_v61  ;;  %9737 = vmatprep.mubr.bf16.mxu1 %v15374_v8  ;;  %v13883_v54 = vld [vmem:[#allocation9 + $0x6ac] ss:$12 sps:$4 sm:$0xff]  }
 0x3d0   :  { %9621 = vmatpush2.bf16.msra.mxu0 %v13872_v14  ;;  %9624 = vmatprep.mubr.bf16.mxu0 %v16859_v30  ;;  %v6465_v33 = vpop.f32.mrf.mxu0  ;;  %v6578_v19 = vpop.f32.mrf.mxu1  ;;  %v7466_v2 = vsel %vm7114_vm10, %v6569_v28, %v7290_v32  ;;  %v14381_v28 = vld [vmem:[#allocation8 + $0x8] sm:$0x7]  ;;  %v13899_v56 = vld [vmem:[#allocation9 + $0x618] ss:$12 sps:$4 sm:$0xff]   ;;  %v13908_v30 = vld [vmem:[#allocation9 + $0x768] ss:$12 sps:$4 sm:$0xff]  }
 0x3d1   :  { %v7476_v11 = vsel %vm7124_vm9, %v6571_v57, %v7300_v39  ;;  %vm7125_vm11 = vcmp.ge.f32.partialorder %v6573_v20, 0.0  ;;  %v7301_v5 = vmul.f32 0.2, %v6573_v20  ;;  %v6466_v63 = vadd.f32 %v6465_v33, %v15544_v25  ;;  %9735 = vmatprep.subr.bf16.mxu1 %v13877_v10  ;;  %9622 = vmatprep.subr.bf16.mxu0 %v13880_v44  ;;  %v13881_v25 = vld [vmem:[#allocation9 + $0x6a8] ss:$12 sps:$4 sm:$0xff]   ;;  %v16862_v32 = vld [vmem:[#allocation34_spill] sm:$0xff] }
 0x3d2   :  { %v15651_v61 = vpack.c.bf16 %v7476_v11, %v7465_v59  ;;  %v6577_v52 = vadd.f32 %v6576_v15, %v6464_v18  ;;  %v6467_v16 = vpop.f32.mrf.mxu0  ;;  %v6580_v29 = vpop.f32.mrf.mxu1  ;;  %v13886_v18 = vld [vmem:[#allocation9 + $0x694] ss:$12 sps:$4 sm:$0xff]   ;;  %v13925_v41 = vld [vmem:[#allocation9 + $0x724] ss:$12 sps:$4 sm:$0xff]  }
 0x3d3   :  { %v6468_v27 = vadd.f32 %v6467_v16, %v15547_v42  ;;  %v6579_v14 = vadd.f32 %v6578_v19, %v6466_v63  ;;  %9736 = vmatpush2.bf16.msra.mxu1 %v13875_v48  ;;  %v7477_v23 = vsel %vm7125_vm11, %v6573_v20, %v7301_v5  ;;  %v13902_v42 = vld [vmem:[#allocation9 + $0x828] ss:$12 sps:$4 sm:$0xff]   ;;  %v15660_v20 = vrot.slane %v14381_v28, %v16862_v32  ;;  %v16863_v11 = vld [vmem:[#allocation55_spill] sm:$0xff]  ;;  %v16864_v5 = vld [vmem:[#allocation58_spill] sm:$0xff] }
 0x3d4   :  { %16860 = vst [vmem:[#allocation93_spill] sm:$0xff] %v15651_v61  ;;  %v7311_v57 = vmul.f32 0.2, %v6577_v52  ;;  %9623 = vmatpush2.bf16.msra.mxu0 %v13878_v50  ;;  %v6469_v39 = vpop.f32.mrf.mxu0  ;;  %v6582_v8 = vpop.f32.mrf.mxu1  ;;  %9931 = vmatprep.subr.bf16.mxu1 %v13904_v0  ;;  %v15655_v10 = vpack.c.bf16 %v7477_v23, %v7466_v2  ;;  %vm7135_vm12 = vcmp.ge.f32.partialorder %v6577_v52, 0.0  ;;  %v13913_v33 = vld [vmem:[#allocation9 + $0x814] ss:$12 sps:$4 sm:$0xff]  }
 0x3d5   :  { %v6470_v44 = vadd.f32 %v6469_v39, %v15551_v45  ;;  %v6581_v15 = vadd.f32 %v6580_v29, %v6468_v27  ;;  %9818 = vmatprep.subr.bf16.mxu0 %v13883_v54  ;;  %v7312_v19 = vmul.f32 0.2, %v6579_v14  ;;  %vm7136_vm14 = vcmp.ge.f32.partialorder %v6579_v14, 0.0  ;;  %v13884_v16 = vld [vmem:[#allocation9 + $0x690] ss:$12 sps:$4 sm:$0xff]  }
 0x3d6   :  { %16861 = vst [vmem:[#allocation94_spill] sm:$0xff] %v15655_v10  ;;  %9738 = vmatmul.mubr.bf16.vlgmr.msra.gmra.mxu1 %v15366_v17  ;;  %v12103_v48 = vpop.f32.mrf.mxu0  ;;  %v12167_v59 = vpop.f32.mrf.mxu1  ;;  %v7487_v45 = vsel %vm7135_vm12, %v6577_v52, %v7311_v57  ;;  %v13889_v29 = vld [vmem:[#allocation9 + $0x67c] ss:$12 sps:$4 sm:$0xff]  }
 0x3d7   :  { %vm7146_vm13 = vcmp.ge.f32.partialorder %v6581_v15, 0.0  ;;  %v7322_v50 = vmul.f32 0.2, %v6581_v15  ;;  %v6583_v0 = vadd.f32 %v6582_v8, %v6470_v44  ;;  %9625 = vmatmul.mubr.bf16.vlgmr.msra.gmra.mxu0 %v16863_v11  ;;  %9747 = vmatprep.mubr.bf16.mxu1 %v15383_v46  ;;  %v13911_v8 = vld [vmem:[#allocation9 + $0x810] ss:$12 sps:$4 sm:$0xff]   ;;  %v7488_v32 = vsel %vm7136_vm14, %v6579_v14, %v7312_v19 }
 0x3d8   :  { %9634 = vmatprep.mubr.bf16.mxu0 %v16864_v5  ;;  %9819 = vmatpush1.bf16.msra.mxu0 %v13881_v25  ;;  %v12104_v63 = vpop.f32.mrf.mxu0  ;;  %v12168_v54 = vpop.f32.mrf.mxu1  ;;  %v13922_v25 = vld [vmem:[#allocation9 + $0x7fc] ss:$12 sps:$4 sm:$0xff]   ;;  %v13931_v14 = vld [vmem:[#allocation9 + $0x7e4] ss:$12 sps:$4 sm:$0xff]  }
 0x3d9   :  { %v7498_v27 = vsel %vm7146_vm13, %v6581_v15, %v7322_v50  ;;  %vm7147_vm15 = vcmp.ge.f32.partialorder %v6583_v0, 0.0  ;;  %v7323_v2 = vmul.f32 0.2, %v6583_v0  ;;  %v12105_v23 = vadd.f32 %v12104_v63, %v12103_v48  ;;  %9820 = vmatprep.subr.bf16.mxu0 %v13886_v18  ;;  %9932 = vmatpush1.bf16.msra.mxu1 %v13902_v42  ;;  %v13887_v42 = vld [vmem:[#allocation9 + $0x678] ss:$12 sps:$4 sm:$0xff]   ;;  %v16867_v19 = vld [vmem:[#allocation57_spill] sm:$0xff] }
 0x3da   :  { %v15666_v39 = vpack.c.bf16 %v7498_v27, %v7487_v45  ;;  %v15668_v44 = vpop.f32.mrf.mxu0  ;;  %v12169_v52 = vadd.f32 %v12168_v54, %v12167_v59  ;;  %v15670_v57 = vpop.f32.mrf.mxu1  ;;  %9933 = vmatprep.subr.bf16.mxu1 %v13913_v33  ;;  %v13892_v59 = vld [vmem:[#allocation9 + $0x664] ss:$12 sps:$4 sm:$0xff]   ;;  %v13890_v27 = vld [vmem:[#allocation9 + $0x660] ss:$12 sps:$4 sm:$0xff]  }
 0x3db   :  { %v6620_v28 = vadd.f32 %v12105_v23, %v15660_v20  ;;  %v7499_v15 = vsel %vm7147_vm15, %v6583_v0, %v7323_v2  ;;  %v13920_v33 = vld [vmem:[#allocation9 + $0x7f8] ss:$12 sps:$4 sm:$0xff]   ;;  %v16868_v0 = vld [vmem:[#allocation60_spill] sm:$0xff] }
 0x3dc   :  { %16865 = vst [vmem:[#allocation95_spill] sm:$0xff] %v15666_v39  ;;  %9821 = vmatpush1.bf16.msra.mxu0 %v13884_v16  ;;  %v15674_v50 = vpop.f32.mrf.mxu0  ;;  %v15676_v18 = vpop.f32.mrf.mxu1  ;;  %v15678_v48 = vpack.c.bf16 %v7499_v15, %v7488_v32  ;;  %v13895_v23 = vld [vmem:[#allocation9 + $0x64c] ss:$12 sps:$4 sm:$0xff]  }
 0x3dd   :  { %v15680_v45 = vadd.f32 %v12169_v52, %v6620_v28  ;;  %9822 = vmatprep.subr.bf16.mxu0 %v13889_v29  ;;  %9934 = vmatpush1.bf16.msra.mxu1 %v13911_v8  ;;  %v13929_v8 = vld [vmem:[#allocation9 + $0x7e0] ss:$12 sps:$4 sm:$0xff]  }
 0x3de   :  { %16866 = vst [vmem:[#allocation96_spill] sm:$0xff] %v15678_v48  ;;  %9748 = vmatmul.mubr.bf16.gmra.mxu1 %v15379_v13  ;;  %v12109_v63 = vpop.f32.mrf.mxu0  ;;  %v12173_v54 = vpop.f32.mrf.mxu1  ;;  %9935 = vmatprep.subr.bf16.mxu1 %v13922_v25  ;;  %v13940_v28 = vld [vmem:[#allocation9 + $0x7cc] ss:$12 sps:$4 sm:$0xff]   ;;  %v13893_v13 = vld [vmem:[#allocation9 + $0x648] ss:$12 sps:$4 sm:$0xff]  }
 0x3df   :  { %9635 = vmatmul.mubr.bf16.gmra.mxu0 %v16867_v19  ;;  %9757 = vmatprep.mubr.bf16.mxu1 %v15393_v26  ;;  %v13941_v39 = vld [vmem:[#allocation9 + $0x6c0] ss:$12 sps:$4 sm:$0xff]  }
 0x3e0   :  { %9644 = vmatprep.mubr.bf16.mxu0 %v16868_v0  ;;  %9823 = vmatpush1.bf16.msra.mxu0 %v13887_v42  ;;  %v12110_v32 = vpop.f32.mrf.mxu0  ;;  %v12174_v16 = vpop.f32.mrf.mxu1  ;;  %v16872_v0 = vld [vmem:[#allocation61_spill] sm:$0xff] }
 0x3e1   :  { %v12111_v29 = vadd.f32 %v12110_v32, %v12109_v63  ;;  %v12175_v2 = vadd.f32 %v12174_v16, %v12173_v54  ;;  %9824 = vmatprep.subr.bf16.mxu0 %v13892_v59  ;;  %9936 = vmatpush1.bf16.msra.mxu1 %v13920_v33  ;;  %v13898_v59 = vld [vmem:[#allocation9 + $0x634] ss:$12 sps:$4 sm:$0xff]  }
 0x3e2   :  { %v15686_v52 = vpop.f32.mrf.mxu0  ;;  %v15688_v25 = vpop.f32.mrf.mxu1  ;;  %9937 = vmatprep.subr.bf16.mxu1 %v13931_v14  ;;  %v13938_v33 = vld [vmem:[#allocation9 + $0x7c8] ss:$12 sps:$4 sm:$0xff]   ;;  %v16869_v16 = vld [vmem:[#allocation59_spill] sm:$0xff] }
 0x3e3   :  { %v6628_v15 = vadd.f32 %v12111_v29, %v15660_v20  ;;  %v13948_v14 = vld [vmem:[#allocation9 + $0x7b4] ss:$12 sps:$4 sm:$0xff]  }
 0x3e4   :  { %9825 = vmatpush1.bf16.msra.mxu0 %v13890_v27  ;;  %v15691_v26 = vpop.f32.mrf.mxu0  ;;  %v15693_v42 = vpop.f32.mrf.mxu1  ;;  %v16870_v27 = vld [vmem:[#allocation62_spill] sm:$0xff] }
 0x3e5   :  { %v15695_v63 = vadd.f32 %v12175_v2, %v6628_v15  ;;  %9826 = vmatprep.subr.bf16.mxu0 %v13895_v23  ;;  %9938 = vmatpush1.bf16.msra.mxu1 %v13929_v8  ;;  %v13896_v15 = vld [vmem:[#allocation9 + $0x630] ss:$12 sps:$4 sm:$0xff]  }
 0x3e6   :  { %9758 = vmatmul.mubr.bf16.gmra.mxu1 %v15389_v43  ;;  %v12115_v54 = vpop.f32.mrf.mxu0  ;;  %v12179_v32 = vpop.f32.mrf.mxu1  ;;  %9939 = vmatprep.subr.bf16.mxu1 %v13940_v28  ;;  %v13901_v8 = vld [vmem:[#allocation9 + $0x61c] ss:$12 sps:$4 sm:$0xff]  }
 0x3e7   :  { %9645 = vmatmul.mubr.bf16.gmra.mxu0 %v16869_v16  ;;  %9767 = vmatprep.mubr.bf16.mxu1 %v15402_v60  ;;  %v13946_v43 = vld [vmem:[#allocation9 + $0x7b0] ss:$12 sps:$4 sm:$0xff]  }
 0x3e8   :  { %9654 = vmatprep.mubr.bf16.mxu0 %v16870_v27  ;;  %9827 = vmatpush1.bf16.msra.mxu0 %v13893_v13  ;;  %v12116_v29 = vpop.f32.mrf.mxu0  ;;  %v12180_v2 = vpop.f32.mrf.mxu1  ;;  %v13953_v16 = vld [vmem:[#allocation9 + $0x79c] ss:$12 sps:$4 sm:$0xff]  }
 0x3e9   :  { %v12117_v23 = vadd.f32 %v12116_v29, %v12115_v54  ;;  %v12181_v46 = vadd.f32 %v12180_v2, %v12179_v32  ;;  %9828 = vmatprep.subr.bf16.mxu0 %v13898_v59  ;;  %9940 = vmatpush1.bf16.msra.mxu1 %v13938_v33  ;;  %v13907_v59 = vld [vmem:[#allocation9 + $0x604] ss:$12 sps:$4 sm:$0xff]  }
 0x3ea   :  { %v15701_v17 = vpop.f32.mrf.mxu0  ;;  %v15703_v28 = vpop.f32.mrf.mxu1  ;;  %9941 = vmatprep.subr.bf16.mxu1 %v13948_v14  ;;  %v13951_v33 = vld [vmem:[#allocation9 + $0x798] ss:$12 sps:$4 sm:$0xff]   ;;  %v16871_v32 = vld [vmem:[#allocation77_spill] sm:$0xff] }
 0x3eb   :  { %v6636_v60 = vadd.f32 %v12117_v23, %v15660_v20  ;;  %v13956_v14 = vld [vmem:[#allocation9 + $0x784] ss:$12 sps:$4 sm:$0xff]   ;;  %v16874_v23 = vld [vmem:[#allocation64_spill] sm:$0xff] }
 0x3ec   :  { %9829 = vmatpush1.bf16.msra.mxu0 %v13896_v15  ;;  %v15706_v27 = vpop.f32.mrf.mxu0  ;;  %v15708_v13 = vpop.f32.mrf.mxu1  ;;  %v16873_v15 = vld [vmem:[#allocation80_spill] sm:$0xff] }
 0x3ed   :  { %v15710_v54 = vadd.f32 %v12181_v46, %v6636_v60  ;;  %9830 = vmatprep.subr.bf16.mxu0 %v13901_v8  ;;  %9942 = vmatpush1.bf16.msra.mxu1 %v13946_v43  ;;  %v13905_v60 = vld [vmem:[#allocation9 + $0x600] ss:$12 sps:$4 sm:$0xff]  }
 0x3ee   :  { %9768 = vmatmul.mubr.bf16.gmra.mxu1 %v16871_v32  ;;  %v12121_v29 = vpop.f32.mrf.mxu0  ;;  %v12185_v2 = vpop.f32.mrf.mxu1  ;;  %9943 = vmatprep.subr.bf16.mxu1 %v13953_v16  ;;  %v13910_v43 = vld [vmem:[#allocation9 + $0x76c] ss:$12 sps:$4 sm:$0xff]  }
 0x3ef   :  { %9655 = vmatmul.mubr.bf16.gmra.mxu0 %v16872_v0  ;;  %9777 = vmatprep.mubr.bf16.mxu1 %v16873_v15  ;;  %v13954_v32 = vld [vmem:[#allocation9 + $0x780] ss:$12 sps:$4 sm:$0xff]   ;;  %v13961_v0 = vld [vmem:[#allocation9 + $0x2f0] ss:$12 sps:$4 sm:$0xff]  }
 0x3f0   :  { %9664 = vmatprep.mubr.bf16.mxu0 %v16874_v23  ;;  %9831 = vmatpush1.bf16.msra.mxu0 %v13899_v56  ;;  %v12122_v19 = vpop.f32.mrf.mxu0  ;;  %v12186_v46 = vpop.f32.mrf.mxu1 }
 0x3f1   :  { %v12123_v8 = vadd.f32 %v12122_v19, %v12121_v29  ;;  %v12187_v5 = vadd.f32 %v12186_v46, %v12185_v2  ;;  %9832 = vmatprep.subr.bf16.mxu0 %v13907_v59  ;;  %9944 = vmatpush1.bf16.msra.mxu1 %v13951_v33  ;;  %v13916_v59 = vld [vmem:[#allocation9 + $0x754] ss:$12 sps:$4 sm:$0xff]   ;;  %v16877_v46 = vld [vmem:[#allocation82_spill] sm:$0xff] }
 0x3f2   :  { %v15716_v11 = vpop.f32.mrf.mxu0  ;;  %v15718_v16 = vpop.f32.mrf.mxu1  ;;  %9945 = vmatprep.subr.bf16.mxu1 %v13956_v14  ;;  %v16875_v33 = vld [vmem:[#allocation79_spill] sm:$0xff] }
 0x3f3   :  { %v6644_v15 = vadd.f32 %v12123_v8, %v15660_v20  ;;  %v16876_v14 = vld [vmem:[#allocation63_spill] sm:$0xff] }
 0x3f4   :  { %9833 = vmatpush1.bf16.msra.mxu0 %v13905_v60  ;;  %v15721_v23 = vpop.f32.mrf.mxu0  ;;  %v15723_v56 = vpop.f32.mrf.mxu1  ;;  %v16878_v60 = vld [vmem:[#allocation66_spill] sm:$0xff] }
 0x3f5   :  { %v15725_v19 = vadd.f32 %v12187_v5, %v6644_v15  ;;  %9834 = vmatprep.subr.bf16.mxu0 %v13910_v43  ;;  %9946 = vmatpush1.bf16.msra.mxu1 %v13954_v32  ;;  %v13919_v43 = vld [vmem:[#allocation9 + $0x73c] ss:$12 sps:$4 sm:$0xff]  }
 0x3f6   :  { %9778 = vmatmul.mubr.bf16.gmra.mxu1 %v16875_v33  ;;  %v12127_v29 = vpop.f32.mrf.mxu0  ;;  %v12191_v2 = vpop.f32.mrf.mxu1  ;;  %12359 = vmatprep.subr.bf16.mxu1 %v13961_v0 }
 0x3f7   :  { %9665 = vmatmul.mubr.bf16.gmra.mxu0 %v16876_v14  ;;  %9787 = vmatprep.mubr.bf16.mxu1 %v16877_v46 }
 0x3f8   :  { %9674 = vmatprep.mubr.bf16.mxu0 %v16878_v60  ;;  %9835 = vmatpush2.bf16.msra.mxu0 %v13908_v30  ;;  %v12128_v8 = vpop.f32.mrf.mxu0  ;;  %v12192_v35 = vpop.f32.mrf.mxu1  ;;  %v13917_v60 = vld [vmem:[#allocation9 + $0x738] ss:$12 sps:$4 sm:$0xff]  }
 0x3f9   :  { %v12129_v5 = vadd.f32 %v12128_v8, %v12127_v29  ;;  %v12193_v15 = vadd.f32 %v12192_v35, %v12191_v2  ;;  %9836 = vmatprep.subr.bf16.mxu0 %v13916_v59  ;;  %v16879_v29 = vld [vmem:[#allocation81_spill] sm:$0xff]  ;;  %v16881_v8 = vld [vmem:[#allocation84_spill] sm:$0xff] }
 0x3fa   :  { %v15731_v32 = vpop.f32.mrf.mxu0  ;;  %v15733_v33 = vpop.f32.mrf.mxu1  ;;  %v16880_v2 = vld [vmem:[#allocation65_spill] sm:$0xff] }
 0x3fb   :  { %v6652_v0 = vadd.f32 %v12129_v5, %v15660_v20 }
 0x3fc   :  { %9837 = vmatpush2.bf16.msra.mxu0 %v13914_v38  ;;  %v15736_v14 = vpop.f32.mrf.mxu0  ;;  %v15738_v46 = vpop.f32.mrf.mxu1 }
 0x3fd   :  { %v15740_v30 = vadd.f32 %v12193_v15, %v6652_v0  ;;  %9838 = vmatprep.subr.bf16.mxu0 %v13919_v43  ;;  %v13928_v15 = vld [vmem:[#allocation9 + $0x70c] ss:$12 sps:$4 sm:$0xff]  }
 0x3fe   :  { %9788 = vmatmul.mubr.bf16.gmra.mxu1 %v16879_v29  ;;  %v12133_v35 = vpop.f32.mrf.mxu0  ;;  %v12197_v59 = vpop.f32.mrf.mxu1 }
 0x3ff   :  { %9675 = vmatmul.mubr.bf16.gmra.mxu0 %v16880_v2  ;;  %9797 = vmatprep.mubr.bf16.mxu1 %v16881_v8 }
 0x400   :  { %9684 = vmatprep.mubr.bf16.mxu0 %v16882_v36  ;;  %9839 = vmatpush2.bf16.msra.mxu0 %v13917_v60  ;;  %v12134_v38 = vpop.f32.mrf.mxu0  ;;  %v12198_v5 = vpop.f32.mrf.mxu1  ;;  %v13926_v36 = vld [vmem:[#allocation9 + $0x708] ss:$12 sps:$4 sm:$0xff]  }
 0x401   :  { %v12135_v47 = vadd.f32 %v12134_v38, %v12133_v35  ;;  %v12199_v7 = vadd.f32 %v12198_v5, %v12197_v59  ;;  %9840 = vmatprep.subr.bf16.mxu0 %v13925_v41  ;;  %v16883_v35 = vld [vmem:[#allocation83_spill] sm:$0xff]  ;;  %v16885_v5 = vld [vmem:[#allocation86_spill] sm:$0xff] }
 0x402   :  { %v15746_v43 = vpop.f32.mrf.mxu0  ;;  %v15748_v0 = vpop.f32.mrf.mxu1  ;;  %v16884_v38 = vld [vmem:[#allocation67_spill] sm:$0xff] }
 0x403   :  { %v6660_v29 = vadd.f32 %v12135_v47, %v15660_v20 }
 0x404   :  { %9841 = vmatpush2.bf16.msra.mxu0 %v13923_v62  ;;  %v15751_v2 = vpop.f32.mrf.mxu0  ;;  %v15753_v8 = vpop.f32.mrf.mxu1 }
 0x405   :  { %v15755_v60 = vadd.f32 %v12199_v7, %v6660_v29  ;;  %9842 = vmatprep.subr.bf16.mxu0 %v13928_v15  ;;  %v13937_v7 = vld [vmem:[#allocation9 + $0x6dc] ss:$12 sps:$4 sm:$0xff]  }
 0x406   :  { %9798 = vmatmul.mubr.bf16.gmra.mxu1 %v16883_v35  ;;  %v12139_v41 = vpop.f32.mrf.mxu0  ;;  %v12203_v59 = vpop.f32.mrf.mxu1 }
 0x407   :  { %9685 = vmatmul.mubr.bf16.gmra.mxu0 %v16884_v38  ;;  %9807 = vmatprep.mubr.bf16.mxu1 %v16885_v5 }
 0x408   :  { %9694 = vmatprep.mubr.bf16.mxu0 %v16886_v58  ;;  %9843 = vmatpush2.bf16.msra.mxu0 %v13926_v36  ;;  %v12140_v47 = vpop.f32.mrf.mxu0  ;;  %v12204_v62 = vpop.f32.mrf.mxu1  ;;  %v13935_v58 = vld [vmem:[#allocation9 + $0x6d8] ss:$12 sps:$4 sm:$0xff]  }
 0x409   :  { %v12141_v6 = vadd.f32 %v12140_v47, %v12139_v41  ;;  %v12205_v9 = vadd.f32 %v12204_v62, %v12203_v59  ;;  %9844 = vmatprep.subr.bf16.mxu0 %v13934_v4  ;;  %v16890_v41 = vld [vmem:[#allocation85_spill] sm:$0xff]  ;;  %v16892_v62 = vmov 0  }
 0x40a   :  { %v15761_v29 = vpop.f32.mrf.mxu0  ;;  %v15763_v15 = vpop.f32.mrf.mxu1  ;;  %v16891_v47 = vld [vmem:[#allocation69_spill] sm:$0xff] }
 0x40b   :  { %16887 = vst [vmem:[#allocation97_spill] sm:$0xff] %v15763_v15  ;;  %v6668_v35 = vadd.f32 %v12141_v6, %v15660_v20 }
 0x40c   :  { %9845 = vmatpush2.bf16.msra.mxu0 %v13932_v55  ;;  %v15766_v38 = vpop.f32.mrf.mxu0  ;;  %v15768_v5 = vpop.f32.mrf.mxu1 }
 0x40d   :  { %16888 = vst [vmem:[#allocation98_spill] sm:$0xff] %v15768_v5  ;;  %v15770_v36 = vadd.f32 %v12205_v9, %v6668_v35  ;;  %9846 = vmatprep.subr.bf16.mxu0 %v13937_v7  ;;  %v13944_v9 = vld [vmem:[#allocation9 + $0x170] ss:$12 sps:$4 sm:$0xff]  }
 0x40e   :  { %9808 = vmatmul.mubr.bf16.gmra.mxu1 %v16890_v41  ;;  %v12145_v4 = vpop.f32.mrf.mxu0  ;;  %v12209_v59 = vpop.f32.mrf.mxu1 }
 0x40f   :  { %16889 = vst [vmem:[#allocation99_spill] sm:$0xff] %v15770_v36  ;;  %9695 = vmatmul.mubr.bf16.gmra.mxu0 %v16891_v47  ;;  %9963 = vmatprep.mubr.bf16.mxu1 %v16892_v62 }
 0x410   :  { %9847 = vmatpush2.bf16.msra.mxu0 %v13935_v58  ;;  %9850 = vmatprep.mubr.bf16.mxu0 %v15572_v12  ;;  %v12146_v6 = vpop.f32.mrf.mxu0  ;;  %v12210_v55 = vpop.f32.mrf.mxu1  ;;  %v13945_v58 = vld [vmem:[#allocation9 + $0xb0] ss:$12 sps:$4 sm:$0xff]   ;;  %v12108_v12 = vadd.f32 %v15674_v50, %v15668_v44  ;;  %v13957_v50 = vld [vmem:[#allocation9 + $0x140] ss:$12 sps:$4 sm:$0xff]  }
 0x411   :  { %v12147_v48 = vadd.f32 %v12146_v6, %v12145_v4  ;;  %v12211_v5 = vadd.f32 %v12210_v55, %v12209_v59  ;;  %9848 = vmatprep.subr.bf16.mxu0 %v13943_v24  ;;  %v13949_v24 = vld [vmem:[#allocation9 + $0x158] ss:$12 sps:$4 sm:$0xff]  }
 0x412   :  { %v15776_v35 = vpop.f32.mrf.mxu0  ;;  %v15778_v7 = vpop.f32.mrf.mxu1  ;;  %v13950_v6 = vld [vmem:[#allocation9 + $0x98] ss:$12 sps:$4 sm:$0xff]   ;;  %v6623_v55 = vadd.f32 %v12108_v12, %v15660_v20  ;;  %v13959_v12 = vld [vmem:[#allocation9 + $0x128] ss:$12 sps:$4 sm:$0xff]  }
 0x413   :  { %16893 = vst [vmem:[#allocation100_spill] sm:$0xff] %v15776_v35  ;;  %16894 = vst [vmem:[#allocation101_spill] sm:$0xff] %v15778_v7  ;;  %v6676_v41 = vadd.f32 %v12147_v48, %v15660_v20 }
 0x414   :  { %9849 = vmatpush2.bf16.msra.mxu0 %v13941_v39  ;;  %v15781_v47 = vpop.f32.mrf.mxu0  ;;  %v15783_v36 = vpop.f32.mrf.mxu1 }
 0x415   :  { %16895 = vst [vmem:[#allocation102_spill] sm:$0xff] %v15781_v47  ;;  %16896 = vst [vmem:[#allocation103_spill] sm:$0xff] %v15783_v36  ;;  %v15787_v15 = vadd.f32 %v12211_v5, %v6676_v41  ;;  %12295 = vmatprep.subr.bf16.mxu0 %v13944_v9  ;;  %v12172_v36 = vadd.f32 %v15676_v18, %v15670_v57 }
 0x416   :  { %v12231_v4 = vpop.f32.mrf.mxu0  ;;  %v12649_v59 = vpop.f32.mrf.mxu1 }
 0x417   :  { %16897 = vst [vmem:[#allocation104_spill] sm:$0xff] %v15787_v15  ;;  %9851 = vmatmul.mubr.bf16.vlgmr.msra.gmra.mxu0 %v15566_v53  ;;  %v12114_v53 = vadd.f32 %v15691_v26, %v15686_v52  ;;  %v6720_v15 = vadd.f32 %v12172_v36, %v6623_v55  ;;  %v13960_v52 = vld [vmem:[#allocation9 + $0x68] ss:$12 sps:$4 sm:$0xff]  }
 0x418   :  { %9860 = vmatprep.mubr.bf16.mxu0 %v15585_v34  ;;  %12296 = vmatpush3.bf16.msra.mxu0 %v13945_v58  ;;  %v12232_v39 = vpop.f32.mrf.mxu0  ;;  %v6910_v48 = vpop.f32.mrf.mxu1  ;;  %v13958_v58 = vld [vmem:[#allocation9 + $0x80] ss:$12 sps:$4 sm:$0xff]  }
 0x419   :  { %v12233_v44 = vadd.f32 %v12232_v39, %v12231_v4  ;;  %12297 = vmatprep.subr.bf16.mxu0 %v13949_v24  ;;  %v6631_v24 = vadd.f32 %v12114_v53, %v15660_v20  ;;  %v13963_v39 = vld [vmem:[#allocation9 + $0x110] ss:$12 sps:$4 sm:$0xff]  }
 0x41a   :  { %v12234_v5 = vpop.f32.mrf.mxu0  ;;  %v12650_v41 = vpop.f32.mrf.mxu1 }
 0x41b   :  { %v6814_v9 = vadd.f32 %v12233_v44, %v15680_v45  ;;  %v12178_v45 = vadd.f32 %v15693_v42, %v15688_v25  ;;  %v12120_v25 = vadd.f32 %v15706_v27, %v15701_v17  ;;  %v12184_v27 = vadd.f32 %v15708_v13, %v15703_v28  ;;  %v13969_v28 = vld [vmem:[#allocation9 + $0x2c0] ss:$12 sps:$4 sm:$0xff]  }
 0x41c   :  { %v12235_v34 = vpop.f32.mrf.mxu0  ;;  %12298 = vmatpush3.bf16.msra.mxu0 %v13950_v6  ;;  %v6913_v57 = vpop.f32.mrf.mxu1 }
 0x41d   :  { %v12236_v7 = vadd.f32 %v12235_v34, %v12234_v5  ;;  %v6911_v47 = vadd.f32 %v6910_v48, %v6814_v9  ;;  %12299 = vmatprep.subr.bf16.mxu0 %v13957_v50  ;;  %v13962_v5 = vld [vmem:[#allocation9 + $0x230] ss:$12 sps:$4 sm:$0xff]   ;;  %v6639_v17 = vadd.f32 %v12120_v25, %v15660_v20 }
 0x41e   :  { %v12237_v35 = vpop.f32.mrf.mxu0  ;;  %v15802_v6 = vpop.f32.mrf.mxu1 }
 0x41f   :  { %9861 = vmatmul.mubr.bf16.gmra.mxu0 %v15581_v40  ;;  %v6817_v18 = vadd.f32 %v12236_v7, %v6720_v15  ;;  %v7159_v36 = vmul.f32 0.2, %v6911_v47  ;;  %vm6983_vm0 = vcmp.ge.f32.partialorder %v6911_v47, 0.0  ;;  %v6728_v7 = vadd.f32 %v12178_v45, %v6631_v24  ;;  %v13967_v24 = vld [vmem:[#allocation9 + $0xf8] ss:$12 sps:$4 sm:$0xff]  }
 0x420   :  { %9870 = vmatprep.mubr.bf16.mxu0 %v15599_v51  ;;  %v12238_v26 = vpop.f32.mrf.mxu0  ;;  %12300 = vmatpush3.bf16.msra.mxu0 %v13958_v58 }
 0x421   :  { %v12239_v34 = vadd.f32 %v12238_v26, %v12237_v35  ;;  %v6914_v4 = vadd.f32 %v6913_v57, %v6817_v18  ;;  %12301 = vmatprep.subr.bf16.mxu0 %v13959_v12  ;;  %v7335_v55 = vsel %vm6983_vm0, %v6911_v47, %v7159_v36  ;;  %v6926_v12 = vpop.f32.mrf.mxu1  ;;  %v13964_v57 = vld [vmem:[#allocation9 + $0x50] ss:$12 sps:$4 sm:$0xff]  }
 0x422   :  { %v12240_v48 = vpop.f32.mrf.mxu0 }
 0x423   :  { %v6822_v15 = vadd.f32 %v12239_v34, %v15695_v63  ;;  %vm6994_vm1 = vcmp.ge.f32.partialorder %v6914_v4, 0.0  ;;  %v7170_v53 = vmul.f32 0.2, %v6914_v4  ;;  %v13965_v63 = vld [vmem:[#allocation9 + $0x2d8] ss:$12 sps:$4 sm:$0xff]   ;;  %v15816_v34 = vpop.f32.mrf.mxu1 }
 0x424   :  { %v12241_v42 = vpop.f32.mrf.mxu0  ;;  %12302 = vmatpush3.bf16.msra.mxu0 %v13960_v52  ;;  %v13966_v52 = vld [vmem:[#allocation9 + $0x218] ss:$12 sps:$4 sm:$0xff]  }
 0x425   :  { %v6919_v44 = vadd.f32 %v12649_v59, %v6822_v15  ;;  %v7346_v35 = vsel %vm6994_vm1, %v6914_v4, %v7170_v53  ;;  %v12242_v50 = vadd.f32 %v12241_v42, %v12240_v48  ;;  %12303 = vmatprep.subr.bf16.mxu0 %v13963_v39  ;;  %v13968_v4 = vld [vmem:[#allocation9 + $0x38] ss:$12 sps:$4 sm:$0xff]   ;;  %v13971_v48 = vld [vmem:[#allocation9 + $0xe0] ss:$12 sps:$4 sm:$0xff]   ;;  %v12126_v15 = vadd.f32 %v15721_v23, %v15716_v11  ;;  %v13975_v11 = vld [vmem:[#allocation9 + $0xc8] ss:$12 sps:$4 sm:$0xff]  }
 0x426   :  { %v15807_v9 = vpack.c.bf16 %v7346_v35, %v7335_v55  ;;  %v12243_v58 = vpop.f32.mrf.mxu0  ;;  %v13970_v35 = vld [vmem:[#allocation9 + $0x200] ss:$12 sps:$4 sm:$0xff]  }
 0x427   :  { %v6825_v18 = vadd.f32 %v12242_v50, %v6728_v7  ;;  %9871 = vmatmul.mubr.bf16.gmra.mxu0 %v15595_v1  ;;  %v7181_v59 = vmul.f32 0.2, %v6919_v44  ;;  %vm7005_vm2 = vcmp.ge.f32.partialorder %v6919_v44, 0.0  ;;  %v6647_v23 = vadd.f32 %v12126_v15, %v15660_v20  ;;  %v13978_v15 = vld [vmem:[#allocation9 + $0x1d0] ss:$12 sps:$4 sm:$0xff]  }
 0x428   :  { %9880 = vmatprep.mubr.bf16.mxu0 %v15613_v22  ;;  %v12244_v47 = vpop.f32.mrf.mxu0  ;;  %9964 = vmatmul.mubr.bf16.vlgmr.msra.gmra.mxu1 %v15807_v9 }
 0x429   :  { %v6922_v45 = vadd.f32 %v12650_v41, %v6825_v18  ;;  %v12245_v26 = vadd.f32 %v12244_v47, %v12243_v58  ;;  %9973 = vmatprep.mubr.bf16.mxu1 %v16892_v62  ;;  %12360 = vmatpush3.bf16.msra.mxu1 %v13962_v5  ;;  %v6736_v41 = vadd.f32 %v12184_v27, %v6639_v17  ;;  %v6929_v5 = vpop.f32.mrf.mxu1  ;;  %v13974_v27 = vld [vmem:[#allocation9 + $0x1e8] ss:$12 sps:$4 sm:$0xff]  }
 0x42a   :  { %v12246_v36 = vpop.f32.mrf.mxu0  ;;  %12304 = vmatpush3.bf16.msra.mxu0 %v13964_v57  ;;  %12361 = vmatprep.subr.bf16.mxu1 %v13965_v63  ;;  %v7357_v42 = vsel %vm7005_vm2, %v6919_v44, %v7181_v59  ;;  %v13973_v57 = vld [vmem:[#allocation9 + $0x2a8] ss:$12 sps:$4 sm:$0xff]   ;;  %v12190_v44 = vadd.f32 %v15723_v56, %v15718_v16  ;;  %v13977_v16 = vld [vmem:[#allocation9 + $0x290] ss:$12 sps:$4 sm:$0xff]  }
 0x42b   :  { %vm7016_vm3 = vcmp.ge.f32.partialorder %v6922_v45, 0.0  ;;  %v7192_v13 = vmul.f32 0.2, %v6922_v45  ;;  %v6830_v39 = vadd.f32 %v12245_v26, %v15710_v54  ;;  %12305 = vmatprep.subr.bf16.mxu0 %v13967_v24  ;;  %v13972_v54 = vld [vmem:[#allocation9 + $0x20] ss:$12 sps:$4 sm:$0xff]   ;;  %v15831_v59 = vpop.f32.mrf.mxu1 }
 0x42c   :  { %v12247_v53 = vpop.f32.mrf.mxu0 }
 0x42d   :  { %v12248_v7 = vadd.f32 %v12247_v53, %v12246_v36  ;;  %v6927_v25 = vadd.f32 %v6926_v12, %v6830_v39  ;;  %v7368_v55 = vsel %vm7016_vm3, %v6922_v45, %v7192_v13  ;;  %12362 = vmatpush3.bf16.msra.mxu1 %v13966_v52  ;;  %v13976_v45 = vld [vmem:[#allocation9 + $0x8] ss:$12 sps:$4 sm:$0xff]   ;;  %v13979_v52 = vld [vmem:[#allocation9 + $0x470] ss:$12 sps:$4 sm:$0xff]   ;;  %v6744_v36 = vadd.f32 %v12190_v44, %v6647_v23 }
 0x42e   :  { %v12249_v50 = vpop.f32.mrf.mxu0  ;;  %v15822_v58 = vpack.c.bf16 %v7368_v55, %v7357_v42  ;;  %12306 = vmatpush3.bf16.msra.mxu0 %v13968_v4  ;;  %12363 = vmatprep.subr.bf16.mxu1 %v13969_v28  ;;  %v12132_v4 = vadd.f32 %v15736_v14, %v15731_v32  ;;  %v13981_v42 = vld [vmem:[#allocation9 + $0x278] ss:$12 sps:$4 sm:$0xff]   ;;  %v12196_v32 = vadd.f32 %v15738_v46, %v15733_v33 }
 0x42f   :  { %9881 = vmatmul.mubr.bf16.gmra.mxu0 %v15609_v31  ;;  %v6833_v63 = vadd.f32 %v12248_v7, %v6736_v41  ;;  %12307 = vmatprep.subr.bf16.mxu0 %v13971_v48  ;;  %v7203_v18 = vmul.f32 0.2, %v6927_v25  ;;  %vm7027_vm4 = vcmp.ge.f32.partialorder %v6927_v25, 0.0  ;;  %v12138_v23 = vadd.f32 %v15751_v2, %v15746_v43 }
 0x430   :  { %9890 = vmatprep.mubr.bf16.mxu0 %v15627_v21  ;;  %v12250_v12 = vpop.f32.mrf.mxu0  ;;  %9974 = vmatmul.mubr.bf16.gmra.mxu1 %v15822_v58  ;;  %v6655_v14 = vadd.f32 %v12132_v4, %v15660_v20  ;;  %v12202_v2 = vadd.f32 %v15753_v8, %v15748_v0  ;;  %v13988_v4 = vld [vmem:[#allocation9 + $0x188] ss:$12 sps:$4 sm:$0xff]  }
 0x431   :  { %v12251_v24 = vadd.f32 %v12250_v12, %v12249_v50  ;;  %v6930_v17 = vadd.f32 %v6929_v5, %v6833_v63  ;;  %9983 = vmatprep.mubr.bf16.mxu1 %v16892_v62  ;;  %12364 = vmatpush3.bf16.msra.mxu1 %v13970_v35  ;;  %v7379_v13 = vsel %vm7027_vm4, %v6927_v25, %v7203_v18  ;;  %v13982_v5 = vld [vmem:[#allocation9 + $0x1b8] ss:$12 sps:$4 sm:$0xff]   ;;  %v13985_v63 = vld [vmem:[#allocation9 + $0x260] ss:$12 sps:$4 sm:$0xff]  }
 0x432   :  { %v12252_v47 = vpop.f32.mrf.mxu0  ;;  %12308 = vmatpush3.bf16.msra.mxu0 %v13972_v54  ;;  %12365 = vmatprep.subr.bf16.mxu1 %v13973_v57 }
 0x433   :  { %v6838_v56 = vadd.f32 %v12251_v24, %v15725_v19  ;;  %vm7038_vm5 = vcmp.ge.f32.partialorder %v6930_v17, 0.0  ;;  %v7214_v26 = vmul.f32 0.2, %v6930_v17  ;;  %12309 = vmatprep.subr.bf16.mxu0 %v13975_v11  ;;  %v6942_v19 = vpop.f32.mrf.mxu1  ;;  %v6752_v11 = vadd.f32 %v12196_v32, %v6655_v14 }
 0x434   :  { %v12253_v28 = vpop.f32.mrf.mxu0 }
 0x435   :  { %v6935_v39 = vadd.f32 %v15802_v6, %v6838_v56  ;;  %v7390_v48 = vsel %vm7038_vm5, %v6930_v17, %v7214_v26  ;;  %v12254_v41 = vadd.f32 %v12253_v28, %v12252_v47  ;;  %12366 = vmatpush3.bf16.msra.mxu1 %v13974_v27  ;;  %v12658_v57 = vpop.f32.mrf.mxu1  ;;  %v13986_v17 = vld [vmem:[#allocation9 + $0x1a0] ss:$12 sps:$4 sm:$0xff]   ;;  %v6663_v56 = vadd.f32 %v12138_v23, %v15660_v20 }
 0x436   :  { %v15837_v53 = vpack.c.bf16 %v7390_v48, %v7379_v13  ;;  %v12255_v7 = vpop.f32.mrf.mxu0  ;;  %12310 = vmatpush3.bf16.msra.mxu0 %v13976_v45  ;;  %12367 = vmatprep.subr.bf16.mxu1 %v13977_v16  ;;  %v13987_v16 = vld [vmem:[#allocation9 + $0x248] ss:$12 sps:$4 sm:$0xff]   ;;  %v16901_v23 = vld [vmem:[#allocation99_spill] sm:$0xff] }
 0x437   :  { %v6841_v55 = vadd.f32 %v12254_v41, %v6744_v36  ;;  %9891 = vmatmul.mubr.bf16.gmra.mxu0 %v15623_v49  ;;  %12423 = vmatprep.subr.bf16.mxu0 %v13979_v52  ;;  %v7225_v25 = vmul.f32 0.2, %v6935_v39  ;;  %vm7049_vm6 = vcmp.ge.f32.partialorder %v6935_v39, 0.0  ;;  %v6945_v47 = vpop.f32.mrf.mxu1  ;;  %v6760_v48 = vadd.f32 %v12202_v2, %v6663_v56 }
 0x438   :  { %9900 = vmatprep.mubr.bf16.mxu0 %v15641_v37  ;;  %v12256_v6 = vpop.f32.mrf.mxu0  ;;  %9984 = vmatmul.mubr.bf16.gmra.mxu1 %v15837_v53  ;;  %v12144_v41 = vadd.f32 %v15766_v38, %v15761_v29  ;;  %v16900_v29 = vld [vmem:[#allocation96_spill] sm:$0xff] }
 0x439   :  { %v6938_v35 = vadd.f32 %v15816_v34, %v6841_v55  ;;  %v12257_v50 = vadd.f32 %v12256_v6, %v12255_v7  ;;  %9993 = vmatprep.mubr.bf16.mxu1 %v16892_v62  ;;  %12368 = vmatpush3.bf16.msra.mxu1 %v13978_v15  ;;  %v7401_v18 = vsel %vm7049_vm6, %v6935_v39, %v7225_v25  ;;  %v15859_v13 = vpop.f32.mrf.mxu1  ;;  %v13993_v39 = vld [vmem:[#allocation9 + $0x5f0] ss:$12 sps:$4 sm:$0xff]  }
 0x43a   :  { %v12258_v54 = vpop.f32.mrf.mxu0  ;;  %12369 = vmatprep.subr.bf16.mxu1 %v13981_v42 }
 0x43b   :  { %vm7060_vm7 = vcmp.ge.f32.partialorder %v6938_v35, 0.0  ;;  %v7236_v33 = vmul.f32 0.2, %v6938_v35  ;;  %v6846_v46 = vadd.f32 %v12257_v50, %v15740_v30  ;;  %v6958_v6 = vpop.f32.mrf.mxu1  ;;  %v16899_v50 = vld [vmem:[#allocation98_spill] sm:$0xff] }
 0x43c   :  { %v12259_v44 = vpop.f32.mrf.mxu0 }
 0x43d   :  { %v12260_v34 = vadd.f32 %v12259_v44, %v12258_v54  ;;  %v6943_v12 = vadd.f32 %v6942_v19, %v6846_v46  ;;  %v7412_v24 = vsel %vm7060_vm7, %v6938_v35, %v7236_v33  ;;  %12370 = vmatpush3.bf16.msra.mxu1 %v13982_v5  ;;  %v16898_v35 = vld [vmem:[#allocation97_spill] sm:$0xff]  ;;  %v12662_v46 = vpop.f32.mrf.mxu1 }
 0x43e   :  { %v12261_v27 = vpop.f32.mrf.mxu0  ;;  %v15850_v45 = vpack.c.bf16 %v7412_v24, %v7401_v18  ;;  %12371 = vmatprep.subr.bf16.mxu1 %v13985_v63  ;;  %v12208_v38 = vadd.f32 %v16899_v50, %v16898_v35  ;;  %v16903_v18 = vld [vmem:[#allocation102_spill] sm:$0xff]  ;;  %v16911_v35 = vld [vmem:[#allocation21_spill] sm:$0xff] }
 0x43f   :  { %9901 = vmatmul.mubr.bf16.gmra.mxu0 %v15637_v3  ;;  %v6849_v30 = vadd.f32 %v12260_v34, %v6752_v11  ;;  %v7247_v26 = vmul.f32 0.2, %v6943_v12  ;;  %vm7071_vm8 = vcmp.ge.f32.partialorder %v6943_v12, 0.0  ;;  %v6961_v56 = vpop.f32.mrf.mxu1 }
 0x440   :  { %9910 = vmatprep.mubr.bf16.mxu0 %v15655_v10  ;;  %v12262_v43 = vpop.f32.mrf.mxu0  ;;  %9994 = vmatmul.mubr.bf16.gmra.mxu1 %v15850_v45 }
 0x441   :  { %v12263_v52 = vadd.f32 %v12262_v43, %v12261_v27  ;;  %v6946_v36 = vadd.f32 %v6945_v47, %v6849_v30  ;;  %10003 = vmatprep.mubr.bf16.mxu1 %v16892_v62  ;;  %12372 = vmatpush3.bf16.msra.mxu1 %v13986_v17  ;;  %v7423_v7 = vsel %vm7071_vm8, %v6943_v12, %v7247_v26  ;;  %v16902_v12 = vld [vmem:[#allocation100_spill] sm:$0xff]  ;;  %v16905_v43 = vld [vmem:[#allocation95_spill] sm:$0xff] }
 0x442   :  { %v12264_v28 = vpop.f32.mrf.mxu0  ;;  %12373 = vmatprep.subr.bf16.mxu1 %v13987_v16  ;;  %v12150_v24 = vadd.f32 %v16903_v18, %v16902_v12  ;;  %v16913_v12 = vld [vmem:[#allocation22_spill] sm:$0xff] }
 0x443   :  { %v6854_v8 = vadd.f32 %v12263_v52, %v15755_v60  ;;  %vm7082_vm9 = vcmp.ge.f32.partialorder %v6946_v36, 0.0  ;;  %v7258_v0 = vmul.f32 0.2, %v6946_v36  ;;  %v6671_v60 = vadd.f32 %v12144_v41, %v15660_v20 }
 0x444   :  { %v12265_v15 = vpop.f32.mrf.mxu0  ;;  %v6679_v52 = vadd.f32 %v12150_v24, %v15660_v20  ;;  %v16914_v24 = vld [vmem:[#allocation25_spill] sm:$0xff] }
 0x445   :  { %v6951_v19 = vadd.f32 %v15831_v59, %v6854_v8  ;;  %v7434_v42 = vsel %vm7082_vm9, %v6946_v36, %v7258_v0  ;;  %v12266_v55 = vadd.f32 %v12265_v15, %v12264_v28  ;;  %12374 = vmatpush3.bf16.msra.mxu1 %v13988_v4  ;;  %v6768_v34 = vadd.f32 %v12208_v38, %v6671_v60  ;;  %v16906_v36 = vld [vmem:[#allocation101_spill] sm:$0xff]  ;;  %v16907_v4 = vld [vmem:[#allocation103_spill] sm:$0xff] }
 0x446   :  { %v15865_v14 = vpack.c.bf16 %v7434_v42, %v7423_v7  ;;  %v12267_v32 = vpop.f32.mrf.mxu0  ;;  %12487 = vmatprep.subr.bf16.mxu1 %v13993_v39  ;;  %v12214_v28 = vadd.f32 %v16907_v4, %v16906_v36  ;;  %v16908_v39 = vld [vmem:[#allocation23_spill] sm:$0xff]  ;;  %v13980_v60 = vld [vmem:[#allocation9 + $0x3b0] ss:$12 sps:$4 sm:$0xff]  }
 0x447   :  { %v6857_v25 = vadd.f32 %v12266_v55, %v6760_v48  ;;  %9911 = vmatmul.mubr.bf16.gmra.mxu0 %v15651_v61  ;;  %v7269_v59 = vmul.f32 0.2, %v6951_v19  ;;  %vm7093_vm10 = vcmp.ge.f32.partialorder %v6951_v19, 0.0  ;;  %v7941_v0 = vld [vmem:[#allocation11] sm:$0x7]  ;;  %v16910_v55 = vld [vmem:[#allocation20_spill] sm:$0xff] }
 0x448   :  { %9920 = vmatprep.mubr.bf16.mxu0 %v16900_v29  ;;  %v12268_v5 = vpop.f32.mrf.mxu0  ;;  %10004 = vmatmul.mubr.bf16.gmra.mxu1 %v15865_v14  ;;  %v15891_v50 = vrot.slane %v7941_v0, %v16911_v35 }
 0x449   :  { %v6954_v54 = vadd.f32 %v12658_v57, %v6857_v25  ;;  %v12269_v63 = vadd.f32 %v12268_v5, %v12267_v32  ;;  %10013 = vmatprep.mubr.bf16.mxu1 %v16892_v62  ;;  %v7445_v16 = vsel %vm7093_vm10, %v6951_v19, %v7269_v59  ;;  %v16909_v19 = vld [vmem:[#allocation104_spill] sm:$0xff]  ;;  %v15888_v32 = vrot.slane %v7941_v0, %v16910_v55 }
 0x44a   :  { %v12270_v33 = vpop.f32.mrf.mxu0 }
 0x44b   :  { %vm7104_vm11 = vcmp.ge.f32.partialorder %v6954_v54, 0.0  ;;  %v7280_v11 = vmul.f32 0.2, %v6954_v54  ;;  %v6862_v44 = vadd.f32 %v12269_v63, %v16901_v23  ;;  %v13983_v63 = vld [vmem:[#allocation9 + $0x458] ss:$12 sps:$4 sm:$0xff]  }
 0x44c   :  { %v12271_v17 = vpop.f32.mrf.mxu0 }
 0x44d   :  { %v12272_v27 = vadd.f32 %v12271_v17, %v12270_v33  ;;  %v6959_v47 = vadd.f32 %v6958_v6, %v6862_v44  ;;  %v7456_v30 = vsel %vm7104_vm11, %v6954_v54, %v7280_v11  ;;  %v6776_v6 = vadd.f32 %v12214_v28, %v6679_v52 }
 0x44e   :  { %v12273_v57 = vpop.f32.mrf.mxu0  ;;  %v15877_v2 = vpack.c.bf16 %v7456_v30, %v7445_v16  ;;  %v13989_v30 = vld [vmem:[#allocation9 + $0x440] ss:$12 sps:$4 sm:$0xff]  }
 0x44f   :  { %9921 = vmatmul.mubr.bf16.gmra.mxu0 %v16905_v43  ;;  %v6865_v26 = vadd.f32 %v12272_v27, %v6768_v34  ;;  %v7291_v48 = vmul.f32 0.2, %v6959_v47  ;;  %vm7115_vm12 = vcmp.ge.f32.partialorder %v6959_v47, 0.0  ;;  %v13984_v27 = vld [vmem:[#allocation9 + $0x398] ss:$12 sps:$4 sm:$0xff]  }
 0x450   :  { %16904 = vst [vmem:[#allocation97_spill] sm:$0xff] %v15877_v2  ;;  %10076 = vmatprep.mubr.bf16.mxu0 %v16908_v39  ;;  %v12274_v8 = vpop.f32.mrf.mxu0  ;;  %10014 = vmatmul.mubr.bf16.gmra.mxu1 %v15877_v2  ;;  %v13990_v39 = vld [vmem:[#allocation9 + $0x380] ss:$12 sps:$4 sm:$0xff]  }
 0x451   :  { %v12275_v41 = vadd.f32 %v12274_v8, %v12273_v57  ;;  %v6962_v15 = vadd.f32 %v6961_v56, %v6865_v26  ;;  %10023 = vmatprep.mubr.bf16.mxu1 %v16892_v62  ;;  %v7467_v38 = vsel %vm7115_vm12, %v6959_v47, %v7291_v48 }
 0x452   :  { %v12276_v7 = vpop.f32.mrf.mxu0 }
 0x453   :  { %v6870_v42 = vadd.f32 %v12275_v41, %v16909_v19  ;;  %vm7126_vm13 = vcmp.ge.f32.partialorder %v6962_v15, 0.0  ;;  %v7302_v20 = vmul.f32 0.2, %v6962_v15  ;;  %v13991_v41 = vld [vmem:[#allocation9 + $0x428] ss:$12 sps:$4 sm:$0xff]  }
 0x454   :  { %v12277_v25 = vpop.f32.mrf.mxu0 }
 0x455   :  { %v6967_v5 = vadd.f32 %v15859_v13, %v6870_v42  ;;  %v7478_v59 = vsel %vm7126_vm13, %v6962_v15, %v7302_v20  ;;  %v12278_v54 = vadd.f32 %v12277_v25, %v12276_v7  ;;  %v16916_v20 = vld [vmem:[#allocation24_spill] sm:$0xff] }
 0x456   :  { %v15894_v33 = vpack.c.bf16 %v7478_v59, %v7467_v38  ;;  %v9513_v11 = vpop.f32.mrf.mxu1  ;;  %v9400_v23 = vpop.f32.mrf.mxu0 }
 0x457   :  { %v6873_v44 = vadd.f32 %v12278_v54, %v6776_v6  ;;  %v9401_v34 = vadd.f32 %v9400_v23, %v15888_v32  ;;  %10077 = vmatmul.mubr.bf16.vlgmr.msra.gmra.mxu0 %v16913_v12  ;;  %v7313_v47 = vmul.f32 0.2, %v6967_v5  ;;  %vm7137_vm14 = vcmp.ge.f32.partialorder %v6967_v5, 0.0  ;;  %v13995_v54 = vld [vmem:[#allocation9 + $0x410] ss:$12 sps:$4 sm:$0xff]   ;;  %v16918_v23 = vld [vmem:[#allocation40_spill] sm:$0xff] }
 0x458   :  { %16912 = vst [vmem:[#allocation98_spill] sm:$0xff] %v15894_v33  ;;  %v9515_v18 = vpop.f32.mrf.mxu1  ;;  %10084 = vmatprep.mubr.bf16.mxu0 %v16914_v24  ;;  %12424 = vmatpush3.bf16.msra.mxu0 %v13980_v60  ;;  %v9402_v17 = vpop.f32.mrf.mxu0  ;;  %v16917_v60 = vld [vmem:[#allocation27_spill] sm:$0xff] }
 0x459   :  { %v6970_v13 = vadd.f32 %v12662_v46, %v6873_v44  ;;  %v9403_v16 = vadd.f32 %v9402_v17, %v15891_v50  ;;  %10024 = vmatmul.mubr.bf16.gmra.mxu1 %v15894_v33  ;;  %12425 = vmatprep.subr.bf16.mxu0 %v13983_v63  ;;  %v15902_v26 = vadd.f32 %v9513_v11, %v9401_v34  ;;  %v13996_v17 = vld [vmem:[#allocation9 + $0x350] ss:$12 sps:$4 sm:$0xff]   ;;  %v14015_v33 = vld [vmem:[#allocation9 + $0x758] ss:$12 sps:$4 sm:$0xff]  }
 0x45a   :  { %v9517_v57 = vpop.f32.mrf.mxu1  ;;  %v9404_v56 = vpop.f32.mrf.mxu0  ;;  %10033 = vmatprep.mubr.bf16.mxu1 %v16892_v62  ;;  %v7489_v0 = vsel %vm7137_vm14, %v6967_v5, %v7313_v47  ;;  %v13992_v5 = vld [vmem:[#allocation9 + $0x368] ss:$12 sps:$4 sm:$0xff]   ;;  %v13999_v47 = vld [vmem:[#allocation9 + $0x3f8] ss:$12 sps:$4 sm:$0xff]  }
 0x45b   :  { %vm7148_vm15 = vcmp.ge.f32.partialorder %v6970_v13, 0.0  ;;  %v7324_v52 = vmul.f32 0.2, %v6970_v13  ;;  %v9405_v36 = vadd.f32 %v9404_v56, %v15888_v32  ;;  %v15905_v4 = vadd.f32 %v9515_v18, %v9403_v16 }
 0x45c   :  { %v9519_v46 = vpop.f32.mrf.mxu1  ;;  %v9406_v28 = vpop.f32.mrf.mxu0  ;;  %12426 = vmatpush3.bf16.msra.mxu0 %v13984_v27 }
 0x45d   :  { %v9407_v8 = vadd.f32 %v9406_v28, %v15891_v50  ;;  %v7500_v48 = vsel %vm7148_vm15, %v6970_v13, %v7324_v52  ;;  %12427 = vmatprep.subr.bf16.mxu0 %v13989_v30  ;;  %v15908_v15 = vadd.f32 %v9517_v57, %v9405_v36  ;;  %v13994_v57 = vld [vmem:[#allocation9 + $0x530] ss:$12 sps:$4 sm:$0xff]   ;;  %v13997_v36 = vld [vmem:[#allocation9 + $0x5d8] ss:$12 sps:$4 sm:$0xff]  }
 0x45e   :  { %v9523_v62 = vpop.f32.mrf.mxu1  ;;  %v9410_v7 = vpop.f32.mrf.mxu0  ;;  %v15910_v19 = vpack.c.bf16 %v7500_v48, %v7489_v0  ;;  %v16919_v52 = vld [vmem:[#allocation26_spill] sm:$0xff] }
 0x45f   :  { %v9411_v42 = vadd.f32 %v9410_v7, %v15888_v32  ;;  %10085 = vmatmul.mubr.bf16.gmra.mxu0 %v16916_v20  ;;  %v15914_v6 = vadd.f32 %v9519_v46, %v9407_v8  ;;  %v14000_v0 = vld [vmem:[#allocation9 + $0x338] ss:$12 sps:$4 sm:$0xff]  }
 0x460   :  { %16915 = vst [vmem:[#allocation99_spill] sm:$0xff] %v15910_v19  ;;  %v9525_v25 = vpop.f32.mrf.mxu1  ;;  %10092 = vmatprep.mubr.bf16.mxu0 %v16917_v60  ;;  %v9412_v38 = vpop.f32.mrf.mxu0  ;;  %12428 = vmatpush3.bf16.msra.mxu0 %v13990_v39  ;;  %v16920_v39 = vld [vmem:[#allocation29_spill] sm:$0xff]  ;;  %v16922_v20 = vld [vmem:[#allocation42_spill] sm:$0xff] }
 0x461   :  { %v9413_v59 = vadd.f32 %v9412_v38, %v15891_v50  ;;  %10034 = vmatmul.mubr.bf16.gmra.mxu1 %v15910_v19  ;;  %12429 = vmatprep.subr.bf16.mxu0 %v13991_v41  ;;  %v15919_v63 = vadd.f32 %v9523_v62, %v9411_v42  ;;  %v16921_v41 = vld [vmem:[#allocation39_spill] sm:$0xff]  ;;  %v16940_v19 = vld [vmem:[#allocation56_spill] sm:$0xff] }
 0x462   :  { %v9527_v11 = vpop.f32.mrf.mxu1  ;;  %10173 = vmatprep.mubr.bf16.mxu1 %v16918_v23  ;;  %v9414_v44 = vpop.f32.mrf.mxu0  ;;  %v14003_v62 = vld [vmem:[#allocation9 + $0x3e0] ss:$12 sps:$4 sm:$0xff]   ;;  %v13998_v60 = vld [vmem:[#allocation9 + $0x518] ss:$12 sps:$4 sm:$0xff]  }
 0x463   :  { %v9415_v34 = vadd.f32 %v9414_v44, %v15888_v32  ;;  %v15923_v12 = vadd.f32 %v9525_v25, %v9413_v59  ;;  %v14004_v23 = vld [vmem:[#allocation9 + $0x320] ss:$12 sps:$4 sm:$0xff]  }
 0x464   :  { %v9529_v18 = vpop.f32.mrf.mxu1  ;;  %v9416_v24 = vpop.f32.mrf.mxu0  ;;  %12430 = vmatpush3.bf16.msra.mxu0 %v13992_v5  ;;  %v14001_v5 = vld [vmem:[#allocation9 + $0x5c0] ss:$12 sps:$4 sm:$0xff]  }
 0x465   :  { %v9417_v27 = vadd.f32 %v9416_v24, %v15891_v50  ;;  %12431 = vmatprep.subr.bf16.mxu0 %v13995_v54  ;;  %v15926_v13 = vadd.f32 %v9527_v11, %v9415_v34  ;;  %v14007_v34 = vld [vmem:[#allocation9 + $0x3c8] ss:$12 sps:$4 sm:$0xff]  }
 0x466   :  { %v9533_v16 = vpop.f32.mrf.mxu1  ;;  %v9420_v30 = vpop.f32.mrf.mxu0 }
 0x467   :  { %v9421_v56 = vadd.f32 %v9420_v30, %v15888_v32  ;;  %10093 = vmatmul.mubr.bf16.gmra.mxu0 %v16919_v52  ;;  %v15930_v46 = vadd.f32 %v9529_v18, %v9417_v27  ;;  %v14002_v27 = vld [vmem:[#allocation9 + $0x500] ss:$12 sps:$4 sm:$0xff]   ;;  %v14005_v30 = vld [vmem:[#allocation9 + $0x5a8] ss:$12 sps:$4 sm:$0xff]  }
 0x468   :  { %v9535_v28 = vpop.f32.mrf.mxu1  ;;  %10100 = vmatprep.mubr.bf16.mxu0 %v16920_v39  ;;  %v9422_v8 = vpop.f32.mrf.mxu0  ;;  %12432 = vmatpush3.bf16.msra.mxu0 %v13996_v17  ;;  %v16924_v52 = vld [vmem:[#allocation31_spill] sm:$0xff] }
 0x469   :  { %v9423_v48 = vadd.f32 %v9422_v8, %v15891_v50  ;;  %10174 = vmatmul.mubr.bf16.vlgmr.msra.gmra.mxu1 %v16921_v41  ;;  %12433 = vmatprep.subr.bf16.mxu0 %v13999_v47  ;;  %v15935_v7 = vadd.f32 %v9533_v16, %v9421_v56  ;;  %v16923_v16 = vld [vmem:[#allocation28_spill] sm:$0xff]  ;;  %v16925_v8 = vld [vmem:[#allocation41_spill] sm:$0xff] }
 0x46a   :  { %v9537_v42 = vpop.f32.mrf.mxu1  ;;  %10181 = vmatprep.mubr.bf16.mxu1 %v16922_v20  ;;  %v9424_v25 = vpop.f32.mrf.mxu0  ;;  %12488 = vmatpush3.bf16.msra.mxu1 %v13994_v57  ;;  %v14006_v20 = vld [vmem:[#allocation9 + $0x4e8] ss:$12 sps:$4 sm:$0xff]  }
 0x46b   :  { %v9425_v38 = vadd.f32 %v9424_v25, %v15888_v32  ;;  %12489 = vmatprep.subr.bf16.mxu1 %v13997_v36  ;;  %v15939_v59 = vadd.f32 %v9535_v28, %v9423_v48  ;;  %v14008_v28 = vld [vmem:[#allocation9 + $0x308] ss:$12 sps:$4 sm:$0xff]  }
 0x46c   :  { %v9539_v54 = vpop.f32.mrf.mxu1  ;;  %v9426_v11 = vpop.f32.mrf.mxu0  ;;  %12434 = vmatpush3.bf16.msra.mxu0 %v14000_v0  ;;  %v14011_v0 = vld [vmem:[#allocation9 + $0x770] ss:$12 sps:$4 sm:$0xff]  }
 0x46d   :  { %v9427_v44 = vadd.f32 %v9426_v11, %v15891_v50  ;;  %12435 = vmatprep.subr.bf16.mxu0 %v14003_v62  ;;  %v15942_v18 = vadd.f32 %v9537_v42, %v9425_v38  ;;  %v16926_v62 = vld [vmem:[#allocation44_spill] sm:$0xff] }
 0x46e   :  { %v9543_v24 = vpop.f32.mrf.mxu1  ;;  %v9430_v17 = vpop.f32.mrf.mxu0  ;;  %12490 = vmatpush3.bf16.msra.mxu1 %v13998_v60  ;;  %v14009_v60 = vld [vmem:[#allocation9 + $0x590] ss:$12 sps:$4 sm:$0xff]  }
 0x46f   :  { %v9431_v47 = vadd.f32 %v9430_v17, %v15888_v32  ;;  %10101 = vmatmul.mubr.bf16.gmra.mxu0 %v16923_v16  ;;  %12491 = vmatprep.subr.bf16.mxu1 %v14001_v5  ;;  %v15946_v57 = vadd.f32 %v9539_v54, %v9427_v44 }
 0x470   :  { %v9545_v56 = vpop.f32.mrf.mxu1  ;;  %10108 = vmatprep.mubr.bf16.mxu0 %v16924_v52  ;;  %v9432_v36 = vpop.f32.mrf.mxu0  ;;  %12436 = vmatpush3.bf16.msra.mxu0 %v14004_v23 }
 0x471   :  { %v9433_v39 = vadd.f32 %v9432_v36, %v15891_v50  ;;  %10182 = vmatmul.mubr.bf16.gmra.mxu1 %v16925_v8  ;;  %12437 = vmatprep.subr.bf16.mxu0 %v14007_v34  ;;  %v15951_v48 = vadd.f32 %v9543_v24, %v9431_v47  ;;  %v14010_v24 = vld [vmem:[#allocation9 + $0x4d0] ss:$12 sps:$4 sm:$0xff]   ;;  %v14013_v47 = vld [vmem:[#allocation9 + $0x578] ss:$12 sps:$4 sm:$0xff]  }
 0x472   :  { %v9547_v41 = vpop.f32.mrf.mxu1  ;;  %10189 = vmatprep.mubr.bf16.mxu1 %v16926_v62  ;;  %v9434_v42 = vpop.f32.mrf.mxu0  ;;  %12492 = vmatpush3.bf16.msra.mxu1 %v14002_v27  ;;  %v16927_v27 = vld [vmem:[#allocation30_spill] sm:$0xff] }
 0x473   :  { %v9435_v25 = vadd.f32 %v9434_v42, %v15888_v32  ;;  %12493 = vmatprep.subr.bf16.mxu1 %v14005_v30  ;;  %v15955_v38 = vadd.f32 %v9545_v56, %v9433_v39  ;;  %v16928_v56 = vld [vmem:[#allocation33_spill] sm:$0xff]  ;;  %v14014_v62 = vld [vmem:[#allocation9 + $0x4b8] ss:$12 sps:$4 sm:$0xff]  }
 0x474   :  { %v9549_v5 = vpop.f32.mrf.mxu1  ;;  %v9436_v54 = vpop.f32.mrf.mxu0  ;;  %12438 = vmatpush3.bf16.msra.mxu0 %v14008_v28  ;;  %v16929_v28 = vld [vmem:[#allocation43_spill] sm:$0xff] }
 0x475   :  { %v9437_v11 = vadd.f32 %v9436_v54, %v15891_v50  ;;  %12551 = vmatprep.subr.bf16.mxu0 %v14011_v0  ;;  %v15958_v23 = vadd.f32 %v9547_v41, %v9435_v25  ;;  %v16930_v0 = vld [vmem:[#allocation46_spill] sm:$0xff] }
 0x476   :  { %v9553_v44 = vpop.f32.mrf.mxu1  ;;  %v9440_v34 = vpop.f32.mrf.mxu0  ;;  %12494 = vmatpush3.bf16.msra.mxu1 %v14006_v20  ;;  %v14017_v20 = vld [vmem:[#allocation9 + $0x560] ss:$12 sps:$4 sm:$0xff]  }
 0x477   :  { %v9441_v17 = vadd.f32 %v9440_v34, %v15888_v32  ;;  %10109 = vmatmul.mubr.bf16.gmra.mxu0 %v16927_v27  ;;  %12495 = vmatprep.subr.bf16.mxu1 %v14009_v60  ;;  %v15962_v16 = vadd.f32 %v9549_v5, %v9437_v11 }
 0x478   :  { %v9555_v30 = vpop.f32.mrf.mxu1  ;;  %10116 = vmatprep.mubr.bf16.mxu0 %v16928_v56  ;;  %v9442_v52 = vpop.f32.mrf.mxu0  ;;  %v14019_v56 = vld [vmem:[#allocation9 + $0x548] ss:$12 sps:$4 sm:$0xff]  }
 0x479   :  { %v9443_v36 = vadd.f32 %v9442_v52, %v15891_v50  ;;  %10190 = vmatmul.mubr.bf16.gmra.mxu1 %v16929_v28  ;;  %v15967_v39 = vadd.f32 %v9553_v44, %v9441_v17  ;;  %v14018_v17 = vld [vmem:[#allocation9 + $0x4a0] ss:$12 sps:$4 sm:$0xff]  }
 0x47a   :  { %v9557_v8 = vpop.f32.mrf.mxu1  ;;  %10197 = vmatprep.mubr.bf16.mxu1 %v16930_v0  ;;  %v9444_v41 = vpop.f32.mrf.mxu0  ;;  %12496 = vmatpush3.bf16.msra.mxu1 %v14010_v24  ;;  %v16931_v24 = vld [vmem:[#allocation32_spill] sm:$0xff] }
 0x47b   :  { %v9445_v42 = vadd.f32 %v9444_v41, %v15888_v32  ;;  %12497 = vmatprep.subr.bf16.mxu1 %v14013_v47  ;;  %v15971_v25 = vadd.f32 %v9555_v30, %v9443_v36  ;;  %v16932_v52 = vld [vmem:[#allocation36_spill] sm:$0xff] }
 0x47c   :  { %v9559_v60 = vpop.f32.mrf.mxu1  ;;  %v9446_v5 = vpop.f32.mrf.mxu0 }
 0x47d   :  { %v9447_v54 = vadd.f32 %v9446_v5, %v15891_v50  ;;  %v15974_v11 = vadd.f32 %v9557_v8, %v9445_v42  ;;  %v16933_v8 = vld [vmem:[#allocation45_spill] sm:$0xff] }
 0x47e   :  { %v9563_v44 = vpop.f32.mrf.mxu1  ;;  %v9450_v34 = vpop.f32.mrf.mxu0  ;;  %12498 = vmatpush3.bf16.msra.mxu1 %v14014_v62  ;;  %v16934_v62 = vld [vmem:[#allocation48_spill] sm:$0xff] }
 0x47f   :  { %v9451_v27 = vadd.f32 %v9450_v34, %v15888_v32  ;;  %10117 = vmatmul.mubr.bf16.gmra.mxu0 %v16931_v24  ;;  %12499 = vmatprep.subr.bf16.mxu1 %v14017_v20  ;;  %v15978_v47 = vadd.f32 %v9559_v60, %v9447_v54  ;;  %v14020_v5 = vld [vmem:[#allocation9 + $0x488] ss:$12 sps:$4 sm:$0xff]   ;;  %v15987_v60 = vld [vmem:[#allocation9 + $0x830] ss:$12 sps:$4 sm:$0xff]  }
 0x480   :  { %v9565_v30 = vpop.f32.mrf.mxu1  ;;  %10124 = vmatprep.mubr.bf16.mxu0 %v16932_v52  ;;  %v9452_v36 = vpop.f32.mrf.mxu0 }
 0x481   :  { %v9453_v28 = vadd.f32 %v9452_v36, %v15891_v50  ;;  %10198 = vmatmul.mubr.bf16.gmra.mxu1 %v16933_v8  ;;  %v15983_v0 = vadd.f32 %v9563_v44, %v9451_v27 }
 0x482   :  { %v9567_v41 = vpop.f32.mrf.mxu1  ;;  %10205 = vmatprep.mubr.bf16.mxu1 %v16934_v62  ;;  %v9454_v42 = vpop.f32.mrf.mxu0  ;;  %12500 = vmatpush3.bf16.msra.mxu1 %v14018_v17  ;;  %v16935_v17 = vld [vmem:[#allocation35_spill] sm:$0xff] }
 0x483   :  { %v9455_v20 = vadd.f32 %v9454_v42, %v15888_v32  ;;  %12501 = vmatprep.subr.bf16.mxu1 %v14019_v56  ;;  %v15989_v54 = vadd.f32 %v9565_v30, %v9453_v28  ;;  %v16936_v30 = vld [vmem:[#allocation38_spill] sm:$0xff] }
 0x484   :  { %v9569_v34 = vpop.f32.mrf.mxu1  ;;  %v9456_v24 = vpop.f32.mrf.mxu0 }
 0x485   :  { %v9457_v52 = vadd.f32 %v9456_v24, %v15891_v50  ;;  %v15992_v36 = vadd.f32 %v9567_v41, %v9455_v20  ;;  %v16937_v24 = vld [vmem:[#allocation47_spill] sm:$0xff] }
 0x486   :  { %v9573_v44 = vpop.f32.mrf.mxu1  ;;  %v9460_v27 = vpop.f32.mrf.mxu0  ;;  %12502 = vmatpush3.bf16.msra.mxu1 %v14020_v5  ;;  %v16938_v5 = vld [vmem:[#allocation50_spill] sm:$0xff] }
 0x487   :  { %v9461_v8 = vadd.f32 %v9460_v27, %v15888_v32  ;;  %10125 = vmatmul.mubr.bf16.gmra.mxu0 %v16935_v17  ;;  %12663 = vmatprep.subr.bf16.mxu1 %v15987_v60  ;;  %v15997_v56 = vadd.f32 %v9569_v34, %v9457_v52 }
 0x488   :  { %v9575_v62 = vpop.f32.mrf.mxu1  ;;  %10132 = vmatprep.mubr.bf16.mxu0 %v16936_v30  ;;  %v9462_v28 = vpop.f32.mrf.mxu0 }
 0x489   :  { %v9463_v42 = vadd.f32 %v9462_v28, %v15891_v50  ;;  %10206 = vmatmul.mubr.bf16.gmra.mxu1 %v16937_v24  ;;  %v16002_v41 = vadd.f32 %v9573_v44, %v9461_v8  ;;  %v16939_v44 = vld [vmem:[#allocation37_spill] sm:$0xff] }
 0x48a   :  { %v9577_v20 = vpop.f32.mrf.mxu1  ;;  %10213 = vmatprep.mubr.bf16.mxu1 %v16938_v5  ;;  %v9464_v27 = vpop.f32.mrf.mxu0 }
 0x48b   :  { %v9465_v17 = vadd.f32 %v9464_v27, %v15888_v32  ;;  %v16006_v43 = vadd.f32 %v9575_v62, %v9463_v42  ;;  %v16941_v42 = vld [vmem:[#allocation49_spill] sm:$0xff] }
 0x48c   :  { %v9579_v34 = vpop.f32.mrf.mxu1  ;;  %v9466_v52 = vpop.f32.mrf.mxu0 }
 0x48d   :  { %v9467_v29 = vadd.f32 %v9466_v52, %v15891_v50  ;;  %v16009_v30 = vadd.f32 %v9577_v20, %v9465_v17  ;;  %v16942_v17 = vld [vmem:[#allocation52_spill] sm:$0xff] }
 0x48e   :  { %v9583_v61 = vpop.f32.mrf.mxu1  ;;  %v9470_v28 = vpop.f32.mrf.mxu0 }
 0x48f   :  { %v9471_v24 = vadd.f32 %v9470_v28, %v15888_v32  ;;  %10133 = vmatmul.mubr.bf16.gmra.mxu0 %v16939_v44  ;;  %v16013_v8 = vadd.f32 %v9579_v34, %v9467_v29  ;;  %v14012_v44 = vld [vmem:[#allocation9 + $0x6b0] ss:$12 sps:$4 sm:$0xff]  }
 0x490   :  { %v9585_v5 = vpop.f32.mrf.mxu1  ;;  %10270 = vmatprep.mubr.bf16.mxu0 %v16940_v19  ;;  %v9472_v27 = vpop.f32.mrf.mxu0 }
 0x491   :  { %v9473_v62 = vadd.f32 %v9472_v27, %v15891_v50  ;;  %10214 = vmatmul.mubr.bf16.gmra.mxu1 %v16941_v42  ;;  %v16018_v10 = vadd.f32 %v9583_v61, %v9471_v24  ;;  %v16943_v61 = vld [vmem:[#allocation55_spill] sm:$0xff] }
 0x492   :  { %v9587_v20 = vpop.f32.mrf.mxu1  ;;  %10221 = vmatprep.mubr.bf16.mxu1 %v16942_v17  ;;  %v9474_v52 = vpop.f32.mrf.mxu0 }
 0x493   :  { %v9475_v28 = vadd.f32 %v9474_v52, %v15888_v32  ;;  %v16022_v3 = vadd.f32 %v9585_v5, %v9473_v62  ;;  %v16944_v32 = vld [vmem:[#allocation58_spill] sm:$0xff]  ;;  %v16945_v52 = vld [vmem:[#allocation51_spill] sm:$0xff] }
 0x494   :  { %v9589_v29 = vpop.f32.mrf.mxu1  ;;  %v9476_v34 = vpop.f32.mrf.mxu0  ;;  %v14016_v5 = vld [vmem:[#allocation9 + $0x698] ss:$12 sps:$4 sm:$0xff]  }
 0x495   :  { %v9477_v19 = vadd.f32 %v9476_v34, %v15891_v50  ;;  %v16025_v2 = vadd.f32 %v9587_v20, %v9475_v28  ;;  %v14021_v50 = vld [vmem:[#allocation9 + $0x740] ss:$12 sps:$4 sm:$0xff]   ;;  %v16946_v34 = vld [vmem:[#allocation54_spill] sm:$0xff] }
 0x496   :  { %v9739_v27 = vpop.f32.mrf.mxu1 }
 0x497   :  { %v9626_v42 = vpop.f32.mrf.mxu0  ;;  %10271 = vmatmul.mubr.bf16.vlgmr.msra.gmra.mxu0 %v16943_v61  ;;  %v16028_v24 = vadd.f32 %v9589_v29, %v9477_v19 }
 0x498   :  { %v9627_v17 = vadd.f32 %v9626_v42, %v15902_v26  ;;  %v9741_v37 = vpop.f32.mrf.mxu1  ;;  %10278 = vmatprep.mubr.bf16.mxu0 %v16944_v32  ;;  %12552 = vmatpush3.bf16.msra.mxu0 %v14012_v44  ;;  %v14022_v42 = vld [vmem:[#allocation9 + $0x680] ss:$12 sps:$4 sm:$0xff]  }
 0x499   :  { %v9628_v62 = vpop.f32.mrf.mxu0  ;;  %10222 = vmatmul.mubr.bf16.gmra.mxu1 %v16945_v52  ;;  %12553 = vmatprep.subr.bf16.mxu0 %v14015_v33  ;;  %v14023_v52 = vld [vmem:[#allocation9 + $0x728] ss:$12 sps:$4 sm:$0xff]  }
 0x49a   :  { %v9629_v20 = vadd.f32 %v9628_v62, %v15905_v4  ;;  %v9743_v28 = vpop.f32.mrf.mxu1  ;;  %10229 = vmatprep.mubr.bf16.mxu1 %v16946_v34  ;;  %v16035_v61 = vadd.f32 %v9739_v27, %v9627_v17  ;;  %v16947_v34 = vld [vmem:[#allocation57_spill] sm:$0xff] }
 0x49b   :  { %v9630_v29 = vpop.f32.mrf.mxu0 }
 0x49c   :  { %v9631_v26 = vadd.f32 %v9630_v29, %v15908_v15  ;;  %v9745_v19 = vpop.f32.mrf.mxu1  ;;  %12554 = vmatpush3.bf16.msra.mxu0 %v14016_v5  ;;  %v16038_v44 = vadd.f32 %v9741_v37, %v9629_v20  ;;  %v16948_v15 = vld [vmem:[#allocation60_spill] sm:$0xff] }
 0x49d   :  { %v9632_v32 = vpop.f32.mrf.mxu0  ;;  %12555 = vmatprep.subr.bf16.mxu0 %v14021_v50  ;;  %v14024_v5 = vld [vmem:[#allocation9 + $0x668] ss:$12 sps:$4 sm:$0xff]  }
 0x49e   :  { %v9633_v33 = vadd.f32 %v9632_v32, %v15914_v6  ;;  %v9749_v49 = vpop.f32.mrf.mxu1  ;;  %v16041_v4 = vadd.f32 %v9743_v28, %v9631_v26  ;;  %v16949_v50 = vld [vmem:[#allocation53_spill] sm:$0xff]  ;;  %v16950_v26 = vld [vmem:[#allocation72_spill] sm:$0xff] }
 0x49f   :  { %v9636_v62 = vpop.f32.mrf.mxu0  ;;  %10279 = vmatmul.mubr.bf16.gmra.mxu0 %v16947_v34  ;;  %v14026_v6 = vld [vmem:[#allocation9 + $0x710] ss:$12 sps:$4 sm:$0xff]  }
 0x4a0   :  { %v9637_v27 = vadd.f32 %v9636_v62, %v15919_v63  ;;  %v9751_v17 = vpop.f32.mrf.mxu1  ;;  %10286 = vmatprep.mubr.bf16.mxu0 %v16948_v15  ;;  %12556 = vmatpush3.bf16.msra.mxu0 %v14022_v42  ;;  %v16046_v37 = vadd.f32 %v9745_v19, %v9633_v33  ;;  %v14027_v42 = vld [vmem:[#allocation9 + $0x650] ss:$12 sps:$4 sm:$0xff]   ;;  %v14029_v15 = vld [vmem:[#allocation9 + $0x6f8] ss:$12 sps:$4 sm:$0xff]  }
 0x4a1   :  { %v9638_v20 = vpop.f32.mrf.mxu0  ;;  %10230 = vmatmul.mubr.bf16.gmra.mxu1 %v16949_v50  ;;  %12557 = vmatprep.subr.bf16.mxu0 %v14023_v52 }
 0x4a2   :  { %v9639_v28 = vadd.f32 %v9638_v20, %v15923_v12  ;;  %v9753_v29 = vpop.f32.mrf.mxu1  ;;  %10367 = vmatprep.mubr.bf16.mxu1 %v16950_v26  ;;  %v16051_v32 = vadd.f32 %v9749_v49, %v9637_v27  ;;  %v16951_v26 = vld [vmem:[#allocation59_spill] sm:$0xff] }
 0x4a3   :  { %v9640_v63 = vpop.f32.mrf.mxu0  ;;  %v14028_v49 = vld [vmem:[#allocation9 + $0x818] ss:$12 sps:$4 sm:$0xff]  }
 0x4a4   :  { %v9641_v62 = vadd.f32 %v9640_v63, %v15926_v13  ;;  %v9755_v34 = vpop.f32.mrf.mxu1  ;;  %12558 = vmatpush3.bf16.msra.mxu0 %v14024_v5  ;;  %v16054_v19 = vadd.f32 %v9751_v17, %v9639_v28  ;;  %v16952_v63 = vld [vmem:[#allocation62_spill] sm:$0xff]  ;;  %v16953_v28 = vld [vmem:[#allocation71_spill] sm:$0xff] }
 0x4a5   :  { %v9642_v33 = vpop.f32.mrf.mxu0  ;;  %12559 = vmatprep.subr.bf16.mxu0 %v14026_v6  ;;  %v14030_v17 = vld [vmem:[#allocation9 + $0x638] ss:$12 sps:$4 sm:$0xff]  }
 0x4a6   :  { %v9643_v52 = vadd.f32 %v9642_v33, %v15930_v46  ;;  %v9759_v50 = vpop.f32.mrf.mxu1  ;;  %v16057_v12 = vadd.f32 %v9753_v29, %v9641_v62  ;;  %v14032_v46 = vld [vmem:[#allocation9 + $0x6e0] ss:$12 sps:$4 sm:$0xff]   ;;  %v16954_v33 = vld [vmem:[#allocation74_spill] sm:$0xff] }
 0x4a7   :  { %v9646_v20 = vpop.f32.mrf.mxu0  ;;  %10287 = vmatmul.mubr.bf16.gmra.mxu0 %v16951_v26  ;;  %v14033_v26 = vld [vmem:[#allocation9 + $0x620] ss:$12 sps:$4 sm:$0xff]  }
 0x4a8   :  { %v9647_v27 = vadd.f32 %v9646_v20, %v15935_v7  ;;  %v9761_v13 = vpop.f32.mrf.mxu1  ;;  %10294 = vmatprep.mubr.bf16.mxu0 %v16952_v63  ;;  %12560 = vmatpush3.bf16.msra.mxu0 %v14027_v42  ;;  %v16062_v5 = vadd.f32 %v9755_v34, %v9643_v52  ;;  %v14031_v42 = vld [vmem:[#allocation9 + $0x800] ss:$12 sps:$4 sm:$0xff]  }
 0x4a9   :  { %v9648_v6 = vpop.f32.mrf.mxu0  ;;  %10368 = vmatmul.mubr.bf16.vlgmr.msra.gmra.mxu1 %v16953_v28  ;;  %12561 = vmatprep.subr.bf16.mxu0 %v14029_v15 }
 0x4aa   :  { %v9649_v29 = vadd.f32 %v9648_v6, %v15939_v59  ;;  %v9763_v62 = vpop.f32.mrf.mxu1  ;;  %10375 = vmatprep.mubr.bf16.mxu1 %v16954_v33  ;;  %12664 = vmatpush3.bf16.msra.mxu1 %v15987_v60  ;;  %v16068_v7 = vadd.f32 %v9759_v50, %v9647_v27  ;;  %v14035_v59 = vld [vmem:[#allocation9 + $0x6c8] ss:$12 sps:$4 sm:$0xff]  }
 0x4ab   :  { %v9650_v20 = vpop.f32.mrf.mxu0  ;;  %12665 = vmatprep.subr.bf16.mxu1 %v14028_v49  ;;  %v16955_v27 = vld [vmem:[#allocation61_spill] sm:$0xff] }
 0x4ac   :  { %v9651_v34 = vadd.f32 %v9650_v20, %v15942_v18  ;;  %v9765_v52 = vpop.f32.mrf.mxu1  ;;  %12562 = vmatpush3.bf16.msra.mxu0 %v14030_v17  ;;  %v16071_v63 = vadd.f32 %v9761_v13, %v9649_v29  ;;  %v14034_v33 = vld [vmem:[#allocation9 + $0x7e8] ss:$12 sps:$4 sm:$0xff]  }
 0x4ad   :  { %v9652_v15 = vpop.f32.mrf.mxu0  ;;  %12563 = vmatprep.subr.bf16.mxu0 %v14032_v46  ;;  %v16956_v20 = vld [vmem:[#allocation64_spill] sm:$0xff] }
 0x4ae   :  { %v9653_v6 = vadd.f32 %v9652_v15, %v15946_v57  ;;  %v9769_v28 = vpop.f32.mrf.mxu1  ;;  %12666 = vmatpush3.bf16.msra.mxu1 %v14028_v49  ;;  %v16074_v60 = vadd.f32 %v9763_v62, %v9651_v34  ;;  %v14036_v13 = vld [vmem:[#allocation9 + $0x608] ss:$12 sps:$4 sm:$0xff]  }
 0x4af   :  { %v9656_v50 = vpop.f32.mrf.mxu0  ;;  %10295 = vmatmul.mubr.bf16.gmra.mxu0 %v16955_v27  ;;  %12667 = vmatprep.subr.bf16.mxu1 %v14031_v42  ;;  %v16957_v57 = vld [vmem:[#allocation73_spill] sm:$0xff]  ;;  %v16958_v34 = vld [vmem:[#allocation76_spill] sm:$0xff] }
 0x4b0   :  { %v9657_v18 = vadd.f32 %v9656_v50, %v15951_v48  ;;  %v9771_v17 = vpop.f32.mrf.mxu1  ;;  %10302 = vmatprep.mubr.bf16.mxu0 %v16956_v20  ;;  %12564 = vmatpush3.bf16.msra.mxu0 %v14033_v26  ;;  %v16079_v46 = vadd.f32 %v9765_v52, %v9653_v6  ;;  %v14037_v50 = vld [vmem:[#allocation9 + $0x7d0] ss:$12 sps:$4 sm:$0xff]  }
 0x4b1   :  { %v9658_v29 = vpop.f32.mrf.mxu0  ;;  %10376 = vmatmul.mubr.bf16.gmra.mxu1 %v16957_v57  ;;  %12565 = vmatprep.subr.bf16.mxu0 %v14035_v59 }
 0x4b2   :  { %v9659_v49 = vadd.f32 %v9658_v29, %v15955_v38  ;;  %v9773_v62 = vpop.f32.mrf.mxu1  ;;  %10383 = vmatprep.mubr.bf16.mxu1 %v16958_v34  ;;  %12668 = vmatpush3.bf16.msra.mxu1 %v14031_v42  ;;  %v16084_v15 = vadd.f32 %v9769_v28, %v9657_v18  ;;  %v16959_v42 = vld [vmem:[#allocation63_spill] sm:$0xff] }
 0x4b3   :  { %v9660_v48 = vpop.f32.mrf.mxu0  ;;  %12669 = vmatprep.subr.bf16.mxu1 %v14034_v33  ;;  %v14038_v28 = vld [vmem:[#allocation9 + $0x7b8] ss:$12 sps:$4 sm:$0xff]  }
 0x4b4   :  { %v9661_v26 = vadd.f32 %v9660_v48, %v15958_v23  ;;  %v9775_v27 = vpop.f32.mrf.mxu1  ;;  %12566 = vmatpush3.bf16.msra.mxu0 %v14036_v13  ;;  %v16087_v52 = vadd.f32 %v9771_v17, %v9659_v49  ;;  %v16960_v23 = vld [vmem:[#allocation66_spill] sm:$0xff]  ;;  %v16961_v49 = vld [vmem:[#allocation75_spill] sm:$0xff] }
 0x4b5   :  { %v9662_v6 = vpop.f32.mrf.mxu0 }
 0x4b6   :  { %v9663_v59 = vadd.f32 %v9662_v6, %v15962_v16  ;;  %v9779_v20 = vpop.f32.mrf.mxu1  ;;  %12670 = vmatpush3.bf16.msra.mxu1 %v14034_v33  ;;  %v16090_v38 = vadd.f32 %v9773_v62, %v9661_v26  ;;  %v16962_v62 = vld [vmem:[#allocation78_spill] sm:$0xff]  ;;  %v14039_v26 = vld [vmem:[#allocation9 + $0x7a0] ss:$12 sps:$4 sm:$0xff]  }
 0x4b7   :  { %v9666_v29 = vpop.f32.mrf.mxu0  ;;  %10303 = vmatmul.mubr.bf16.gmra.mxu0 %v16959_v42  ;;  %12671 = vmatprep.subr.bf16.mxu1 %v14037_v50 }
 0x4b8   :  { %v9667_v18 = vadd.f32 %v9666_v29, %v15967_v39  ;;  %v9781_v57 = vpop.f32.mrf.mxu1  ;;  %10310 = vmatprep.mubr.bf16.mxu0 %v16960_v23  ;;  %v16095_v13 = vadd.f32 %v9775_v27, %v9663_v59 }
 0x4b9   :  { %v9668_v17 = vpop.f32.mrf.mxu0  ;;  %10384 = vmatmul.mubr.bf16.gmra.mxu1 %v16961_v49  ;;  %v16964_v49 = vld [vmem:[#allocation68_spill] sm:$0xff] }
 0x4ba   :  { %v9669_v16 = vadd.f32 %v9668_v17, %v15971_v25  ;;  %v9783_v33 = vpop.f32.mrf.mxu1  ;;  %10391 = vmatprep.mubr.bf16.mxu1 %v16962_v62  ;;  %12672 = vmatpush3.bf16.msra.mxu1 %v14037_v50  ;;  %v16100_v34 = vadd.f32 %v9779_v20, %v9667_v18  ;;  %v16963_v17 = vld [vmem:[#allocation65_spill] sm:$0xff] }
 0x4bb   :  { %v9670_v48 = vpop.f32.mrf.mxu0  ;;  %12673 = vmatprep.subr.bf16.mxu1 %v14038_v28  ;;  %v14040_v50 = vld [vmem:[#allocation9 + $0x788] ss:$12 sps:$4 sm:$0xff]  }
 0x4bc   :  { %v9671_v39 = vadd.f32 %v9670_v48, %v15974_v11  ;;  %v9785_v6 = vpop.f32.mrf.mxu1  ;;  %v16103_v29 = vadd.f32 %v9781_v57, %v9669_v16  ;;  %v16965_v16 = vld [vmem:[#allocation77_spill] sm:$0xff] }
 0x4bd   :  { %v9672_v27 = vpop.f32.mrf.mxu0 }
 0x4be   :  { %v9673_v59 = vadd.f32 %v9672_v27, %v15978_v47  ;;  %v9789_v42 = vpop.f32.mrf.mxu1  ;;  %12674 = vmatpush3.bf16.msra.mxu1 %v14038_v28  ;;  %v16106_v25 = vadd.f32 %v9783_v33, %v9671_v39  ;;  %v16966_v33 = vld [vmem:[#allocation80_spill] sm:$0xff] }
 0x4bf   :  { %v9676_v23 = vpop.f32.mrf.mxu0  ;;  %10311 = vmatmul.mubr.bf16.gmra.mxu0 %v16963_v17  ;;  %12675 = vmatprep.subr.bf16.mxu1 %v14039_v26 }
 0x4c0   :  { %v9677_v20 = vadd.f32 %v9676_v23, %v15983_v0  ;;  %v9791_v18 = vpop.f32.mrf.mxu1  ;;  %10318 = vmatprep.mubr.bf16.mxu0 %v16964_v49  ;;  %v16111_v11 = vadd.f32 %v9785_v6, %v9673_v59  ;;  %v16967_v49 = vld [vmem:[#allocation67_spill] sm:$0xff] }
 0x4c1   :  { %v9678_v57 = vpop.f32.mrf.mxu0  ;;  %10392 = vmatmul.mubr.bf16.gmra.mxu1 %v16965_v16 }
 0x4c2   :  { %v9679_v47 = vadd.f32 %v9678_v57, %v15989_v54  ;;  %v9793_v28 = vpop.f32.mrf.mxu1  ;;  %10399 = vmatprep.mubr.bf16.mxu1 %v16966_v33  ;;  %12676 = vmatpush3.bf16.msra.mxu1 %v14039_v26  ;;  %v16116_v62 = vadd.f32 %v9789_v42, %v9677_v20  ;;  %v16968_v20 = vld [vmem:[#allocation70_spill] sm:$0xff] }
 0x4c3   :  { %v9680_v48 = vpop.f32.mrf.mxu0  ;;  %12677 = vmatprep.subr.bf16.mxu1 %v14040_v50 }
 0x4c4   :  { %v9681_v0 = vadd.f32 %v9680_v48, %v15992_v36  ;;  %v9795_v39 = vpop.f32.mrf.mxu1  ;;  %v16119_v27 = vadd.f32 %v9791_v18, %v9679_v47  ;;  %v16969_v18 = vld [vmem:[#allocation79_spill] sm:$0xff]  ;;  %v16970_v47 = vld [vmem:[#allocation82_spill] sm:$0xff] }
 0x4c5   :  { %v9682_v6 = vpop.f32.mrf.mxu0 }
 0x4c6   :  { %v9683_v59 = vadd.f32 %v9682_v6, %v15997_v56  ;;  %v9799_v23 = vpop.f32.mrf.mxu1  ;;  %12678 = vmatpush3.bf16.msra.mxu1 %v14040_v50  ;;  %v16122_v17 = vadd.f32 %v9793_v28, %v9681_v0 }
 0x4c7   :  { %v9686_v54 = vpop.f32.mrf.mxu0  ;;  %10319 = vmatmul.mubr.bf16.gmra.mxu0 %v16967_v49  ;;  %v16971_v49 = vld [vmem:[#allocation69_spill] sm:$0xff] }
 0x4c8   :  { %v9687_v26 = vadd.f32 %v9686_v54, %v16002_v41  ;;  %v9801_v42 = vpop.f32.mrf.mxu1  ;;  %10326 = vmatprep.mubr.bf16.mxu0 %v16968_v20  ;;  %v16127_v57 = vadd.f32 %v9795_v39, %v9683_v59 }
 0x4c9   :  { %v9688_v36 = vpop.f32.mrf.mxu0  ;;  %10400 = vmatmul.mubr.bf16.gmra.mxu1 %v16969_v18  ;;  %v16974_v18 = vld [vmem:[#allocation84_spill] sm:$0xff] }
 0x4ca   :  { %v9689_v16 = vadd.f32 %v9688_v36, %v16006_v43  ;;  %v9803_v56 = vpop.f32.mrf.mxu1  ;;  %10407 = vmatprep.mubr.bf16.mxu1 %v16970_v47  ;;  %v16132_v50 = vadd.f32 %v9799_v23, %v9687_v26  ;;  %v16972_v23 = vld [vmem:[#allocation88_spill] sm:$0xff]  ;;  %v16973_v36 = vld [vmem:[#allocation81_spill] sm:$0xff] }
 0x4cb   :  { %v9690_v28 = vpop.f32.mrf.mxu0 }
 0x4cc   :  { %v9691_v33 = vadd.f32 %v9690_v28, %v16009_v30  ;;  %v9805_v48 = vpop.f32.mrf.mxu1  ;;  %v16135_v41 = vadd.f32 %v9801_v42, %v9689_v16 }
 0x4cd   :  { %v9692_v0 = vpop.f32.mrf.mxu0 }
 0x4ce   :  { %v9693_v39 = vadd.f32 %v9692_v0, %v16013_v8  ;;  %v9809_v6 = vpop.f32.mrf.mxu1  ;;  %v16138_v59 = vadd.f32 %v9803_v56, %v9691_v33 }
 0x4cf   :  { %v9696_v54 = vpop.f32.mrf.mxu0  ;;  %10327 = vmatmul.mubr.bf16.gmra.mxu0 %v16971_v49  ;;  %v16976_v49 = vld [vmem:[#allocation89_spill] sm:$0xff] }
 0x4d0   :  { %v9697_v43 = vadd.f32 %v9696_v54, %v16018_v10  ;;  %v9811_v20 = vpop.f32.mrf.mxu1  ;;  %10464 = vmatprep.mubr.bf16.mxu0 %v16972_v23  ;;  %v16143_v26 = vadd.f32 %v9805_v48, %v9693_v39  ;;  %v16975_v54 = vld [vmem:[#allocation87_spill] sm:$0xff] }
 0x4d1   :  { %v9698_v30 = vpop.f32.mrf.mxu0  ;;  %10408 = vmatmul.mubr.bf16.gmra.mxu1 %v16973_v36  ;;  %v16977_v23 = vld [vmem:[#allocation83_spill] sm:$0xff] }
 0x4d2   :  { %v9699_v42 = vadd.f32 %v9698_v30, %v16022_v3  ;;  %10415 = vmatprep.mubr.bf16.mxu1 %v16974_v18  ;;  %v16148_v8 = vadd.f32 %v9809_v6, %v9697_v43  ;;  %v9813_v16 = vpop.f32.mrf.mxu1 }
 0x4d3   :  { %v9700_v56 = vpop.f32.mrf.mxu0 }
 0x4d4   :  { %v9701_v47 = vadd.f32 %v9700_v56, %v16025_v2  ;;  %v16151_v28 = vadd.f32 %v9811_v20, %v9699_v42  ;;  %v9815_v0 = vpop.f32.mrf.mxu1  ;;  %v16978_v20 = vld [vmem:[#allocation86_spill] sm:$0xff]  ;;  %v16979_v56 = vld [vmem:[#allocation85_spill] sm:$0xff] }
 0x4d5   :  { %v9702_v10 = vpop.f32.mrf.mxu0 }
 0x4d6   :  { %v9703_v33 = vadd.f32 %v9702_v10, %v16028_v24  ;;  %v16154_v48 = vadd.f32 %v9813_v16, %v9701_v47 }
 0x4d7   :  { %v9852_v39 = vpop.f32.mrf.mxu0  ;;  %10465 = vmatmul.mubr.bf16.vlgmr.msra.gmra.mxu0 %v16975_v54 }
 0x4d8   :  { %v9853_v3 = vadd.f32 %v9852_v39, %v16035_v61  ;;  %10472 = vmatprep.mubr.bf16.mxu0 %v16976_v49  ;;  %v16159_v6 = vadd.f32 %v9815_v0, %v9703_v33 }
 0x4d9   :  { %v9854_v43 = vpop.f32.mrf.mxu0  ;;  %10416 = vmatmul.mubr.bf16.gmra.mxu1 %v16977_v23 }
 0x4da   :  { %v9855_v2 = vadd.f32 %v9854_v43, %v16038_v44  ;;  %10423 = vmatprep.mubr.bf16.mxu1 %v16978_v20 }
 0x4db   :  { %v9856_v24 = vpop.f32.mrf.mxu0 }
 0x4dc   :  { %v9857_v30 = vadd.f32 %v9856_v24, %v16041_v4 }
 0x4dd   :  { %v9858_v36 = vpop.f32.mrf.mxu0 }
 0x4de   :  { %v9859_v42 = vadd.f32 %v9858_v36, %v16046_v37 }
 0x4df   :  { %v9862_v18 = vpop.f32.mrf.mxu0  ;;  %10473 = vmatmul.mubr.bf16.gmra.mxu0 %v15581_v40 }
 0x4e0   :  { %v9863_v61 = vadd.f32 %v9862_v18, %v16051_v32  ;;  %10480 = vmatprep.mubr.bf16.mxu0 %v15599_v51 }
 0x4e1   :  { %v9864_v16 = vpop.f32.mrf.mxu0  ;;  %10424 = vmatmul.mubr.bf16.gmra.mxu1 %v16979_v56 }
 0x4e2   :  { %v9865_v44 = vadd.f32 %v9864_v16, %v16054_v19  ;;  %12679 = vmatprep.mubr.bf16.mxu1 %v15807_v9  ;;  %v16184_v9 = vld [vmem:[#allocation12] sm:$0x7] }
 0x4e3   :  { %v9866_v47 = vpop.f32.mrf.mxu0  ;;  %v16195_v54 = vrot.slane %v16184_v9, %v16910_v55 }
 0x4e4   :  { %v16173_v4 = vadd.f32 %v9866_v47, %v16057_v12 }
 0x4e5   :  { %v9868_v10 = vpop.f32.mrf.mxu0 }
 0x4e6   :  { %v16176_v37 = vadd.f32 %v9868_v10, %v16062_v5 }
 0x4e7   :  { %v9872_v40 = vpop.f32.mrf.mxu0  ;;  %10481 = vmatmul.mubr.bf16.gmra.mxu0 %v15595_v1 }
 0x4e8   :  { %v16180_v51 = vadd.f32 %v9872_v40, %v16068_v7  ;;  %10488 = vmatprep.mubr.bf16.mxu0 %v15613_v22  ;;  %v9965_v32 = vpop.f32.mrf.mxu1 }
 0x4e9   :  { %v9874_v19 = vpop.f32.mrf.mxu0  ;;  %v9966_v33 = vadd.f32 %v9965_v32, %v9853_v3  ;;  %12680 = vmatmul.mubr.bf16.vlgmr.msra.gmra.mxu1 %v15822_v58  ;;  %v16199_v58 = vrot.slane %v16184_v9, %v16911_v35 }
 0x4ea   :  { %v16187_v12 = vadd.f32 %v9874_v19, %v16071_v63  ;;  %12683 = vmatprep.mubr.bf16.mxu1 %v15837_v53  ;;  %v9967_v5 = vpop.f32.mrf.mxu1 }
 0x4eb   :  { %vm10626_vm0 = vcmp.ge.f32.partialorder %v9966_v33, 0.0  ;;  %v10674_v1 = vmul.f32 0.2, %v9966_v33  ;;  %v9876_v0 = vpop.f32.mrf.mxu0  ;;  %v9968_v7 = vadd.f32 %v9967_v5, %v9855_v2 }
 0x4ec   :  { %v16191_v39 = vadd.f32 %v9876_v0, %v16074_v60  ;;  %v9969_v22 = vpop.f32.mrf.mxu1 }
 0x4ed   :  { %vm10627_vm1 = vcmp.ge.f32.partialorder %v9968_v7, 0.0  ;;  %v10675_v63 = vmul.f32 0.2, %v9968_v7  ;;  %v9878_v53 = vpop.f32.mrf.mxu0  ;;  %v9970_v3 = vadd.f32 %v9969_v22, %v9857_v30  ;;  %v10722_v49 = vsel %vm10626_vm0, %v9966_v33, %v10674_v1 }
 0x4ee   :  { %v16202_v43 = vadd.f32 %v9878_v53, %v16079_v46  ;;  %v9971_v23 = vpop.f32.mrf.mxu1  ;;  %v10787_v30 = vmul.f32 %v16195_v54, %v10722_v49  ;;  %v16981_v49 = vld [vmem:[#allocation92_spill] sm:$0xff] }
 0x4ef   :  { %vm10629_vm2 = vcmp.ge.f32.partialorder %v9970_v3, 0.0  ;;  %v10677_v60 = vmul.f32 0.2, %v9970_v3  ;;  %v9882_v2 = vpop.f32.mrf.mxu0  ;;  %v9972_v20 = vadd.f32 %v9971_v23, %v9859_v42  ;;  %10489 = vmatmul.mubr.bf16.gmra.mxu0 %v15609_v31  ;;  %v10723_v55 = vsel %vm10627_vm1, %v9968_v7, %v10675_v63  ;;  %v16980_v63 = vld [vmem:[#allocation90_spill] sm:$0xff] }
 0x4f0   :  { %v16206_v24 = vadd.f32 %v9882_v2, %v16084_v15  ;;  %10496 = vmatprep.mubr.bf16.mxu0 %v15627_v21  ;;  %v9975_v35 = vpop.f32.mrf.mxu1  ;;  %v10788_v36 = vmul.f32 %v16199_v58, %v10723_v55 }
 0x4f1   :  { %v10725_v46 = vsel %vm10629_vm2, %v9970_v3, %v10677_v60  ;;  %vm10630_vm3 = vcmp.ge.f32.partialorder %v9972_v20, 0.0  ;;  %v10678_v18 = vmul.f32 0.2, %v9972_v20  ;;  %v9884_v16 = vpop.f32.mrf.mxu0  ;;  %v9976_v56 = vadd.f32 %v9975_v35, %v9863_v61  ;;  %12684 = vmatmul.mubr.bf16.gmra.mxu1 %v15850_v45 }
 0x4f2   :  { %v16213_v31 = vadd.f32 %v9884_v16, %v16087_v52  ;;  %12687 = vmatprep.mubr.bf16.mxu1 %v15865_v14  ;;  %v9977_v15 = vpop.f32.mrf.mxu1  ;;  %v16216_v42 = vadd.f32 %v10788_v36, %v10787_v30  ;;  %v10790_v61 = vmul.f32 %v16195_v54, %v10725_v46 }
 0x4f3   :  { %v10726_v21 = vsel %vm10630_vm3, %v9972_v20, %v10678_v18  ;;  %vm10632_vm4 = vcmp.ge.f32.partialorder %v9976_v56, 0.0  ;;  %v10680_v47 = vmul.f32 0.2, %v9976_v56  ;;  %v9886_v10 = vpop.f32.mrf.mxu0  ;;  %v9978_v40 = vadd.f32 %v9977_v15, %v9865_v44 }
 0x4f4   :  { %v16219_v32 = vadd.f32 %v9886_v10, %v16090_v38  ;;  %v9979_v19 = vpop.f32.mrf.mxu1  ;;  %v10791_v45 = vmul.f32 %v16199_v58, %v10726_v21 }
 0x4f5   :  { %vm10633_vm5 = vcmp.ge.f32.partialorder %v9978_v40, 0.0  ;;  %v10681_v52 = vmul.f32 0.2, %v9978_v40  ;;  %v9888_v33 = vpop.f32.mrf.mxu0  ;;  %v9980_v14 = vadd.f32 %v9979_v19, %v16173_v4  ;;  %v10728_v5 = vsel %vm10632_vm4, %v9976_v56, %v10680_v47 }
 0x4f6   :  { %v16225_v1 = vadd.f32 %v9888_v33, %v16095_v13  ;;  %v9981_v0 = vpop.f32.mrf.mxu1  ;;  %v16227_v7 = vadd.f32 %v10791_v45, %v10790_v61  ;;  %v10793_v13 = vmul.f32 %v16195_v54, %v10728_v5  ;;  %v16984_v5 = vld [vmem:[#allocation91_spill] sm:$0xff] }
 0x4f7   :  { %vm10635_vm6 = vcmp.ge.f32.partialorder %v9980_v14, 0.0  ;;  %v10683_v38 = vmul.f32 0.2, %v9980_v14  ;;  %v9892_v44 = vpop.f32.mrf.mxu0  ;;  %v9982_v22 = vadd.f32 %v9981_v0, %v16176_v37  ;;  %10497 = vmatmul.mubr.bf16.gmra.mxu0 %v16980_v63  ;;  %v10729_v53 = vsel %vm10633_vm5, %v9978_v40, %v10681_v52  ;;  %v16982_v37 = vld [vmem:[#allocation97_spill] sm:$0xff] }
 0x4f8   :  { %v16232_v3 = vadd.f32 %v9892_v44, %v16100_v34  ;;  %10504 = vmatprep.mubr.bf16.mxu0 %v16981_v49  ;;  %v9985_v4 = vpop.f32.mrf.mxu1  ;;  %v10794_v23 = vmul.f32 %v16199_v58, %v10729_v53  ;;  %v16983_v34 = vld [vmem:[#allocation98_spill] sm:$0xff] }
 0x4f9   :  { %v10731_v60 = vsel %vm10635_vm6, %v9980_v14, %v10683_v38  ;;  %vm10636_vm7 = vcmp.ge.f32.partialorder %v9982_v22, 0.0  ;;  %v10684_v2 = vmul.f32 0.2, %v9982_v22  ;;  %v9894_v20 = vpop.f32.mrf.mxu0  ;;  %v9986_v55 = vadd.f32 %v9985_v4, %v16180_v51  ;;  %12688 = vmatmul.mubr.bf16.gmra.mxu1 %v16982_v37  ;;  %v16985_v38 = vld [vmem:[#allocation94_spill] sm:$0xff]  ;;  %v16986_v4 = vld [vmem:[#allocation99_spill] sm:$0xff] }
 0x4fa   :  { %v16240_v35 = vadd.f32 %v9894_v20, %v16103_v29  ;;  %12691 = vmatprep.mubr.bf16.mxu1 %v16983_v34  ;;  %v9987_v30 = vpop.f32.mrf.mxu1  ;;  %v16243_v36 = vadd.f32 %v10794_v23, %v10793_v13  ;;  %v10796_v21 = vmul.f32 %v16195_v54, %v10731_v60 }
 0x4fb   :  { %v10732_v46 = vsel %vm10636_vm7, %v9982_v22, %v10684_v2  ;;  %vm10638_vm8 = vcmp.ge.f32.partialorder %v9986_v55, 0.0  ;;  %v10686_v18 = vmul.f32 0.2, %v9986_v55  ;;  %v9896_v16 = vpop.f32.mrf.mxu0  ;;  %v9988_v56 = vadd.f32 %v9987_v30, %v16187_v12 }
 0x4fc   :  { %v16247_v15 = vadd.f32 %v9896_v16, %v16106_v25  ;;  %v9989_v51 = vpop.f32.mrf.mxu1  ;;  %v10797_v29 = vmul.f32 %v16199_v58, %v10732_v46 }
 0x4fd   :  { %v10734_v47 = vsel %vm10638_vm8, %v9986_v55, %v10686_v18  ;;  %vm10639_vm9 = vcmp.ge.f32.partialorder %v9988_v56, 0.0  ;;  %v10687_v10 = vmul.f32 0.2, %v9988_v56  ;;  %v9898_v40 = vpop.f32.mrf.mxu0  ;;  %v9990_v19 = vadd.f32 %v9989_v51, %v16191_v39 }
 0x4fe   :  { %v16253_v61 = vadd.f32 %v9898_v40, %v16111_v11  ;;  %v9991_v45 = vpop.f32.mrf.mxu1  ;;  %v16255_v52 = vadd.f32 %v10797_v29, %v10796_v21  ;;  %v10799_v11 = vmul.f32 %v16195_v54, %v10734_v47  ;;  %v16989_v47 = vld [vmem:[#allocation93_spill] sm:$0xff]  ;;  %v16990_v40 = vld [vmem:[#allocation96_spill] sm:$0xff] }
 0x4ff   :  { %v10735_v12 = vsel %vm10639_vm9, %v9988_v56, %v10687_v10  ;;  %vm10641_vm10 = vcmp.ge.f32.partialorder %v9990_v19, 0.0  ;;  %v10689_v25 = vmul.f32 0.2, %v9990_v19  ;;  %v9902_v33 = vpop.f32.mrf.mxu0  ;;  %v9992_v14 = vadd.f32 %v9991_v45, %v16202_v43  ;;  %10505 = vmatmul.mubr.bf16.gmra.mxu0 %v16984_v5 }
 0x500   :  { %v16260_v0 = vadd.f32 %v9902_v33, %v16116_v62  ;;  %10512 = vmatprep.mubr.bf16.mxu0 %v16985_v38  ;;  %v9995_v39 = vpop.f32.mrf.mxu1  ;;  %v10800_v44 = vmul.f32 %v16199_v58, %v10735_v12 }
 0x501   :  { %v10737_v22 = vsel %vm10641_vm10, %v9990_v19, %v10689_v25  ;;  %vm10642_vm11 = vcmp.ge.f32.partialorder %v9992_v14, 0.0  ;;  %v10690_v63 = vmul.f32 0.2, %v9992_v14  ;;  %v9904_v53 = vpop.f32.mrf.mxu0  ;;  %v9996_v49 = vadd.f32 %v9995_v39, %v16206_v24  ;;  %12692 = vmatmul.mubr.bf16.gmra.mxu1 %v16986_v4 }
 0x502   :  { %v16268_v43 = vadd.f32 %v9904_v53, %v16119_v27  ;;  %v9997_v62 = vpop.f32.mrf.mxu1  ;;  %v16270_v13 = vadd.f32 %v10800_v44, %v10799_v11  ;;  %v10802_v24 = vmul.f32 %v16195_v54, %v10737_v22 }
 0x503   :  { %v10738_v23 = vsel %vm10642_vm11, %v9992_v14, %v10690_v63  ;;  %vm10644_vm12 = vcmp.ge.f32.partialorder %v9996_v49, 0.0  ;;  %v10692_v60 = vmul.f32 0.2, %v9996_v49  ;;  %v9906_v2 = vpop.f32.mrf.mxu0  ;;  %v9998_v20 = vadd.f32 %v9997_v62, %v16213_v31 }
 0x504   :  { %16987 = vst [vmem:[#allocation100_spill] sm:$0xff] %v16270_v13  ;;  %v16274_v55 = vadd.f32 %v9906_v2, %v16122_v17  ;;  %v9999_v37 = vpop.f32.mrf.mxu1  ;;  %v10803_v34 = vmul.f32 %v16199_v58, %v10738_v23 }
 0x505   :  { %v10740_v30 = vsel %vm10644_vm12, %v9996_v49, %v10692_v60  ;;  %vm10645_vm13 = vcmp.ge.f32.partialorder %v9998_v20, 0.0  ;;  %v10693_v27 = vmul.f32 0.2, %v9998_v20  ;;  %v9908_v46 = vpop.f32.mrf.mxu0  ;;  %v10000_v18 = vadd.f32 %v9999_v37, %v16219_v32  ;;  %v16993_v37 = vld [vmem:[#allocation95_spill] sm:$0xff] }
 0x506   :  { %v16280_v16 = vadd.f32 %v9908_v46, %v16127_v57  ;;  %v10001_v56 = vpop.f32.mrf.mxu1  ;;  %v16282_v51 = vadd.f32 %v10803_v34, %v10802_v24  ;;  %v10805_v57 = vmul.f32 %v16195_v54, %v10740_v30 }
 0x507   :  { %v10741_v31 = vsel %vm10645_vm13, %v9998_v20, %v10693_v27  ;;  %vm10647_vm14 = vcmp.ge.f32.partialorder %v10000_v18, 0.0  ;;  %v10695_v17 = vmul.f32 0.2, %v10000_v18  ;;  %v9912_v21 = vpop.f32.mrf.mxu0  ;;  %v10002_v29 = vadd.f32 %v10001_v56, %v16225_v1  ;;  %10513 = vmatmul.mubr.bf16.gmra.mxu0 %v16989_v47 }
 0x508   :  { %16988 = vst [vmem:[#allocation102_spill] sm:$0xff] %v16282_v51  ;;  %v16287_v10 = vadd.f32 %v9912_v21, %v16132_v50  ;;  %10520 = vmatprep.mubr.bf16.mxu0 %v16990_v40  ;;  %v10005_v32 = vpop.f32.mrf.mxu1  ;;  %v10806_v19 = vmul.f32 %v16199_v58, %v10741_v31 }
 0x509   :  { %v10743_v45 = vsel %vm10647_vm14, %v10000_v18, %v10695_v17  ;;  %vm10648_vm15 = vcmp.ge.f32.partialorder %v10002_v29, 0.0  ;;  %v10696_v12 = vmul.f32 0.2, %v10002_v29  ;;  %v9914_v25 = vpop.f32.mrf.mxu0  ;;  %v10006_v33 = vadd.f32 %v10005_v32, %v16232_v3 }
 0x50a   :  { %v16294_v1 = vadd.f32 %v9914_v25, %v16135_v41  ;;  %v10007_v14 = vpop.f32.mrf.mxu1  ;;  %v16296_v5 = vadd.f32 %v10806_v19, %v10805_v57  ;;  %v10808_v63 = vmul.f32 %v16195_v54, %v10743_v45 }
 0x50b   :  { %v10744_v50 = vsel %vm10648_vm15, %v10002_v29, %v10696_v12  ;;  %vm10650_vm0 = vcmp.ge.f32.partialorder %v10006_v33, 0.0  ;;  %v10698_v38 = vmul.f32 0.2, %v10006_v33  ;;  %v9916_v39 = vpop.f32.mrf.mxu0  ;;  %v10008_v11 = vadd.f32 %v10007_v14, %v16240_v35 }
 0x50c   :  { %16991 = vst [vmem:[#allocation101_spill] sm:$0xff] %v16296_v5  ;;  %v16300_v44 = vadd.f32 %v9916_v39, %v16138_v59  ;;  %v10009_v22 = vpop.f32.mrf.mxu1  ;;  %v10809_v3 = vmul.f32 %v16199_v58, %v10744_v50 }
 0x50d   :  { %v10746_v53 = vsel %vm10650_vm0, %v10006_v33, %v10698_v38  ;;  %vm10651_vm1 = vcmp.ge.f32.partialorder %v10008_v11, 0.0  ;;  %v10699_v41 = vmul.f32 0.2, %v10008_v11  ;;  %v9918_v49 = vpop.f32.mrf.mxu0  ;;  %v10010_v4 = vadd.f32 %v10009_v22, %v16247_v15 }
 0x50e   :  { %v16306_v62 = vadd.f32 %v9918_v49, %v16143_v26  ;;  %v10011_v23 = vpop.f32.mrf.mxu1  ;;  %v16308_v60 = vadd.f32 %v10809_v3, %v10808_v63  ;;  %v10811_v15 = vmul.f32 %v16195_v54, %v10746_v53 }
 0x50f   :  { %v10747_v35 = vsel %vm10651_vm1, %v10008_v11, %v10699_v41  ;;  %vm10653_vm2 = vcmp.ge.f32.partialorder %v10010_v4, 0.0  ;;  %v10701_v59 = vmul.f32 0.2, %v10010_v4  ;;  %v9922_v2 = vpop.f32.mrf.mxu0  ;;  %v10012_v20 = vadd.f32 %v10011_v23, %v16253_v61  ;;  %10521 = vmatmul.mubr.bf16.gmra.mxu0 %v16993_v37 }
 0x510   :  { %16992 = vst [vmem:[#allocation103_spill] sm:$0xff] %v16308_v60  ;;  %v16313_v24 = vadd.f32 %v9922_v2, %v16148_v8  ;;  %v10015_v34 = vpop.f32.mrf.mxu1  ;;  %v10812_v26 = vmul.f32 %v16199_v58, %v10747_v35 }
 0x511   :  { %v10749_v30 = vsel %vm10653_vm2, %v10010_v4, %v10701_v59  ;;  %vm10654_vm3 = vcmp.ge.f32.partialorder %v10012_v20, 0.0  ;;  %v10702_v27 = vmul.f32 0.2, %v10012_v20  ;;  %v9924_v46 = vpop.f32.mrf.mxu0  ;;  %v10016_v18 = vadd.f32 %v10015_v34, %v16260_v0 }
 0x512   :  { %v16319_v56 = vadd.f32 %v9924_v46, %v16151_v28  ;;  %v10017_v61 = vpop.f32.mrf.mxu1  ;;  %v16321_v31 = vadd.f32 %v10812_v26, %v10811_v15  ;;  %v10814_v32 = vmul.f32 %v16195_v54, %v10749_v30 }
 0x513   :  { %v10750_v17 = vsel %vm10654_vm3, %v10012_v20, %v10702_v27  ;;  %vm10656_vm4 = vcmp.ge.f32.partialorder %v10016_v18, 0.0  ;;  %v10704_v8 = vmul.f32 0.2, %v10016_v18  ;;  %v9926_v21 = vpop.f32.mrf.mxu0  ;;  %v10018_v29 = vadd.f32 %v10017_v61, %v16268_v43 }
 0x514   :  { %16994 = vst [vmem:[#allocation23_spill] sm:$0xff] %v16321_v31  ;;  %v16325_v47 = vadd.f32 %v9926_v21, %v16154_v48  ;;  %v10019_v40 = vpop.f32.mrf.mxu1  ;;  %v10815_v0 = vmul.f32 %v16199_v58, %v10750_v17 }
 0x515   :  { %v10752_v57 = vsel %vm10656_vm4, %v10016_v18, %v10704_v8  ;;  %vm10657_vm5 = vcmp.ge.f32.partialorder %v10018_v29, 0.0  ;;  %v10705_v28 = vmul.f32 0.2, %v10018_v29  ;;  %v9928_v19 = vpop.f32.mrf.mxu0  ;;  %v10020_v45 = vadd.f32 %v10019_v40, %v16274_v55 }
 0x516   :  { %v16331_v12 = vadd.f32 %v9928_v19, %v16159_v6  ;;  %v10021_v25 = vpop.f32.mrf.mxu1  ;;  %v16333_v33 = vadd.f32 %v10815_v0, %v10814_v32  ;;  %v10817_v38 = vmul.f32 %v16195_v54, %v10752_v57 }
 0x517   :  { %v10753_v43 = vsel %vm10657_vm5, %v10018_v29, %v10705_v28  ;;  %vm10659_vm6 = vcmp.ge.f32.partialorder %v10020_v45, 0.0  ;;  %v10707_v48 = vmul.f32 0.2, %v10020_v45  ;;  %v10022_v14 = vadd.f32 %v10021_v25, %v16280_v16  ;;  %v12311_v50 = vpop.f32.mrf.mxu0 }
 0x518   :  { %16995 = vst [vmem:[#allocation104_spill] sm:$0xff] %v16333_v33  ;;  %v10818_v39 = vmul.f32 %v16199_v58, %v10753_v43 }
 0x519   :  { %vm10660_vm7 = vcmp.ge.f32.partialorder %v10022_v14, 0.0  ;;  %v10708_v11 = vmul.f32 0.2, %v10022_v14  ;;  %v10025_v22 = vpop.f32.mrf.mxu1  ;;  %v12312_v55 = vpop.f32.mrf.mxu0  ;;  %v10755_v63 = vsel %vm10659_vm6, %v10020_v45, %v10707_v48 }
 0x51a   :  { %v10026_v6 = vadd.f32 %v10025_v22, %v16287_v10  ;;  %v16339_v3 = vadd.f32 %v12312_v55, %v12311_v50  ;;  %v16341_v53 = vadd.f32 %v10818_v39, %v10817_v38  ;;  %v10820_v2 = vmul.f32 %v16195_v54, %v10755_v63  ;;  %v14382_v39 = vld [vmem:[#allocation11] sm:$0x7] }
 0x51b   :  { %v10756_v41 = vsel %vm10660_vm7, %v10022_v14, %v10708_v11  ;;  %v10027_v49 = vpop.f32.mrf.mxu1  ;;  %v12314_v4 = vpop.f32.mrf.mxu0  ;;  %v16999_v11 = vld [vmem:[#allocation34_spill] sm:$0xff] }
 0x51c   :  { %16996 = vst [vmem:[#allocation20_spill] sm:$0xff] %v16341_v53  ;;  %vm10662_vm8 = vcmp.ge.f32.partialorder %v10026_v6, 0.0  ;;  %v10710_v16 = vmul.f32 0.2, %v10026_v6  ;;  %v10028_v23 = vadd.f32 %v10027_v49, %v16294_v1  ;;  %v10821_v20 = vmul.f32 %v16199_v58, %v10756_v41 }
 0x51d   :  { %v10029_v35 = vpop.f32.mrf.mxu1  ;;  %v12315_v59 = vpop.f32.mrf.mxu0  ;;  %v16362_v22 = vrot.slane %v14382_v39, %v16999_v11 }
 0x51e   :  { %v10758_v37 = vsel %vm10662_vm8, %v10026_v6, %v10710_v16  ;;  %vm10663_vm9 = vcmp.ge.f32.partialorder %v10028_v23, 0.0  ;;  %v10711_v10 = vmul.f32 0.2, %v10028_v23  ;;  %v10030_v34 = vadd.f32 %v10029_v35, %v16300_v44 }
 0x51f   :  { %v16347_v15 = vadd.f32 %v12315_v59, %v12314_v4  ;;  %v10031_v26 = vpop.f32.mrf.mxu1  ;;  %v12317_v30 = vpop.f32.mrf.mxu0  ;;  %v16349_v27 = vadd.f32 %v10821_v20, %v10820_v2  ;;  %v10823_v8 = vmul.f32 %v16195_v54, %v10758_v37 }
 0x520   :  { %v10759_v46 = vsel %vm10663_vm9, %v10028_v23, %v10711_v10  ;;  %vm10665_vm10 = vcmp.ge.f32.partialorder %v10030_v34, 0.0  ;;  %v10713_v1 = vmul.f32 0.2, %v10030_v34  ;;  %v10032_v18 = vadd.f32 %v10031_v26, %v16306_v62 }
 0x521   :  { %16997 = vst [vmem:[#allocation21_spill] sm:$0xff] %v16349_v27  ;;  %v10035_v61 = vpop.f32.mrf.mxu1  ;;  %v12318_v17 = vpop.f32.mrf.mxu0  ;;  %v10824_v21 = vmul.f32 %v16199_v58, %v10759_v46  ;;  %v10079_v26 = vadd.f32 %v16339_v3, %v16362_v22 }
 0x522   :  { %v10761_v29 = vsel %vm10665_vm10, %v10030_v34, %v10713_v1  ;;  %vm10666_vm11 = vcmp.ge.f32.partialorder %v10032_v18, 0.0  ;;  %v10714_v44 = vmul.f32 0.2, %v10032_v18  ;;  %v10036_v40 = vadd.f32 %v10035_v61, %v16313_v24 }
 0x523   :  { %v12319_v32 = vadd.f32 %v12318_v17, %v12317_v30  ;;  %v10037_v0 = vpop.f32.mrf.mxu1  ;;  %v12320_v57 = vpop.f32.mrf.mxu0  ;;  %v16355_v28 = vadd.f32 %v10824_v21, %v10823_v8  ;;  %v10826_v48 = vmul.f32 %v16195_v54, %v10761_v29 }
 0x524   :  { %v10762_v19 = vsel %vm10666_vm11, %v10032_v18, %v10714_v44  ;;  %vm10668_vm12 = vcmp.ge.f32.partialorder %v10036_v40, 0.0  ;;  %v10716_v45 = vmul.f32 0.2, %v10036_v40  ;;  %v10038_v62 = vadd.f32 %v10037_v0, %v16319_v56 }
 0x525   :  { %16998 = vst [vmem:[#allocation22_spill] sm:$0xff] %v16355_v28  ;;  %v10039_v25 = vpop.f32.mrf.mxu1  ;;  %v12321_v43 = vpop.f32.mrf.mxu0  ;;  %v10827_v14 = vmul.f32 %v16199_v58, %v10762_v19 }
 0x526   :  { %v10764_v50 = vsel %vm10668_vm12, %v10036_v40, %v10716_v45  ;;  %vm10669_vm13 = vcmp.ge.f32.partialorder %v10038_v62, 0.0  ;;  %v10717_v38 = vmul.f32 0.2, %v10038_v62  ;;  %v10040_v24 = vadd.f32 %v10039_v25, %v16325_v47 }
 0x527   :  { %v12322_v55 = vadd.f32 %v12321_v43, %v12320_v57  ;;  %v10041_v63 = vpop.f32.mrf.mxu1  ;;  %v12323_v6 = vpop.f32.mrf.mxu0  ;;  %v16364_v41 = vadd.f32 %v10827_v14, %v10826_v48  ;;  %v10829_v35 = vmul.f32 %v16195_v54, %v10764_v50  ;;  %v10082_v40 = vadd.f32 %v16347_v15, %v16362_v22 }
 0x528   :  { %v10765_v56 = vsel %vm10669_vm13, %v10038_v62, %v10717_v38  ;;  %vm10671_vm14 = vcmp.ge.f32.partialorder %v10040_v24, 0.0  ;;  %v10719_v49 = vmul.f32 0.2, %v10040_v24  ;;  %v10042_v4 = vadd.f32 %v10041_v63, %v16331_v12 }
 0x529   :  { %17000 = vst [vmem:[#allocation25_spill] sm:$0xff] %v16364_v41  ;;  %v12324_v16 = vpop.f32.mrf.mxu0  ;;  %v12375_v23 = vpop.f32.mrf.mxu1  ;;  %v10830_v47 = vmul.f32 %v16199_v58, %v10765_v56  ;;  %v10090_v15 = vadd.f32 %v12322_v55, %v16362_v22 }
 0x52a   :  { %v10767_v59 = vsel %vm10671_vm14, %v10040_v24, %v10719_v49  ;;  %vm10672_vm15 = vcmp.ge.f32.partialorder %v10042_v4, 0.0  ;;  %v10720_v2 = vmul.f32 0.2, %v10042_v4  ;;  %v12325_v20 = vadd.f32 %v12324_v16, %v12323_v6 }
 0x52b   :  { %v12326_v37 = vpop.f32.mrf.mxu0  ;;  %v12376_v10 = vpop.f32.mrf.mxu1  ;;  %v16369_v34 = vadd.f32 %v10830_v47, %v10829_v35  ;;  %v10832_v18 = vmul.f32 %v16195_v54, %v10767_v59 }
 0x52c   :  { %v10768_v30 = vsel %vm10672_vm15, %v10042_v4, %v10720_v2  ;;  %v12377_v46 = vadd.f32 %v12376_v10, %v12375_v23 }
 0x52d   :  { %17001 = vst [vmem:[#allocation24_spill] sm:$0xff] %v16369_v34  ;;  %v12327_v12 = vpop.f32.mrf.mxu0  ;;  %v12378_v1 = vpop.f32.mrf.mxu1  ;;  %v10833_v61 = vmul.f32 %v16199_v58, %v10768_v30  ;;  %v10087_v58 = vadd.f32 %v12319_v32, %v16362_v22  ;;  %v10095_v32 = vadd.f32 %v12325_v20, %v16362_v22 }
 0x52e   :  { %v16375_v17 = vadd.f32 %v12377_v46, %v10079_v26  ;;  %v12328_v8 = vadd.f32 %v12327_v12, %v12326_v37 }
 0x52f   :  { %v12329_v21 = vpop.f32.mrf.mxu0  ;;  %v12379_v29 = vpop.f32.mrf.mxu1  ;;  %v16377_v44 = vadd.f32 %v10833_v61, %v10832_v18 }
 0x530   :  { %v12380_v0 = vadd.f32 %v12379_v29, %v12378_v1  ;;  %v10098_v55 = vadd.f32 %v12328_v8, %v16362_v22 }
 0x531   :  { %17002 = vst [vmem:[#allocation27_spill] sm:$0xff] %v16377_v44  ;;  %v12330_v3 = vpop.f32.mrf.mxu0  ;;  %v12381_v57 = vpop.f32.mrf.mxu1 }
 0x532   :  { %v16381_v19 = vadd.f32 %v12380_v0, %v10082_v40  ;;  %v12331_v45 = vadd.f32 %v12330_v3, %v12329_v21 }
 0x533   :  { %v12332_v62 = vpop.f32.mrf.mxu0  ;;  %v12382_v54 = vpop.f32.mrf.mxu1 }
 0x534   :  { %v12383_v25 = vadd.f32 %v12382_v54, %v12381_v57  ;;  %v10103_v20 = vadd.f32 %v12331_v45, %v16362_v22 }
 0x535   :  { %v12333_v43 = vpop.f32.mrf.mxu0  ;;  %v12384_v48 = vpop.f32.mrf.mxu1 }
 0x536   :  { %v16384_v14 = vadd.f32 %v12383_v25, %v10087_v58  ;;  %v12334_v50 = vadd.f32 %v12333_v43, %v12332_v62 }
 0x537   :  { %v12335_v38 = vpop.f32.mrf.mxu0  ;;  %v12385_v24 = vpop.f32.mrf.mxu1 }
 0x538   :  { %v12386_v39 = vadd.f32 %v12385_v24, %v12384_v48  ;;  %v10106_v8 = vadd.f32 %v12334_v50, %v16362_v22 }
 0x539   :  { %v12336_v63 = vpop.f32.mrf.mxu0  ;;  %v12387_v6 = vpop.f32.mrf.mxu1 }
 0x53a   :  { %v16387_v56 = vadd.f32 %v12386_v39, %v10090_v15  ;;  %v12337_v49 = vadd.f32 %v12336_v63, %v12335_v38 }
 0x53b   :  { %v12338_v4 = vpop.f32.mrf.mxu0  ;;  %v12388_v16 = vpop.f32.mrf.mxu1 }
 0x53c   :  { %v12389_v23 = vadd.f32 %v12388_v16, %v12387_v6  ;;  %v10111_v45 = vadd.f32 %v12337_v49, %v16362_v22 }
 0x53d   :  { %v12339_v35 = vpop.f32.mrf.mxu0  ;;  %v12390_v47 = vpop.f32.mrf.mxu1 }
 0x53e   :  { %v16390_v59 = vadd.f32 %v12389_v23, %v10095_v32  ;;  %v12340_v2 = vadd.f32 %v12339_v35, %v12338_v4 }
 0x53f   :  { %v12341_v37 = vpop.f32.mrf.mxu0  ;;  %v12391_v10 = vpop.f32.mrf.mxu1 }
 0x540   :  { %v12392_v26 = vadd.f32 %v12391_v10, %v12390_v47  ;;  %v10114_v50 = vadd.f32 %v12340_v2, %v16362_v22 }
 0x541   :  { %v12342_v30 = vpop.f32.mrf.mxu0  ;;  %v12393_v46 = vpop.f32.mrf.mxu1 }
 0x542   :  { %v16393_v12 = vadd.f32 %v12392_v26, %v10098_v55  ;;  %v12343_v1 = vadd.f32 %v12342_v30, %v12341_v37 }
 0x543   :  { %v12344_v18 = vpop.f32.mrf.mxu0  ;;  %v12394_v61 = vpop.f32.mrf.mxu1 }
 0x544   :  { %v12395_v21 = vadd.f32 %v12394_v61, %v12393_v46  ;;  %v10119_v49 = vadd.f32 %v12343_v1, %v16362_v22 }
 0x545   :  { %v12345_v29 = vpop.f32.mrf.mxu0  ;;  %v12396_v40 = vpop.f32.mrf.mxu1 }
 0x546   :  { %v16396_v0 = vadd.f32 %v12395_v21, %v10103_v20  ;;  %v12346_v3 = vadd.f32 %v12345_v29, %v12344_v18 }
 0x547   :  { %v12347_v57 = vpop.f32.mrf.mxu0  ;;  %v12397_v62 = vpop.f32.mrf.mxu1 }
 0x548   :  { %v12398_v54 = vadd.f32 %v12397_v62, %v12396_v40  ;;  %v10122_v2 = vadd.f32 %v12346_v3, %v16362_v22 }
 0x549   :  { %v12348_v58 = vpop.f32.mrf.mxu0  ;;  %v12399_v25 = vpop.f32.mrf.mxu1 }
 0x54a   :  { %v16399_v43 = vadd.f32 %v12398_v54, %v10106_v8  ;;  %v12349_v48 = vadd.f32 %v12348_v58, %v12347_v57 }
 0x54b   :  { %v12350_v38 = vpop.f32.mrf.mxu0  ;;  %v12400_v24 = vpop.f32.mrf.mxu1 }
 0x54c   :  { %v12401_v15 = vadd.f32 %v12400_v24, %v12399_v25  ;;  %v10127_v1 = vadd.f32 %v12349_v48, %v16362_v22 }
 0x54d   :  { %v12351_v39 = vpop.f32.mrf.mxu0  ;;  %v12402_v63 = vpop.f32.mrf.mxu1 }
 0x54e   :  { %v16402_v6 = vadd.f32 %v12401_v15, %v10111_v45  ;;  %v12352_v4 = vadd.f32 %v12351_v39, %v12350_v38 }
 0x54f   :  { %v12353_v16 = vpop.f32.mrf.mxu0  ;;  %v12403_v32 = vpop.f32.mrf.mxu1 }
 0x550   :  { %v12404_v23 = vadd.f32 %v12403_v32, %v12402_v63  ;;  %v10130_v32 = vadd.f32 %v12352_v4, %v16362_v22 }
 0x551   :  { %v12354_v35 = vpop.f32.mrf.mxu0  ;;  %v12405_v47 = vpop.f32.mrf.mxu1 }
 0x552   :  { %v16405_v37 = vadd.f32 %v12404_v23, %v10114_v50  ;;  %v12355_v10 = vadd.f32 %v12354_v35, %v12353_v16 }
 0x553   :  { %v12356_v55 = vpop.f32.mrf.mxu0  ;;  %v12406_v26 = vpop.f32.mrf.mxu1 }
 0x554   :  { %v12407_v30 = vadd.f32 %v12406_v26, %v12405_v47 }
 0x555   :  { %v12357_v46 = vpop.f32.mrf.mxu0  ;;  %v12408_v18 = vpop.f32.mrf.mxu1 }
 0x556   :  { %v16408_v61 = vadd.f32 %v12407_v30, %v10119_v49  ;;  %v12358_v20 = vadd.f32 %v12357_v46, %v12356_v55  ;;  %v10135_v49 = vadd.f32 %v12355_v10, %v16362_v22 }
 0x557   :  { %v12409_v21 = vpop.f32.mrf.mxu1  ;;  %v12439_v29 = vpop.f32.mrf.mxu0 }
 0x558   :  { %17003 = vst [vmem:[#allocation40_spill] sm:$0xff] %v16408_v61  ;;  %v12410_v40 = vadd.f32 %v12409_v21, %v12408_v18 }
 0x559   :  { %v12411_v57 = vpop.f32.mrf.mxu1  ;;  %v12440_v62 = vpop.f32.mrf.mxu0 }
 0x55a   :  { %v16411_v8 = vadd.f32 %v12410_v40, %v10122_v2  ;;  %v12441_v54 = vadd.f32 %v12440_v62, %v12439_v29  ;;  %v10138_v40 = vadd.f32 %v12358_v20, %v16362_v22 }
 0x55b   :  { %v12412_v58 = vpop.f32.mrf.mxu1  ;;  %v12442_v25 = vpop.f32.mrf.mxu0 }
 0x55c   :  { %17004 = vst [vmem:[#allocation26_spill] sm:$0xff] %v16411_v8  ;;  %v16415_v38 = vadd.f32 %v12441_v54, %v16375_v17  ;;  %v12413_v24 = vadd.f32 %v12412_v58, %v12411_v57 }
 0x55d   :  { %v12414_v45 = vpop.f32.mrf.mxu1  ;;  %v12443_v15 = vpop.f32.mrf.mxu0 }
 0x55e   :  { %v16417_v39 = vadd.f32 %v12413_v24, %v10127_v1  ;;  %v12444_v63 = vadd.f32 %v12443_v15, %v12442_v25 }
 0x55f   :  { %v12415_v3 = vpop.f32.mrf.mxu1  ;;  %v12445_v16 = vpop.f32.mrf.mxu0 }
 0x560   :  { %17005 = vst [vmem:[#allocation29_spill] sm:$0xff] %v16417_v39  ;;  %v16421_v50 = vadd.f32 %v12444_v63, %v16381_v19  ;;  %v12416_v23 = vadd.f32 %v12415_v3, %v12414_v45 }
 0x561   :  { %v12417_v35 = vpop.f32.mrf.mxu1  ;;  %v12446_v47 = vpop.f32.mrf.mxu0 }
 0x562   :  { %v16423_v48 = vadd.f32 %v12416_v23, %v10130_v32  ;;  %v12447_v17 = vadd.f32 %v12446_v47, %v12445_v16 }
 0x563   :  { %v12418_v55 = vpop.f32.mrf.mxu1  ;;  %v12448_v26 = vpop.f32.mrf.mxu0 }
 0x564   :  { %17006 = vst [vmem:[#allocation39_spill] sm:$0xff] %v16423_v48  ;;  %v16427_v30 = vadd.f32 %v12447_v17, %v16384_v14  ;;  %v12419_v46 = vadd.f32 %v12418_v55, %v12417_v35 }
 0x565   :  { %v12420_v18 = vpop.f32.mrf.mxu1  ;;  %v12449_v21 = vpop.f32.mrf.mxu0 }
 0x566   :  { %v16429_v4 = vadd.f32 %v12419_v46, %v10135_v49  ;;  %v12450_v19 = vadd.f32 %v12449_v21, %v12448_v26 }
 0x567   :  { %v12421_v29 = vpop.f32.mrf.mxu1  ;;  %v12451_v2 = vpop.f32.mrf.mxu0 }
 0x568   :  { %17007 = vst [vmem:[#allocation42_spill] sm:$0xff] %v16429_v4  ;;  %v16433_v57 = vadd.f32 %v12450_v19, %v16387_v56  ;;  %v12422_v62 = vadd.f32 %v12421_v29, %v12420_v18 }
 0x569   :  { %v12452_v54 = vpop.f32.mrf.mxu0  ;;  %v16435_v58 = vpop.f32.mrf.mxu1 }
 0x56a   :  { %v16437_v10 = vadd.f32 %v12422_v62, %v10138_v40  ;;  %v12453_v14 = vadd.f32 %v12452_v54, %v12451_v2 }
 0x56b   :  { %v12454_v25 = vpop.f32.mrf.mxu0  ;;  %v16439_v1 = vpop.f32.mrf.mxu1 }
 0x56c   :  { %17008 = vst [vmem:[#allocation28_spill] sm:$0xff] %v16437_v10  ;;  %v16442_v24 = vadd.f32 %v12453_v14, %v16390_v59 }
 0x56d   :  { %v12455_v45 = vpop.f32.mrf.mxu0  ;;  %v16444_v15 = vpop.f32.mrf.mxu1 }
 0x56e   :  { %v12456_v22 = vadd.f32 %v12455_v45, %v12454_v25 }
 0x56f   :  { %v12457_v20 = vpop.f32.mrf.mxu0  ;;  %v16446_v56 = vpop.f32.mrf.mxu1 }
 0x570   :  { %v16449_v63 = vadd.f32 %v12456_v22, %v16393_v12 }
 0x571   :  { %v12458_v3 = vpop.f32.mrf.mxu0  ;;  %v12509_v16 = vpop.f32.mrf.mxu1 }
 0x572   :  { %v12459_v32 = vadd.f32 %v12458_v3, %v12457_v20 }
 0x573   :  { %v12460_v23 = vpop.f32.mrf.mxu0  ;;  %v12510_v35 = vpop.f32.mrf.mxu1 }
 0x574   :  { %v16452_v47 = vadd.f32 %v12459_v32, %v16396_v0  ;;  %v12511_v60 = vadd.f32 %v12510_v35, %v12509_v16 }
 0x575   :  { %v12461_v59 = vpop.f32.mrf.mxu0  ;;  %v12512_v17 = vpop.f32.mrf.mxu1 }
 0x576   :  { %v12462_v55 = vadd.f32 %v12461_v59, %v12460_v23 }
 0x577   :  { %v16454_v26 = vpop.f32.mrf.mxu0  ;;  %v12513_v49 = vpop.f32.mrf.mxu1 }
 0x578   :  { %v16457_v46 = vadd.f32 %v12462_v55, %v16399_v43  ;;  %v12514_v5 = vadd.f32 %v12513_v49, %v12512_v17 }
 0x579   :  { %v16459_v18 = vpop.f32.mrf.mxu0  ;;  %v16461_v12 = vpop.f32.mrf.mxu1 }
 0x57b   :  { %v16463_v21 = vpop.f32.mrf.mxu0  ;;  %v12516_v19 = vpop.f32.mrf.mxu1 }
 0x57d   :  { %v16465_v29 = vpop.f32.mrf.mxu0  ;;  %v16467_v0 = vpop.f32.mrf.mxu1 }
 0x57f   :  { %v16469_v2 = vpop.f32.mrf.mxu0  ;;  %v16471_v40 = vpop.f32.mrf.mxu1 }
 0x581   :  { %v16473_v62 = vpop.f32.mrf.mxu0  ;;  %v16475_v54 = vpop.f32.mrf.mxu1 }
 0x583   :  { %v16477_v43 = vpop.f32.mrf.mxu0  ;;  %v16479_v14 = vpop.f32.mrf.mxu1 }
 0x584   :  { %17009 = vst [vmem:[#allocation31_spill] sm:$0xff] %v16477_v43 }
 0x585   :  { %v16481_v25 = vpop.f32.mrf.mxu0  ;;  %v16483_v45 = vpop.f32.mrf.mxu1 }
 0x586   :  { %17010 = vst [vmem:[#allocation41_spill] sm:$0xff] %v16481_v25 }
 0x587   :  { %v16485_v22 = vpop.f32.mrf.mxu0  ;;  %v16487_v20 = vpop.f32.mrf.mxu1 }
 0x588   :  { %17011 = vst [vmem:[#allocation44_spill] sm:$0xff] %v16485_v22 }
 0x589   :  { %v16489_v3 = vpop.f32.mrf.mxu0  ;;  %v16491_v32 = vpop.f32.mrf.mxu1 }
 0x58a   :  { %17012 = vst [vmem:[#allocation30_spill] sm:$0xff] %v16489_v3 }
 0x58b   :  { %v16493_v23 = vpop.f32.mrf.mxu0  ;;  %v16495_v59 = vpop.f32.mrf.mxu1 }
 0x58c   :  { %17013 = vst [vmem:[#allocation33_spill] sm:$0xff] %v16493_v23 }
 0x58d   :  { %v16497_v55 = vpop.f32.mrf.mxu0  ;;  %v16499_v44 = vpop.f32.mrf.mxu1 }
 0x58e   :  { %17014 = vst [vmem:[#allocation43_spill] sm:$0xff] %v16497_v55 }
 0x58f   :  { %v16501_v34 = vpop.f32.mrf.mxu0  ;;  %v16503_v41 = vpop.f32.mrf.mxu1 }
 0x590   :  { %17015 = vst [vmem:[#allocation46_spill] sm:$0xff] %v16501_v34 }
 0x591   :  { %v16505_v28 = vpop.f32.mrf.mxu0  ;;  %v16507_v10 = vpop.f32.mrf.mxu1 }
 0x592   :  { %17016 = vst [vmem:[#allocation32_spill] sm:$0xff] %v16505_v28 }
 0x593   :  { %v16509_v27 = vpop.f32.mrf.mxu0  ;;  %v16511_v4 = vpop.f32.mrf.mxu1 }
 0x594   :  { %17017 = vst [vmem:[#allocation36_spill] sm:$0xff] %v16509_v27 }
 0x595   :  { %v16513_v53 = vpop.f32.mrf.mxu0  ;;  %v16515_v48 = vpop.f32.mrf.mxu1 }
 0x596   :  { %17018 = vst [vmem:[#allocation45_spill] sm:$0xff] %v16513_v53  ;;  %17019 = vst [vmem:[#allocation48_spill] sm:$0xff] %v16515_v48 }
 0x597   :  { %v16517_v33 = vpop.f32.mrf.mxu1  ;;  %v12567_v55 = vpop.f32.mrf.mxu0 }
 0x598   :  { %17020 = vst [vmem:[#allocation35_spill] sm:$0xff] %v16517_v33 }
 0x599   :  { %v16519_v23 = vpop.f32.mrf.mxu1  ;;  %v12568_v34 = vpop.f32.mrf.mxu0 }
 0x59a   :  { %17021 = vst [vmem:[#allocation38_spill] sm:$0xff] %v16519_v23  ;;  %v12505_v23 = vadd.f32 %v16439_v1, %v16435_v58  ;;  %v12569_v51 = vadd.f32 %v12568_v34, %v12567_v55  ;;  %v12517_v34 = vadd.f32 %v12516_v19, %v16461_v12 }
 0x59b   :  { %v16521_v39 = vpop.f32.mrf.mxu1  ;;  %v12570_v31 = vpop.f32.mrf.mxu0 }
 0x59c   :  { %17022 = vst [vmem:[#allocation47_spill] sm:$0xff] %v16521_v39  ;;  %v10370_v35 = vadd.f32 %v12505_v23, %v16415_v38 }
 0x59d   :  { %v16523_v28 = vpop.f32.mrf.mxu1  ;;  %v12571_v8 = vpop.f32.mrf.mxu0 }
 0x59e   :  { %17023 = vst [vmem:[#allocation50_spill] sm:$0xff] %v16523_v28  ;;  %v10378_v28 = vadd.f32 %v12511_v60, %v16427_v30 }
 0x59f   :  { %v16525_v3 = vpop.f32.mrf.mxu1  ;;  %v12573_v27 = vpop.f32.mrf.mxu0 }
 0x5a0   :  { %17024 = vst [vmem:[#allocation37_spill] sm:$0xff] %v16525_v3  ;;  %v12508_v3 = vadd.f32 %v16446_v56, %v16444_v15  ;;  %v16546_v56 = vrot.slane %v16184_v9, %v16999_v11  ;;  %v10386_v9 = vadd.f32 %v12517_v34, %v16442_v24  ;;  %v12520_v11 = vadd.f32 %v16471_v40, %v16467_v0 }
 0x5a1   :  { %v16527_v22 = vpop.f32.mrf.mxu1  ;;  %v12574_v53 = vpop.f32.mrf.mxu0 }
 0x5a2   :  { %17025 = vst [vmem:[#allocation56_spill] sm:$0xff] %v16527_v22  ;;  %v12575_v25 = vadd.f32 %v12574_v53, %v12573_v27  ;;  %v10381_v53 = vadd.f32 %v12514_v5, %v16433_v57  ;;  %v12572_v27 = vadd.f32 %v12571_v8, %v12570_v31  ;;  %v10373_v60 = vadd.f32 %v12508_v3, %v16421_v50 }
 0x5a3   :  { %v16529_v48 = vpop.f32.mrf.mxu1  ;;  %v12576_v33 = vpop.f32.mrf.mxu0  ;;  %v12465_v5 = vadd.f32 %v16459_v18, %v16454_v26 }
 0x5a4   :  { %17026 = vst [vmem:[#allocation49_spill] sm:$0xff] %v16529_v48  ;;  %v10475_v61 = vadd.f32 %v12575_v25, %v10378_v28  ;;  %v10470_v57 = vadd.f32 %v12572_v27, %v10373_v60 }
 0x5a5   :  { %v16533_v43 = vpop.f32.mrf.mxu1  ;;  %v12577_v39 = vpop.f32.mrf.mxu0 }
 0x5a6   :  { %17027 = vst [vmem:[#allocation52_spill] sm:$0xff] %v16533_v43  ;;  %v12578_v48 = vadd.f32 %v12577_v39, %v12576_v33  ;;  %v10467_v43 = vadd.f32 %v12569_v51, %v10370_v35  ;;  %v12523_v51 = vadd.f32 %v16479_v14, %v16475_v54 }
 0x5a7   :  { %v16538_v22 = vpop.f32.mrf.mxu1  ;;  %v12579_v16 = vpop.f32.mrf.mxu0 }
 0x5a8   :  { %v10478_v38 = vadd.f32 %v12578_v48, %v10381_v53  ;;  %v12526_v48 = vadd.f32 %v16487_v20, %v16483_v45  ;;  %v10394_v19 = vadd.f32 %v12523_v51, %v16452_v47  ;;  %v10389_v20 = vadd.f32 %v12520_v11, %v16449_v63 }
 0x5a9   :  { %v12580_v13 = vpop.f32.mrf.mxu0  ;;  %v12681_v58 = vpop.f32.mrf.mxu1 }
 0x5aa   :  { %v10572_v1 = vadd.f32 %v12681_v58, %v10475_v61  ;;  %v12581_v31 = vadd.f32 %v12580_v13, %v12579_v16  ;;  %v10397_v3 = vadd.f32 %v12526_v48, %v16457_v46 }
 0x5ab   :  { %v12582_v30 = vpop.f32.mrf.mxu0  ;;  %v10563_v15 = vpop.f32.mrf.mxu1 }
 0x5ac   :  { %vm10634_vm0 = vcmp.ge.f32.partialorder %v10572_v1, 0.0  ;;  %v10682_v33 = vmul.f32 0.2, %v10572_v1  ;;  %v10564_v28 = vadd.f32 %v10563_v15, %v10467_v43  ;;  %v10483_v14 = vadd.f32 %v12581_v31, %v10386_v9 }
 0x5ad   :  { %v12583_v61 = vpop.f32.mrf.mxu0  ;;  %v12682_v8 = vpop.f32.mrf.mxu1 }
 0x5ae   :  { %vm10628_vm1 = vcmp.ge.f32.partialorder %v10564_v28, 0.0  ;;  %v10676_v39 = vmul.f32 0.2, %v10564_v28  ;;  %v10575_v50 = vadd.f32 %v12682_v8, %v10478_v38  ;;  %v10730_v49 = vsel %vm10634_vm0, %v10572_v1, %v10682_v33 }
 0x5af   :  { %v12585_v17 = vpop.f32.mrf.mxu0  ;;  %v10566_v26 = vpop.f32.mrf.mxu1  ;;  %v10795_v12 = vmul.f32 %v16546_v56, %v10730_v49  ;;  %v12584_v54 = vadd.f32 %v12583_v61, %v12582_v30  ;;  %v12529_v1 = vadd.f32 %v16495_v59, %v16491_v32  ;;  %v12468_v38 = vadd.f32 %v16465_v29, %v16463_v21 }
 0x5b0   :  { %vm10637_vm2 = vcmp.ge.f32.partialorder %v10575_v50, 0.0  ;;  %v10685_v13 = vmul.f32 0.2, %v10575_v50  ;;  %v10567_v18 = vadd.f32 %v10566_v26, %v10470_v57  ;;  %v10724_v0 = vsel %vm10628_vm1, %v10564_v28, %v10676_v39 }
 0x5b1   :  { %v12586_v43 = vpop.f32.mrf.mxu0  ;;  %v12685_v24 = vpop.f32.mrf.mxu1  ;;  %v10844_v45 = vadd.f32 %v16243_v36, %v10795_v12  ;;  %v10789_v16 = vmul.f32 %v16546_v56, %v10724_v0  ;;  %v10486_v46 = vadd.f32 %v12584_v54, %v10389_v20  ;;  %v10305_v28 = vadd.f32 %v12465_v5, %v16402_v6  ;;  %v17029_v0 = vld [vmem:[#allocation40_spill] sm:$0xff] }
 0x5b2   :  { %vm10631_vm3 = vcmp.ge.f32.partialorder %v10567_v18, 0.0  ;;  %v10679_v40 = vmul.f32 0.2, %v10567_v18  ;;  %v12587_v25 = vadd.f32 %v12586_v43, %v12585_v17  ;;  %v10733_v47 = vsel %vm10637_vm2, %v10575_v50, %v10685_v13 }
 0x5b3   :  { %v12588_v23 = vpop.f32.mrf.mxu0  ;;  %v10579_v55 = vpop.f32.mrf.mxu1  ;;  %10845 = vadd.xlane.f32.xlu1 %v10844_v45  ;;  %v10798_v53 = vmul.f32 %v16546_v56, %v10733_v47  ;;  %v10836_v63 = vadd.f32 %v16216_v42, %v10789_v16  ;;  %v10402_v39 = vadd.f32 %v12529_v1, %v10305_v28  ;;  %v12532_v50 = vadd.f32 %v16503_v41, %v16499_v44  ;;  %v17030_v45 = vld [vmem:[#allocation102_spill] sm:$0xff]  ;;  %v17034_v1 = vld [vmem:[#allocation103_spill] sm:$0xff] }
 0x5b4   :  { %v10491_v35 = vadd.f32 %v12587_v25, %v10394_v19  ;;  %v10580_v58 = vadd.f32 %v10579_v55, %v10483_v14  ;;  %v10727_v27 = vsel %vm10631_vm3, %v10567_v18, %v10679_v40  ;;  %v12535_v13 = vadd.f32 %v16511_v4, %v16507_v10  ;;  %v17033_v55 = vld [vmem:[#allocation41_spill] sm:$0xff]  ;;  %v17038_v28 = vld [vmem:[#allocation30_spill] sm:$0xff] }
 0x5b5   :  { %v12589_v36 = vpop.f32.mrf.mxu0  ;;  %v12686_v60 = vpop.f32.mrf.mxu1  ;;  %v10792_v34 = vmul.f32 %v16546_v56, %v10727_v27  ;;  %10837 = vadd.xlane.f32.xlu0 %v10836_v63  ;;  %v10848_v32 = vadd.f32 %v16255_v52, %v10798_v53  ;;  %v10308_v52 = vadd.f32 %v12468_v38, %v16405_v37  ;;  %v17028_v37 = vld [vmem:[#allocation100_spill] sm:$0xff]  ;;  %v17036_v63 = vld [vmem:[#allocation35_spill] sm:$0xff] }
 0x5b6   :  { %v10588_v30 = vadd.f32 %v12685_v24, %v10491_v35  ;;  %vm10640_vm4 = vcmp.ge.f32.partialorder %v10580_v58, 0.0  ;;  %v10688_v15 = vmul.f32 0.2, %v10580_v58  ;;  %v12590_v33 = vadd.f32 %v12589_v36, %v12588_v23  ;;  %v17032_v23 = vld [vmem:[#allocation31_spill] sm:$0xff] }
 0x5b7   :  { %v12591_v51 = vpop.f32.mrf.mxu0  ;;  %v10582_v31 = vpop.f32.mrf.mxu1  ;;  %v10840_v59 = vadd.f32 %v16227_v7, %v10792_v34  ;;  %10849 = vadd.xlane.f32.xlu1 %v10848_v32  ;;  %v12471_v7 = vadd.f32 %v16473_v62, %v16469_v2  ;;  %v10405_v54 = vadd.f32 %v12532_v50, %v10308_v52  ;;  %v12474_v16 = vadd.f32 %v17033_v55, %v17032_v23  ;;  %v17039_v32 = vld [vmem:[#allocation26_spill] sm:$0xff]  ;;  %v17051_v23 = vld [vmem:[#allocation39_spill] sm:$0xff] }
 0x5b8   :  { %vm10646_vm5 = vcmp.ge.f32.partialorder %v10588_v30, 0.0  ;;  %v10694_v42 = vmul.f32 0.2, %v10588_v30  ;;  %v10494_v61 = vadd.f32 %v12590_v33, %v10397_v3  ;;  %v10583_v8 = vadd.f32 %v10582_v31, %v10486_v46  ;;  %v17031_v3 = vld [vmem:[#allocation101_spill] sm:$0xff]  ;;  %v17037_v33 = vld [vmem:[#allocation44_spill] sm:$0xff] }
 0x5b9   :  { %v12592_v6 = vpop.f32.mrf.mxu0  ;;  %v12689_v5 = vpop.f32.mrf.mxu1  ;;  %v10736_v21 = vsel %vm10640_vm4, %v10580_v58, %v10688_v15  ;;  %10841 = vadd.xlane.f32.xlu0 %v10840_v59  ;;  %v10313_v40 = vadd.f32 %v12471_v7, %v17029_v0  ;;  %v12477_v38 = vadd.f32 %v17038_v28, %v17037_v33  ;;  %v10316_v59 = vadd.f32 %v12474_v16, %v17039_v32 }
 0x5ba   :  { %v10591_v29 = vadd.f32 %v12686_v60, %v10494_v61  ;;  %vm10643_vm6 = vcmp.ge.f32.partialorder %v10583_v8, 0.0  ;;  %v10691_v57 = vmul.f32 0.2, %v10583_v8  ;;  %v12593_v9 = vadd.f32 %v12592_v6, %v12591_v51  ;;  %v17035_v60 = vld [vmem:[#allocation48_spill] sm:$0xff] }
 0x5bb   :  { %v12594_v11 = vpop.f32.mrf.mxu0  ;;  %v10595_v48 = vpop.f32.mrf.mxu1  ;;  %v10801_v17 = vmul.f32 %v16546_v56, %v10736_v21  ;;  %v10742_v41 = vsel %vm10646_vm5, %v10588_v30, %v10694_v42  ;;  %v10410_v58 = vadd.f32 %v12535_v13, %v10313_v40  ;;  %v12538_v46 = vadd.f32 %v17036_v63, %v17035_v60 }
 0x5bc   :  { %vm10649_vm7 = vcmp.ge.f32.partialorder %v10591_v29, 0.0  ;;  %v10697_v44 = vmul.f32 0.2, %v10591_v29  ;;  %v10499_v26 = vadd.f32 %v12593_v9, %v10402_v39  ;;  %v10739_v49 = vsel %vm10643_vm6, %v10583_v8, %v10691_v57  ;;  %v17040_v8 = vld [vmem:[#allocation38_spill] sm:$0xff]  ;;  %v17041_v39 = vld [vmem:[#allocation47_spill] sm:$0xff] }
 0x5bd   :  { %v12595_v18 = vpop.f32.mrf.mxu0  ;;  %v12690_v12 = vpop.f32.mrf.mxu1  ;;  %v10852_v19 = vadd.f32 %v17028_v37, %v10801_v17  ;;  %v10804_v2 = vmul.f32 %v16546_v56, %v10739_v49  ;;  %v10807_v62 = vmul.f32 %v16546_v56, %v10742_v41  ;;  %v12541_v50 = vadd.f32 %v17041_v39, %v17040_v8  ;;  %v17045_v49 = vld [vmem:[#allocation43_spill] sm:$0xff]  ;;  %v17058_v39 = vld [vmem:[#allocation21_spill] sm:$0xff] }
 0x5be   :  { %v10596_v43 = vadd.f32 %v10595_v48, %v10499_v26  ;;  %v12596_v24 = vadd.f32 %v12595_v18, %v12594_v11  ;;  %v10745_v14 = vsel %vm10649_vm7, %v10591_v29, %v10697_v44  ;;  %v17042_v29 = vld [vmem:[#allocation23_spill] sm:$0xff]  ;;  %v10413_v9 = vadd.f32 %v12538_v46, %v10316_v59  ;;  %v17043_v48 = vld [vmem:[#allocation29_spill] sm:$0xff] }
 0x5bf   :  { %10853 = vadd.xlane.f32.xlu0 %v10852_v19  ;;  %v12597_v25 = vpop.f32.mrf.mxu0  ;;  %v10856_v20 = vadd.f32 %v17030_v45, %v10804_v2  ;;  %v10860_v4 = vadd.f32 %v17031_v3, %v10807_v62  ;;  %v10810_v10 = vmul.f32 %v16546_v56, %v10745_v14  ;;  %v10598_v53 = vpop.f32.mrf.mxu1  ;;  %v10321_v17 = vadd.f32 %v12477_v38, %v17043_v48  ;;  %v17044_v26 = vld [vmem:[#allocation33_spill] sm:$0xff]  ;;  %v17049_v45 = vld [vmem:[#allocation46_spill] sm:$0xff]  ;;  %v17056_v38 = vld [vmem:[#allocation36_spill] sm:$0xff] }
 0x5c0   :  { %vm10652_vm8 = vcmp.ge.f32.partialorder %v10596_v43, 0.0  ;;  %v10700_v47 = vmul.f32 0.2, %v10596_v43  ;;  %v10502_v35 = vadd.f32 %v12596_v24, %v10405_v54  ;;  %v12480_v13 = vadd.f32 %v17045_v49, %v17044_v26  ;;  %v17046_v54 = vld [vmem:[#allocation104_spill] sm:$0xff]  ;;  %v17048_v24 = vld [vmem:[#allocation37_spill] sm:$0xff]  ;;  %v17061_v49 = vld [vmem:[#allocation22_spill] sm:$0xff] }
 0x5c1   :  { %v12598_v27 = vpop.f32.mrf.mxu0  ;;  %10857 = vadd.xlane.f32.xlu1 %v10856_v20  ;;  %v10864_v36 = vadd.f32 %v17034_v1, %v10810_v10  ;;  %v16604_v6 = vpop.f32.mrf.mxu1  ;;  %v10418_v19 = vadd.f32 %v12541_v50, %v10321_v17  ;;  %v17050_v20 = vld [vmem:[#allocation32_spill] sm:$0xff] }
 0x5c2   :  { %v10599_v34 = vadd.f32 %v10598_v53, %v10502_v35  ;;  %v12599_v30 = vadd.f32 %v12598_v27, %v12597_v25  ;;  %v10748_v15 = vsel %vm10652_vm8, %v10596_v43, %v10700_v47  ;;  %v12483_v3 = vadd.f32 %v17050_v20, %v17049_v45  ;;  %v17052_v35 = vld [vmem:[#allocation56_spill] sm:$0xff] }
 0x5c3   :  { %10861 = vadd.xlane.f32.xlu0 %v10860_v4  ;;  %v12600_v51 = vpop.f32.mrf.mxu0  ;;  %v10813_v31 = vmul.f32 %v16546_v56, %v10748_v15  ;;  %v10611_v2 = vpop.f32.mrf.mxu1  ;;  %v10324_v55 = vadd.f32 %v12480_v13, %v17051_v23  ;;  %v17060_v48 = vld [vmem:[#allocation28_spill] sm:$0xff] }
 0x5c4   :  { %vm10655_vm9 = vcmp.ge.f32.partialorder %v10599_v34, 0.0  ;;  %v10703_v42 = vmul.f32 0.2, %v10599_v34  ;;  %v10507_v61 = vadd.f32 %v12599_v30, %v10410_v58  ;;  %v17053_v58 = vld [vmem:[#allocation49_spill] sm:$0xff]  ;;  %v17055_v30 = vld [vmem:[#allocation42_spill] sm:$0xff] }
 0x5c5   :  { %v12601_v21 = vpop.f32.mrf.mxu0  ;;  %10865 = vadd.xlane.f32.xlu1 %v10864_v36  ;;  %v10868_v57 = vadd.f32 %v17042_v29, %v10813_v31  ;;  %v12547_v53 = vadd.f32 %v17053_v58, %v17052_v35  ;;  %v12694_v27 = vpop.f32.mrf.mxu1  ;;  %v10329_v15 = vadd.f32 %v12483_v3, %v17055_v30  ;;  %v17064_v3 = vld [vmem:[#allocation27_spill] sm:$0xff] }
 0x5c6   :  { %v10604_v52 = vadd.f32 %v12689_v5, %v10507_v61  ;;  %v12602_v7 = vadd.f32 %v12601_v21, %v12600_v51  ;;  %v10751_v11 = vsel %vm10655_vm9, %v10599_v34, %v10703_v42  ;;  %v17047_v5 = vld [vmem:[#allocation50_spill] sm:$0xff]  ;;  %v17057_v51 = vld [vmem:[#allocation45_spill] sm:$0xff]  ;;  %v17059_v21 = vld [vmem:[#allocation52_spill] sm:$0xff] }
 0x5c7   :  { %v12603_v41 = vpop.f32.mrf.mxu0  ;;  %10869 = vadd.xlane.f32.xlu0 %v10868_v57  ;;  %v10816_v44 = vmul.f32 %v16546_v56, %v10751_v11  ;;  %v12544_v14 = vadd.f32 %v17048_v24, %v17047_v5  ;;  %v12486_v31 = vadd.f32 %v17057_v51, %v17056_v38  ;;  %v10426_v42 = vadd.f32 %v12547_v53, %v10329_v15  ;;  %v10614_v61 = vpop.f32.mrf.mxu1 }
 0x5c8   :  { %v10510_v18 = vadd.f32 %v12602_v7, %v10413_v9  ;;  %vm10658_vm10 = vcmp.ge.f32.partialorder %v10604_v52, 0.0  ;;  %v10706_v37 = vmul.f32 0.2, %v10604_v52  ;;  %v12550_v29 = vadd.f32 %v16538_v22, %v17059_v21 }
 0x5c9   :  { %v12604_v62 = vpop.f32.mrf.mxu0  ;;  %v10872_v43 = vadd.f32 %v17046_v54, %v10816_v44  ;;  %v10421_v60 = vadd.f32 %v12544_v14, %v10324_v55  ;;  %v10332_v17 = vadd.f32 %v12486_v31, %v17060_v48 }
 0x5ca   :  { %v10607_v0 = vadd.f32 %v12690_v12, %v10510_v18  ;;  %v12605_v40 = vadd.f32 %v12604_v62, %v12603_v41  ;;  %v10754_v25 = vsel %vm10658_vm10, %v10604_v52, %v10706_v37  ;;  %v17054_v12 = vld [vmem:[#allocation20_spill] sm:$0xff] }
 0x5cb   :  { %v12606_v4 = vpop.f32.mrf.mxu0  ;;  %10873 = vadd.xlane.f32.xlu1 %v10872_v43  ;;  %v10819_v10 = vmul.f32 %v16546_v56, %v10754_v25  ;;  %v10429_v18 = vadd.f32 %v12550_v29, %v10332_v17  ;;  %v17062_v43 = vld [vmem:[#allocation25_spill] sm:$0xff]  ;;  %v17063_v25 = vld [vmem:[#allocation24_spill] sm:$0xff] }
 0x5cc   :  { %v10515_v16 = vadd.f32 %v12605_v40, %v10418_v19  ;;  %vm10661_vm11 = vcmp.ge.f32.partialorder %v10607_v0, 0.0  ;;  %v10709_v47 = vmul.f32 0.2, %v10607_v0 }
 0x5cd   :  { %v12607_v1 = vpop.f32.mrf.mxu0  ;;  %v10876_v36 = vadd.f32 %v17054_v12, %v10819_v10  ;;  %v16638_v10 = vld [vmem:[#allocation2] ss:$0 sm:$0xff] }
 0x5ce   :  { %v10612_v63 = vadd.f32 %v10611_v2, %v10515_v16  ;;  %v12608_v46 = vadd.f32 %v12607_v1, %v12606_v4  ;;  %v10757_v34 = vsel %vm10661_vm11, %v10607_v0, %v10709_v47 }
 0x5cf   :  { %v12609_v33 = vpop.f32.mrf.mxu0  ;;  %10877 = vadd.xlane.f32.xlu0 %v10876_v36  ;;  %v10822_v28 = vmul.f32 %v16546_v56, %v10757_v34 }
 0x5d0   :  { %v10518_v32 = vadd.f32 %v12608_v46, %v10421_v60  ;;  %vm10664_vm12 = vcmp.ge.f32.partialorder %v10612_v63, 0.0  ;;  %v10712_v59 = vmul.f32 0.2, %v10612_v63 }
 0x5d1   :  { %v12610_v8 = vpop.f32.mrf.mxu0  ;;  %v10880_v50 = vadd.f32 %v17058_v39, %v10822_v28 }
 0x5d2   :  { %v10615_v57 = vadd.f32 %v10614_v61, %v10518_v32  ;;  %v12611_v9 = vadd.f32 %v12610_v8, %v12609_v33  ;;  %v10760_v52 = vsel %vm10664_vm12, %v10612_v63, %v10712_v59 }
 0x5d3   :  { %v12612_v7 = vpop.f32.mrf.mxu0  ;;  %10881 = vadd.xlane.f32.xlu1 %v10880_v50  ;;  %v10825_v11 = vmul.f32 %v16546_v56, %v10760_v52 }
 0x5d4   :  { %v10523_v41 = vadd.f32 %v12611_v9, %v10426_v42  ;;  %vm10667_vm13 = vcmp.ge.f32.partialorder %v10615_v57, 0.0  ;;  %v10715_v44 = vmul.f32 0.2, %v10615_v57 }
 0x5d5   :  { %v12613_v26 = vpop.f32.mrf.mxu0  ;;  %v10884_v13 = vadd.f32 %v17061_v49, %v10825_v11 }
 0x5d6   :  { %v10620_v37 = vadd.f32 %v16604_v6, %v10523_v41  ;;  %v12614_v19 = vadd.f32 %v12613_v26, %v12612_v7  ;;  %v10763_v22 = vsel %vm10667_vm13, %v10615_v57, %v10715_v44 }
 0x5d7   :  { %10885 = vadd.xlane.f32.xlu0 %v10884_v13  ;;  %v10828_v2 = vmul.f32 %v16546_v56, %v10763_v22 }
 0x5d8   :  { %v10526_v62 = vadd.f32 %v12614_v19, %v10429_v18  ;;  %vm10670_vm14 = vcmp.ge.f32.partialorder %v10620_v37, 0.0  ;;  %v10718_v54 = vmul.f32 0.2, %v10620_v37 }
 0x5d9   :  { %v10888_v5 = vadd.f32 %v17062_v43, %v10828_v2 }
 0x5da   :  { %v10623_v24 = vadd.f32 %v12694_v27, %v10526_v62  ;;  %v10766_v14 = vsel %vm10670_vm14, %v10620_v37, %v10718_v54 }
 0x5db   :  { %10889 = vadd.xlane.f32.xlu1 %v10888_v5  ;;  %v10831_v0 = vmul.f32 %v16546_v56, %v10766_v14 }
 0x5dc   :  { %vm10673_vm15 = vcmp.ge.f32.partialorder %v10623_v24, 0.0  ;;  %v10721_v40 = vmul.f32 0.2, %v10623_v24 }
 0x5dd   :  { %v10892_v45 = vadd.f32 %v17063_v25, %v10831_v0 }
 0x5de   :  { %v10769_v6 = vsel %vm10673_vm15, %v10623_v24, %v10721_v40 }
 0x5df   :  { %10893 = vadd.xlane.f32.xlu0 %v10892_v45  ;;  %v10834_v20 = vmul.f32 %v16546_v56, %v10769_v6 }
 0x5e1   :  { %v10896_v4 = vadd.f32 %v17064_v3, %v10834_v20 }
 0x5e3   :  { %10897 = vadd.xlane.f32.xlu1 %v10896_v4 }
 0x63c   :  { %v10846_v23 = vpop.xlane.xlu1 %10845 }
 0x63d   :  { %v10908_v55 = vadd.f32 %v16638_v10, %v10846_v23 }
 0x63e   :  { %v10838_v47 = vpop.xlane.xlu0 %10837 }
 0x63f   :  { %v12073_v16 = vmul.f32 -1.442695, %v10908_v55  ;;  %v10906_v35 = vadd.f32 %v16638_v10, %v10838_v47 }
 0x640   :  { %v10850_v58 = vpop.xlane.xlu1 %10849 }
 0x641   :  { %14041 = vpow2.f32 %v12073_v16  ;;  %v12071_v53 = vmul.f32 -1.442695, %v10906_v35  ;;  %v10909_v27 = vadd.f32 %v16638_v10, %v10850_v58 }
 0x642   :  { %v10842_v1 = vpop.xlane.xlu0 %10841 }
 0x643   :  { %14043 = vpow2.f32 %v12071_v53  ;;  %v12074_v56 = vmul.f32 -1.442695, %v10909_v27  ;;  %v10907_v12 = vadd.f32 %v16638_v10, %v10842_v1 }
 0x645   :  { %14045 = vpow2.f32 %v12074_v56  ;;  %v12072_v36 = vmul.f32 -1.442695, %v10907_v12 }
 0x647   :  { %14047 = vpow2.f32 %v12072_v36 }
 0x648   :  { %v10854_v60 = vpop.xlane.xlu0 %10853 }
 0x649   :  { %v10910_v63 = vadd.f32 %v16638_v10, %v10854_v60 }
 0x64a   :  { %v10858_v46 = vpop.xlane.xlu1 %10857 }
 0x64b   :  { %v12075_v34 = vmul.f32 -1.442695, %v10910_v63  ;;  %v10911_v30 = vadd.f32 %v16638_v10, %v10858_v46 }
 0x64c   :  { %v10862_v15 = vpop.xlane.xlu0 %10861 }
 0x64d   :  { %14049 = vpow2.f32 %v12075_v34  ;;  %v10912_v33 = vadd.f32 %v16638_v10, %v10862_v15  ;;  %v12076_v51 = vmul.f32 -1.442695, %v10911_v30 }
 0x64e   :  { %v10866_v28 = vpop.xlane.xlu1 %10865  ;;  %v14042_v38 = vpop.eup %14041 }
 0x64f   :  { %v12077_v31 = vmul.f32 -1.442695, %v10912_v33  ;;  %v10913_v32 = vadd.f32 %v16638_v10, %v10866_v28  ;;  %v10972_v59 = vadd.f32 1.0, %v14042_v38 }
 0x650   :  { %v10870_v42 = vpop.xlane.xlu0 %10869  ;;  %v14044_v8 = vpop.eup %14043 }
 0x651   :  { %14051 = vpow2.f32 %v12077_v31  ;;  %v10914_v61 = vadd.f32 %v16638_v10, %v10870_v42  ;;  %v12078_v39 = vmul.f32 -1.442695, %v10913_v32  ;;  %v10970_v50 = vadd.f32 1.0, %v14044_v8 }
 0x652   :  { %14053 = vrcp.f32 %v10972_v59  ;;  %v14046_v21 = vpop.eup %14045 }
 0x653   :  { %14055 = vpow2.f32 %v12076_v51  ;;  %v10973_v57 = vadd.f32 1.0, %v14046_v21  ;;  %v12079_v9 = vmul.f32 -1.442695, %v10914_v61 }
 0x654   :  { %v10874_v29 = vpop.xlane.xlu1 %10873  ;;  %14057 = vrcp.f32 %v10970_v50  ;;  %v14048_v7 = vpop.eup %14047 }
 0x655   :  { %v10915_v52 = vadd.f32 %v16638_v10, %v10874_v29  ;;  %14059 = vpow2.f32 %v12078_v39  ;;  %v10971_v11 = vadd.f32 1.0, %v14048_v7 }
 0x656   :  { %14061 = vrcp.f32 %v10973_v57 }
 0x657   :  { %v12080_v48 = vmul.f32 -1.442695, %v10915_v52  ;;  %14063 = vpow2.f32 %v12079_v9 }
 0x658   :  { %v10878_v17 = vpop.xlane.xlu0 %10877 }
 0x659   :  { %v10916_v41 = vadd.f32 %v16638_v10, %v10878_v17  ;;  %14065 = vpow2.f32 %v12080_v48 }
 0x65a   :  { %v14050_v44 = vpop.eup %14049  ;;  %14067 = vrcp.f32 %v10971_v11 }
 0x65b   :  { %v10974_v26 = vadd.f32 1.0, %v14050_v44  ;;  %v12081_v49 = vmul.f32 -1.442695, %v10916_v41 }
 0x65c   :  { %v10882_v13 = vpop.xlane.xlu1 %10881 }
 0x65d   :  { %v10917_v18 = vadd.f32 %v16638_v10, %v10882_v13  ;;  %14069 = vrcp.f32 %v10974_v26 }
 0x65e   :  { %v14052_v37 = vpop.eup %14051  ;;  %14071 = vpow2.f32 %v12081_v49 }
 0x65f   :  { %v14054_v19 = vpop.eup %14053  ;;  %v10976_v22 = vadd.f32 1.0, %v14052_v37  ;;  %v12082_v2 = vmul.f32 -1.442695, %v10917_v18 }
 0x660   :  { %v14056_v62 = vpop.eup %14055  ;;  %11030 = vperm.xlu1 %12711, %v14054_v19   ;;  %v10886_v54 = vpop.xlane.xlu0 %10885 }
 0x661   :  { %v10918_v43 = vadd.f32 %v16638_v10, %v10886_v54  ;;  %v14058_v5 = vpop.eup %14057  ;;  %14073 = vpow2.f32 %v12082_v2  ;;  %v10975_v14 = vadd.f32 1.0, %v14056_v62 }
 0x662   :  { %v14060_v24 = vpop.eup %14059  ;;  %14075 = vrcp.f32 %v10976_v22  ;;  %11020 = vperm.xlu0 %12712, %v14058_v5  }
 0x663   :  { %v12083_v0 = vmul.f32 -1.442695, %v10918_v43  ;;  %v14062_v40 = vpop.eup %14061  ;;  %v10977_v3 = vadd.f32 1.0, %v14060_v24 }
 0x664   :  { %v10890_v25 = vpop.xlane.xlu1 %10889  ;;  %11035 = vperm.xlu1 %12711, %v14062_v40   ;;  %v14064_v6 = vpop.eup %14063 }
 0x665   :  { %14077 = vpow2.f32 %v12083_v0  ;;  %v10919_v45 = vadd.f32 %v16638_v10, %v10890_v25  ;;  %v10978_v58 = vadd.f32 1.0, %v14064_v6 }
 0x666   :  { %v14066_v20 = vpop.eup %14065  ;;  %14079 = vrcp.f32 %v10975_v14 }
 0x667   :  { %v12084_v4 = vmul.f32 -1.442695, %v10919_v45  ;;  %v14068_v23 = vpop.eup %14067  ;;  %v10979_v55 = vadd.f32 1.0, %v14066_v20 }
 0x668   :  { %v10894_v16 = vpop.xlane.xlu0 %10893  ;;  %11025 = vperm.xlu1 %12711, %v14068_v23  }
 0x669   :  { %14081 = vpow2.f32 %v12084_v4  ;;  %v10920_v47 = vadd.f32 %v16638_v10, %v10894_v16 }
 0x66a   :  { %14083 = vrcp.f32 %v10979_v55  ;;  %v14070_v35 = vpop.eup %14069 }
 0x66b   :  { %14085 = vrcp.f32 %v10977_v3  ;;  %v12085_v53 = vmul.f32 -1.442695, %v10920_v47  ;;  %v14072_v27 = vpop.eup %14071 }
 0x66c   :  { %v10898_v1 = vpop.xlane.xlu1 %10897  ;;  %11040 = vperm.xlu1 %12711, %v14070_v35   ;;  %v10980_v36 = vadd.f32 1.0, %v14072_v27 }
 0x66d   :  { %14087 = vpow2.f32 %v12085_v53  ;;  %v10921_v56 = vadd.f32 %v16638_v10, %v10898_v1 }
 0x66e   :  { %v14074_v12 = vpop.eup %14073  ;;  %14089 = vrcp.f32 %v10978_v58 }
 0x66f   :  { %v12086_v60 = vmul.f32 -1.442695, %v10921_v56  ;;  %v14076_v63 = vpop.eup %14075  ;;  %v10981_v46 = vadd.f32 1.0, %v14074_v12 }
 0x670   :  { %11050 = vperm.xlu1 %12711, %v14076_v63  }
 0x671   :  { %14091 = vpow2.f32 %v12086_v60 }
 0x672   :  { %v14078_v34 = vpop.eup %14077  ;;  %14093 = vrcp.f32 %v10981_v46 }
 0x673   :  { %14095 = vrcp.f32 %v10980_v36  ;;  %v10982_v30 = vadd.f32 1.0, %v14078_v34  ;;  %v14080_v15 = vpop.eup %14079 }
 0x674   :  { %11045 = vperm.xlu1 %12711, %v14080_v15  }
 0x675   :  { %14097 = vrcp.f32 %v10982_v30 }
 0x676   :  { %v14082_v33 = vpop.eup %14081 }
 0x677   :  { %v14084_v28 = vpop.eup %14083  ;;  %v10983_v38 = vadd.f32 1.0, %v14082_v33 }
 0x678   :  { %v14086_v51 = vpop.eup %14085  ;;  %11065 = vperm.xlu0 %12712, %v14084_v28  }
 0x679   :  { %14099 = vrcp.f32 %v10983_v38  ;;  %11055 = vperm.xlu1 %12711, %v14086_v51  }
 0x67a   :  { %v14088_v10 = vpop.eup %14087 }
 0x67b   :  { %v10984_v31 = vadd.f32 1.0, %v14088_v10  ;;  %v14090_v32 = vpop.eup %14089 }
 0x67d   :  { %14101 = vrcp.f32 %v10984_v31  ;;  %11060 = vperm.xlu1 %12711, %v14090_v32  }
 0x67e   :  { %v14092_v59 = vpop.eup %14091 }
 0x67f   :  { %v14094_v42 = vpop.eup %14093  ;;  %v10985_v61 = vadd.f32 1.0, %v14092_v59 }
 0x680   :  { %v14096_v8 = vpop.eup %14095  ;;  %11075 = vperm.xlu0 %12712, %v14094_v42  }
 0x681   :  { %14103 = vrcp.f32 %v10985_v61  ;;  %11070 = vperm.xlu1 %12711, %v14096_v8  }
 0x682   :  { %v14098_v39 = vpop.eup %14097 }
 0x685   :  { %11080 = vperm.xlu1 %12711, %v14098_v39  }
 0x686   :  { %v14100_v50 = vpop.eup %14099 }
 0x687   :  { %11085 = vperm.xlu0 %12712, %v14100_v50  }
 0x68a   :  { %v14102_v21 = vpop.eup %14101 }
 0x68b   :  { %11090 = vperm.xlu1 %12711, %v14102_v21  }
 0x68e   :  { %v14104_v29 = vpop.eup %14103 }
 0x68f   :  { %11095 = vperm.xlu0 %12712, %v14104_v29  }
 0x6db   :  { %v11031_v57 = vpop.permute.xlu1 %11030 }
 0x6dc   :  { %11100 = vst [vmem:[#allocation14 + $0x10] sm:$0xff] %v11031_v57 }
 0x6dd   :  { %v11021_v9 = vpop.permute.xlu0 %11020 }
 0x6de   :  { %11098 = vst [vmem:[#allocation14] sm:$0xff] %v11021_v9 }
 0x6df   :  { %v11036_v52 = vpop.permute.xlu1 %11035 }
 0x6e0   :  { %11101 = vst [vmem:[#allocation14 + $0x18] sm:$0xff] %v11036_v52 }
 0x6e3   :  { %v11026_v7 = vpop.permute.xlu1 %11025 }
 0x6e4   :  { %11099 = vst [vmem:[#allocation14 + $0x8] sm:$0xff] %v11026_v7 }
 0x6e7   :  { %v11041_v11 = vpop.permute.xlu1 %11040 }
 0x6e8   :  { %11102 = vst [vmem:[#allocation14 + $0x20] sm:$0xff] %v11041_v11 }
 0x6eb   :  { %v11051_v48 = vpop.permute.xlu1 %11050 }
 0x6ec   :  { %11104 = vst [vmem:[#allocation14 + $0x30] sm:$0xff] %v11051_v48 }
 0x6ef   :  { %v11046_v17 = vpop.permute.xlu1 %11045 }
 0x6f0   :  { %11103 = vst [vmem:[#allocation14 + $0x28] sm:$0xff] %v11046_v17 }
 0x6f3   :  { %v11066_v41 = vpop.permute.xlu0 %11065 }
 0x6f4   :  { %v11056_v44 = vpop.permute.xlu1 %11055  ;;  %11107 = vst [vmem:[#allocation14 + $0x48] sm:$0xff] %v11066_v41 }
 0x6f5   :  { %11105 = vst [vmem:[#allocation14 + $0x38] sm:$0xff] %v11056_v44 }
 0x6f8   :  { %v11061_v26 = vpop.permute.xlu1 %11060 }
 0x6f9   :  { %11106 = vst [vmem:[#allocation14 + $0x40] sm:$0xff] %v11061_v26 }
 0x6fb   :  { %v11076_v49 = vpop.permute.xlu0 %11075 }
 0x6fc   :  { %v11071_v13 = vpop.permute.xlu1 %11070  ;;  %11109 = vst [vmem:[#allocation14 + $0x58] sm:$0xff] %v11076_v49 }
 0x6fd   :  { %11108 = vst [vmem:[#allocation14 + $0x50] sm:$0xff] %v11071_v13 }
 0x700   :  { %v11081_v18 = vpop.permute.xlu1 %11080 }
 0x701   :  { %11110 = vst [vmem:[#allocation14 + $0x60] sm:$0xff] %v11081_v18 }
 0x702   :  { %v11086_v37 = vpop.permute.xlu0 %11085 }
 0x703   :  { %11111 = vst [vmem:[#allocation14 + $0x68] sm:$0xff] %v11086_v37 }
 0x706   :  { %v11091_v19 = vpop.permute.xlu1 %11090 }
 0x707   :  { %11112 = vst [vmem:[#allocation14 + $0x70] sm:$0xff] %v11091_v19 }
 0x70a   :  { %v11096_v22 = vpop.permute.xlu0 %11095 }
 0x70b   :  { %11113 = vst [vmem:[#allocation14 + $0x78] sm:$0xff] %v11096_v22 }
 0x70c   :  { %14514 = shalt.err (!%p14511_p6)
}
 0x70d   :  { %s14547_s14 = smov 128   ;;  %s14548_s15 = smov 8  }
 0x70e   :  { %11125 = dma.vmem_to_hbm [thread:$0]  %s11120_s5, 2048, %s16666_s7, [#allocation5], %s14547_s14, %s14547_s14, %s14548_s15  }
 0x70f   :  { %14531 = dma.done.wait [#allocation5], 2048  }
 0x710   :  { %14532 = vsyncadd [#allocation5], 4294965248 }
 0x711   :  { %11129 = vsyncpa [#allocation4], 1 }
 0x712   :  { %11130 = vsyncpa [#allocation7], 1 }
 0x713   :  { %11131 = vsyncpa [#allocation10], 1 }
 0x714   :  { %11132 = vsyncpa [#allocation13], 1 }
 0x715   :  { %11133 = vsyncpa [#allocation5], 1 }

</bundles_post_ra>
